<compile_context>
chip_gen: v5e
topology: v5e:2x2
jax: 0.10.0
libtpu: 0.0.40
codegen_flags: <defaults>
</compile_context>

<pallas_src>
import functools

import numpy as np
import jax
import jax.numpy as jnp
from jax.experimental import pallas as pl
from jax.experimental.pallas import tpu as pltpu


_VMEM_LIMIT_BYTES = 32 * 1024 * 1024  # safe on v5e/v6e/v7x; >> working set here


def _cparams(num_grid_axes):
    return pltpu.CompilerParams(
        dimension_semantics=("parallel",) * num_grid_axes,
        vmem_limit_bytes=_VMEM_LIMIT_BYTES,
    )


def _pick_row_block(m, cap=1024):
    """Largest power-of-two row block dividing m, capped, with grid >= 2 when possible."""
    target = min(cap, m)
    if m >= 16:
        target = min(target, m // 2)  # at least 2 grid steps -> both v7x TCs busy
    for tm in (1024, 512, 256, 128, 64, 32, 16, 8):
        if tm <= target and m % tm == 0:
            return tm
    return m


# --------------------------------------------------------------------------
# 1x1 convolution (= row-batched matmul + bias), optionally fused with the
# FPN top-down skip add.
# --------------------------------------------------------------------------
def _mm_bias_kernel(x_ref, w_ref, b_ref, o_ref):
    acc = jnp.dot(x_ref[...].astype(jnp.float32), w_ref[...].astype(jnp.float32),
                  preferred_element_type=jnp.float32)
    o_ref[...] = (acc + b_ref[...].astype(jnp.float32)).astype(o_ref.dtype)


def _mm_bias_skip_kernel(x_ref, w_ref, b_ref, s_ref, o_ref):
    acc = jnp.dot(x_ref[...].astype(jnp.float32), w_ref[...].astype(jnp.float32),
                  preferred_element_type=jnp.float32)
    acc = acc + b_ref[...].astype(jnp.float32) + s_ref[...].astype(jnp.float32)
    o_ref[...] = acc.astype(o_ref.dtype)


def conv1x1(x_nhwc, w, b, skip_nhwc=None):
    """1x1 conv in NHWC: y = x @ w + b (+ skip). w: (Cin, Cout), b: (1, Cout)."""
    n, h, wd, cin = x_nhwc.shape
    cout = w.shape[1]
    m = n * h * wd
    tm = _pick_row_block(m)
    x2d = x_nhwc.reshape(m, cin)

    in_specs = [
        pl.BlockSpec((tm, cin), lambda i: (i, 0)),
        pl.BlockSpec((cin, cout), lambda i: (0, 0)),   # resident weight
        pl.BlockSpec((1, cout), lambda i: (0, 0)),     # resident bias
    ]
    args = [x2d, w, b]
    kernel = _mm_bias_kernel
    if skip_nhwc is not None:
        in_specs.append(pl.BlockSpec((tm, cout), lambda i: (i, 0)))
        args.append(skip_nhwc.reshape(m, cout))
        kernel = _mm_bias_skip_kernel

    out2d = pl.pallas_call(
        kernel,
        out_shape=jax.ShapeDtypeStruct((m, cout), x_nhwc.dtype),
        grid_spec=pltpu.PrefetchScalarGridSpec(
            num_scalar_prefetch=0,
            grid=(m // tm,),
            in_specs=in_specs,
            out_specs=pl.BlockSpec((tm, cout), lambda i: (i, 0)),
        ),
        compiler_params=_cparams(1),
    )(*args)
    return out2d.reshape(n, h, wd, cout)


# --------------------------------------------------------------------------
# Nearest-neighbour 2x upsample (per-image kernel).
# --------------------------------------------------------------------------
@functools.lru_cache(maxsize=None)
def _repeat_matrix(w):
    """(2W, W) 0/1 matrix with R[2j+b, j] = 1 -> R @ x repeats rows pairwise."""
    r = np.zeros((2 * w, w), dtype=np.float32)
    r[np.arange(2 * w), np.arange(2 * w) // 2] = 1.0
    return r


def _upsample2x_kernel(x_ref, r_ref, o_ref):
    h = x_ref.shape[0]
    r = r_ref[...]
    for i in range(h):  # h is a small static trip count
        row2 = jnp.dot(r, x_ref[i].astype(jnp.float32),
                       preferred_element_type=jnp.float32).astype(o_ref.dtype)
        o_ref[2 * i] = row2
        o_ref[2 * i + 1] = row2


def upsample2x_nearest(x_nhwc):
    n, h, w, c = x_nhwc.shape
    r = jnp.asarray(_repeat_matrix(w))
    return pl.pallas_call(
        _upsample2x_kernel,
        out_shape=jax.ShapeDtypeStruct((n, 2 * h, 2 * w, c), x_nhwc.dtype),
        grid_spec=pltpu.PrefetchScalarGridSpec(
            num_scalar_prefetch=0,
            grid=(n,),
            in_specs=[
                pl.BlockSpec((None, h, w, c), lambda i: (i, 0, 0, 0)),
                pl.BlockSpec((2 * w, w), lambda i: (0, 0)),
            ],
            out_specs=pl.BlockSpec((None, 2 * h, 2 * w, c), lambda i: (i, 0, 0, 0)),
        ),
        compiler_params=_cparams(1),
    )(x_nhwc, r)


# --------------------------------------------------------------------------
# 3x3 "same" convolution: 9 shifted matmuls on a flattened padded image.
# --------------------------------------------------------------------------
def _conv3x3_kernel(xp_ref, w_ref, b_ref, o_ref):
    # xp_ref: ((H+3)*(W+2), Cin) flattened zero-padded image (1 extra zero row
    #         at the bottom keeps every shifted slice in bounds)
    # w_ref : (9, Cin, Cout), tap k = dy*3 + dx
    # b_ref : (1, Cout)
    # o_ref : (H, W, Cout)
    h, w, cout = o_ref.shape
    wp = w + 2
    hwp = h * wp

    acc = jnp.zeros((hwp, cout), jnp.float32)
    for dy in range(3):
        for dx in range(3):
            off = dy * wp + dx
            patch = xp_ref[off:off + hwp, :].astype(jnp.float32)   # (H*Wp, Cin)
            acc = acc + jnp.dot(patch, w_ref[dy * 3 + dx].astype(jnp.float32),
                                preferred_element_type=jnp.float32)
    acc = acc + b_ref[...].astype(jnp.float32)

    # Row h of the output lives at acc[h*Wp : h*Wp + W]; the last 2 columns of
    # each flattened row are garbage (padding spill) and are simply dropped.
    for i in range(h):
        o_ref[i, :, :] = acc[i * wp:i * wp + w, :].astype(o_ref.dtype)


def conv3x3_same(x_nhwc, w9, b):
    """3x3 conv, stride 1, padding 1 (PyTorch semantics), NHWC."""
    n, h, w, cin = x_nhwc.shape
    cout = w9.shape[-1]
    wp = w + 2
    # pad: 1 row top, 2 rows bottom (extra zero row for shifted-slice bounds), 1 col each side
    xp = jnp.pad(x_nhwc, ((0, 0), (1, 2), (1, 1), (0, 0)))
    xp_flat = xp.reshape(n, (h + 3) * wp, cin)

    return pl.pallas_call(
        _conv3x3_kernel,
        out_shape=jax.ShapeDtypeStruct((n, h, w, cout), x_nhwc.dtype),
        grid_spec=pltpu.PrefetchScalarGridSpec(
            num_scalar_prefetch=0,
            grid=(n,),
            in_specs=[
                pl.BlockSpec((None, (h + 3) * wp, cin), lambda i: (i, 0, 0)),
                pl.BlockSpec((9, cin, cout), lambda i: (0, 0, 0)),  # resident weights
                pl.BlockSpec((1, cout), lambda i: (0, 0)),
            ],
            out_specs=pl.BlockSpec((None, h, w, cout), lambda i: (i, 0, 0, 0)),
        ),
        compiler_params=_cparams(1),
    )(xp_flat, w9, b)


# --------------------------------------------------------------------------
# PyramidFeatures module
# --------------------------------------------------------------------------
class PyramidFeaturesPallas:
    """Pallas-TPU equivalent of the PyTorch PyramidFeatures forward pass."""

    def __init__(self, C3_size, C4_size, C5_size, feature_size=256, key=None,
                 dtype=jnp.float32):
        if key is None:
            key = jax.random.PRNGKey(0)
        ks = jax.random.split(key, 12)
        f = feature_size

        def w1x1(k, cin):
            return (jax.random.normal(k, (cin, f), dtype) / np.sqrt(cin)).astype(dtype)

        def w3x3(k):
            return (jax.random.normal(k, (9, f, f), dtype) / np.sqrt(9 * f)).astype(dtype)

        def bias(k):
            return (jax.random.normal(k, (1, f), dtype) * 0.01).astype(dtype)

        self.p5_1_w, self.p5_1_b = w1x1(ks[0], C5_size), bias(ks[1])
        self.p5_2_w, self.p5_2_b = w3x3(ks[2]), bias(ks[3])
        self.p4_1_w, self.p4_1_b = w1x1(ks[4], C4_size), bias(ks[5])
        self.p4_2_w, self.p4_2_b = w3x3(ks[6]), bias(ks[7])
        self.p3_1_w, self.p3_1_b = w1x1(ks[8], C3_size), bias(ks[9])
        self.p3_2_w, self.p3_2_b = w3x3(ks[10]), bias(ks[11])

    # ---------------- Pallas forward ----------------
    def __call__(self, c3_nchw, c4_nchw, c5_nchw):
        to_nhwc = lambda t: jnp.transpose(t, (0, 2, 3, 1))
        to_nchw = lambda t: jnp.transpose(t, (0, 3, 1, 2))
        c3, c4, c5 = to_nhwc(c3_nchw), to_nhwc(c4_nchw), to_nhwc(c5_nchw)

        p5_lat = conv1x1(c5, self.p5_1_w, self.p5_1_b)
        p5_up = upsample2x_nearest(p5_lat)
        p5_out = conv3x3_same(p5_lat, self.p5_2_w, self.p5_2_b)

        p4_lat = conv1x1(c4, self.p4_1_w, self.p4_1_b, skip_nhwc=p5_up)
        p4_up = upsample2x_nearest(p4_lat)
        p4_out = conv3x3_same(p4_lat, self.p4_2_w, self.p4_2_b)

        p3_lat = conv1x1(c3, self.p3_1_w, self.p3_1_b, skip_nhwc=p4_up)
        p3_out = conv3x3_same(p3_lat, self.p3_2_w, self.p3_2_b)

        return [to_nchw(p3_out), to_nchw(p4_out), to_nchw(p5_out)]

    # ---------------- Pure-XLA reference ----------------
    def reference(self, c3_nchw, c4_nchw, c5_nchw):
        hp = jax.lax.Precision.HIGHEST

        def conv1(x, w, b):
            return jnp.einsum('nhwc,cf->nhwf', x, w, precision=hp) + b.reshape(1, 1, 1, -1)

        def conv3(x, w9, b):
            w_hwio = w9.reshape(3, 3, w9.shape[1], w9.shape[2])
            y = jax.lax.conv_general_dilated(
                x, w_hwio, window_strides=(1, 1), padding=((1, 1), (1, 1)),
                dimension_numbers=('NHWC', 'HWIO', 'NHWC'), precision=hp)
            return y + b.reshape(1, 1, 1, -1)

        def up2(x):
            return jnp.repeat(jnp.repeat(x, 2, axis=1), 2, axis=2)

        to_nhwc = lambda t: jnp.transpose(t, (0, 2, 3, 1))
        to_nchw = lambda t: jnp.transpose(t, (0, 3, 1, 2))
        c3, c4, c5 = to_nhwc(c3_nchw), to_nhwc(c4_nchw), to_nhwc(c5_nchw)

        p5_lat = conv1(c5, self.p5_1_w, self.p5_1_b)
        p5_up = up2(p5_lat)
        p5_out = conv3(p5_lat, self.p5_2_w, self.p5_2_b)

        p4_lat = conv1(c4, self.p4_1_w, self.p4_1_b) + p5_up
        p4_up = up2(p4_lat)
        p4_out = conv3(p4_lat, self.p4_2_w, self.p4_2_b)

        p3_lat = conv1(c3, self.p3_1_w, self.p3_1_b) + p4_up
        p3_out = conv3(p3_lat, self.p3_2_w, self.p3_2_b)

        return [to_nchw(p3_out), to_nchw(p4_out), to_nchw(p5_out)]


if __name__ == "__main__":
    key = jax.random.PRNGKey(0)
    k3, k4, k5, kp = jax.random.split(key, 4)

    # Small pyramid: C5 at 4x4, C4 at 8x8, C3 at 16x16 (each level 2x the previous).
    N = 2
    C3_size, C4_size, C5_size = 32, 64, 128
    feature_size = 128  # module default is 256; 128 keeps the demo small and lane-dense

    c5 = jax.random.normal(k5, (N, C5_size, 4, 4), jnp.float32)
    c4 = jax.random.normal(k4, (N, C4_size, 8, 8), jnp.float32)
    c3 = jax.random.normal(k3, (N, C3_size, 16, 16), jnp.float32)

    model = PyramidFeaturesPallas(C3_size, C4_size, C5_size, feature_size, key=kp)

    fwd = jax.jit(model.__call__)
    p3, p4, p5 = jax.block_until_ready(fwd(c3, c4, c5))

    r3, r4, r5 = model.reference(c3, c4, c5)
    np.testing.assert_allclose(np.asarray(p3), np.asarray(r3), rtol=1e-3, atol=1e-3)
    np.testing.assert_allclose(np.asarray(p4), np.asarray(r4), rtol=1e-3, atol=1e-3)
    np.testing.assert_allclose(np.asarray(p5), np.asarray(r5), rtol=1e-3, atol=1e-3)

    print("KERNEL_OK")
</pallas_src>

<mosaic_0001>
module attributes {stable_mosaic.version = 11 : i64} {
  func.func @_mm_bias_kernel(%arg0: i32, %arg1: memref<16x128xf32, #tpu.memory_space<vmem>>, %arg2: memref<128x128xf32, #tpu.memory_space<vmem>>, %arg3: memref<1x128xf32, #tpu.memory_space<vmem>>, %arg4: memref<16x128xf32, #tpu.memory_space<vmem>>) attributes {dimension_semantics = [#tpu.dimension_semantics<parallel>], iteration_bounds = array<i64: 2>, scalar_prefetch = 0 : i64, scratch_operands = 0 : i64, tpu.core_type = #tpu.core_type<tc>, window_params = [{transform_indices = @transform_0, window_bounds = array<i64: 16, 128>}, {pipeline_mode = #tpu.pipeline_mode<synchronous>, transform_indices = @transform_1, window_bounds = array<i64: 128, 128>}, {pipeline_mode = #tpu.pipeline_mode<synchronous>, transform_indices = @transform_2, window_bounds = array<i64: 1, 128>}, {transform_indices = @transform_3, window_bounds = array<i64: 16, 128>}]} {
    %c0 = arith.constant 0 : index
    %c0_0 = arith.constant 0 : index
    %0 = vector.load %arg1[%c0, %c0_0] : memref<16x128xf32, #tpu.memory_space<vmem>>, vector<16x128xf32>
    %c0_1 = arith.constant 0 : index
    %c0_2 = arith.constant 0 : index
    %1 = vector.load %arg2[%c0_1, %c0_2] : memref<128x128xf32, #tpu.memory_space<vmem>>, vector<128x128xf32>
    %cst = arith.constant dense<0.000000e+00> : vector<16x128xf32>
    %2 = tpu.matmul %0, %1, %cst {dimension_numbers = #tpu.dot_dimension_numbers<[1], [0], [0], [1], [0, 0, 1, 1], [], []>} : vector<16x128xf32>, vector<128x128xf32>, vector<16x128xf32> -> vector<16x128xf32>
    %c0_3 = arith.constant 0 : index
    %c0_4 = arith.constant 0 : index
    %3 = vector.load %arg3[%c0_3, %c0_4] : memref<1x128xf32, #tpu.memory_space<vmem>>, vector<1x128xf32>
    %4 = vector.broadcast %3 : vector<1x128xf32> to vector<16x128xf32>
    %5 = arith.addf %2, %4 : vector<16x128xf32>
    %c0_5 = arith.constant 0 : index
    %c0_6 = arith.constant 0 : index
    %6 = vector.load %arg4[%c0_5, %c0_6] : memref<16x128xf32, #tpu.memory_space<vmem>>, vector<16x128xf32>
    tpu.vector_store %arg4[%c0_5, %c0_6], %5 {strides = array<i32>} : memref<16x128xf32, #tpu.memory_space<vmem>>, vector<16x128xf32>,
    return
  }
  func.func @transform_0(%arg0: i32) -> (i32, i32) {
    %c0_i32 = arith.constant 0 : i32
    %c0_i32_0 = arith.constant 0 : i32
    return %arg0, %c0_i32 : i32, i32
  }
  func.func @transform_1(%arg0: i32) -> (i32, i32) {
    %c0_i32 = arith.constant 0 : i32
    %c0_i32_0 = arith.constant 0 : i32
    %c0_i32_1 = arith.constant 0 : i32
    return %c0_i32, %c0_i32_0 : i32, i32
  }
  func.func @transform_2(%arg0: i32) -> (i32, i32) {
    %c0_i32 = arith.constant 0 : i32
    %c0_i32_0 = arith.constant 0 : i32
    %c0_i32_1 = arith.constant 0 : i32
    return %c0_i32, %c0_i32_0 : i32, i32
  }
  func.func @transform_3(%arg0: i32) -> (i32, i32) {
    %c0_i32 = arith.constant 0 : i32
    %c0_i32_0 = arith.constant 0 : i32
    return %arg0, %c0_i32 : i32, i32
  }
}

module attributes {stable_mosaic.version = 11 : i64} {
  func.func @_upsample2x_kernel(%arg0: i32, %arg1: memref<1x4x4x128xf32, #tpu.memory_space<vmem>>, %arg2: memref<8x4xf32, #tpu.memory_space<vmem>>, %arg3: memref<1x8x8x128xf32, #tpu.memory_space<vmem>>) attributes {dimension_semantics = [#tpu.dimension_semantics<parallel>], iteration_bounds = array<i64: 2>, scalar_prefetch = 0 : i64, scratch_operands = 0 : i64, tpu.core_type = #tpu.core_type<tc>, window_params = [{transform_indices = @transform_0, window_bounds = array<i64: 1, 4, 4, 128>}, {pipeline_mode = #tpu.pipeline_mode<synchronous>, transform_indices = @transform_1, window_bounds = array<i64: 8, 4>}, {transform_indices = @transform_2, window_bounds = array<i64: 1, 8, 8, 128>}]} {
    %c0 = arith.constant 0 : index
    %c0_0 = arith.constant 0 : index
    %0 = vector.load %arg2[%c0, %c0_0] : memref<8x4xf32, #tpu.memory_space<vmem>>, vector<8x4xf32>
    %c0_1 = arith.constant 0 : index
    %c0_2 = arith.constant 0 : index
    %c0_3 = arith.constant 0 : index
    %c0_4 = arith.constant 0 : index
    %1 = vector.load %arg1[%c0_1, %c0_2, %c0_3, %c0_4] : memref<1x4x4x128xf32, #tpu.memory_space<vmem>>, vector<1x1x4x128xf32>
    %2 = vector.shape_cast %1 : vector<1x1x4x128xf32> to vector<4x128xf32>
    %cst = arith.constant dense<0.000000e+00> : vector<8x128xf32>
    %3 = tpu.matmul %0, %2, %cst {dimension_numbers = #tpu.dot_dimension_numbers<[1], [0], [0], [1], [0, 0, 1, 1], [], []>} : vector<8x4xf32>, vector<4x128xf32>, vector<8x128xf32> -> vector<8x128xf32>
    %c0_5 = arith.constant 0 : index
    %c0_6 = arith.constant 0 : index
    %c0_7 = arith.constant 0 : index
    %c0_8 = arith.constant 0 : index
    %4 = vector.load %arg3[%c0_5, %c0_6, %c0_7, %c0_8] : memref<1x8x8x128xf32, #tpu.memory_space<vmem>>, vector<1x1x8x128xf32>
    %5 = vector.shape_cast %4 : vector<1x1x8x128xf32> to vector<8x128xf32>
    %6 = vector.shape_cast %3 : vector<8x128xf32> to vector<1x1x8x128xf32>
    tpu.vector_store %arg3[%c0_5, %c0_6, %c0_7, %c0_8], %6 {strides = array<i32>} : memref<1x8x8x128xf32, #tpu.memory_space<vmem>>, vector<1x1x8x128xf32>,
    %c0_9 = arith.constant 0 : index
    %c1 = arith.constant 1 : index
    %c0_10 = arith.constant 0 : index
    %c0_11 = arith.constant 0 : index
    %7 = vector.load %arg3[%c0_9, %c1, %c0_10, %c0_11] : memref<1x8x8x128xf32, #tpu.memory_space<vmem>>, vector<1x1x8x128xf32>
    %8 = vector.shape_cast %7 : vector<1x1x8x128xf32> to vector<8x128xf32>
    %9 = vector.shape_cast %3 : vector<8x128xf32> to vector<1x1x8x128xf32>
    tpu.vector_store %arg3[%c0_9, %c1, %c0_10, %c0_11], %9 {strides = array<i32>} : memref<1x8x8x128xf32, #tpu.memory_space<vmem>>, vector<1x1x8x128xf32>,
    %c0_12 = arith.constant 0 : index
    %c1_13 = arith.constant 1 : index
    %c0_14 = arith.constant 0 : index
    %c0_15 = arith.constant 0 : index
    %10 = vector.load %arg1[%c0_12, %c1_13, %c0_14, %c0_15] : memref<1x4x4x128xf32, #tpu.memory_space<vmem>>, vector<1x1x4x128xf32>
    %11 = vector.shape_cast %10 : vector<1x1x4x128xf32> to vector<4x128xf32>
    %cst_16 = arith.constant dense<0.000000e+00> : vector<8x128xf32>
    %12 = tpu.matmul %0, %11, %cst_16 {dimension_numbers = #tpu.dot_dimension_numbers<[1], [0], [0], [1], [0, 0, 1, 1], [], []>} : vector<8x4xf32>, vector<4x128xf32>, vector<8x128xf32> -> vector<8x128xf32>
    %c0_17 = arith.constant 0 : index
    %c2 = arith.constant 2 : index
    %c0_18 = arith.constant 0 : index
    %c0_19 = arith.constant 0 : index
    %13 = vector.load %arg3[%c0_17, %c2, %c0_18, %c0_19] : memref<1x8x8x128xf32, #tpu.memory_space<vmem>>, vector<1x1x8x128xf32>
    %14 = vector.shape_cast %13 : vector<1x1x8x128xf32> to vector<8x128xf32>
    %15 = vector.shape_cast %12 : vector<8x128xf32> to vector<1x1x8x128xf32>
    tpu.vector_store %arg3[%c0_17, %c2, %c0_18, %c0_19], %15 {strides = array<i32>} : memref<1x8x8x128xf32, #tpu.memory_space<vmem>>, vector<1x1x8x128xf32>,
    %c0_20 = arith.constant 0 : index
    %c3 = arith.constant 3 : index
    %c0_21 = arith.constant 0 : index
    %c0_22 = arith.constant 0 : index
    %16 = vector.load %arg3[%c0_20, %c3, %c0_21, %c0_22] : memref<1x8x8x128xf32, #tpu.memory_space<vmem>>, vector<1x1x8x128xf32>
    %17 = vector.shape_cast %16 : vector<1x1x8x128xf32> to vector<8x128xf32>
    %18 = vector.shape_cast %12 : vector<8x128xf32> to vector<1x1x8x128xf32>
    tpu.vector_store %arg3[%c0_20, %c3, %c0_21, %c0_22], %18 {strides = array<i32>} : memref<1x8x8x128xf32, #tpu.memory_space<vmem>>, vector<1x1x8x128xf32>,
    %c0_23 = arith.constant 0 : index
    %c2_24 = arith.constant 2 : index
    %c0_25 = arith.constant 0 : index
    %c0_26 = arith.constant 0 : index
    %19 = vector.load %arg1[%c0_23, %c2_24, %c0_25, %c0_26] : memref<1x4x4x128xf32, #tpu.memory_space<vmem>>, vector<1x1x4x128xf32>
    %20 = vector.shape_cast %19 : vector<1x1x4x128xf32> to vector<4x128xf32>
    %cst_27 = arith.constant dense<0.000000e+00> : vector<8x128xf32>
    %21 = tpu.matmul %0, %20, %cst_27 {dimension_numbers = #tpu.dot_dimension_numbers<[1], [0], [0], [1], [0, 0, 1, 1], [], []>} : vector<8x4xf32>, vector<4x128xf32>, vector<8x128xf32> -> vector<8x128xf32>
    %c0_28 = arith.constant 0 : index
    %c4 = arith.constant 4 : index
    %c0_29 = arith.constant 0 : index
    %c0_30 = arith.constant 0 : index
    %22 = vector.load %arg3[%c0_28, %c4, %c0_29, %c0_30] : memref<1x8x8x128xf32, #tpu.memory_space<vmem>>, vector<1x1x8x128xf32>
    %23 = vector.shape_cast %22 : vector<1x1x8x128xf32> to vector<8x128xf32>
    %24 = vector.shape_cast %21 : vector<8x128xf32> to vector<1x1x8x128xf32>
    tpu.vector_store %arg3[%c0_28, %c4, %c0_29, %c0_30], %24 {strides = array<i32>} : memref<1x8x8x128xf32, #tpu.memory_space<vmem>>, vector<1x1x8x128xf32>,
    %c0_31 = arith.constant 0 : index
    %c5 = arith.constant 5 : index
    %c0_32 = arith.constant 0 : index
    %c0_33 = arith.constant 0 : index
    %25 = vector.load %arg3[%c0_31, %c5, %c0_32, %c0_33] : memref<1x8x8x128xf32, #tpu.memory_space<vmem>>, vector<1x1x8x128xf32>
    %26 = vector.shape_cast %25 : vector<1x1x8x128xf32> to vector<8x128xf32>
    %27 = vector.shape_cast %21 : vector<8x128xf32> to vector<1x1x8x128xf32>
    tpu.vector_store %arg3[%c0_31, %c5, %c0_32, %c0_33], %27 {strides = array<i32>} : memref<1x8x8x128xf32, #tpu.memory_space<vmem>>, vector<1x1x8x128xf32>,
    %c0_34 = arith.constant 0 : index
    %c3_35 = arith.constant 3 : index
    %c0_36 = arith.constant 0 : index
    %c0_37 = arith.constant 0 : index
    %28 = vector.load %arg1[%c0_34, %c3_35, %c0_36, %c0_37] : memref<1x4x4x128xf32, #tpu.memory_space<vmem>>, vector<1x1x4x128xf32>
    %29 = vector.shape_cast %28 : vector<1x1x4x128xf32> to vector<4x128xf32>
    %cst_38 = arith.constant dense<0.000000e+00> : vector<8x128xf32>
    %30 = tpu.matmul %0, %29, %cst_38 {dimension_numbers = #tpu.dot_dimension_numbers<[1], [0], [0], [1], [0, 0, 1, 1], [], []>} : vector<8x4xf32>, vector<4x128xf32>, vector<8x128xf32> -> vector<8x128xf32>
    %c0_39 = arith.constant 0 : index
    %c6 = arith.constant 6 : index
    %c0_40 = arith.constant 0 : index
    %c0_41 = arith.constant 0 : index
    %31 = vector.load %arg3[%c0_39, %c6, %c0_40, %c0_41] : memref<1x8x8x128xf32, #tpu.memory_space<vmem>>, vector<1x1x8x128xf32>
    %32 = vector.shape_cast %31 : vector<1x1x8x128xf32> to vector<8x128xf32>
    %33 = vector.shape_cast %30 : vector<8x128xf32> to vector<1x1x8x128xf32>
    tpu.vector_store %arg3[%c0_39, %c6, %c0_40, %c0_41], %33 {strides = array<i32>} : memref<1x8x8x128xf32, #tpu.memory_space<vmem>>, vector<1x1x8x128xf32>,
    %c0_42 = arith.constant 0 : index
    %c7 = arith.constant 7 : index
    %c0_43 = arith.constant 0 : index
    %c0_44 = arith.constant 0 : index
    %34 = vector.load %arg3[%c0_42, %c7, %c0_43, %c0_44] : memref<1x8x8x128xf32, #tpu.memory_space<vmem>>, vector<1x1x8x128xf32>
    %35 = vector.shape_cast %34 : vector<1x1x8x128xf32> to vector<8x128xf32>
    %36 = vector.shape_cast %30 : vector<8x128xf32> to vector<1x1x8x128xf32>
    tpu.vector_store %arg3[%c0_42, %c7, %c0_43, %c0_44], %36 {strides = array<i32>} : memref<1x8x8x128xf32, #tpu.memory_space<vmem>>, vector<1x1x8x128xf32>,
    return
  }
  func.func @transform_0(%arg0: i32) -> (i32, i32, i32, i32) {
    %c0_i32 = arith.constant 0 : i32
    %c0_i32_0 = arith.constant 0 : i32
    %c0_i32_1 = arith.constant 0 : i32
    %c0_i32_2 = arith.constant 0 : i32
    return %arg0, %c0_i32, %c0_i32_0, %c0_i32_1 : i32, i32, i32, i32
  }
  func.func @transform_1(%arg0: i32) -> (i32, i32) {
    %c0_i32 = arith.constant 0 : i32
    %c0_i32_0 = arith.constant 0 : i32
    %c0_i32_1 = arith.constant 0 : i32
    return %c0_i32, %c0_i32_0 : i32, i32
  }
  func.func @transform_2(%arg0: i32) -> (i32, i32, i32, i32) {
    %c0_i32 = arith.constant 0 : i32
    %c0_i32_0 = arith.constant 0 : i32
    %c0_i32_1 = arith.constant 0 : i32
    %c0_i32_2 = arith.constant 0 : i32
    return %arg0, %c0_i32, %c0_i32_0, %c0_i32_1 : i32, i32, i32, i32
  }
}

module attributes {stable_mosaic.version = 11 : i64} {
  func.func @_conv3x3_kernel(%arg0: i32, %arg1: memref<1x42x128xf32, #tpu.memory_space<vmem>>, %arg2: memref<9x128x128xf32, #tpu.memory_space<vmem>>, %arg3: memref<1x128xf32, #tpu.memory_space<vmem>>, %arg4: memref<1x4x4x128xf32, #tpu.memory_space<vmem>>) attributes {dimension_semantics = [#tpu.dimension_semantics<parallel>], iteration_bounds = array<i64: 2>, scalar_prefetch = 0 : i64, scratch_operands = 0 : i64, tpu.core_type = #tpu.core_type<tc>, window_params = [{transform_indices = @transform_0, window_bounds = array<i64: 1, 42, 128>}, {pipeline_mode = #tpu.pipeline_mode<synchronous>, transform_indices = @transform_1, window_bounds = array<i64: 9, 128, 128>}, {pipeline_mode = #tpu.pipeline_mode<synchronous>, transform_indices = @transform_2, window_bounds = array<i64: 1, 128>}, {transform_indices = @transform_3, window_bounds = array<i64: 1, 4, 4, 128>}]} {
    %cst = arith.constant 0.000000e+00 : f32
    %0 = vector.broadcast %cst : f32 to vector<24x128xf32>
    %c0 = arith.constant 0 : index
    %c0_0 = arith.constant 0 : index
    %c0_1 = arith.constant 0 : index
    %1 = vector.load %arg1[%c0, %c0_0, %c0_1] : memref<1x42x128xf32, #tpu.memory_space<vmem>>, vector<1x24x128xf32>
    %2 = vector.shape_cast %1 : vector<1x24x128xf32> to vector<24x128xf32>
    %c0_2 = arith.constant 0 : index
    %c0_3 = arith.constant 0 : index
    %c0_4 = arith.constant 0 : index
    %3 = vector.load %arg2[%c0_2, %c0_3, %c0_4] : memref<9x128x128xf32, #tpu.memory_space<vmem>>, vector<1x128x128xf32>
    %4 = vector.shape_cast %3 : vector<1x128x128xf32> to vector<128x128xf32>
    %cst_5 = arith.constant dense<0.000000e+00> : vector<24x128xf32>
    %5 = tpu.matmul %2, %4, %cst_5 {dimension_numbers = #tpu.dot_dimension_numbers<[1], [0], [0], [1], [0, 0, 1, 1], [], []>} : vector<24x128xf32>, vector<128x128xf32>, vector<24x128xf32> -> vector<24x128xf32>
    %6 = arith.addf %0, %5 : vector<24x128xf32>
    %c0_6 = arith.constant 0 : index
    %c1 = arith.constant 1 : index
    %c0_7 = arith.constant 0 : index
    %7 = vector.load %arg1[%c0_6, %c1, %c0_7] : memref<1x42x128xf32, #tpu.memory_space<vmem>>, vector<1x24x128xf32>
    %8 = vector.shape_cast %7 : vector<1x24x128xf32> to vector<24x128xf32>
    %c1_8 = arith.constant 1 : index
    %c0_9 = arith.constant 0 : index
    %c0_10 = arith.constant 0 : index
    %9 = vector.load %arg2[%c1_8, %c0_9, %c0_10] : memref<9x128x128xf32, #tpu.memory_space<vmem>>, vector<1x128x128xf32>
    %10 = vector.shape_cast %9 : vector<1x128x128xf32> to vector<128x128xf32>
    %cst_11 = arith.constant dense<0.000000e+00> : vector<24x128xf32>
    %11 = tpu.matmul %8, %10, %cst_11 {dimension_numbers = #tpu.dot_dimension_numbers<[1], [0], [0], [1], [0, 0, 1, 1], [], []>} : vector<24x128xf32>, vector<128x128xf32>, vector<24x128xf32> -> vector<24x128xf32>
    %12 = arith.addf %6, %11 : vector<24x128xf32>
    %c0_12 = arith.constant 0 : index
    %c2 = arith.constant 2 : index
    %c0_13 = arith.constant 0 : index
    %13 = vector.load %arg1[%c0_12, %c2, %c0_13] : memref<1x42x128xf32, #tpu.memory_space<vmem>>, vector<1x24x128xf32>
    %14 = vector.shape_cast %13 : vector<1x24x128xf32> to vector<24x128xf32>
    %c2_14 = arith.constant 2 : index
    %c0_15 = arith.constant 0 : index
    %c0_16 = arith.constant 0 : index
    %15 = vector.load %arg2[%c2_14, %c0_15, %c0_16] : memref<9x128x128xf32, #tpu.memory_space<vmem>>, vector<1x128x128xf32>
    %16 = vector.shape_cast %15 : vector<1x128x128xf32> to vector<128x128xf32>
    %cst_17 = arith.constant dense<0.000000e+00> : vector<24x128xf32>
    %17 = tpu.matmul %14, %16, %cst_17 {dimension_numbers = #tpu.dot_dimension_numbers<[1], [0], [0], [1], [0, 0, 1, 1], [], []>} : vector<24x128xf32>, vector<128x128xf32>, vector<24x128xf32> -> vector<24x128xf32>
    %18 = arith.addf %12, %17 : vector<24x128xf32>
    %c0_18 = arith.constant 0 : index
    %c6 = arith.constant 6 : index
    %c0_19 = arith.constant 0 : index
    %19 = vector.load %arg1[%c0_18, %c6, %c0_19] : memref<1x42x128xf32, #tpu.memory_space<vmem>>, vector<1x24x128xf32>
    %20 = vector.shape_cast %19 : vector<1x24x128xf32> to vector<24x128xf32>
    %c3 = arith.constant 3 : index
    %c0_20 = arith.constant 0 : index
    %c0_21 = arith.constant 0 : index
    %21 = vector.load %arg2[%c3, %c0_20, %c0_21] : memref<9x128x128xf32, #tpu.memory_space<vmem>>, vector<1x128x128xf32>
    %22 = vector.shape_cast %21 : vector<1x128x128xf32> to vector<128x128xf32>
    %cst_22 = arith.constant dense<0.000000e+00> : vector<24x128xf32>
    %23 = tpu.matmul %20, %22, %cst_22 {dimension_numbers = #tpu.dot_dimension_numbers<[1], [0], [0], [1], [0, 0, 1, 1], [], []>} : vector<24x128xf32>, vector<128x128xf32>, vector<24x128xf32> -> vector<24x128xf32>
    %24 = arith.addf %18, %23 : vector<24x128xf32>
    %c0_23 = arith.constant 0 : index
    %c7 = arith.constant 7 : index
    %c0_24 = arith.constant 0 : index
    %25 = vector.load %arg1[%c0_23, %c7, %c0_24] : memref<1x42x128xf32, #tpu.memory_space<vmem>>, vector<1x24x128xf32>
    %26 = vector.shape_cast %25 : vector<1x24x128xf32> to vector<24x128xf32>
    %c4 = arith.constant 4 : index
    %c0_25 = arith.constant 0 : index
    %c0_26 = arith.constant 0 : index
    %27 = vector.load %arg2[%c4, %c0_25, %c0_26] : memref<9x128x128xf32, #tpu.memory_space<vmem>>, vector<1x128x128xf32>
    %28 = vector.shape_cast %27 : vector<1x128x128xf32> to vector<128x128xf32>
    %cst_27 = arith.constant dense<0.000000e+00> : vector<24x128xf32>
    %29 = tpu.matmul %26, %28, %cst_27 {dimension_numbers = #tpu.dot_dimension_numbers<[1], [0], [0], [1], [0, 0, 1, 1], [], []>} : vector<24x128xf32>, vector<128x128xf32>, vector<24x128xf32> -> vector<24x128xf32>
    %30 = arith.addf %24, %29 : vector<24x128xf32>
    %c0_28 = arith.constant 0 : index
    %c8 = arith.constant 8 : index
    %c0_29 = arith.constant 0 : index
    %31 = vector.load %arg1[%c0_28, %c8, %c0_29] : memref<1x42x128xf32, #tpu.memory_space<vmem>>, vector<1x24x128xf32>
    %32 = vector.shape_cast %31 : vector<1x24x128xf32> to vector<24x128xf32>
    %c5 = arith.constant 5 : index
    %c0_30 = arith.constant 0 : index
    %c0_31 = arith.constant 0 : index
    %33 = vector.load %arg2[%c5, %c0_30, %c0_31] : memref<9x128x128xf32, #tpu.memory_space<vmem>>, vector<1x128x128xf32>
    %34 = vector.shape_cast %33 : vector<1x128x128xf32> to vector<128x128xf32>
    %cst_32 = arith.constant dense<0.000000e+00> : vector<24x128xf32>
    %35 = tpu.matmul %32, %34, %cst_32 {dimension_numbers = #tpu.dot_dimension_numbers<[1], [0], [0], [1], [0, 0, 1, 1], [], []>} : vector<24x128xf32>, vector<128x128xf32>, vector<24x128xf32> -> vector<24x128xf32>
    %36 = arith.addf %30, %35 : vector<24x128xf32>
    %c0_33 = arith.constant 0 : index
    %c12 = arith.constant 12 : index
    %c0_34 = arith.constant 0 : index
    %37 = vector.load %arg1[%c0_33, %c12, %c0_34] : memref<1x42x128xf32, #tpu.memory_space<vmem>>, vector<1x24x128xf32>
    %38 = vector.shape_cast %37 : vector<1x24x128xf32> to vector<24x128xf32>
    %c6_35 = arith.constant 6 : index
    %c0_36 = arith.constant 0 : index
    %c0_37 = arith.constant 0 : index
    %39 = vector.load %arg2[%c6_35, %c0_36, %c0_37] : memref<9x128x128xf32, #tpu.memory_space<vmem>>, vector<1x128x128xf32>
    %40 = vector.shape_cast %39 : vector<1x128x128xf32> to vector<128x128xf32>
    %cst_38 = arith.constant dense<0.000000e+00> : vector<24x128xf32>
    %41 = tpu.matmul %38, %40, %cst_38 {dimension_numbers = #tpu.dot_dimension_numbers<[1], [0], [0], [1], [0, 0, 1, 1], [], []>} : vector<24x128xf32>, vector<128x128xf32>, vector<24x128xf32> -> vector<24x128xf32>
    %42 = arith.addf %36, %41 : vector<24x128xf32>
    %c0_39 = arith.constant 0 : index
    %c13 = arith.constant 13 : index
    %c0_40 = arith.constant 0 : index
    %43 = vector.load %arg1[%c0_39, %c13, %c0_40] : memref<1x42x128xf32, #tpu.memory_space<vmem>>, vector<1x24x128xf32>
    %44 = vector.shape_cast %43 : vector<1x24x128xf32> to vector<24x128xf32>
    %c7_41 = arith.constant 7 : index
    %c0_42 = arith.constant 0 : index
    %c0_43 = arith.constant 0 : index
    %45 = vector.load %arg2[%c7_41, %c0_42, %c0_43] : memref<9x128x128xf32, #tpu.memory_space<vmem>>, vector<1x128x128xf32>
    %46 = vector.shape_cast %45 : vector<1x128x128xf32> to vector<128x128xf32>
    %cst_44 = arith.constant dense<0.000000e+00> : vector<24x128xf32>
    %47 = tpu.matmul %44, %46, %cst_44 {dimension_numbers = #tpu.dot_dimension_numbers<[1], [0], [0], [1], [0, 0, 1, 1], [], []>} : vector<24x128xf32>, vector<128x128xf32>, vector<24x128xf32> -> vector<24x128xf32>
    %48 = arith.addf %42, %47 : vector<24x128xf32>
    %c0_45 = arith.constant 0 : index
    %c14 = arith.constant 14 : index
    %c0_46 = arith.constant 0 : index
    %49 = vector.load %arg1[%c0_45, %c14, %c0_46] : memref<1x42x128xf32, #tpu.memory_space<vmem>>, vector<1x24x128xf32>
    %50 = vector.shape_cast %49 : vector<1x24x128xf32> to vector<24x128xf32>
    %c8_47 = arith.constant 8 : index
    %c0_48 = arith.constant 0 : index
    %c0_49 = arith.constant 0 : index
    %51 = vector.load %arg2[%c8_47, %c0_48, %c0_49] : memref<9x128x128xf32, #tpu.memory_space<vmem>>, vector<1x128x128xf32>
    %52 = vector.shape_cast %51 : vector<1x128x128xf32> to vector<128x128xf32>
    %cst_50 = arith.constant dense<0.000000e+00> : vector<24x128xf32>
    %53 = tpu.matmul %50, %52, %cst_50 {dimension_numbers = #tpu.dot_dimension_numbers<[1], [0], [0], [1], [0, 0, 1, 1], [], []>} : vector<24x128xf32>, vector<128x128xf32>, vector<24x128xf32> -> vector<24x128xf32>
    %54 = arith.addf %48, %53 : vector<24x128xf32>
    %c0_51 = arith.constant 0 : index
    %c0_52 = arith.constant 0 : index
    %55 = vector.load %arg3[%c0_51, %c0_52] : memref<1x128xf32, #tpu.memory_space<vmem>>, vector<1x128xf32>
    %56 = vector.broadcast %55 : vector<1x128xf32> to vector<24x128xf32>
    %57 = arith.addf %54, %56 : vector<24x128xf32>
    %58 = vector.extract_strided_slice %57 {offsets = [0, 0], sizes = [4, 128], strides = [1, 1]} : vector<24x128xf32> to vector<4x128xf32>
    %c0_53 = arith.constant 0 : index
    %c0_54 = arith.constant 0 : index
    %c0_55 = arith.constant 0 : index
    %c0_56 = arith.constant 0 : index
    %59 = vector.load %arg4[%c0_53, %c0_54, %c0_55, %c0_56] : memref<1x4x4x128xf32, #tpu.memory_space<vmem>>, vector<1x1x4x128xf32>
    %60 = vector.shape_cast %59 : vector<1x1x4x128xf32> to vector<4x128xf32>
    %61 = vector.shape_cast %58 : vector<4x128xf32> to vector<1x1x4x128xf32>
    tpu.vector_store %arg4[%c0_53, %c0_54, %c0_55, %c0_56], %61 {strides = array<i32>} : memref<1x4x4x128xf32, #tpu.memory_space<vmem>>, vector<1x1x4x128xf32>,
    %62 = vector.extract_strided_slice %57 {offsets = [6, 0], sizes = [4, 128], strides = [1, 1]} : vector<24x128xf32> to vector<4x128xf32>
    %c0_57 = arith.constant 0 : index
    %c1_58 = arith.constant 1 : index
    %c0_59 = arith.constant 0 : index
    %c0_60 = arith.constant 0 : index
    %63 = vector.load %arg4[%c0_57, %c1_58, %c0_59, %c0_60] : memref<1x4x4x128xf32, #tpu.memory_space<vmem>>, vector<1x1x4x128xf32>
    %64 = vector.shape_cast %63 : vector<1x1x4x128xf32> to vector<4x128xf32>
    %65 = vector.shape_cast %62 : vector<4x128xf32> to vector<1x1x4x128xf32>
    tpu.vector_store %arg4[%c0_57, %c1_58, %c0_59, %c0_60], %65 {strides = array<i32>} : memref<1x4x4x128xf32, #tpu.memory_space<vmem>>, vector<1x1x4x128xf32>,
    %66 = vector.extract_strided_slice %57 {offsets = [12, 0], sizes = [4, 128], strides = [1, 1]} : vector<24x128xf32> to vector<4x128xf32>
    %c0_61 = arith.constant 0 : index
    %c2_62 = arith.constant 2 : index
    %c0_63 = arith.constant 0 : index
    %c0_64 = arith.constant 0 : index
    %67 = vector.load %arg4[%c0_61, %c2_62, %c0_63, %c0_64] : memref<1x4x4x128xf32, #tpu.memory_space<vmem>>, vector<1x1x4x128xf32>
    %68 = vector.shape_cast %67 : vector<1x1x4x128xf32> to vector<4x128xf32>
    %69 = vector.shape_cast %66 : vector<4x128xf32> to vector<1x1x4x128xf32>
    tpu.vector_store %arg4[%c0_61, %c2_62, %c0_63, %c0_64], %69 {strides = array<i32>} : memref<1x4x4x128xf32, #tpu.memory_space<vmem>>, vector<1x1x4x128xf32>,
    %70 = vector.extract_strided_slice %57 {offsets = [18, 0], sizes = [4, 128], strides = [1, 1]} : vector<24x128xf32> to vector<4x128xf32>
    %c0_65 = arith.constant 0 : index
    %c3_66 = arith.constant 3 : index
    %c0_67 = arith.constant 0 : index
    %c0_68 = arith.constant 0 : index
    %71 = vector.load %arg4[%c0_65, %c3_66, %c0_67, %c0_68] : memref<1x4x4x128xf32, #tpu.memory_space<vmem>>, vector<1x1x4x128xf32>
    %72 = vector.shape_cast %71 : vector<1x1x4x128xf32> to vector<4x128xf32>
    %73 = vector.shape_cast %70 : vector<4x128xf32> to vector<1x1x4x128xf32>
    tpu.vector_store %arg4[%c0_65, %c3_66, %c0_67, %c0_68], %73 {strides = array<i32>} : memref<1x4x4x128xf32, #tpu.memory_space<vmem>>, vector<1x1x4x128xf32>,
    return
  }
  func.func @transform_0(%arg0: i32) -> (i32, i32, i32) {
    %c0_i32 = arith.constant 0 : i32
    %c0_i32_0 = arith.constant 0 : i32
    %c0_i32_1 = arith.constant 0 : i32
    return %arg0, %c0_i32, %c0_i32_0 : i32, i32, i32
  }
  func.func @transform_1(%arg0: i32) -> (i32, i32, i32) {
    %c0_i32 = arith.constant 0 : i32
    %c0_i32_0 = arith.constant 0 : i32
    %c0_i32_1 = arith.constant 0 : i32
    %c0_i32_2 = arith.constant 0 : i32
    return %c0_i32, %c0_i32_0, %c0_i32_1 : i32, i32, i32
  }
  func.func @transform_2(%arg0: i32) -> (i32, i32) {
    %c0_i32 = arith.constant 0 : i32
    %c0_i32_0 = arith.constant 0 : i32
    %c0_i32_1 = arith.constant 0 : i32
    return %c0_i32, %c0_i32_0 : i32, i32
  }
  func.func @transform_3(%arg0: i32) -> (i32, i32, i32, i32) {
    %c0_i32 = arith.constant 0 : i32
    %c0_i32_0 = arith.constant 0 : i32
    %c0_i32_1 = arith.constant 0 : i32
    %c0_i32_2 = arith.constant 0 : i32
    return %arg0, %c0_i32, %c0_i32_0, %c0_i32_1 : i32, i32, i32, i32
  }
}

module attributes {stable_mosaic.version = 11 : i64} {
  func.func @_mm_bias_skip_kernel(%arg0: i32, %arg1: memref<64x64xf32, #tpu.memory_space<vmem>>, %arg2: memref<64x128xf32, #tpu.memory_space<vmem>>, %arg3: memref<1x128xf32, #tpu.memory_space<vmem>>, %arg4: memref<64x128xf32, #tpu.memory_space<vmem>>, %arg5: memref<64x128xf32, #tpu.memory_space<vmem>>) attributes {dimension_semantics = [#tpu.dimension_semantics<parallel>], iteration_bounds = array<i64: 2>, scalar_prefetch = 0 : i64, scratch_operands = 0 : i64, tpu.core_type = #tpu.core_type<tc>, window_params = [{transform_indices = @transform_0, window_bounds = array<i64: 64, 64>}, {pipeline_mode = #tpu.pipeline_mode<synchronous>, transform_indices = @transform_1, window_bounds = array<i64: 64, 128>}, {pipeline_mode = #tpu.pipeline_mode<synchronous>, transform_indices = @transform_2, window_bounds = array<i64: 1, 128>}, {transform_indices = @transform_3, window_bounds = array<i64: 64, 128>}, {transform_indices = @transform_4, window_bounds = array<i64: 64, 128>}]} {
    %c0 = arith.constant 0 : index
    %c0_0 = arith.constant 0 : index
    %0 = vector.load %arg1[%c0, %c0_0] : memref<64x64xf32, #tpu.memory_space<vmem>>, vector<64x64xf32>
    %c0_1 = arith.constant 0 : index
    %c0_2 = arith.constant 0 : index
    %1 = vector.load %arg2[%c0_1, %c0_2] : memref<64x128xf32, #tpu.memory_space<vmem>>, vector<64x128xf32>
    %cst = arith.constant dense<0.000000e+00> : vector<64x128xf32>
    %2 = tpu.matmul %0, %1, %cst {dimension_numbers = #tpu.dot_dimension_numbers<[1], [0], [0], [1], [0, 0, 1, 1], [], []>} : vector<64x64xf32>, vector<64x128xf32>, vector<64x128xf32> -> vector<64x128xf32>
    %c0_3 = arith.constant 0 : index
    %c0_4 = arith.constant 0 : index
    %3 = vector.load %arg3[%c0_3, %c0_4] : memref<1x128xf32, #tpu.memory_space<vmem>>, vector<1x128xf32>
    %4 = vector.broadcast %3 : vector<1x128xf32> to vector<64x128xf32>
    %5 = arith.addf %2, %4 : vector<64x128xf32>
    %c0_5 = arith.constant 0 : index
    %c0_6 = arith.constant 0 : index
    %6 = vector.load %arg4[%c0_5, %c0_6] : memref<64x128xf32, #tpu.memory_space<vmem>>, vector<64x128xf32>
    %7 = arith.addf %5, %6 : vector<64x128xf32>
    %c0_7 = arith.constant 0 : index
    %c0_8 = arith.constant 0 : index
    %8 = vector.load %arg5[%c0_7, %c0_8] : memref<64x128xf32, #tpu.memory_space<vmem>>, vector<64x128xf32>
    tpu.vector_store %arg5[%c0_7, %c0_8], %7 {strides = array<i32>} : memref<64x128xf32, #tpu.memory_space<vmem>>, vector<64x128xf32>,
    return
  }
  func.func @transform_0(%arg0: i32) -> (i32, i32) {
    %c0_i32 = arith.constant 0 : i32
    %c0_i32_0 = arith.constant 0 : i32
    return %arg0, %c0_i32 : i32, i32
  }
  func.func @transform_1(%arg0: i32) -> (i32, i32) {
    %c0_i32 = arith.constant 0 : i32
    %c0_i32_0 = arith.constant 0 : i32
    %c0_i32_1 = arith.constant 0 : i32
    return %c0_i32, %c0_i32_0 : i32, i32
  }
  func.func @transform_2(%arg0: i32) -> (i32, i32) {
    %c0_i32 = arith.constant 0 : i32
    %c0_i32_0 = arith.constant 0 : i32
    %c0_i32_1 = arith.constant 0 : i32
    return %c0_i32, %c0_i32_0 : i32, i32
  }
  func.func @transform_3(%arg0: i32) -> (i32, i32) {
    %c0_i32 = arith.constant 0 : i32
    %c0_i32_0 = arith.constant 0 : i32
    return %arg0, %c0_i32 : i32, i32
  }
  func.func @transform_4(%arg0: i32) -> (i32, i32) {
    %c0_i32 = arith.constant 0 : i32
    %c0_i32_0 = arith.constant 0 : i32
    return %arg0, %c0_i32 : i32, i32
  }
}

module attributes {stable_mosaic.version = 11 : i64} {
  func.func @_upsample2x_kernel(%arg0: i32, %arg1: memref<1x8x8x128xf32, #tpu.memory_space<vmem>>, %arg2: memref<16x8xf32, #tpu.memory_space<vmem>>, %arg3: memref<1x16x16x128xf32, #tpu.memory_space<vmem>>) attributes {dimension_semantics = [#tpu.dimension_semantics<parallel>], iteration_bounds = array<i64: 2>, scalar_prefetch = 0 : i64, scratch_operands = 0 : i64, tpu.core_type = #tpu.core_type<tc>, window_params = [{transform_indices = @transform_0, window_bounds = array<i64: 1, 8, 8, 128>}, {pipeline_mode = #tpu.pipeline_mode<synchronous>, transform_indices = @transform_1, window_bounds = array<i64: 16, 8>}, {transform_indices = @transform_2, window_bounds = array<i64: 1, 16, 16, 128>}]} {
    %c0 = arith.constant 0 : index
    %c0_0 = arith.constant 0 : index
    %0 = vector.load %arg2[%c0, %c0_0] : memref<16x8xf32, #tpu.memory_space<vmem>>, vector<16x8xf32>
    %c0_1 = arith.constant 0 : index
    %c0_2 = arith.constant 0 : index
    %c0_3 = arith.constant 0 : index
    %c0_4 = arith.constant 0 : index
    %1 = vector.load %arg1[%c0_1, %c0_2, %c0_3, %c0_4] : memref<1x8x8x128xf32, #tpu.memory_space<vmem>>, vector<1x1x8x128xf32>
    %2 = vector.shape_cast %1 : vector<1x1x8x128xf32> to vector<8x128xf32>
    %cst = arith.constant dense<0.000000e+00> : vector<16x128xf32>
    %3 = tpu.matmul %0, %2, %cst {dimension_numbers = #tpu.dot_dimension_numbers<[1], [0], [0], [1], [0, 0, 1, 1], [], []>} : vector<16x8xf32>, vector<8x128xf32>, vector<16x128xf32> -> vector<16x128xf32>
    %c0_5 = arith.constant 0 : index
    %c0_6 = arith.constant 0 : index
    %c0_7 = arith.constant 0 : index
    %c0_8 = arith.constant 0 : index
    %4 = vector.load %arg3[%c0_5, %c0_6, %c0_7, %c0_8] : memref<1x16x16x128xf32, #tpu.memory_space<vmem>>, vector<1x1x16x128xf32>
    %5 = vector.shape_cast %4 : vector<1x1x16x128xf32> to vector<16x128xf32>
    %6 = vector.shape_cast %3 : vector<16x128xf32> to vector<1x1x16x128xf32>
    tpu.vector_store %arg3[%c0_5, %c0_6, %c0_7, %c0_8], %6 {strides = array<i32>} : memref<1x16x16x128xf32, #tpu.memory_space<vmem>>, vector<1x1x16x128xf32>,
    %c0_9 = arith.constant 0 : index
    %c1 = arith.constant 1 : index
    %c0_10 = arith.constant 0 : index
    %c0_11 = arith.constant 0 : index
    %7 = vector.load %arg3[%c0_9, %c1, %c0_10, %c0_11] : memref<1x16x16x128xf32, #tpu.memory_space<vmem>>, vector<1x1x16x128xf32>
    %8 = vector.shape_cast %7 : vector<1x1x16x128xf32> to vector<16x128xf32>
    %9 = vector.shape_cast %3 : vector<16x128xf32> to vector<1x1x16x128xf32>
    tpu.vector_store %arg3[%c0_9, %c1, %c0_10, %c0_11], %9 {strides = array<i32>} : memref<1x16x16x128xf32, #tpu.memory_space<vmem>>, vector<1x1x16x128xf32>,
    %c0_12 = arith.constant 0 : index
    %c1_13 = arith.constant 1 : index
    %c0_14 = arith.constant 0 : index
    %c0_15 = arith.constant 0 : index
    %10 = vector.load %arg1[%c0_12, %c1_13, %c0_14, %c0_15] : memref<1x8x8x128xf32, #tpu.memory_space<vmem>>, vector<1x1x8x128xf32>
    %11 = vector.shape_cast %10 : vector<1x1x8x128xf32> to vector<8x128xf32>
    %cst_16 = arith.constant dense<0.000000e+00> : vector<16x128xf32>
    %12 = tpu.matmul %0, %11, %cst_16 {dimension_numbers = #tpu.dot_dimension_numbers<[1], [0], [0], [1], [0, 0, 1, 1], [], []>} : vector<16x8xf32>, vector<8x128xf32>, vector<16x128xf32> -> vector<16x128xf32>
    %c0_17 = arith.constant 0 : index
    %c2 = arith.constant 2 : index
    %c0_18 = arith.constant 0 : index
    %c0_19 = arith.constant 0 : index
    %13 = vector.load %arg3[%c0_17, %c2, %c0_18, %c0_19] : memref<1x16x16x128xf32, #tpu.memory_space<vmem>>, vector<1x1x16x128xf32>
    %14 = vector.shape_cast %13 : vector<1x1x16x128xf32> to vector<16x128xf32>
    %15 = vector.shape_cast %12 : vector<16x128xf32> to vector<1x1x16x128xf32>
    tpu.vector_store %arg3[%c0_17, %c2, %c0_18, %c0_19], %15 {strides = array<i32>} : memref<1x16x16x128xf32, #tpu.memory_space<vmem>>, vector<1x1x16x128xf32>,
    %c0_20 = arith.constant 0 : index
    %c3 = arith.constant 3 : index
    %c0_21 = arith.constant 0 : index
    %c0_22 = arith.constant 0 : index
    %16 = vector.load %arg3[%c0_20, %c3, %c0_21, %c0_22] : memref<1x16x16x128xf32, #tpu.memory_space<vmem>>, vector<1x1x16x128xf32>
    %17 = vector.shape_cast %16 : vector<1x1x16x128xf32> to vector<16x128xf32>
    %18 = vector.shape_cast %12 : vector<16x128xf32> to vector<1x1x16x128xf32>
    tpu.vector_store %arg3[%c0_20, %c3, %c0_21, %c0_22], %18 {strides = array<i32>} : memref<1x16x16x128xf32, #tpu.memory_space<vmem>>, vector<1x1x16x128xf32>,
    %c0_23 = arith.constant 0 : index
    %c2_24 = arith.constant 2 : index
    %c0_25 = arith.constant 0 : index
    %c0_26 = arith.constant 0 : index
    %19 = vector.load %arg1[%c0_23, %c2_24, %c0_25, %c0_26] : memref<1x8x8x128xf32, #tpu.memory_space<vmem>>, vector<1x1x8x128xf32>
    %20 = vector.shape_cast %19 : vector<1x1x8x128xf32> to vector<8x128xf32>
    %cst_27 = arith.constant dense<0.000000e+00> : vector<16x128xf32>
    %21 = tpu.matmul %0, %20, %cst_27 {dimension_numbers = #tpu.dot_dimension_numbers<[1], [0], [0], [1], [0, 0, 1, 1], [], []>} : vector<16x8xf32>, vector<8x128xf32>, vector<16x128xf32> -> vector<16x128xf32>
    %c0_28 = arith.constant 0 : index
    %c4 = arith.constant 4 : index
    %c0_29 = arith.constant 0 : index
    %c0_30 = arith.constant 0 : index
    %22 = vector.load %arg3[%c0_28, %c4, %c0_29, %c0_30] : memref<1x16x16x128xf32, #tpu.memory_space<vmem>>, vector<1x1x16x128xf32>
    %23 = vector.shape_cast %22 : vector<1x1x16x128xf32> to vector<16x128xf32>
    %24 = vector.shape_cast %21 : vector<16x128xf32> to vector<1x1x16x128xf32>
    tpu.vector_store %arg3[%c0_28, %c4, %c0_29, %c0_30], %24 {strides = array<i32>} : memref<1x16x16x128xf32, #tpu.memory_space<vmem>>, vector<1x1x16x128xf32>,
    %c0_31 = arith.constant 0 : index
    %c5 = arith.constant 5 : index
    %c0_32 = arith.constant 0 : index
    %c0_33 = arith.constant 0 : index
    %25 = vector.load %arg3[%c0_31, %c5, %c0_32, %c0_33] : memref<1x16x16x128xf32, #tpu.memory_space<vmem>>, vector<1x1x16x128xf32>
    %26 = vector.shape_cast %25 : vector<1x1x16x128xf32> to vector<16x128xf32>
    %27 = vector.shape_cast %21 : vector<16x128xf32> to vector<1x1x16x128xf32>
    tpu.vector_store %arg3[%c0_31, %c5, %c0_32, %c0_33], %27 {strides = array<i32>} : memref<1x16x16x128xf32, #tpu.memory_space<vmem>>, vector<1x1x16x128xf32>,
    %c0_34 = arith.constant 0 : index
    %c3_35 = arith.constant 3 : index
    %c0_36 = arith.constant 0 : index
    %c0_37 = arith.constant 0 : index
    %28 = vector.load %arg1[%c0_34, %c3_35, %c0_36, %c0_37] : memref<1x8x8x128xf32, #tpu.memory_space<vmem>>, vector<1x1x8x128xf32>
    %29 = vector.shape_cast %28 : vector<1x1x8x128xf32> to vector<8x128xf32>
    %cst_38 = arith.constant dense<0.000000e+00> : vector<16x128xf32>
    %30 = tpu.matmul %0, %29, %cst_38 {dimension_numbers = #tpu.dot_dimension_numbers<[1], [0], [0], [1], [0, 0, 1, 1], [], []>} : vector<16x8xf32>, vector<8x128xf32>, vector<16x128xf32> -> vector<16x128xf32>
    %c0_39 = arith.constant 0 : index
    %c6 = arith.constant 6 : index
    %c0_40 = arith.constant 0 : index
    %c0_41 = arith.constant 0 : index
    %31 = vector.load %arg3[%c0_39, %c6, %c0_40, %c0_41] : memref<1x16x16x128xf32, #tpu.memory_space<vmem>>, vector<1x1x16x128xf32>
    %32 = vector.shape_cast %31 : vector<1x1x16x128xf32> to vector<16x128xf32>
    %33 = vector.shape_cast %30 : vector<16x128xf32> to vector<1x1x16x128xf32>
    tpu.vector_store %arg3[%c0_39, %c6, %c0_40, %c0_41], %33 {strides = array<i32>} : memref<1x16x16x128xf32, #tpu.memory_space<vmem>>, vector<1x1x16x128xf32>,
    %c0_42 = arith.constant 0 : index
    %c7 = arith.constant 7 : index
    %c0_43 = arith.constant 0 : index
    %c0_44 = arith.constant 0 : index
    %34 = vector.load %arg3[%c0_42, %c7, %c0_43, %c0_44] : memref<1x16x16x128xf32, #tpu.memory_space<vmem>>, vector<1x1x16x128xf32>
    %35 = vector.shape_cast %34 : vector<1x1x16x128xf32> to vector<16x128xf32>
    %36 = vector.shape_cast %30 : vector<16x128xf32> to vector<1x1x16x128xf32>
    tpu.vector_store %arg3[%c0_42, %c7, %c0_43, %c0_44], %36 {strides = array<i32>} : memref<1x16x16x128xf32, #tpu.memory_space<vmem>>, vector<1x1x16x128xf32>,
    %c0_45 = arith.constant 0 : index
    %c4_46 = arith.constant 4 : index
    %c0_47 = arith.constant 0 : index
    %c0_48 = arith.constant 0 : index
    %37 = vector.load %arg1[%c0_45, %c4_46, %c0_47, %c0_48] : memref<1x8x8x128xf32, #tpu.memory_space<vmem>>, vector<1x1x8x128xf32>
    %38 = vector.shape_cast %37 : vector<1x1x8x128xf32> to vector<8x128xf32>
    %cst_49 = arith.constant dense<0.000000e+00> : vector<16x128xf32>
    %39 = tpu.matmul %0, %38, %cst_49 {dimension_numbers = #tpu.dot_dimension_numbers<[1], [0], [0], [1], [0, 0, 1, 1], [], []>} : vector<16x8xf32>, vector<8x128xf32>, vector<16x128xf32> -> vector<16x128xf32>
    %c0_50 = arith.constant 0 : index
    %c8 = arith.constant 8 : index
    %c0_51 = arith.constant 0 : index
    %c0_52 = arith.constant 0 : index
    %40 = vector.load %arg3[%c0_50, %c8, %c0_51, %c0_52] : memref<1x16x16x128xf32, #tpu.memory_space<vmem>>, vector<1x1x16x128xf32>
    %41 = vector.shape_cast %40 : vector<1x1x16x128xf32> to vector<16x128xf32>
    %42 = vector.shape_cast %39 : vector<16x128xf32> to vector<1x1x16x128xf32>
    tpu.vector_store %arg3[%c0_50, %c8, %c0_51, %c0_52], %42 {strides = array<i32>} : memref<1x16x16x128xf32, #tpu.memory_space<vmem>>, vector<1x1x16x128xf32>,
    %c0_53 = arith.constant 0 : index
    %c9 = arith.constant 9 : index
    %c0_54 = arith.constant 0 : index
    %c0_55 = arith.constant 0 : index
    %43 = vector.load %arg3[%c0_53, %c9, %c0_54, %c0_55] : memref<1x16x16x128xf32, #tpu.memory_space<vmem>>, vector<1x1x16x128xf32>
    %44 = vector.shape_cast %43 : vector<1x1x16x128xf32> to vector<16x128xf32>
    %45 = vector.shape_cast %39 : vector<16x128xf32> to vector<1x1x16x128xf32>
    tpu.vector_store %arg3[%c0_53, %c9, %c0_54, %c0_55], %45 {strides = array<i32>} : memref<1x16x16x128xf32, #tpu.memory_space<vmem>>, vector<1x1x16x128xf32>,
    %c0_56 = arith.constant 0 : index
    %c5_57 = arith.constant 5 : index
    %c0_58 = arith.constant 0 : index
    %c0_59 = arith.constant 0 : index
    %46 = vector.load %arg1[%c0_56, %c5_57, %c0_58, %c0_59] : memref<1x8x8x128xf32, #tpu.memory_space<vmem>>, vector<1x1x8x128xf32>
    %47 = vector.shape_cast %46 : vector<1x1x8x128xf32> to vector<8x128xf32>
    %cst_60 = arith.constant dense<0.000000e+00> : vector<16x128xf32>
    %48 = tpu.matmul %0, %47, %cst_60 {dimension_numbers = #tpu.dot_dimension_numbers<[1], [0], [0], [1], [0, 0, 1, 1], [], []>} : vector<16x8xf32>, vector<8x128xf32>, vector<16x128xf32> -> vector<16x128xf32>
    %c0_61 = arith.constant 0 : index
    %c10 = arith.constant 10 : index
    %c0_62 = arith.constant 0 : index
    %c0_63 = arith.constant 0 : index
    %49 = vector.load %arg3[%c0_61, %c10, %c0_62, %c0_63] : memref<1x16x16x128xf32, #tpu.memory_space<vmem>>, vector<1x1x16x128xf32>
    %50 = vector.shape_cast %49 : vector<1x1x16x128xf32> to vector<16x128xf32>
    %51 = vector.shape_cast %48 : vector<16x128xf32> to vector<1x1x16x128xf32>
    tpu.vector_store %arg3[%c0_61, %c10, %c0_62, %c0_63], %51 {strides = array<i32>} : memref<1x16x16x128xf32, #tpu.memory_space<vmem>>, vector<1x1x16x128xf32>,
    %c0_64 = arith.constant 0 : index
    %c11 = arith.constant 11 : index
    %c0_65 = arith.constant 0 : index
    %c0_66 = arith.constant 0 : index
    %52 = vector.load %arg3[%c0_64, %c11, %c0_65, %c0_66] : memref<1x16x16x128xf32, #tpu.memory_space<vmem>>, vector<1x1x16x128xf32>
    %53 = vector.shape_cast %52 : vector<1x1x16x128xf32> to vector<16x128xf32>
    %54 = vector.shape_cast %48 : vector<16x128xf32> to vector<1x1x16x128xf32>
    tpu.vector_store %arg3[%c0_64, %c11, %c0_65, %c0_66], %54 {strides = array<i32>} : memref<1x16x16x128xf32, #tpu.memory_space<vmem>>, vector<1x1x16x128xf32>,
    %c0_67 = arith.constant 0 : index
    %c6_68 = arith.constant 6 : index
    %c0_69 = arith.constant 0 : index
    %c0_70 = arith.constant 0 : index
    %55 = vector.load %arg1[%c0_67, %c6_68, %c0_69, %c0_70] : memref<1x8x8x128xf32, #tpu.memory_space<vmem>>, vector<1x1x8x128xf32>
    %56 = vector.shape_cast %55 : vector<1x1x8x128xf32> to vector<8x128xf32>
    %cst_71 = arith.constant dense<0.000000e+00> : vector<16x128xf32>
    %57 = tpu.matmul %0, %56, %cst_71 {dimension_numbers = #tpu.dot_dimension_numbers<[1], [0], [0], [1], [0, 0, 1, 1], [], []>} : vector<16x8xf32>, vector<8x128xf32>, vector<16x128xf32> -> vector<16x128xf32>
    %c0_72 = arith.constant 0 : index
    %c12 = arith.constant 12 : index
    %c0_73 = arith.constant 0 : index
    %c0_74 = arith.constant 0 : index
    %58 = vector.load %arg3[%c0_72, %c12, %c0_73, %c0_74] : memref<1x16x16x128xf32, #tpu.memory_space<vmem>>, vector<1x1x16x128xf32>
    %59 = vector.shape_cast %58 : vector<1x1x16x128xf32> to vector<16x128xf32>
    %60 = vector.shape_cast %57 : vector<16x128xf32> to vector<1x1x16x128xf32>
    tpu.vector_store %arg3[%c0_72, %c12, %c0_73, %c0_74], %60 {strides = array<i32>} : memref<1x16x16x128xf32, #tpu.memory_space<vmem>>, vector<1x1x16x128xf32>,
    %c0_75 = arith.constant 0 : index
    %c13 = arith.constant 13 : index
    %c0_76 = arith.constant 0 : index
    %c0_77 = arith.constant 0 : index
    %61 = vector.load %arg3[%c0_75, %c13, %c0_76, %c0_77] : memref<1x16x16x128xf32, #tpu.memory_space<vmem>>, vector<1x1x16x128xf32>
    %62 = vector.shape_cast %61 : vector<1x1x16x128xf32> to vector<16x128xf32>
    %63 = vector.shape_cast %57 : vector<16x128xf32> to vector<1x1x16x128xf32>
    tpu.vector_store %arg3[%c0_75, %c13, %c0_76, %c0_77], %63 {strides = array<i32>} : memref<1x16x16x128xf32, #tpu.memory_space<vmem>>, vector<1x1x16x128xf32>,
    %c0_78 = arith.constant 0 : index
    %c7_79 = arith.constant 7 : index
    %c0_80 = arith.constant 0 : index
    %c0_81 = arith.constant 0 : index
    %64 = vector.load %arg1[%c0_78, %c7_79, %c0_80, %c0_81] : memref<1x8x8x128xf32, #tpu.memory_space<vmem>>, vector<1x1x8x128xf32>
    %65 = vector.shape_cast %64 : vector<1x1x8x128xf32> to vector<8x128xf32>
    %cst_82 = arith.constant dense<0.000000e+00> : vector<16x128xf32>
    %66 = tpu.matmul %0, %65, %cst_82 {dimension_numbers = #tpu.dot_dimension_numbers<[1], [0], [0], [1], [0, 0, 1, 1], [], []>} : vector<16x8xf32>, vector<8x128xf32>, vector<16x128xf32> -> vector<16x128xf32>
    %c0_83 = arith.constant 0 : index
    %c14 = arith.constant 14 : index
    %c0_84 = arith.constant 0 : index
    %c0_85 = arith.constant 0 : index
    %67 = vector.load %arg3[%c0_83, %c14, %c0_84, %c0_85] : memref<1x16x16x128xf32, #tpu.memory_space<vmem>>, vector<1x1x16x128xf32>
    %68 = vector.shape_cast %67 : vector<1x1x16x128xf32> to vector<16x128xf32>
    %69 = vector.shape_cast %66 : vector<16x128xf32> to vector<1x1x16x128xf32>
    tpu.vector_store %arg3[%c0_83, %c14, %c0_84, %c0_85], %69 {strides = array<i32>} : memref<1x16x16x128xf32, #tpu.memory_space<vmem>>, vector<1x1x16x128xf32>,
    %c0_86 = arith.constant 0 : index
    %c15 = arith.constant 15 : index
    %c0_87 = arith.constant 0 : index
    %c0_88 = arith.constant 0 : index
    %70 = vector.load %arg3[%c0_86, %c15, %c0_87, %c0_88] : memref<1x16x16x128xf32, #tpu.memory_space<vmem>>, vector<1x1x16x128xf32>
    %71 = vector.shape_cast %70 : vector<1x1x16x128xf32> to vector<16x128xf32>
    %72 = vector.shape_cast %66 : vector<16x128xf32> to vector<1x1x16x128xf32>
    tpu.vector_store %arg3[%c0_86, %c15, %c0_87, %c0_88], %72 {strides = array<i32>} : memref<1x16x16x128xf32, #tpu.memory_space<vmem>>, vector<1x1x16x128xf32>,
    return
  }
  func.func @transform_0(%arg0: i32) -> (i32, i32, i32, i32) {
    %c0_i32 = arith.constant 0 : i32
    %c0_i32_0 = arith.constant 0 : i32
    %c0_i32_1 = arith.constant 0 : i32
    %c0_i32_2 = arith.constant 0 : i32
    return %arg0, %c0_i32, %c0_i32_0, %c0_i32_1 : i32, i32, i32, i32
  }
  func.func @transform_1(%arg0: i32) -> (i32, i32) {
    %c0_i32 = arith.constant 0 : i32
    %c0_i32_0 = arith.constant 0 : i32
    %c0_i32_1 = arith.constant 0 : i32
    return %c0_i32, %c0_i32_0 : i32, i32
  }
  func.func @transform_2(%arg0: i32) -> (i32, i32, i32, i32) {
    %c0_i32 = arith.constant 0 : i32
    %c0_i32_0 = arith.constant 0 : i32
    %c0_i32_1 = arith.constant 0 : i32
    %c0_i32_2 = arith.constant 0 : i32
    return %arg0, %c0_i32, %c0_i32_0, %c0_i32_1 : i32, i32, i32, i32
  }
}

module attributes {stable_mosaic.version = 11 : i64} {
  func.func @_mm_bias_skip_kernel(%arg0: i32, %arg1: memref<256x32xf32, #tpu.memory_space<vmem>>, %arg2: memref<32x128xf32, #tpu.memory_space<vmem>>, %arg3: memref<1x128xf32, #tpu.memory_space<vmem>>, %arg4: memref<256x128xf32, #tpu.memory_space<vmem>>, %arg5: memref<256x128xf32, #tpu.memory_space<vmem>>) attributes {dimension_semantics = [#tpu.dimension_semantics<parallel>], iteration_bounds = array<i64: 2>, scalar_prefetch = 0 : i64, scratch_operands = 0 : i64, tpu.core_type = #tpu.core_type<tc>, window_params = [{transform_indices = @transform_0, window_bounds = array<i64: 256, 32>}, {pipeline_mode = #tpu.pipeline_mode<synchronous>, transform_indices = @transform_1, window_bounds = array<i64: 32, 128>}, {pipeline_mode = #tpu.pipeline_mode<synchronous>, transform_indices = @transform_2, window_bounds = array<i64: 1, 128>}, {transform_indices = @transform_3, window_bounds = array<i64: 256, 128>}, {transform_indices = @transform_4, window_bounds = array<i64: 256, 128>}]} {
    %c0 = arith.constant 0 : index
    %c0_0 = arith.constant 0 : index
    %0 = vector.load %arg1[%c0, %c0_0] : memref<256x32xf32, #tpu.memory_space<vmem>>, vector<256x32xf32>
    %c0_1 = arith.constant 0 : index
    %c0_2 = arith.constant 0 : index
    %1 = vector.load %arg2[%c0_1, %c0_2] : memref<32x128xf32, #tpu.memory_space<vmem>>, vector<32x128xf32>
    %cst = arith.constant dense<0.000000e+00> : vector<256x128xf32>
    %2 = tpu.matmul %0, %1, %cst {dimension_numbers = #tpu.dot_dimension_numbers<[1], [0], [0], [1], [0, 0, 1, 1], [], []>} : vector<256x32xf32>, vector<32x128xf32>, vector<256x128xf32> -> vector<256x128xf32>
    %c0_3 = arith.constant 0 : index
    %c0_4 = arith.constant 0 : index
    %3 = vector.load %arg3[%c0_3, %c0_4] : memref<1x128xf32, #tpu.memory_space<vmem>>, vector<1x128xf32>
    %4 = vector.broadcast %3 : vector<1x128xf32> to vector<256x128xf32>
    %5 = arith.addf %2, %4 : vector<256x128xf32>
    %c0_5 = arith.constant 0 : index
    %c0_6 = arith.constant 0 : index
    %6 = vector.load %arg4[%c0_5, %c0_6] : memref<256x128xf32, #tpu.memory_space<vmem>>, vector<256x128xf32>
    %7 = arith.addf %5, %6 : vector<256x128xf32>
    %c0_7 = arith.constant 0 : index
    %c0_8 = arith.constant 0 : index
    %8 = vector.load %arg5[%c0_7, %c0_8] : memref<256x128xf32, #tpu.memory_space<vmem>>, vector<256x128xf32>
    tpu.vector_store %arg5[%c0_7, %c0_8], %7 {strides = array<i32>} : memref<256x128xf32, #tpu.memory_space<vmem>>, vector<256x128xf32>,
    return
  }
  func.func @transform_0(%arg0: i32) -> (i32, i32) {
    %c0_i32 = arith.constant 0 : i32
    %c0_i32_0 = arith.constant 0 : i32
    return %arg0, %c0_i32 : i32, i32
  }
  func.func @transform_1(%arg0: i32) -> (i32, i32) {
    %c0_i32 = arith.constant 0 : i32
    %c0_i32_0 = arith.constant 0 : i32
    %c0_i32_1 = arith.constant 0 : i32
    return %c0_i32, %c0_i32_0 : i32, i32
  }
  func.func @transform_2(%arg0: i32) -> (i32, i32) {
    %c0_i32 = arith.constant 0 : i32
    %c0_i32_0 = arith.constant 0 : i32
    %c0_i32_1 = arith.constant 0 : i32
    return %c0_i32, %c0_i32_0 : i32, i32
  }
  func.func @transform_3(%arg0: i32) -> (i32, i32) {
    %c0_i32 = arith.constant 0 : i32
    %c0_i32_0 = arith.constant 0 : i32
    return %arg0, %c0_i32 : i32, i32
  }
  func.func @transform_4(%arg0: i32) -> (i32, i32) {
    %c0_i32 = arith.constant 0 : i32
    %c0_i32_0 = arith.constant 0 : i32
    return %arg0, %c0_i32 : i32, i32
  }
}

module attributes {stable_mosaic.version = 11 : i64} {
  func.func @_conv3x3_kernel(%arg0: i32, %arg1: memref<1x110x128xf32, #tpu.memory_space<vmem>>, %arg2: memref<9x128x128xf32, #tpu.memory_space<vmem>>, %arg3: memref<1x128xf32, #tpu.memory_space<vmem>>, %arg4: memref<1x8x8x128xf32, #tpu.memory_space<vmem>>) attributes {dimension_semantics = [#tpu.dimension_semantics<parallel>], iteration_bounds = array<i64: 2>, scalar_prefetch = 0 : i64, scratch_operands = 0 : i64, tpu.core_type = #tpu.core_type<tc>, window_params = [{transform_indices = @transform_0, window_bounds = array<i64: 1, 110, 128>}, {pipeline_mode = #tpu.pipeline_mode<synchronous>, transform_indices = @transform_1, window_bounds = array<i64: 9, 128, 128>}, {pipeline_mode = #tpu.pipeline_mode<synchronous>, transform_indices = @transform_2, window_bounds = array<i64: 1, 128>}, {transform_indices = @transform_3, window_bounds = array<i64: 1, 8, 8, 128>}]} {
    %cst = arith.constant 0.000000e+00 : f32
    %0 = vector.broadcast %cst : f32 to vector<80x128xf32>
    %c0 = arith.constant 0 : index
    %c0_0 = arith.constant 0 : index
    %c0_1 = arith.constant 0 : index
    %1 = vector.load %arg1[%c0, %c0_0, %c0_1] : memref<1x110x128xf32, #tpu.memory_space<vmem>>, vector<1x80x128xf32>
    %2 = vector.shape_cast %1 : vector<1x80x128xf32> to vector<80x128xf32>
    %c0_2 = arith.constant 0 : index
    %c0_3 = arith.constant 0 : index
    %c0_4 = arith.constant 0 : index
    %3 = vector.load %arg2[%c0_2, %c0_3, %c0_4] : memref<9x128x128xf32, #tpu.memory_space<vmem>>, vector<1x128x128xf32>
    %4 = vector.shape_cast %3 : vector<1x128x128xf32> to vector<128x128xf32>
    %cst_5 = arith.constant dense<0.000000e+00> : vector<80x128xf32>
    %5 = tpu.matmul %2, %4, %cst_5 {dimension_numbers = #tpu.dot_dimension_numbers<[1], [0], [0], [1], [0, 0, 1, 1], [], []>} : vector<80x128xf32>, vector<128x128xf32>, vector<80x128xf32> -> vector<80x128xf32>
    %6 = arith.addf %0, %5 : vector<80x128xf32>
    %c0_6 = arith.constant 0 : index
    %c1 = arith.constant 1 : index
    %c0_7 = arith.constant 0 : index
    %7 = vector.load %arg1[%c0_6, %c1, %c0_7] : memref<1x110x128xf32, #tpu.memory_space<vmem>>, vector<1x80x128xf32>
    %8 = vector.shape_cast %7 : vector<1x80x128xf32> to vector<80x128xf32>
    %c1_8 = arith.constant 1 : index
    %c0_9 = arith.constant 0 : index
    %c0_10 = arith.constant 0 : index
    %9 = vector.load %arg2[%c1_8, %c0_9, %c0_10] : memref<9x128x128xf32, #tpu.memory_space<vmem>>, vector<1x128x128xf32>
    %10 = vector.shape_cast %9 : vector<1x128x128xf32> to vector<128x128xf32>
    %cst_11 = arith.constant dense<0.000000e+00> : vector<80x128xf32>
    %11 = tpu.matmul %8, %10, %cst_11 {dimension_numbers = #tpu.dot_dimension_numbers<[1], [0], [0], [1], [0, 0, 1, 1], [], []>} : vector<80x128xf32>, vector<128x128xf32>, vector<80x128xf32> -> vector<80x128xf32>
    %12 = arith.addf %6, %11 : vector<80x128xf32>
    %c0_12 = arith.constant 0 : index
    %c2 = arith.constant 2 : index
    %c0_13 = arith.constant 0 : index
    %13 = vector.load %arg1[%c0_12, %c2, %c0_13] : memref<1x110x128xf32, #tpu.memory_space<vmem>>, vector<1x80x128xf32>
    %14 = vector.shape_cast %13 : vector<1x80x128xf32> to vector<80x128xf32>
    %c2_14 = arith.constant 2 : index
    %c0_15 = arith.constant 0 : index
    %c0_16 = arith.constant 0 : index
    %15 = vector.load %arg2[%c2_14, %c0_15, %c0_16] : memref<9x128x128xf32, #tpu.memory_space<vmem>>, vector<1x128x128xf32>
    %16 = vector.shape_cast %15 : vector<1x128x128xf32> to vector<128x128xf32>
    %cst_17 = arith.constant dense<0.000000e+00> : vector<80x128xf32>
    %17 = tpu.matmul %14, %16, %cst_17 {dimension_numbers = #tpu.dot_dimension_numbers<[1], [0], [0], [1], [0, 0, 1, 1], [], []>} : vector<80x128xf32>, vector<128x128xf32>, vector<80x128xf32> -> vector<80x128xf32>
    %18 = arith.addf %12, %17 : vector<80x128xf32>
    %c0_18 = arith.constant 0 : index
    %c10 = arith.constant 10 : index
    %c0_19 = arith.constant 0 : index
    %19 = vector.load %arg1[%c0_18, %c10, %c0_19] : memref<1x110x128xf32, #tpu.memory_space<vmem>>, vector<1x80x128xf32>
    %20 = vector.shape_cast %19 : vector<1x80x128xf32> to vector<80x128xf32>
    %c3 = arith.constant 3 : index
    %c0_20 = arith.constant 0 : index
    %c0_21 = arith.constant 0 : index
    %21 = vector.load %arg2[%c3, %c0_20, %c0_21] : memref<9x128x128xf32, #tpu.memory_space<vmem>>, vector<1x128x128xf32>
    %22 = vector.shape_cast %21 : vector<1x128x128xf32> to vector<128x128xf32>
    %cst_22 = arith.constant dense<0.000000e+00> : vector<80x128xf32>
    %23 = tpu.matmul %20, %22, %cst_22 {dimension_numbers = #tpu.dot_dimension_numbers<[1], [0], [0], [1], [0, 0, 1, 1], [], []>} : vector<80x128xf32>, vector<128x128xf32>, vector<80x128xf32> -> vector<80x128xf32>
    %24 = arith.addf %18, %23 : vector<80x128xf32>
    %c0_23 = arith.constant 0 : index
    %c11 = arith.constant 11 : index
    %c0_24 = arith.constant 0 : index
    %25 = vector.load %arg1[%c0_23, %c11, %c0_24] : memref<1x110x128xf32, #tpu.memory_space<vmem>>, vector<1x80x128xf32>
    %26 = vector.shape_cast %25 : vector<1x80x128xf32> to vector<80x128xf32>
    %c4 = arith.constant 4 : index
    %c0_25 = arith.constant 0 : index
    %c0_26 = arith.constant 0 : index
    %27 = vector.load %arg2[%c4, %c0_25, %c0_26] : memref<9x128x128xf32, #tpu.memory_space<vmem>>, vector<1x128x128xf32>
    %28 = vector.shape_cast %27 : vector<1x128x128xf32> to vector<128x128xf32>
    %cst_27 = arith.constant dense<0.000000e+00> : vector<80x128xf32>
    %29 = tpu.matmul %26, %28, %cst_27 {dimension_numbers = #tpu.dot_dimension_numbers<[1], [0], [0], [1], [0, 0, 1, 1], [], []>} : vector<80x128xf32>, vector<128x128xf32>, vector<80x128xf32> -> vector<80x128xf32>
    %30 = arith.addf %24, %29 : vector<80x128xf32>
    %c0_28 = arith.constant 0 : index
    %c12 = arith.constant 12 : index
    %c0_29 = arith.constant 0 : index
    %31 = vector.load %arg1[%c0_28, %c12, %c0_29] : memref<1x110x128xf32, #tpu.memory_space<vmem>>, vector<1x80x128xf32>
    %32 = vector.shape_cast %31 : vector<1x80x128xf32> to vector<80x128xf32>
    %c5 = arith.constant 5 : index
    %c0_30 = arith.constant 0 : index
    %c0_31 = arith.constant 0 : index
    %33 = vector.load %arg2[%c5, %c0_30, %c0_31] : memref<9x128x128xf32, #tpu.memory_space<vmem>>, vector<1x128x128xf32>
    %34 = vector.shape_cast %33 : vector<1x128x128xf32> to vector<128x128xf32>
    %cst_32 = arith.constant dense<0.000000e+00> : vector<80x128xf32>
    %35 = tpu.matmul %32, %34, %cst_32 {dimension_numbers = #tpu.dot_dimension_numbers<[1], [0], [0], [1], [0, 0, 1, 1], [], []>} : vector<80x128xf32>, vector<128x128xf32>, vector<80x128xf32> -> vector<80x128xf32>
    %36 = arith.addf %30, %35 : vector<80x128xf32>
    %c0_33 = arith.constant 0 : index
    %c20 = arith.constant 20 : index
    %c0_34 = arith.constant 0 : index
    %37 = vector.load %arg1[%c0_33, %c20, %c0_34] : memref<1x110x128xf32, #tpu.memory_space<vmem>>, vector<1x80x128xf32>
    %38 = vector.shape_cast %37 : vector<1x80x128xf32> to vector<80x128xf32>
    %c6 = arith.constant 6 : index
    %c0_35 = arith.constant 0 : index
    %c0_36 = arith.constant 0 : index
    %39 = vector.load %arg2[%c6, %c0_35, %c0_36] : memref<9x128x128xf32, #tpu.memory_space<vmem>>, vector<1x128x128xf32>
    %40 = vector.shape_cast %39 : vector<1x128x128xf32> to vector<128x128xf32>
    %cst_37 = arith.constant dense<0.000000e+00> : vector<80x128xf32>
    %41 = tpu.matmul %38, %40, %cst_37 {dimension_numbers = #tpu.dot_dimension_numbers<[1], [0], [0], [1], [0, 0, 1, 1], [], []>} : vector<80x128xf32>, vector<128x128xf32>, vector<80x128xf32> -> vector<80x128xf32>
    %42 = arith.addf %36, %41 : vector<80x128xf32>
    %c0_38 = arith.constant 0 : index
    %c21 = arith.constant 21 : index
    %c0_39 = arith.constant 0 : index
    %43 = vector.load %arg1[%c0_38, %c21, %c0_39] : memref<1x110x128xf32, #tpu.memory_space<vmem>>, vector<1x80x128xf32>
    %44 = vector.shape_cast %43 : vector<1x80x128xf32> to vector<80x128xf32>
    %c7 = arith.constant 7 : index
    %c0_40 = arith.constant 0 : index
    %c0_41 = arith.constant 0 : index
    %45 = vector.load %arg2[%c7, %c0_40, %c0_41] : memref<9x128x128xf32, #tpu.memory_space<vmem>>, vector<1x128x128xf32>
    %46 = vector.shape_cast %45 : vector<1x128x128xf32> to vector<128x128xf32>
    %cst_42 = arith.constant dense<0.000000e+00> : vector<80x128xf32>
    %47 = tpu.matmul %44, %46, %cst_42 {dimension_numbers = #tpu.dot_dimension_numbers<[1], [0], [0], [1], [0, 0, 1, 1], [], []>} : vector<80x128xf32>, vector<128x128xf32>, vector<80x128xf32> -> vector<80x128xf32>
    %48 = arith.addf %42, %47 : vector<80x128xf32>
    %c0_43 = arith.constant 0 : index
    %c22 = arith.constant 22 : index
    %c0_44 = arith.constant 0 : index
    %49 = vector.load %arg1[%c0_43, %c22, %c0_44] : memref<1x110x128xf32, #tpu.memory_space<vmem>>, vector<1x80x128xf32>
    %50 = vector.shape_cast %49 : vector<1x80x128xf32> to vector<80x128xf32>
    %c8 = arith.constant 8 : index
    %c0_45 = arith.constant 0 : index
    %c0_46 = arith.constant 0 : index
    %51 = vector.load %arg2[%c8, %c0_45, %c0_46] : memref<9x128x128xf32, #tpu.memory_space<vmem>>, vector<1x128x128xf32>
    %52 = vector.shape_cast %51 : vector<1x128x128xf32> to vector<128x128xf32>
    %cst_47 = arith.constant dense<0.000000e+00> : vector<80x128xf32>
    %53 = tpu.matmul %50, %52, %cst_47 {dimension_numbers = #tpu.dot_dimension_numbers<[1], [0], [0], [1], [0, 0, 1, 1], [], []>} : vector<80x128xf32>, vector<128x128xf32>, vector<80x128xf32> -> vector<80x128xf32>
    %54 = arith.addf %48, %53 : vector<80x128xf32>
    %c0_48 = arith.constant 0 : index
    %c0_49 = arith.constant 0 : index
    %55 = vector.load %arg3[%c0_48, %c0_49] : memref<1x128xf32, #tpu.memory_space<vmem>>, vector<1x128xf32>
    %56 = vector.broadcast %55 : vector<1x128xf32> to vector<80x128xf32>
    %57 = arith.addf %54, %56 : vector<80x128xf32>
    %58 = vector.extract_strided_slice %57 {offsets = [0, 0], sizes = [8, 128], strides = [1, 1]} : vector<80x128xf32> to vector<8x128xf32>
    %c0_50 = arith.constant 0 : index
    %c0_51 = arith.constant 0 : index
    %c0_52 = arith.constant 0 : index
    %c0_53 = arith.constant 0 : index
    %59 = vector.load %arg4[%c0_50, %c0_51, %c0_52, %c0_53] : memref<1x8x8x128xf32, #tpu.memory_space<vmem>>, vector<1x1x8x128xf32>
    %60 = vector.shape_cast %59 : vector<1x1x8x128xf32> to vector<8x128xf32>
    %61 = vector.shape_cast %58 : vector<8x128xf32> to vector<1x1x8x128xf32>
    tpu.vector_store %arg4[%c0_50, %c0_51, %c0_52, %c0_53], %61 {strides = array<i32>} : memref<1x8x8x128xf32, #tpu.memory_space<vmem>>, vector<1x1x8x128xf32>,
    %62 = vector.extract_strided_slice %57 {offsets = [10, 0], sizes = [8, 128], strides = [1, 1]} : vector<80x128xf32> to vector<8x128xf32>
    %c0_54 = arith.constant 0 : index
    %c1_55 = arith.constant 1 : index
    %c0_56 = arith.constant 0 : index
    %c0_57 = arith.constant 0 : index
    %63 = vector.load %arg4[%c0_54, %c1_55, %c0_56, %c0_57] : memref<1x8x8x128xf32, #tpu.memory_space<vmem>>, vector<1x1x8x128xf32>
    %64 = vector.shape_cast %63 : vector<1x1x8x128xf32> to vector<8x128xf32>
    %65 = vector.shape_cast %62 : vector<8x128xf32> to vector<1x1x8x128xf32>
    tpu.vector_store %arg4[%c0_54, %c1_55, %c0_56, %c0_57], %65 {strides = array<i32>} : memref<1x8x8x128xf32, #tpu.memory_space<vmem>>, vector<1x1x8x128xf32>,
    %66 = vector.extract_strided_slice %57 {offsets = [20, 0], sizes = [8, 128], strides = [1, 1]} : vector<80x128xf32> to vector<8x128xf32>
    %c0_58 = arith.constant 0 : index
    %c2_59 = arith.constant 2 : index
    %c0_60 = arith.constant 0 : index
    %c0_61 = arith.constant 0 : index
    %67 = vector.load %arg4[%c0_58, %c2_59, %c0_60, %c0_61] : memref<1x8x8x128xf32, #tpu.memory_space<vmem>>, vector<1x1x8x128xf32>
    %68 = vector.shape_cast %67 : vector<1x1x8x128xf32> to vector<8x128xf32>
    %69 = vector.shape_cast %66 : vector<8x128xf32> to vector<1x1x8x128xf32>
    tpu.vector_store %arg4[%c0_58, %c2_59, %c0_60, %c0_61], %69 {strides = array<i32>} : memref<1x8x8x128xf32, #tpu.memory_space<vmem>>, vector<1x1x8x128xf32>,
    %70 = vector.extract_strided_slice %57 {offsets = [30, 0], sizes = [8, 128], strides = [1, 1]} : vector<80x128xf32> to vector<8x128xf32>
    %c0_62 = arith.constant 0 : index
    %c3_63 = arith.constant 3 : index
    %c0_64 = arith.constant 0 : index
    %c0_65 = arith.constant 0 : index
    %71 = vector.load %arg4[%c0_62, %c3_63, %c0_64, %c0_65] : memref<1x8x8x128xf32, #tpu.memory_space<vmem>>, vector<1x1x8x128xf32>
    %72 = vector.shape_cast %71 : vector<1x1x8x128xf32> to vector<8x128xf32>
    %73 = vector.shape_cast %70 : vector<8x128xf32> to vector<1x1x8x128xf32>
    tpu.vector_store %arg4[%c0_62, %c3_63, %c0_64, %c0_65], %73 {strides = array<i32>} : memref<1x8x8x128xf32, #tpu.memory_space<vmem>>, vector<1x1x8x128xf32>,
    %74 = vector.extract_strided_slice %57 {offsets = [40, 0], sizes = [8, 128], strides = [1, 1]} : vector<80x128xf32> to vector<8x128xf32>
    %c0_66 = arith.constant 0 : index
    %c4_67 = arith.constant 4 : index
    %c0_68 = arith.constant 0 : index
    %c0_69 = arith.constant 0 : index
    %75 = vector.load %arg4[%c0_66, %c4_67, %c0_68, %c0_69] : memref<1x8x8x128xf32, #tpu.memory_space<vmem>>, vector<1x1x8x128xf32>
    %76 = vector.shape_cast %75 : vector<1x1x8x128xf32> to vector<8x128xf32>
    %77 = vector.shape_cast %74 : vector<8x128xf32> to vector<1x1x8x128xf32>
    tpu.vector_store %arg4[%c0_66, %c4_67, %c0_68, %c0_69], %77 {strides = array<i32>} : memref<1x8x8x128xf32, #tpu.memory_space<vmem>>, vector<1x1x8x128xf32>,
    %78 = vector.extract_strided_slice %57 {offsets = [50, 0], sizes = [8, 128], strides = [1, 1]} : vector<80x128xf32> to vector<8x128xf32>
    %c0_70 = arith.constant 0 : index
    %c5_71 = arith.constant 5 : index
    %c0_72 = arith.constant 0 : index
    %c0_73 = arith.constant 0 : index
    %79 = vector.load %arg4[%c0_70, %c5_71, %c0_72, %c0_73] : memref<1x8x8x128xf32, #tpu.memory_space<vmem>>, vector<1x1x8x128xf32>
    %80 = vector.shape_cast %79 : vector<1x1x8x128xf32> to vector<8x128xf32>
    %81 = vector.shape_cast %78 : vector<8x128xf32> to vector<1x1x8x128xf32>
    tpu.vector_store %arg4[%c0_70, %c5_71, %c0_72, %c0_73], %81 {strides = array<i32>} : memref<1x8x8x128xf32, #tpu.memory_space<vmem>>, vector<1x1x8x128xf32>,
    %82 = vector.extract_strided_slice %57 {offsets = [60, 0], sizes = [8, 128], strides = [1, 1]} : vector<80x128xf32> to vector<8x128xf32>
    %c0_74 = arith.constant 0 : index
    %c6_75 = arith.constant 6 : index
    %c0_76 = arith.constant 0 : index
    %c0_77 = arith.constant 0 : index
    %83 = vector.load %arg4[%c0_74, %c6_75, %c0_76, %c0_77] : memref<1x8x8x128xf32, #tpu.memory_space<vmem>>, vector<1x1x8x128xf32>
    %84 = vector.shape_cast %83 : vector<1x1x8x128xf32> to vector<8x128xf32>
    %85 = vector.shape_cast %82 : vector<8x128xf32> to vector<1x1x8x128xf32>
    tpu.vector_store %arg4[%c0_74, %c6_75, %c0_76, %c0_77], %85 {strides = array<i32>} : memref<1x8x8x128xf32, #tpu.memory_space<vmem>>, vector<1x1x8x128xf32>,
    %86 = vector.extract_strided_slice %57 {offsets = [70, 0], sizes = [8, 128], strides = [1, 1]} : vector<80x128xf32> to vector<8x128xf32>
    %c0_78 = arith.constant 0 : index
    %c7_79 = arith.constant 7 : index
    %c0_80 = arith.constant 0 : index
    %c0_81 = arith.constant 0 : index
    %87 = vector.load %arg4[%c0_78, %c7_79, %c0_80, %c0_81] : memref<1x8x8x128xf32, #tpu.memory_space<vmem>>, vector<1x1x8x128xf32>
    %88 = vector.shape_cast %87 : vector<1x1x8x128xf32> to vector<8x128xf32>
    %89 = vector.shape_cast %86 : vector<8x128xf32> to vector<1x1x8x128xf32>
    tpu.vector_store %arg4[%c0_78, %c7_79, %c0_80, %c0_81], %89 {strides = array<i32>} : memref<1x8x8x128xf32, #tpu.memory_space<vmem>>, vector<1x1x8x128xf32>,
    return
  }
  func.func @transform_0(%arg0: i32) -> (i32, i32, i32) {
    %c0_i32 = arith.constant 0 : i32
    %c0_i32_0 = arith.constant 0 : i32
    %c0_i32_1 = arith.constant 0 : i32
    return %arg0, %c0_i32, %c0_i32_0 : i32, i32, i32
  }
  func.func @transform_1(%arg0: i32) -> (i32, i32, i32) {
    %c0_i32 = arith.constant 0 : i32
    %c0_i32_0 = arith.constant 0 : i32
    %c0_i32_1 = arith.constant 0 : i32
    %c0_i32_2 = arith.constant 0 : i32
    return %c0_i32, %c0_i32_0, %c0_i32_1 : i32, i32, i32
  }
  func.func @transform_2(%arg0: i32) -> (i32, i32) {
    %c0_i32 = arith.constant 0 : i32
    %c0_i32_0 = arith.constant 0 : i32
    %c0_i32_1 = arith.constant 0 : i32
    return %c0_i32, %c0_i32_0 : i32, i32
  }
  func.func @transform_3(%arg0: i32) -> (i32, i32, i32, i32) {
    %c0_i32 = arith.constant 0 : i32
    %c0_i32_0 = arith.constant 0 : i32
    %c0_i32_1 = arith.constant 0 : i32
    %c0_i32_2 = arith.constant 0 : i32
    return %arg0, %c0_i32, %c0_i32_0, %c0_i32_1 : i32, i32, i32, i32
  }
}

module attributes {stable_mosaic.version = 11 : i64} {
  func.func @_conv3x3_kernel(%arg0: i32, %arg1: memref<1x342x128xf32, #tpu.memory_space<vmem>>, %arg2: memref<9x128x128xf32, #tpu.memory_space<vmem>>, %arg3: memref<1x128xf32, #tpu.memory_space<vmem>>, %arg4: memref<1x16x16x128xf32, #tpu.memory_space<vmem>>) attributes {dimension_semantics = [#tpu.dimension_semantics<parallel>], iteration_bounds = array<i64: 2>, scalar_prefetch = 0 : i64, scratch_operands = 0 : i64, tpu.core_type = #tpu.core_type<tc>, window_params = [{transform_indices = @transform_0, window_bounds = array<i64: 1, 342, 128>}, {pipeline_mode = #tpu.pipeline_mode<synchronous>, transform_indices = @transform_1, window_bounds = array<i64: 9, 128, 128>}, {pipeline_mode = #tpu.pipeline_mode<synchronous>, transform_indices = @transform_2, window_bounds = array<i64: 1, 128>}, {transform_indices = @transform_3, window_bounds = array<i64: 1, 16, 16, 128>}]} {
    %cst = arith.constant 0.000000e+00 : f32
    %0 = vector.broadcast %cst : f32 to vector<288x128xf32>
    %c0 = arith.constant 0 : index
    %c0_0 = arith.constant 0 : index
    %c0_1 = arith.constant 0 : index
    %1 = vector.load %arg1[%c0, %c0_0, %c0_1] : memref<1x342x128xf32, #tpu.memory_space<vmem>>, vector<1x288x128xf32>
    %2 = vector.shape_cast %1 : vector<1x288x128xf32> to vector<288x128xf32>
    %c0_2 = arith.constant 0 : index
    %c0_3 = arith.constant 0 : index
    %c0_4 = arith.constant 0 : index
    %3 = vector.load %arg2[%c0_2, %c0_3, %c0_4] : memref<9x128x128xf32, #tpu.memory_space<vmem>>, vector<1x128x128xf32>
    %4 = vector.shape_cast %3 : vector<1x128x128xf32> to vector<128x128xf32>
    %cst_5 = arith.constant dense<0.000000e+00> : vector<288x128xf32>
    %5 = tpu.matmul %2, %4, %cst_5 {dimension_numbers = #tpu.dot_dimension_numbers<[1], [0], [0], [1], [0, 0, 1, 1], [], []>} : vector<288x128xf32>, vector<128x128xf32>, vector<288x128xf32> -> vector<288x128xf32>
    %6 = arith.addf %0, %5 : vector<288x128xf32>
    %c0_6 = arith.constant 0 : index
    %c1 = arith.constant 1 : index
    %c0_7 = arith.constant 0 : index
    %7 = vector.load %arg1[%c0_6, %c1, %c0_7] : memref<1x342x128xf32, #tpu.memory_space<vmem>>, vector<1x288x128xf32>
    %8 = vector.shape_cast %7 : vector<1x288x128xf32> to vector<288x128xf32>
    %c1_8 = arith.constant 1 : index
    %c0_9 = arith.constant 0 : index
    %c0_10 = arith.constant 0 : index
    %9 = vector.load %arg2[%c1_8, %c0_9, %c0_10] : memref<9x128x128xf32, #tpu.memory_space<vmem>>, vector<1x128x128xf32>
    %10 = vector.shape_cast %9 : vector<1x128x128xf32> to vector<128x128xf32>
    %cst_11 = arith.constant dense<0.000000e+00> : vector<288x128xf32>
    %11 = tpu.matmul %8, %10, %cst_11 {dimension_numbers = #tpu.dot_dimension_numbers<[1], [0], [0], [1], [0, 0, 1, 1], [], []>} : vector<288x128xf32>, vector<128x128xf32>, vector<288x128xf32> -> vector<288x128xf32>
    %12 = arith.addf %6, %11 : vector<288x128xf32>
    %c0_12 = arith.constant 0 : index
    %c2 = arith.constant 2 : index
    %c0_13 = arith.constant 0 : index
    %13 = vector.load %arg1[%c0_12, %c2, %c0_13] : memref<1x342x128xf32, #tpu.memory_space<vmem>>, vector<1x288x128xf32>
    %14 = vector.shape_cast %13 : vector<1x288x128xf32> to vector<288x128xf32>
    %c2_14 = arith.constant 2 : index
    %c0_15 = arith.constant 0 : index
    %c0_16 = arith.constant 0 : index
    %15 = vector.load %arg2[%c2_14, %c0_15, %c0_16] : memref<9x128x128xf32, #tpu.memory_space<vmem>>, vector<1x128x128xf32>
    %16 = vector.shape_cast %15 : vector<1x128x128xf32> to vector<128x128xf32>
    %cst_17 = arith.constant dense<0.000000e+00> : vector<288x128xf32>
    %17 = tpu.matmul %14, %16, %cst_17 {dimension_numbers = #tpu.dot_dimension_numbers<[1], [0], [0], [1], [0, 0, 1, 1], [], []>} : vector<288x128xf32>, vector<128x128xf32>, vector<288x128xf32> -> vector<288x128xf32>
    %18 = arith.addf %12, %17 : vector<288x128xf32>
    %c0_18 = arith.constant 0 : index
    %c18 = arith.constant 18 : index
    %c0_19 = arith.constant 0 : index
    %19 = vector.load %arg1[%c0_18, %c18, %c0_19] : memref<1x342x128xf32, #tpu.memory_space<vmem>>, vector<1x288x128xf32>
    %20 = vector.shape_cast %19 : vector<1x288x128xf32> to vector<288x128xf32>
    %c3 = arith.constant 3 : index
    %c0_20 = arith.constant 0 : index
    %c0_21 = arith.constant 0 : index
    %21 = vector.load %arg2[%c3, %c0_20, %c0_21] : memref<9x128x128xf32, #tpu.memory_space<vmem>>, vector<1x128x128xf32>
    %22 = vector.shape_cast %21 : vector<1x128x128xf32> to vector<128x128xf32>
    %cst_22 = arith.constant dense<0.000000e+00> : vector<288x128xf32>
    %23 = tpu.matmul %20, %22, %cst_22 {dimension_numbers = #tpu.dot_dimension_numbers<[1], [0], [0], [1], [0, 0, 1, 1], [], []>} : vector<288x128xf32>, vector<128x128xf32>, vector<288x128xf32> -> vector<288x128xf32>
    %24 = arith.addf %18, %23 : vector<288x128xf32>
    %c0_23 = arith.constant 0 : index
    %c19 = arith.constant 19 : index
    %c0_24 = arith.constant 0 : index
    %25 = vector.load %arg1[%c0_23, %c19, %c0_24] : memref<1x342x128xf32, #tpu.memory_space<vmem>>, vector<1x288x128xf32>
    %26 = vector.shape_cast %25 : vector<1x288x128xf32> to vector<288x128xf32>
    %c4 = arith.constant 4 : index
    %c0_25 = arith.constant 0 : index
    %c0_26 = arith.constant 0 : index
    %27 = vector.load %arg2[%c4, %c0_25, %c0_26] : memref<9x128x128xf32, #tpu.memory_space<vmem>>, vector<1x128x128xf32>
    %28 = vector.shape_cast %27 : vector<1x128x128xf32> to vector<128x128xf32>
    %cst_27 = arith.constant dense<0.000000e+00> : vector<288x128xf32>
    %29 = tpu.matmul %26, %28, %cst_27 {dimension_numbers = #tpu.dot_dimension_numbers<[1], [0], [0], [1], [0, 0, 1, 1], [], []>} : vector<288x128xf32>, vector<128x128xf32>, vector<288x128xf32> -> vector<288x128xf32>
    %30 = arith.addf %24, %29 : vector<288x128xf32>
    %c0_28 = arith.constant 0 : index
    %c20 = arith.constant 20 : index
    %c0_29 = arith.constant 0 : index
    %31 = vector.load %arg1[%c0_28, %c20, %c0_29] : memref<1x342x128xf32, #tpu.memory_space<vmem>>, vector<1x288x128xf32>
    %32 = vector.shape_cast %31 : vector<1x288x128xf32> to vector<288x128xf32>
    %c5 = arith.constant 5 : index
    %c0_30 = arith.constant 0 : index
    %c0_31 = arith.constant 0 : index
    %33 = vector.load %arg2[%c5, %c0_30, %c0_31] : memref<9x128x128xf32, #tpu.memory_space<vmem>>, vector<1x128x128xf32>
    %34 = vector.shape_cast %33 : vector<1x128x128xf32> to vector<128x128xf32>
    %cst_32 = arith.constant dense<0.000000e+00> : vector<288x128xf32>
    %35 = tpu.matmul %32, %34, %cst_32 {dimension_numbers = #tpu.dot_dimension_numbers<[1], [0], [0], [1], [0, 0, 1, 1], [], []>} : vector<288x128xf32>, vector<128x128xf32>, vector<288x128xf32> -> vector<288x128xf32>
    %36 = arith.addf %30, %35 : vector<288x128xf32>
    %c0_33 = arith.constant 0 : index
    %c36 = arith.constant 36 : index
    %c0_34 = arith.constant 0 : index
    %37 = vector.load %arg1[%c0_33, %c36, %c0_34] : memref<1x342x128xf32, #tpu.memory_space<vmem>>, vector<1x288x128xf32>
    %38 = vector.shape_cast %37 : vector<1x288x128xf32> to vector<288x128xf32>
    %c6 = arith.constant 6 : index
    %c0_35 = arith.constant 0 : index
    %c0_36 = arith.constant 0 : index
    %39 = vector.load %arg2[%c6, %c0_35, %c0_36] : memref<9x128x128xf32, #tpu.memory_space<vmem>>, vector<1x128x128xf32>
    %40 = vector.shape_cast %39 : vector<1x128x128xf32> to vector<128x128xf32>
    %cst_37 = arith.constant dense<0.000000e+00> : vector<288x128xf32>
    %41 = tpu.matmul %38, %40, %cst_37 {dimension_numbers = #tpu.dot_dimension_numbers<[1], [0], [0], [1], [0, 0, 1, 1], [], []>} : vector<288x128xf32>, vector<128x128xf32>, vector<288x128xf32> -> vector<288x128xf32>
    %42 = arith.addf %36, %41 : vector<288x128xf32>
    %c0_38 = arith.constant 0 : index
    %c37 = arith.constant 37 : index
    %c0_39 = arith.constant 0 : index
    %43 = vector.load %arg1[%c0_38, %c37, %c0_39] : memref<1x342x128xf32, #tpu.memory_space<vmem>>, vector<1x288x128xf32>
    %44 = vector.shape_cast %43 : vector<1x288x128xf32> to vector<288x128xf32>
    %c7 = arith.constant 7 : index
    %c0_40 = arith.constant 0 : index
    %c0_41 = arith.constant 0 : index
    %45 = vector.load %arg2[%c7, %c0_40, %c0_41] : memref<9x128x128xf32, #tpu.memory_space<vmem>>, vector<1x128x128xf32>
    %46 = vector.shape_cast %45 : vector<1x128x128xf32> to vector<128x128xf32>
    %cst_42 = arith.constant dense<0.000000e+00> : vector<288x128xf32>
    %47 = tpu.matmul %44, %46, %cst_42 {dimension_numbers = #tpu.dot_dimension_numbers<[1], [0], [0], [1], [0, 0, 1, 1], [], []>} : vector<288x128xf32>, vector<128x128xf32>, vector<288x128xf32> -> vector<288x128xf32>
    %48 = arith.addf %42, %47 : vector<288x128xf32>
    %c0_43 = arith.constant 0 : index
    %c38 = arith.constant 38 : index
    %c0_44 = arith.constant 0 : index
    %49 = vector.load %arg1[%c0_43, %c38, %c0_44] : memref<1x342x128xf32, #tpu.memory_space<vmem>>, vector<1x288x128xf32>
    %50 = vector.shape_cast %49 : vector<1x288x128xf32> to vector<288x128xf32>
    %c8 = arith.constant 8 : index
    %c0_45 = arith.constant 0 : index
    %c0_46 = arith.constant 0 : index
    %51 = vector.load %arg2[%c8, %c0_45, %c0_46] : memref<9x128x128xf32, #tpu.memory_space<vmem>>, vector<1x128x128xf32>
    %52 = vector.shape_cast %51 : vector<1x128x128xf32> to vector<128x128xf32>
    %cst_47 = arith.constant dense<0.000000e+00> : vector<288x128xf32>
    %53 = tpu.matmul %50, %52, %cst_47 {dimension_numbers = #tpu.dot_dimension_numbers<[1], [0], [0], [1], [0, 0, 1, 1], [], []>} : vector<288x128xf32>, vector<128x128xf32>, vector<288x128xf32> -> vector<288x128xf32>
    %54 = arith.addf %48, %53 : vector<288x128xf32>
    %c0_48 = arith.constant 0 : index
    %c0_49 = arith.constant 0 : index
    %55 = vector.load %arg3[%c0_48, %c0_49] : memref<1x128xf32, #tpu.memory_space<vmem>>, vector<1x128xf32>
    %56 = vector.broadcast %55 : vector<1x128xf32> to vector<288x128xf32>
    %57 = arith.addf %54, %56 : vector<288x128xf32>
    %58 = vector.extract_strided_slice %57 {offsets = [0, 0], sizes = [16, 128], strides = [1, 1]} : vector<288x128xf32> to vector<16x128xf32>
    %c0_50 = arith.constant 0 : index
    %c0_51 = arith.constant 0 : index
    %c0_52 = arith.constant 0 : index
    %c0_53 = arith.constant 0 : index
    %59 = vector.load %arg4[%c0_50, %c0_51, %c0_52, %c0_53] : memref<1x16x16x128xf32, #tpu.memory_space<vmem>>, vector<1x1x16x128xf32>
    %60 = vector.shape_cast %59 : vector<1x1x16x128xf32> to vector<16x128xf32>
    %61 = vector.shape_cast %58 : vector<16x128xf32> to vector<1x1x16x128xf32>
    tpu.vector_store %arg4[%c0_50, %c0_51, %c0_52, %c0_53], %61 {strides = array<i32>} : memref<1x16x16x128xf32, #tpu.memory_space<vmem>>, vector<1x1x16x128xf32>,
    %62 = vector.extract_strided_slice %57 {offsets = [18, 0], sizes = [16, 128], strides = [1, 1]} : vector<288x128xf32> to vector<16x128xf32>
    %c0_54 = arith.constant 0 : index
    %c1_55 = arith.constant 1 : index
    %c0_56 = arith.constant 0 : index
    %c0_57 = arith.constant 0 : index
    %63 = vector.load %arg4[%c0_54, %c1_55, %c0_56, %c0_57] : memref<1x16x16x128xf32, #tpu.memory_space<vmem>>, vector<1x1x16x128xf32>
    %64 = vector.shape_cast %63 : vector<1x1x16x128xf32> to vector<16x128xf32>
    %65 = vector.shape_cast %62 : vector<16x128xf32> to vector<1x1x16x128xf32>
    tpu.vector_store %arg4[%c0_54, %c1_55, %c0_56, %c0_57], %65 {strides = array<i32>} : memref<1x16x16x128xf32, #tpu.memory_space<vmem>>, vector<1x1x16x128xf32>,
    %66 = vector.extract_strided_slice %57 {offsets = [36, 0], sizes = [16, 128], strides = [1, 1]} : vector<288x128xf32> to vector<16x128xf32>
    %c0_58 = arith.constant 0 : index
    %c2_59 = arith.constant 2 : index
    %c0_60 = arith.constant 0 : index
    %c0_61 = arith.constant 0 : index
    %67 = vector.load %arg4[%c0_58, %c2_59, %c0_60, %c0_61] : memref<1x16x16x128xf32, #tpu.memory_space<vmem>>, vector<1x1x16x128xf32>
    %68 = vector.shape_cast %67 : vector<1x1x16x128xf32> to vector<16x128xf32>
    %69 = vector.shape_cast %66 : vector<16x128xf32> to vector<1x1x16x128xf32>
    tpu.vector_store %arg4[%c0_58, %c2_59, %c0_60, %c0_61], %69 {strides = array<i32>} : memref<1x16x16x128xf32, #tpu.memory_space<vmem>>, vector<1x1x16x128xf32>,
    %70 = vector.extract_strided_slice %57 {offsets = [54, 0], sizes = [16, 128], strides = [1, 1]} : vector<288x128xf32> to vector<16x128xf32>
    %c0_62 = arith.constant 0 : index
    %c3_63 = arith.constant 3 : index
    %c0_64 = arith.constant 0 : index
    %c0_65 = arith.constant 0 : index
    %71 = vector.load %arg4[%c0_62, %c3_63, %c0_64, %c0_65] : memref<1x16x16x128xf32, #tpu.memory_space<vmem>>, vector<1x1x16x128xf32>
    %72 = vector.shape_cast %71 : vector<1x1x16x128xf32> to vector<16x128xf32>
    %73 = vector.shape_cast %70 : vector<16x128xf32> to vector<1x1x16x128xf32>
    tpu.vector_store %arg4[%c0_62, %c3_63, %c0_64, %c0_65], %73 {strides = array<i32>} : memref<1x16x16x128xf32, #tpu.memory_space<vmem>>, vector<1x1x16x128xf32>,
    %74 = vector.extract_strided_slice %57 {offsets = [72, 0], sizes = [16, 128], strides = [1, 1]} : vector<288x128xf32> to vector<16x128xf32>
    %c0_66 = arith.constant 0 : index
    %c4_67 = arith.constant 4 : index
    %c0_68 = arith.constant 0 : index
    %c0_69 = arith.constant 0 : index
    %75 = vector.load %arg4[%c0_66, %c4_67, %c0_68, %c0_69] : memref<1x16x16x128xf32, #tpu.memory_space<vmem>>, vector<1x1x16x128xf32>
    %76 = vector.shape_cast %75 : vector<1x1x16x128xf32> to vector<16x128xf32>
    %77 = vector.shape_cast %74 : vector<16x128xf32> to vector<1x1x16x128xf32>
    tpu.vector_store %arg4[%c0_66, %c4_67, %c0_68, %c0_69], %77 {strides = array<i32>} : memref<1x16x16x128xf32, #tpu.memory_space<vmem>>, vector<1x1x16x128xf32>,
    %78 = vector.extract_strided_slice %57 {offsets = [90, 0], sizes = [16, 128], strides = [1, 1]} : vector<288x128xf32> to vector<16x128xf32>
    %c0_70 = arith.constant 0 : index
    %c5_71 = arith.constant 5 : index
    %c0_72 = arith.constant 0 : index
    %c0_73 = arith.constant 0 : index
    %79 = vector.load %arg4[%c0_70, %c5_71, %c0_72, %c0_73] : memref<1x16x16x128xf32, #tpu.memory_space<vmem>>, vector<1x1x16x128xf32>
    %80 = vector.shape_cast %79 : vector<1x1x16x128xf32> to vector<16x128xf32>
    %81 = vector.shape_cast %78 : vector<16x128xf32> to vector<1x1x16x128xf32>
    tpu.vector_store %arg4[%c0_70, %c5_71, %c0_72, %c0_73], %81 {strides = array<i32>} : memref<1x16x16x128xf32, #tpu.memory_space<vmem>>, vector<1x1x16x128xf32>,
    %82 = vector.extract_strided_slice %57 {offsets = [108, 0], sizes = [16, 128], strides = [1, 1]} : vector<288x128xf32> to vector<16x128xf32>
    %c0_74 = arith.constant 0 : index
    %c6_75 = arith.constant 6 : index
    %c0_76 = arith.constant 0 : index
    %c0_77 = arith.constant 0 : index
    %83 = vector.load %arg4[%c0_74, %c6_75, %c0_76, %c0_77] : memref<1x16x16x128xf32, #tpu.memory_space<vmem>>, vector<1x1x16x128xf32>
    %84 = vector.shape_cast %83 : vector<1x1x16x128xf32> to vector<16x128xf32>
    %85 = vector.shape_cast %82 : vector<16x128xf32> to vector<1x1x16x128xf32>
    tpu.vector_store %arg4[%c0_74, %c6_75, %c0_76, %c0_77], %85 {strides = array<i32>} : memref<1x16x16x128xf32, #tpu.memory_space<vmem>>, vector<1x1x16x128xf32>,
    %86 = vector.extract_strided_slice %57 {offsets = [126, 0], sizes = [16, 128], strides = [1, 1]} : vector<288x128xf32> to vector<16x128xf32>
    %c0_78 = arith.constant 0 : index
    %c7_79 = arith.constant 7 : index
    %c0_80 = arith.constant 0 : index
    %c0_81 = arith.constant 0 : index
    %87 = vector.load %arg4[%c0_78, %c7_79, %c0_80, %c0_81] : memref<1x16x16x128xf32, #tpu.memory_space<vmem>>, vector<1x1x16x128xf32>
    %88 = vector.shape_cast %87 : vector<1x1x16x128xf32> to vector<16x128xf32>
    %89 = vector.shape_cast %86 : vector<16x128xf32> to vector<1x1x16x128xf32>
    tpu.vector_store %arg4[%c0_78, %c7_79, %c0_80, %c0_81], %89 {strides = array<i32>} : memref<1x16x16x128xf32, #tpu.memory_space<vmem>>, vector<1x1x16x128xf32>,
    %90 = vector.extract_strided_slice %57 {offsets = [144, 0], sizes = [16, 128], strides = [1, 1]} : vector<288x128xf32> to vector<16x128xf32>
    %c0_82 = arith.constant 0 : index
    %c8_83 = arith.constant 8 : index
    %c0_84 = arith.constant 0 : index
    %c0_85 = arith.constant 0 : index
    %91 = vector.load %arg4[%c0_82, %c8_83, %c0_84, %c0_85] : memref<1x16x16x128xf32, #tpu.memory_space<vmem>>, vector<1x1x16x128xf32>
    %92 = vector.shape_cast %91 : vector<1x1x16x128xf32> to vector<16x128xf32>
    %93 = vector.shape_cast %90 : vector<16x128xf32> to vector<1x1x16x128xf32>
    tpu.vector_store %arg4[%c0_82, %c8_83, %c0_84, %c0_85], %93 {strides = array<i32>} : memref<1x16x16x128xf32, #tpu.memory_space<vmem>>, vector<1x1x16x128xf32>,
    %94 = vector.extract_strided_slice %57 {offsets = [162, 0], sizes = [16, 128], strides = [1, 1]} : vector<288x128xf32> to vector<16x128xf32>
    %c0_86 = arith.constant 0 : index
    %c9 = arith.constant 9 : index
    %c0_87 = arith.constant 0 : index
    %c0_88 = arith.constant 0 : index
    %95 = vector.load %arg4[%c0_86, %c9, %c0_87, %c0_88] : memref<1x16x16x128xf32, #tpu.memory_space<vmem>>, vector<1x1x16x128xf32>
    %96 = vector.shape_cast %95 : vector<1x1x16x128xf32> to vector<16x128xf32>
    %97 = vector.shape_cast %94 : vector<16x128xf32> to vector<1x1x16x128xf32>
    tpu.vector_store %arg4[%c0_86, %c9, %c0_87, %c0_88], %97 {strides = array<i32>} : memref<1x16x16x128xf32, #tpu.memory_space<vmem>>, vector<1x1x16x128xf32>,
    %98 = vector.extract_strided_slice %57 {offsets = [180, 0], sizes = [16, 128], strides = [1, 1]} : vector<288x128xf32> to vector<16x128xf32>
    %c0_89 = arith.constant 0 : index
    %c10 = arith.constant 10 : index
    %c0_90 = arith.constant 0 : index
    %c0_91 = arith.constant 0 : index
    %99 = vector.load %arg4[%c0_89, %c10, %c0_90, %c0_91] : memref<1x16x16x128xf32, #tpu.memory_space<vmem>>, vector<1x1x16x128xf32>
    %100 = vector.shape_cast %99 : vector<1x1x16x128xf32> to vector<16x128xf32>
    %101 = vector.shape_cast %98 : vector<16x128xf32> to vector<1x1x16x128xf32>
    tpu.vector_store %arg4[%c0_89, %c10, %c0_90, %c0_91], %101 {strides = array<i32>} : memref<1x16x16x128xf32, #tpu.memory_space<vmem>>, vector<1x1x16x128xf32>,
    %102 = vector.extract_strided_slice %57 {offsets = [198, 0], sizes = [16, 128], strides = [1, 1]} : vector<288x128xf32> to vector<16x128xf32>
    %c0_92 = arith.constant 0 : index
    %c11 = arith.constant 11 : index
    %c0_93 = arith.constant 0 : index
    %c0_94 = arith.constant 0 : index
    %103 = vector.load %arg4[%c0_92, %c11, %c0_93, %c0_94] : memref<1x16x16x128xf32, #tpu.memory_space<vmem>>, vector<1x1x16x128xf32>
    %104 = vector.shape_cast %103 : vector<1x1x16x128xf32> to vector<16x128xf32>
    %105 = vector.shape_cast %102 : vector<16x128xf32> to vector<1x1x16x128xf32>
    tpu.vector_store %arg4[%c0_92, %c11, %c0_93, %c0_94], %105 {strides = array<i32>} : memref<1x16x16x128xf32, #tpu.memory_space<vmem>>, vector<1x1x16x128xf32>,
    %106 = vector.extract_strided_slice %57 {offsets = [216, 0], sizes = [16, 128], strides = [1, 1]} : vector<288x128xf32> to vector<16x128xf32>
    %c0_95 = arith.constant 0 : index
    %c12 = arith.constant 12 : index
    %c0_96 = arith.constant 0 : index
    %c0_97 = arith.constant 0 : index
    %107 = vector.load %arg4[%c0_95, %c12, %c0_96, %c0_97] : memref<1x16x16x128xf32, #tpu.memory_space<vmem>>, vector<1x1x16x128xf32>
    %108 = vector.shape_cast %107 : vector<1x1x16x128xf32> to vector<16x128xf32>
    %109 = vector.shape_cast %106 : vector<16x128xf32> to vector<1x1x16x128xf32>
    tpu.vector_store %arg4[%c0_95, %c12, %c0_96, %c0_97], %109 {strides = array<i32>} : memref<1x16x16x128xf32, #tpu.memory_space<vmem>>, vector<1x1x16x128xf32>,
    %110 = vector.extract_strided_slice %57 {offsets = [234, 0], sizes = [16, 128], strides = [1, 1]} : vector<288x128xf32> to vector<16x128xf32>
    %c0_98 = arith.constant 0 : index
    %c13 = arith.constant 13 : index
    %c0_99 = arith.constant 0 : index
    %c0_100 = arith.constant 0 : index
    %111 = vector.load %arg4[%c0_98, %c13, %c0_99, %c0_100] : memref<1x16x16x128xf32, #tpu.memory_space<vmem>>, vector<1x1x16x128xf32>
    %112 = vector.shape_cast %111 : vector<1x1x16x128xf32> to vector<16x128xf32>
    %113 = vector.shape_cast %110 : vector<16x128xf32> to vector<1x1x16x128xf32>
    tpu.vector_store %arg4[%c0_98, %c13, %c0_99, %c0_100], %113 {strides = array<i32>} : memref<1x16x16x128xf32, #tpu.memory_space<vmem>>, vector<1x1x16x128xf32>,
    %114 = vector.extract_strided_slice %57 {offsets = [252, 0], sizes = [16, 128], strides = [1, 1]} : vector<288x128xf32> to vector<16x128xf32>
    %c0_101 = arith.constant 0 : index
    %c14 = arith.constant 14 : index
    %c0_102 = arith.constant 0 : index
    %c0_103 = arith.constant 0 : index
    %115 = vector.load %arg4[%c0_101, %c14, %c0_102, %c0_103] : memref<1x16x16x128xf32, #tpu.memory_space<vmem>>, vector<1x1x16x128xf32>
    %116 = vector.shape_cast %115 : vector<1x1x16x128xf32> to vector<16x128xf32>
    %117 = vector.shape_cast %114 : vector<16x128xf32> to vector<1x1x16x128xf32>
    tpu.vector_store %arg4[%c0_101, %c14, %c0_102, %c0_103], %117 {strides = array<i32>} : memref<1x16x16x128xf32, #tpu.memory_space<vmem>>, vector<1x1x16x128xf32>,
    %118 = vector.extract_strided_slice %57 {offsets = [270, 0], sizes = [16, 128], strides = [1, 1]} : vector<288x128xf32> to vector<16x128xf32>
    %c0_104 = arith.constant 0 : index
    %c15 = arith.constant 15 : index
    %c0_105 = arith.constant 0 : index
    %c0_106 = arith.constant 0 : index
    %119 = vector.load %arg4[%c0_104, %c15, %c0_105, %c0_106] : memref<1x16x16x128xf32, #tpu.memory_space<vmem>>, vector<1x1x16x128xf32>
    %120 = vector.shape_cast %119 : vector<1x1x16x128xf32> to vector<16x128xf32>
    %121 = vector.shape_cast %118 : vector<16x128xf32> to vector<1x1x16x128xf32>
    tpu.vector_store %arg4[%c0_104, %c15, %c0_105, %c0_106], %121 {strides = array<i32>} : memref<1x16x16x128xf32, #tpu.memory_space<vmem>>, vector<1x1x16x128xf32>,
    return
  }
  func.func @transform_0(%arg0: i32) -> (i32, i32, i32) {
    %c0_i32 = arith.constant 0 : i32
    %c0_i32_0 = arith.constant 0 : i32
    %c0_i32_1 = arith.constant 0 : i32
    return %arg0, %c0_i32, %c0_i32_0 : i32, i32, i32
  }
  func.func @transform_1(%arg0: i32) -> (i32, i32, i32) {
    %c0_i32 = arith.constant 0 : i32
    %c0_i32_0 = arith.constant 0 : i32
    %c0_i32_1 = arith.constant 0 : i32
    %c0_i32_2 = arith.constant 0 : i32
    return %c0_i32, %c0_i32_0, %c0_i32_1 : i32, i32, i32
  }
  func.func @transform_2(%arg0: i32) -> (i32, i32) {
    %c0_i32 = arith.constant 0 : i32
    %c0_i32_0 = arith.constant 0 : i32
    %c0_i32_1 = arith.constant 0 : i32
    return %c0_i32, %c0_i32_0 : i32, i32
  }
  func.func @transform_3(%arg0: i32) -> (i32, i32, i32, i32) {
    %c0_i32 = arith.constant 0 : i32
    %c0_i32_0 = arith.constant 0 : i32
    %c0_i32_1 = arith.constant 0 : i32
    %c0_i32_2 = arith.constant 0 : i32
    return %arg0, %c0_i32, %c0_i32_0, %c0_i32_1 : i32, i32, i32, i32
  }
}

</mosaic_0001>

<bundles_post_ra>
// kernel: a_call__.8
= control target key start
LH: loop header
LB: loop body
LE: loop exit
PB: predicated region body
PF: predicated region fallthrough
CT: control target
= control target key end

     0   :  { %8 = vsyncpa [#allocation3], 0  ;;  %s666_s0 = inlined_call_operand.hbm [shape: f32[32,128], index: 0, kind: input, shape index: {}]   ;;  %s667_s1 = inlined_call_operand.hbm [shape: f32[128,128], index: 1, kind: input, shape index: {}]   ;;  %s668_s2 = inlined_call_operand.vmem [shape: f32[1,128], index: 2, kind: input, shape index: {}]   ;;  %s669_s3 = inlined_call_operand.vmem [shape: f32[32,128], index: 3, kind: output, shape index: {}]  }
   0x1   :  { %10 = vsyncpa [#allocation3 + $0x1], 0 }
   0x2   :  { %11 = vsyncpa [#allocation5], 0  ;;  %s544_s12 = smov 0   ;;  %s546_s13 = smov 0  }
   0x3   :  { %s548_s14 = smov 0   ;;  %s550_s15 = smov 0  }
   0x4 LB: > { %s336_s16 = sadd.s32 4294967295, %s519_s15   ;;  %p37_p0 = scmp.ne.s32.totalorder %s511_s13, %s507_s12  ;;  %s519_s15 = sphi %s550_s15, %s677_s15   ;;  %s515_s14 = sphi %s548_s14, %s676_s14   ;;  %s511_s13 = sphi %s546_s13, %s675_s13   ;;  %s507_s12 = sphi %s544_s12, %s674_s12  }
   0x5   : > { %p566_p1 = scmp.eq.s32.totalorder %s336_s16, 0  ;;  %p338_p2 = scmp.ge.s32.totalorder %s519_s15, 1 }
   0x6   : > { %p116_p3 = scmp.lt.s32.totalorder %s519_s15, 3  ;;  %s127_s21 = sshll.u32 %s667_s1, 4  ;;  %s128_s21 = int_to_ptr.hbm [resolvable:$true] %s127_s21 }
   0x7   : > { %p574_p4 = por %p566_p1, %p37_p0  ;;  %s521_s23 = smov [#allocation4]  }
   0x8   : > { %p581_p5 = pnand %p338_p2, %p116_p3  ;;  %s129_s24 = sshll.u32 %s521_s23, 4  ;;  %s130_s24 = int_to_ptr.vmem [resolvable:$true] %s129_s24 }
   0x9   : > { %s590_s25 = sadd.s32 1, %s519_s15   ;;  %s522_s26 = smov 128  }
   0xa   : > { %p374_p6 = pneg %p581_p5  ;;  %s523_s27 = smov 8  }
   0xb   : > { %s21_s28 = ssub.s32 %s519_s15, %s590_s25  ;;  %s24_s29 = sadd.s32 1, %s515_s14 }
   0xc   : > { %p375_p7 = pnand %p374_p6, %p566_p1  ;;  %p22_p8 = scmp.eq.s32.totalorder %s21_s28, 0 }
   0xd   : > { %p31_p9 = scmp.ne.s32.totalorder %s515_s14, %s511_s13  ;;  %p32_p10 = scmp.eq.s32.totalorder %s519_s15, 0 }
   0xe   : > { %377 = dma.hbm_to_vmem [thread:$0]  (!%p375_p7), %s128_s21, 2048, %s130_s24, [#allocation5], %s522_s26, %s522_s26, %s523_s27  }
   0xf   : > { %p383_p11 = scmp.lt.s32.totalorder %s519_s15, 2  ;;  %p33_p12 = por %p32_p10, %p31_p9 }
  0x10   : > { %s603_s30 = scalar_select %p22_p8, %s515_s14, %s24_s29  }
  0x11   : > { %s146_s4 = sand.u32 1, %s515_s14   ;;  %s351_s6 = sshll.u32 %s519_s15, 4 }
  0x12   : > { %s341_s5 = sshll.u32 %s146_s4, 4  ;;  %s155_s9 = scalar_lea.hbm %s666_s0, %s351_s6 }
  0x13   : > { %s150_s10 = scalar_lea.vmem [#allocation2], %s341_s5  ;;  %s156_s12 = sshll.u32 %s155_s9, 4  ;;  %s157_s12 = int_to_ptr.hbm [resolvable:$true] %s156_s12 }
  0x14   : > { %s158_s11 = sshll.u32 %s150_s10, 4  ;;  %p610_p13 = pnand %p383_p11, %p33_p12  ;;  %s159_s11 = int_to_ptr.vmem [resolvable:$true] %s158_s11 }
  0x15   : > { %s147_s20 = scalar_lea.sflag [#allocation3], %s146_s4  ;;  %s451_s21 = sshra.s32 %s157_s12, 4  ;;  %s452_s21 = int_to_ptr.hbm [resolvable:$true] %s451_s21 }
  0x16   : > { %s453_s23 = scalar_lea.hbm %s452_s21, 16  ;;  %p455_p2 = pneg %p610_p13 }
  0x17   : > { %p454_p0 = scmp.ne.s32.totalorder %s452_s21, %s453_s23  ;;  %s458_s29 = scalar_lea.hbm %s666_s0, 32 }
  0x18   : > { %p459_p7 = scmp.lt.s32.totalorder %s452_s21, %s666_s0  ;;  %p460_p8 = scmp.lt.s32.totalorder %s458_s29, %s453_s23 }
  0x19   : > { %p456_p3 = pnand %p455_p2, %p454_p0 }
  0x1a   : > { %p461_p9 = por %p460_p8, %p459_p7 }
  0x1b   : > { %p457_p6 = pneg %p456_p3 }
  0x1d   : > { %p462_p10 = pnand %p461_p9, %p457_p6 }
  0x1f   : > { %465 = shalt.err (!%p462_p10)
}
  0x20   : > { %381 = dma.hbm_to_vmem [thread:$0]  (!%p610_p13), %s157_s12, 256, %s159_s11, %s147_s20, %s522_s26, %s522_s26, %s523_s27  }
  0x21   : > { %170 = sbr.rel (%p581_p5) target bundleno = 203 (0xcb), region = 32  ;;  %s172_s4 = sand.u32 (!%p581_p5), 1, %s511_s13  }
  0x22   : > { %s630_s7 = sshll.u32 (!%p581_p5), %s172_s4, 4  ;;  %s173_s8 = scalar_lea.sflag (!%p581_p5), [#allocation3], %s172_s4 }
  0x23   : > { %s176_s9 = scalar_lea.vmem (!%p581_p5), [#allocation2], %s630_s7 }
  0x26   : > { %498 = dma.done.wait (%p574_p4), %s173_s8, 256  }
  0x27   : > { %500 = vsyncadd (%p574_p4), %s173_s8, 4294967040 }
  0x28   : > { %502 = dma.done.wait (%p566_p1), [#allocation5], 2048  }
  0x29   : > { %504 = vsyncadd (%p566_p1), [#allocation5], 4294965248  ;;  %v229_v0 = vld [vmem:[#allocation4 + $0x78] sm:$0xff]  ;;  %v228_v1 = vld [vmem:[#allocation4 + $0x70] sm:$0xff]  ;;  %s347_s17 = sshll.u32 %s336_s16, 1 }
  0x2a   : > { %234 = vmatpush.msra.mxu0 %v229_v0  ;;  %352 = vmatpush.msra.mxu1 %v229_v0  ;;  %v227_v2 = vld [vmem:[#allocation4 + $0x68] sm:$0xff]  ;;  %v226_v3 = vld [vmem:[#allocation4 + $0x60] sm:$0xff]  ;;  %v225_v4 = vld [vmem:[#allocation4 + $0x58] sm:$0xff]  ;;  %p207_p1 = scmp.lt.s32.totalorder %s347_s17, 3 }
  0x2b   : > { %v224_v5 = vld [vmem:[#allocation4 + $0x50] sm:$0xff]  ;;  %v223_v6 = vld [vmem:[#allocation4 + $0x48] sm:$0xff]  ;;  %v222_v7 = vld [vmem:[#allocation4 + $0x40] sm:$0xff] }
  0x2c   : > { %235 = vmatpush.msra.mxu0 %v228_v1  ;;  %353 = vmatpush.msra.mxu1 %v228_v1  ;;  %v221_v8 = vld [vmem:[#allocation4 + $0x38] sm:$0xff]  ;;  %v220_v9 = vld [vmem:[#allocation4 + $0x30] sm:$0xff]  ;;  %v219_v10 = vld [vmem:[#allocation4 + $0x28] sm:$0xff]  ;;  %s679_s17 = smov (!%p207_p1, %s347_s17), 3 }
  0x2d   : > { %v218_v11 = vld [vmem:[#allocation4 + $0x20] sm:$0xff]  ;;  %v217_v12 = vld [vmem:[#allocation4 + $0x18] sm:$0xff]  ;;  %v216_v13 = vld [vmem:[#allocation4 + $0x10] sm:$0xff]  ;;  %s348_s18 = sshll.u32 %s679_s17, 3 }
  0x2e   : > { %236 = vmatpush.msra.mxu0 %v227_v2  ;;  %354 = vmatpush.msra.mxu1 %v227_v2  ;;  %v215_v14 = vld [vmem:[#allocation4 + $0x8] sm:$0xff]  ;;  %v214_v15 = vld [vmem:[#allocation4] sm:$0xff]  ;;  %s210_s11 = scalar_lea.vmem %s669_s3, %s348_s18 }
  0x2f   : > { %v212_v16 = vld [vmem:[%s176_s9] sm:$0xff]  ;;  %v213_v17 = vld [vmem:[%s176_s9 + $0x8] sm:$0xff] }
  0x30   : > { %237 = vmatpush.msra.mxu0 %v226_v3  ;;  %355 = vmatpush.msra.mxu1 %v226_v3  ;;  %v420_v18 = vld [vmem:[%s668_s2] ss:$0 sm:$0xff] }
  0x32   : > { %238 = vmatpush.msra.mxu0 %v225_v4  ;;  %356 = vmatpush.msra.mxu1 %v225_v4 }
  0x34   : > { %239 = vmatpush.msra.mxu0 %v224_v5  ;;  %357 = vmatpush.msra.mxu1 %v224_v5 }
  0x36   : > { %240 = vmatpush.msra.mxu0 %v223_v6  ;;  %358 = vmatpush.msra.mxu1 %v223_v6 }
  0x38   : > { %241 = vmatpush.msra.mxu0 %v222_v7  ;;  %359 = vmatpush.msra.mxu1 %v222_v7 }
  0x3a   : > { %242 = vmatpush.msra.mxu0 %v221_v8  ;;  %360 = vmatpush.msra.mxu1 %v221_v8 }
  0x3c   : > { %243 = vmatpush.msra.mxu0 %v220_v9  ;;  %361 = vmatpush.msra.mxu1 %v220_v9 }
  0x3e   : > { %244 = vmatpush.msra.mxu0 %v219_v10  ;;  %362 = vmatpush.msra.mxu1 %v219_v10 }
  0x40   : > { %245 = vmatpush.msra.mxu0 %v218_v11  ;;  %363 = vmatpush.msra.mxu1 %v218_v11 }
  0x42   : > { %246 = vmatpush.msra.mxu0 %v217_v12  ;;  %364 = vmatpush.msra.mxu1 %v217_v12 }
  0x44   : > { %247 = vmatpush.msra.mxu0 %v216_v13  ;;  %365 = vmatpush.msra.mxu1 %v216_v13 }
  0x46   : > { %248 = vmatpush.msra.mxu0 %v215_v14  ;;  %366 = vmatpush.msra.mxu1 %v215_v14 }
  0x48   : > { %249 = vmatpush.msra.mxu0 %v214_v15  ;;  %367 = vmatpush.msra.mxu1 %v214_v15 }
  0x49   : > { %250 = vmatmul.f32.vlgmr.msra.gmra.mxu0 %v212_v16  ;;  %253 = vmatmul.f32.vlgmr.msra.gmra.mxu1 %v213_v17 }
  0xc6   : > { %v251_v19 = vpop.f32.mrf.mxu0  ;;  %v254_v20 = vpop.f32.mrf.mxu1 }
  0xc7   : > { %v252_v21 = vadd.f32 %v420_v18, %v251_v19  ;;  %v255_v22 = vadd.f32 %v420_v18, %v254_v20 }
  0xc9   : > { %257 = vst [vmem:[%s210_s11] sm:$0xff] %v252_v21 }
  0xca   : > { %258 = vst [vmem:[%s210_s11 + $0x8] sm:$0xff] %v255_v22 }
  0xcb PF: > { %p14_p4 = scmp.ge.s32.totalorder %s590_s25, 4   ;;  %s674_s12 = smov %s511_s13 }
  0xcc   : > { %s675_s13 = smov %s515_s14  ;;  %s676_s14 = smov %s603_s30 }
  0xcd   : > { %s677_s15 = smov %s590_s25  ;;  %16 = sbr.rel (!%p14_p4) target bundleno = 4 (0x4), region = 76 }
  0xd2   :  { %281 = vsyncpa [#allocation3], 1 }
  0xd3   :  { %283 = vsyncpa [#allocation3 + $0x1], 1 }
  0xd4   :  { %284 = vsyncpa [#allocation5], 1 }

// kernel: a_call__.9
= control target key start
LH: loop header
LB: loop body
LE: loop exit
PB: predicated region body
PF: predicated region fallthrough
CT: control target
= control target key end

     0   :  { %s381_s9 = smov 0   ;;  %s401_s0 = inlined_call_operand.vmem [shape: f32[2,4,4,128], index: 0, kind: input, shape index: {}]   ;;  %s402_s1 = inlined_call_operand.vmem [shape: f32[8,4], index: 1, kind: input, shape index: {}]   ;;  %s403_s2 = inlined_call_operand.vmem [shape: f32[2,8,8,128], index: 2, kind: output, shape index: {}]  }
   0x1 LB: > { %s319_s10 = sadd.s32 4294967295, %s364_s9   ;;  %p323_p0 = scmp.ge.s32.totalorder %s364_s9, 1  ;;  %s364_s9 = sphi %s381_s9, %s12_s9  }
   0x2   : > { %p112_p1 = scmp.lt.s32.totalorder %s364_s9, 3 }
   0x4   : > { %p113_p2 = pnand %p323_p0, %p112_p1 }
   0x5   : > { %p134_p3 = scmp.lt.s32.totalorder (!%p113_p2), %s319_s10, 1 }
   0x6   : > { %116 = sbr.rel (%p113_p2) target bundleno = 152 (0x98), region = 28 }
   0xb   : > { %s405_s10 = smov (!%p134_p3, %s319_s10), 1  ;;  %vm150_vm0 = vcmask 1043456   ;;  %v144_v0 = vld [vmem:[%s402_s1] sm:$0xff]  ;;  %vm146_vm1 = vcmask 31744  }
   0xc   : > { %s348_s11 = sshll.u32 %s405_s10, 4  ;;  %s349_s17 = sshll.u32 %s405_s10, 6 }
   0xd   : > { %s138_s14 = scalar_lea.vmem %s401_s0, %s348_s11  ;;  %s143_s20 = scalar_lea.vmem %s403_s2, %s349_s17 }
   0xe   : > { %v336_v1 = vld [vmem:[%s138_s14 + $0x8] sm:$0xf]  ;;  %v341_v2 = vld [vmem:[%s138_s14 + $0xc] sm:$0xf]  ;;  %v145_v3 = vld [vmem:[%s138_s14] sm:$0xf] }
   0xf   : > { %337 = vmatpush.msk.msra.mxu2 %vm150_vm0, %v336_v1  ;;  %342 = vmatpush.msk.msra.mxu3 %vm150_vm0, %v341_v2  ;;  %v331_v4 = vld [vmem:[%s138_s14 + $0x4] sm:$0xf] }
  0x10   : > { %338 = vmatmul.msk.f32.vlgmr.msra.gmra.mxu2 %vm146_vm1, %v144_v0  ;;  %343 = vmatmul.msk.f32.vlgmr.msra.gmra.mxu3 %vm146_vm1, %v144_v0 }
  0x11   : > { %328 = vmatpush.msk.msra.mxu0 %vm150_vm0, %v145_v3  ;;  %332 = vmatpush.msk.msra.mxu1 %vm150_vm0, %v331_v4 }
  0x12   : > { %329 = vmatmul.msk.f32.vlgmr.msra.gmra.mxu0 %vm146_vm1, %v144_v0  ;;  %333 = vmatmul.msk.f32.vlgmr.msra.gmra.mxu1 %vm146_vm1, %v144_v0 }
  0x8f   : > { %v171_v5 = vpop.f32.mrf.mxu0  ;;  %v199_v6 = vpop.f32.mrf.mxu1 }
  0x90   : > { %174 = vst [vmem:[%s143_s20] sm:$0xff] %v171_v5 }
  0x91   : > { %330 = vst [vmem:[%s143_s20 + $0x8] sm:$0xff] %v171_v5 }
  0x92   : > { %334 = vst [vmem:[%s143_s20 + $0x10] sm:$0xff] %v199_v6 }
  0x93   : > { %335 = vst [vmem:[%s143_s20 + $0x18] sm:$0xff] %v199_v6  ;;  %v228_v7 = vpop.f32.mrf.mxu2  ;;  %v257_v8 = vpop.f32.mrf.mxu3 }
  0x94   : > { %339 = vst [vmem:[%s143_s20 + $0x20] sm:$0xff] %v228_v7 }
  0x95   : > { %340 = vst [vmem:[%s143_s20 + $0x28] sm:$0xff] %v228_v7 }
  0x96   : > { %344 = vst [vmem:[%s143_s20 + $0x30] sm:$0xff] %v257_v8 }
  0x97   : > { %345 = vst [vmem:[%s143_s20 + $0x38] sm:$0xff] %v257_v8 }
  0x98 PF: > { %s12_s9 = sadd.s32 1, %s364_s9  }
  0x99   : > { %p9_p4 = scmp.ge.s32.totalorder %s12_s9, 4  }
  0x9b   :  { %11 = sbr.rel (!%p9_p4) target bundleno = 1 (0x1), region = 68 }

// kernel: a_call__.11
= control target key start
LH: loop header
LB: loop body
LE: loop exit
PB: predicated region body
PF: predicated region fallthrough
CT: control target
= control target key end

     0   :  { %9 = vsyncpa [#allocation3], 0  ;;  %s847_s0 = inlined_call_operand.hbm [shape: f32[128,64], index: 0, kind: input, shape index: {}]   ;;  %s848_s1 = inlined_call_operand.hbm [shape: f32[64,128], index: 1, kind: input, shape index: {}]   ;;  %s849_s2 = inlined_call_operand.vmem [shape: f32[1,128], index: 2, kind: input, shape index: {}]   ;;  %s850_s3 = inlined_call_operand.vmem [shape: f32[128,128], index: 3, kind: input, shape index: {}]   ;;  %s851_s4 = inlined_call_operand.vmem [shape: f32[128,128], index: 4, kind: output, shape index: {}]  }
   0x1   :  { %11 = vsyncpa [#allocation3 + $0x1], 0 }
   0x2   :  { %12 = vsyncpa [#allocation5], 0  ;;  %s691_s15 = smov 0   ;;  %s693_s16 = smov 0  }
   0x3   :  { %s695_s17 = smov 0   ;;  %s697_s18 = smov 0  }
   0x4 LB: > { %s460_s19 = sadd.s32 4294967295, %s661_s18   ;;  %p38_p0 = scmp.ne.s32.totalorder %s653_s16, %s649_s15  ;;  %s661_s18 = sphi %s697_s18, %s859_s18   ;;  %s657_s17 = sphi %s695_s17, %s858_s17   ;;  %s653_s16 = sphi %s693_s16, %s857_s16   ;;  %s649_s15 = sphi %s691_s15, %s856_s15  }
   0x5   : > { %p713_p1 = scmp.eq.s32.totalorder %s460_s19, 0  ;;  %p462_p2 = scmp.ge.s32.totalorder %s661_s18, 1 }
   0x6   : > { %p143_p3 = scmp.lt.s32.totalorder %s661_s18, 3  ;;  %s154_s24 = sshll.u32 %s848_s1, 4  ;;  %s155_s24 = int_to_ptr.hbm [resolvable:$true] %s154_s24 }
   0x7   : > { %p721_p4 = por %p713_p1, %p38_p0  ;;  %s663_s26 = smov [#allocation4]  }
   0x8   : > { %p728_p5 = pnand %p462_p2, %p143_p3  ;;  %s156_s27 = sshll.u32 %s663_s26, 4  ;;  %s157_s27 = int_to_ptr.vmem [resolvable:$true] %s156_s27 }
   0x9   : > { %s737_s28 = sadd.s32 1, %s661_s18   ;;  %s664_s29 = smov 128  }
   0xa   : > { %p516_p6 = pneg %p728_p5  ;;  %s665_s30 = smov 8  }
   0xb   : > { %s22_s5 = ssub.s32 %s661_s18, %s737_s28  ;;  %s25_s6 = sadd.s32 1, %s657_s17 }
   0xc   : > { %p517_p7 = pnand %p516_p6, %p713_p1  ;;  %p23_p8 = scmp.eq.s32.totalorder %s22_s5, 0 }
   0xd   : > { %p32_p9 = scmp.ne.s32.totalorder %s657_s17, %s653_s16  ;;  %p33_p10 = scmp.eq.s32.totalorder %s661_s18, 0 }
   0xe   : > { %519 = dma.hbm_to_vmem [thread:$0]  (!%p517_p7), %s155_s24, 1024, %s157_s27, [#allocation5], %s664_s29, %s664_s29, %s665_s30  }
   0xf   : > { %p525_p11 = scmp.lt.s32.totalorder %s661_s18, 2  ;;  %p34_p12 = por %p33_p10, %p32_p9 }
  0x10   : > { %s750_s7 = scalar_select %p23_p8, %s657_s17, %s25_s6  }
  0x11   : > { %s173_s8 = sand.u32 1, %s657_s17   ;;  %s485_s10 = sshll.u32 %s661_s18, 6 }
  0x12   : > { %s465_s9 = sshll.u32 %s173_s8, 6  ;;  %s182_s13 = scalar_lea.hbm %s847_s0, %s485_s10 }
  0x13   : > { %s177_s14 = scalar_lea.vmem [#allocation2], %s465_s9  ;;  %s183_s22 = sshll.u32 %s182_s13, 4  ;;  %s184_s22 = int_to_ptr.hbm [resolvable:$true] %s183_s22 }
  0x14   : > { %s185_s15 = sshll.u32 %s177_s14, 4  ;;  %p757_p13 = pnand %p525_p11, %p34_p12  ;;  %s186_s15 = int_to_ptr.vmem [resolvable:$true] %s185_s15 }
  0x15   : > { %s174_s24 = scalar_lea.sflag [#allocation3], %s173_s8  ;;  %s593_s26 = sshra.s32 %s184_s22, 4  ;;  %s594_s26 = int_to_ptr.hbm [resolvable:$true] %s593_s26 }
  0x16   : > { %s595_s27 = scalar_lea.hbm %s594_s26, 64  ;;  %p597_p2 = pneg %p757_p13 }
  0x17   : > { %p596_p0 = scmp.ne.s32.totalorder %s594_s26, %s595_s27  ;;  %s600_s9 = scalar_lea.hbm %s847_s0, 128 }
  0x18   : > { %p601_p7 = scmp.lt.s32.totalorder %s594_s26, %s847_s0  ;;  %p602_p8 = scmp.lt.s32.totalorder %s600_s9, %s595_s27 }
  0x19   : > { %p598_p3 = pnand %p597_p2, %p596_p0 }
  0x1a   : > { %p603_p9 = por %p602_p8, %p601_p7 }
  0x1b   : > { %p599_p6 = pneg %p598_p3 }
  0x1d   : > { %p604_p10 = pnand %p603_p9, %p599_p6 }
  0x1f   : > { %607 = shalt.err (!%p604_p10)
}
  0x20   : > { %523 = dma.hbm_to_vmem [thread:$0]  (!%p757_p13), %s184_s22, 1024, %s186_s15, %s174_s24, %s664_s29, %s664_s29, %s665_s30  }
  0x21   : > { %206 = sbr.rel (%p728_p5) target bundleno = 203 (0xcb), region = 36  ;;  %s208_s8 = sand.u32 (!%p728_p5), 1, %s653_s16  }
  0x22   : > { %s469_s12 = sshll.u32 (!%p728_p5), %s208_s8, 6  ;;  %s209_s13 = scalar_lea.sflag (!%p728_p5), [#allocation3], %s208_s8 }
  0x23   : > { %s777_s14 = scalar_lea.vmem (!%p728_p5), [#allocation2], %s469_s12 }
  0x26   : > { %640 = dma.done.wait (%p721_p4), %s209_s13, 1024  }
  0x27   : > { %642 = vsyncadd (%p721_p4), %s209_s13, 4294966272 }
  0x28   : > { %644 = dma.done.wait (%p713_p1), [#allocation5], 1024  }
  0x29   : > { %646 = vsyncadd (%p713_p1), [#allocation5], 4294966272  ;;  %v276_v0 = vld [vmem:[#allocation4 + $0x38] sm:$0xff]  ;;  %v275_v1 = vld [vmem:[#allocation4 + $0x30] sm:$0xff]  ;;  %vm281_vm0 = vcmask 523264   ;;  %s471_s20 = sshll.u32 %s460_s19, 3 }
  0x2a   : > { %487 = vmatpush.msra.mxu2 %v276_v0  ;;  %488 = vmatpush.msra.mxu3 %v276_v0  ;;  %v274_v2 = vld [vmem:[#allocation4 + $0x28] sm:$0xff]  ;;  %v273_v3 = vld [vmem:[#allocation4 + $0x20] sm:$0xff]  ;;  %v272_v4 = vld [vmem:[#allocation4 + $0x18] sm:$0xff]  ;;  %p250_p1 = scmp.lt.s32.totalorder %s471_s20, 15 }
  0x2b   : > { %314 = vmatpush.msra.mxu0 %v276_v0  ;;  %486 = vmatpush.msra.mxu1 %v276_v0  ;;  %v271_v5 = vld [vmem:[#allocation4 + $0x10] sm:$0xff]  ;;  %v270_v6 = vld [vmem:[#allocation4 + $0x8] sm:$0xff]  ;;  %v269_v7 = vld [vmem:[#allocation4] sm:$0xff] }
  0x2c   : > { %490 = vmatpush.msra.mxu2 %v275_v1  ;;  %491 = vmatpush.msra.mxu3 %v275_v1  ;;  %v265_v8 = vld [vmem:[%s777_s14 + $0x20] sm:$0xff]  ;;  %v267_v9 = vld [vmem:[%s777_s14 + $0x30] sm:$0xff]  ;;  %v266_v12 = vld [vmem:[%s777_s14 + $0x28] sm:$0xff]  ;;  %s861_s20 = smov (!%p250_p1, %s471_s20), 15 }
  0x2d   : > { %315 = vmatpush.msra.mxu0 %v275_v1  ;;  %489 = vmatpush.msra.mxu1 %v275_v1  ;;  %v261_v10 = vld [vmem:[%s777_s14] sm:$0xff]  ;;  %v263_v11 = vld [vmem:[%s777_s14 + $0x10] sm:$0xff]  ;;  %v268_v13 = vld [vmem:[%s777_s14 + $0x38] sm:$0xff]  ;;  %s472_s21 = sshll.u32 %s861_s20, 3 }
  0x2e   : > { %493 = vmatpush.msra.mxu2 %v274_v2  ;;  %494 = vmatpush.msra.mxu3 %v274_v2  ;;  %v262_v14 = vld [vmem:[%s777_s14 + $0x8] sm:$0xff]  ;;  %v264_v15 = vld [vmem:[%s777_s14 + $0x18] sm:$0xff]  ;;  %s808_s30 = scalar_lea.vmem %s850_s3, %s472_s21  ;;  %v562_v16 = vld [vmem:[%s849_s2] ss:$0 sm:$0xff]  ;;  %s818_s23 = scalar_lea.vmem %s851_s4, %s472_s21 }
  0x2f   : > { %316 = vmatpush.msra.mxu0 %v274_v2  ;;  %492 = vmatpush.msra.mxu1 %v274_v2  ;;  %v347_v18 = vld [vmem:[%s808_s30] sm:$0xff]  ;;  %v349_v20 = vld [vmem:[%s808_s30 + $0x10] sm:$0xff]  ;;  %v348_v34 = vld [vmem:[%s808_s30 + $0x8] sm:$0xff] }
  0x30   : > { %496 = vmatpush.msra.mxu2 %v273_v3  ;;  %497 = vmatpush.msra.mxu3 %v273_v3  ;;  %v351_v26 = vld [vmem:[%s808_s30 + $0x20] sm:$0xff]  ;;  %v353_v28 = vld [vmem:[%s808_s30 + $0x30] sm:$0xff]  ;;  %v350_v36 = vld [vmem:[%s808_s30 + $0x18] sm:$0xff] }
  0x31   : > { %317 = vmatpush.msra.mxu0 %v273_v3  ;;  %495 = vmatpush.msra.mxu1 %v273_v3  ;;  %v352_v42 = vld [vmem:[%s808_s30 + $0x28] sm:$0xff]  ;;  %v354_v44 = vld [vmem:[%s808_s30 + $0x38] sm:$0xff] }
  0x32   : > { %499 = vmatpush.msra.mxu2 %v272_v4  ;;  %500 = vmatpush.msra.mxu3 %v272_v4 }
  0x33   : > { %318 = vmatpush.msra.mxu0 %v272_v4  ;;  %498 = vmatpush.msra.mxu1 %v272_v4 }
  0x34   : > { %502 = vmatpush.msra.mxu2 %v271_v5  ;;  %503 = vmatpush.msra.mxu3 %v271_v5 }
  0x35   : > { %319 = vmatpush.msra.mxu0 %v271_v5  ;;  %501 = vmatpush.msra.mxu1 %v271_v5 }
  0x36   : > { %505 = vmatpush.msra.mxu2 %v270_v6  ;;  %506 = vmatpush.msra.mxu3 %v270_v6 }
  0x37   : > { %320 = vmatpush.msra.mxu0 %v270_v6  ;;  %504 = vmatpush.msra.mxu1 %v270_v6 }
  0x38   : > { %508 = vmatpush.msra.mxu2 %v269_v7  ;;  %509 = vmatpush.msra.mxu3 %v269_v7 }
  0x39   : > { %479 = vmatmul.msk.f32.vlgmr.msra.gmra.mxu2 %vm281_vm0, %v265_v8  ;;  %481 = vmatmul.msk.f32.vlgmr.msra.gmra.mxu3 %vm281_vm0, %v267_v9 }
  0x3a   : > { %321 = vmatpush.msra.mxu0 %v269_v7  ;;  %507 = vmatpush.msra.mxu1 %v269_v7 }
  0x3b   : > { %475 = vmatmul.msk.f32.vlgmr.msra.gmra.mxu0 %vm281_vm0, %v261_v10  ;;  %477 = vmatmul.msk.f32.vlgmr.msra.gmra.mxu1 %vm281_vm0, %v263_v11 }
  0x41   : > { %480 = vmatmul.msk.f32.gmra.mxu2 %vm281_vm0, %v266_v12  ;;  %482 = vmatmul.msk.f32.gmra.mxu3 %vm281_vm0, %v268_v13 }
  0x43   : > { %476 = vmatmul.msk.f32.gmra.mxu0 %vm281_vm0, %v262_v14  ;;  %478 = vmatmul.msk.f32.gmra.mxu1 %vm281_vm0, %v264_v15 }
  0xb8   : > { %v323_v17 = vpop.f32.mrf.mxu0  ;;  %v329_v19 = vpop.f32.mrf.mxu1 }
  0xb9   : > { %v324_v21 = vadd.f32 %v562_v16, %v323_v17  ;;  %v330_v22 = vadd.f32 %v562_v16, %v329_v19 }
  0xbb   : > { %v355_v23 = vadd.f32 %v347_v18, %v324_v21  ;;  %v357_v24 = vadd.f32 %v349_v20, %v330_v22 }
  0xbc   : > { %v335_v25 = vpop.f32.mrf.mxu2  ;;  %v341_v27 = vpop.f32.mrf.mxu3 }
  0xbd   : > { %363 = vst [vmem:[%s818_s23] sm:$0xff] %v355_v23  ;;  %v336_v29 = vadd.f32 %v562_v16, %v335_v25  ;;  %v342_v30 = vadd.f32 %v562_v16, %v341_v27 }
  0xbe   : > { %365 = vst [vmem:[%s818_s23 + $0x10] sm:$0xff] %v357_v24 }
  0xbf   : > { %v359_v31 = vadd.f32 %v351_v26, %v336_v29  ;;  %v361_v32 = vadd.f32 %v353_v28, %v342_v30 }
  0xc0   : > { %v326_v33 = vpop.f32.mrf.mxu0  ;;  %v332_v35 = vpop.f32.mrf.mxu1 }
  0xc1   : > { %367 = vst [vmem:[%s818_s23 + $0x20] sm:$0xff] %v359_v31  ;;  %v327_v37 = vadd.f32 %v562_v16, %v326_v33  ;;  %v333_v38 = vadd.f32 %v562_v16, %v332_v35 }
  0xc2   : > { %369 = vst [vmem:[%s818_s23 + $0x30] sm:$0xff] %v361_v32 }
  0xc3   : > { %v356_v39 = vadd.f32 %v348_v34, %v327_v37  ;;  %v358_v40 = vadd.f32 %v350_v36, %v333_v38 }
  0xc4   : > { %v338_v41 = vpop.f32.mrf.mxu2  ;;  %v344_v43 = vpop.f32.mrf.mxu3 }
  0xc5   : > { %364 = vst [vmem:[%s818_s23 + $0x8] sm:$0xff] %v356_v39  ;;  %v339_v45 = vadd.f32 %v562_v16, %v338_v41  ;;  %v345_v46 = vadd.f32 %v562_v16, %v344_v43 }
  0xc6   : > { %366 = vst [vmem:[%s818_s23 + $0x18] sm:$0xff] %v358_v40 }
  0xc7   : > { %v360_v47 = vadd.f32 %v352_v42, %v339_v45  ;;  %v362_v48 = vadd.f32 %v354_v44, %v345_v46 }
  0xc9   : > { %368 = vst [vmem:[%s818_s23 + $0x28] sm:$0xff] %v360_v47 }
  0xca   : > { %370 = vst [vmem:[%s818_s23 + $0x38] sm:$0xff] %v362_v48 }
  0xcb PF: > { %p15_p4 = scmp.ge.s32.totalorder %s737_s28, 4   ;;  %s856_s15 = smov %s653_s16 }
  0xcc   : > { %s857_s16 = smov %s657_s17  ;;  %s858_s17 = smov %s750_s7 }
  0xcd   : > { %s859_s18 = smov %s737_s28  ;;  %17 = sbr.rel (!%p15_p4) target bundleno = 4 (0x4), region = 83 }
  0xd2   :  { %393 = vsyncpa [#allocation3], 1 }
  0xd3   :  { %395 = vsyncpa [#allocation3 + $0x1], 1 }
  0xd4   :  { %396 = vsyncpa [#allocation5], 1 }

// kernel: a_call__.10
= control target key start
LH: loop header
LB: loop body
LE: loop exit
PB: predicated region body
PF: predicated region fallthrough
CT: control target
= control target key end

     0   :  { %8 = vsyncpa [#allocation3], 0  ;;  %s1102_s0 = inlined_call_operand.vmem [shape: f32[2,42,128], index: 0, kind: input, shape index: {}]   ;;  %s1103_s1 = inlined_call_operand.hbm [shape: f32[9,128,128], index: 1, kind: input, shape index: {}]   ;;  %s1104_s2 = inlined_call_operand.vmem [shape: f32[1,128], index: 2, kind: input, shape index: {}]   ;;  %s1105_s3 = inlined_call_operand.hbm [shape: f32[2,4,4,128], index: 3, kind: output, shape index: {}]  }
   0x1   :  { %9 = vsyncpa [#allocation4], 0 }
   0x2   :  { %11 = vsyncpa [#allocation4 + $0x1], 0  ;;  %s954_s12 = smov 0   ;;  %s956_s13 = smov 0  }
   0x3   :  { %s958_s14 = smov 0   ;;  %s960_s15 = smov 0  }
   0x4 LB: > { %s975_s16 = sadd.s32 4294967295, %s927_s15   ;;  %s725_s17 = sadd.s32 4294967294, %s927_s15   ;;  %s927_s15 = sphi %s960_s15, %s1111_s15   ;;  %s923_s14 = sphi %s958_s14, %s1110_s14   ;;  %s919_s13 = sphi %s956_s13, %s1109_s13   ;;  %s915_s12 = sphi %s954_s12, %s1108_s12  }
   0x5   : > { %s979_s18 = sadd.s32 1, %s927_s15   ;;  %s92_s19 = sadd.s32 1, %s923_s14 }
   0x6   : > { %s89_s20 = ssub.s32 %s927_s15, %s979_s18  ;;  %p102_p0 = scmp.ne.s32.totalorder %s923_s14, %s919_s13 }
   0x7   : > { %p90_p1 = scmp.eq.s32.totalorder %s89_s20, 0  ;;  %p103_p2 = scmp.eq.s32.totalorder %s975_s16, 1 }
   0x8   : > { %p108_p3 = scmp.ne.s32.totalorder %s919_s13, %s915_s12  ;;  %p109_p4 = scmp.eq.s32.totalorder %s725_s17, 1 }
   0x9   : > { %s990_s21 = scalar_select %p90_p1, %s923_s14, %s92_s19  }
   0xa   : > { %p992_p5 = por %p103_p2, %p102_p0  ;;  %p996_p6 = por %p109_p4, %p108_p3 }
   0xb   : > { %p726_p7 = scmp.ge.s32.totalorder %s927_s15, 1  ;;  %p116_p8 = scmp.lt.s32.totalorder %s927_s15, 3 }
   0xc   : > { %p790_p9 = scmp.eq.s32.totalorder %s975_s16, 0  ;;  %s127_s26 = sshll.u32 %s1103_s1, 4  ;;  %s128_s26 = int_to_ptr.hbm [resolvable:$true] %s127_s26 }
   0xd   : > { %p117_p10 = pnand %p726_p7, %p116_p8  ;;  %s929_s27 = smov [#allocation2]  }
   0xe   : > { %s129_s28 = sshll.u32 %s929_s27, 4  ;;  %s930_s29 = smov 128   ;;  %s130_s28 = int_to_ptr.vmem [resolvable:$true] %s129_s28 }
   0xf   : > { %p782_p11 = pneg %p117_p10  ;;  %s931_s30 = smov 8  }
  0x10   : > { %156 = sbr.rel (%p117_p10) target bundleno = 270 (0x10e), region = 32 }
  0x11   : > { %p783_p12 = pnand %p790_p9, %p782_p11 }
  0x13   : > { %785 = dma.hbm_to_vmem [thread:$0]  (!%p783_p12), %s128_s26, 18432, %s130_s28, [#allocation3], %s930_s29, %s930_s29, %s931_s30  }
  0x15   : > { %906 = dma.done.wait (%p790_p9), [#allocation3], 18432  }
  0x16   : > { %908 = vsyncadd (%p790_p9), [#allocation3], 4294948864  ;;  %v224_v0 = vld [vmem:[#allocation2 + $0xf8] sm:$0xff]  ;;  %v223_v3 = vld [vmem:[#allocation2 + $0xf0] sm:$0xff]  ;;  %p181_p13 = scmp.lt.s32.totalorder %s975_s16, 1  ;;  %s178_s9 = sand.u32 1, %s919_s13  }
  0x17   : > { %v204_v1 = vld [vmem:[#allocation2 + $0x78] sm:$0xff]  ;;  %225 = vmatpush.msra.mxu0 %v224_v0  ;;  %v203_v4 = vld [vmem:[#allocation2 + $0x70] sm:$0xff]  ;;  %v222_v7 = vld [vmem:[#allocation2 + $0xe8] sm:$0xff]  ;;  %s731_s10 = sshll.u32 %s178_s9, 4  ;;  %s742_s19 = sshll.u32 %s975_s16, 4 }
  0x18   : > { %v296_v2 = vld [vmem:[#allocation2 + $0x178] sm:$0xff]  ;;  %251 = vmatpush.msra.mxu1 %v204_v1  ;;  %v295_v5 = vld [vmem:[#allocation2 + $0x170] sm:$0xff]  ;;  %v202_v8 = vld [vmem:[#allocation2 + $0x68] sm:$0xff]  ;;  %s1016_s4 = scalar_select %p181_p13, %s975_s16, 1 }
  0x19   : > { %297 = vmatpush.msra.mxu2 %v296_v2  ;;  %v345_v6 = vld [vmem:[#allocation2 + $0x1f8] sm:$0xff]  ;;  %226 = vmatpush.msra.mxu0 %v223_v3  ;;  %v294_v9 = vld [vmem:[#allocation2 + $0x168] sm:$0xff]  ;;  %v344_v10 = vld [vmem:[#allocation2 + $0x1f0] sm:$0xff]  ;;  %s647_s25 = scalar_lea.hbm %s1105_s3, %s742_s19  ;;  %s180_s26 = scalar_lea.vmem [#allocation5], %s731_s10 }
  0x1a   : > { %252 = vmatpush.msra.mxu1 %v203_v4  ;;  %346 = vmatpush.msra.mxu3 %v345_v6  ;;  %v221_v11 = vld [vmem:[#allocation2 + $0xe0] sm:$0xff]  ;;  %v343_v14 = vld [vmem:[#allocation2 + $0x1e8] sm:$0xff]  ;;  %v220_v15 = vld [vmem:[#allocation2 + $0xd8] sm:$0xff]  ;;  %s775_s5 = smul.u32 48, %s1016_s4  ;;  %s648_s27 = sshll.u32 %s180_s26, 4  ;;  %s649_s27 = int_to_ptr.vmem [resolvable:$true] %s648_s27 }
  0x1b   : > { %298 = vmatpush.msra.mxu2 %v295_v5  ;;  %v201_v12 = vld [vmem:[#allocation2 + $0x60] sm:$0xff]  ;;  %227 = vmatpush.msra.mxu0 %v222_v7  ;;  %v200_v16 = vld [vmem:[#allocation2 + $0x58] sm:$0xff]  ;;  %v219_v19 = vld [vmem:[#allocation2 + $0xd0] sm:$0xff]  ;;  %s650_s28 = sshll.u32 %s647_s25, 4  ;;  %s636_s16 = scalar_lea.sflag [#allocation4], %s178_s9  ;;  %s651_s28 = int_to_ptr.hbm [resolvable:$true] %s650_s28 }
  0x1c   : > { %253 = vmatpush.msra.mxu1 %v202_v8  ;;  %v293_v13 = vld [vmem:[#allocation2 + $0x160] sm:$0xff]  ;;  %347 = vmatpush.msra.mxu3 %v344_v10  ;;  %v292_v17 = vld [vmem:[#allocation2 + $0x158] sm:$0xff]  ;;  %v199_v20 = vld [vmem:[#allocation2 + $0x50] sm:$0xff]  ;;  %s1022_s8 = scalar_lea.vmem %s1102_s0, %s775_s5  ;;  %s875_s29 = sshra.s32 %s651_s28, 4  ;;  %s876_s29 = int_to_ptr.hbm [resolvable:$true] %s875_s29 }
  0x1d   : > { %299 = vmatpush.msra.mxu2 %v294_v9  ;;  %228 = vmatpush.msra.mxu0 %v221_v11  ;;  %v342_v18 = vld [vmem:[#allocation2 + $0x1e0] sm:$0xff]  ;;  %v291_v21 = vld [vmem:[#allocation2 + $0x150] sm:$0xff]  ;;  %v341_v22 = vld [vmem:[#allocation2 + $0x1d8] sm:$0xff]  ;;  %s877_s30 = scalar_lea.hbm %s876_s29, 16  ;;  %s881_s6 = scalar_lea.hbm %s1105_s3, 32 }
  0x1e   : > { %254 = vmatpush.msra.mxu1 %v201_v12  ;;  %348 = vmatpush.msra.mxu3 %v343_v14  ;;  %v218_v23 = vld [vmem:[#allocation2 + $0xc8] sm:$0xff]  ;;  %v340_v26 = vld [vmem:[#allocation2 + $0x1d0] sm:$0xff]  ;;  %v217_v27 = vld [vmem:[#allocation2 + $0xc0] sm:$0xff]  ;;  %p878_p0 = scmp.ne.s32.totalorder %s876_s29, %s877_s30  ;;  %p882_p3 = scmp.lt.s32.totalorder %s876_s29, %s1105_s3 }
  0x1f   : > { %300 = vmatpush.msra.mxu2 %v293_v13  ;;  %229 = vmatpush.msra.mxu0 %v220_v15  ;;  %v198_v24 = vld [vmem:[#allocation2 + $0x48] sm:$0xff]  ;;  %v197_v28 = vld [vmem:[#allocation2 + $0x40] sm:$0xff]  ;;  %v216_v31 = vld [vmem:[#allocation2 + $0xb8] sm:$0xff]  ;;  %p883_p4 = scmp.lt.s32.totalorder %s881_s6, %s877_s30 }
  0x20   : > { %255 = vmatpush.msra.mxu1 %v200_v16  ;;  %349 = vmatpush.msra.mxu3 %v342_v18  ;;  %v290_v25 = vld [vmem:[#allocation2 + $0x148] sm:$0xff]  ;;  %v289_v29 = vld [vmem:[#allocation2 + $0x140] sm:$0xff]  ;;  %v196_v32 = vld [vmem:[#allocation2 + $0x38] sm:$0xff]  ;;  %p879_p1 = pnand %p878_p0, %p992_p5 }
  0x21   : > { %301 = vmatpush.msra.mxu2 %v292_v17  ;;  %230 = vmatpush.msra.mxu0 %v219_v19  ;;  %v339_v30 = vld [vmem:[#allocation2 + $0x1c8] sm:$0xff]  ;;  %v288_v33 = vld [vmem:[#allocation2 + $0x138] sm:$0xff]  ;;  %v338_v34 = vld [vmem:[#allocation2 + $0x1c0] sm:$0xff]  ;;  %p884_p7 = por %p883_p4, %p882_p3 }
  0x22   : > { %256 = vmatpush.msra.mxu1 %v199_v20  ;;  %350 = vmatpush.msra.mxu3 %v341_v22  ;;  %v215_v35 = vld [vmem:[#allocation2 + $0xb0] sm:$0xff]  ;;  %v337_v38 = vld [vmem:[#allocation2 + $0x1b8] sm:$0xff]  ;;  %v214_v39 = vld [vmem:[#allocation2 + $0xa8] sm:$0xff]  ;;  %p880_p2 = pneg %p879_p1 }
  0x23   : > { %302 = vmatpush.msra.mxu2 %v291_v21  ;;  %231 = vmatpush.msra.mxu0 %v218_v23  ;;  %v195_v36 = vld [vmem:[#allocation2 + $0x30] sm:$0xff]  ;;  %v194_v40 = vld [vmem:[#allocation2 + $0x28] sm:$0xff]  ;;  %v213_v43 = vld [vmem:[#allocation2 + $0xa0] sm:$0xff] }
  0x24   : > { %257 = vmatpush.msra.mxu1 %v198_v24  ;;  %351 = vmatpush.msra.mxu3 %v340_v26  ;;  %v287_v37 = vld [vmem:[#allocation2 + $0x130] sm:$0xff]  ;;  %v286_v41 = vld [vmem:[#allocation2 + $0x128] sm:$0xff]  ;;  %v193_v44 = vld [vmem:[#allocation2 + $0x20] sm:$0xff]  ;;  %p885_p8 = pnand %p884_p7, %p880_p2 }
  0x25   : > { %303 = vmatpush.msra.mxu2 %v290_v25  ;;  %232 = vmatpush.msra.mxu0 %v217_v27  ;;  %v336_v42 = vld [vmem:[#allocation2 + $0x1b0] sm:$0xff]  ;;  %v285_v45 = vld [vmem:[#allocation2 + $0x120] sm:$0xff]  ;;  %v335_v46 = vld [vmem:[#allocation2 + $0x1a8] sm:$0xff] }
  0x26   : > { %258 = vmatpush.msra.mxu1 %v197_v28  ;;  %352 = vmatpush.msra.mxu3 %v339_v30  ;;  %v212_v47 = vld [vmem:[#allocation2 + $0x98] sm:$0xff]  ;;  %v334_v50 = vld [vmem:[#allocation2 + $0x1a0] sm:$0xff]  ;;  %v211_v51 = vld [vmem:[#allocation2 + $0x90] sm:$0xff] }
  0x27   : > { %304 = vmatpush.msra.mxu2 %v289_v29  ;;  %233 = vmatpush.msra.mxu0 %v216_v31  ;;  %v192_v48 = vld [vmem:[#allocation2 + $0x18] sm:$0xff]  ;;  %v191_v52 = vld [vmem:[#allocation2 + $0x10] sm:$0xff]  ;;  %v210_v55 = vld [vmem:[#allocation2 + $0x88] sm:$0xff] }
  0x28   : > { %259 = vmatpush.msra.mxu1 %v196_v32  ;;  %353 = vmatpush.msra.mxu3 %v338_v34  ;;  %v284_v49 = vld [vmem:[#allocation2 + $0x118] sm:$0xff]  ;;  %v283_v53 = vld [vmem:[#allocation2 + $0x110] sm:$0xff]  ;;  %v190_v56 = vld [vmem:[#allocation2 + $0x8] sm:$0xff] }
  0x29   : > { %305 = vmatpush.msra.mxu2 %v288_v33  ;;  %234 = vmatpush.msra.mxu0 %v215_v35  ;;  %v333_v54 = vld [vmem:[#allocation2 + $0x198] sm:$0xff]  ;;  %v282_v57 = vld [vmem:[#allocation2 + $0x108] sm:$0xff]  ;;  %v332_v58 = vld [vmem:[#allocation2 + $0x190] sm:$0xff] }
  0x2a   : > { %260 = vmatpush.msra.mxu1 %v195_v36  ;;  %354 = vmatpush.msra.mxu3 %v337_v38  ;;  %v209_v59 = vld [vmem:[#allocation2 + $0x80] sm:$0xff]  ;;  %v331_v62 = vld [vmem:[#allocation2 + $0x188] sm:$0xff]  ;;  %v394_v63 = vld [vmem:[#allocation2 + $0x278] sm:$0xff] }
  0x2b   : > { %306 = vmatpush.msra.mxu2 %v287_v37  ;;  %235 = vmatpush.msra.mxu0 %v214_v39  ;;  %v189_v60 = vld [vmem:[#allocation2] sm:$0xff]  ;;  %v443_v0 = vld [vmem:[#allocation2 + $0x2f8] sm:$0xff]  ;;  %v393_v3 = vld [vmem:[#allocation2 + $0x270] sm:$0xff] }
  0x2c   : > { %261 = vmatpush.msra.mxu1 %v194_v40  ;;  %355 = vmatpush.msra.mxu3 %v336_v42  ;;  %v281_v61 = vld [vmem:[#allocation2 + $0x100] sm:$0xff]  ;;  %v492_v1 = vld [vmem:[#allocation2 + $0x378] sm:$0xff]  ;;  %v442_v4 = vld [vmem:[#allocation2 + $0x2f0] sm:$0xff] }
  0x2d   : > { %307 = vmatpush.msra.mxu2 %v286_v41  ;;  %236 = vmatpush.msra.mxu0 %v213_v43  ;;  %v330_v2 = vld [vmem:[#allocation2 + $0x180] sm:$0xff]  ;;  %v491_v5 = vld [vmem:[#allocation2 + $0x370] sm:$0xff]  ;;  %v541_v6 = vld [vmem:[#allocation2 + $0x3f8] sm:$0xff] }
  0x2e   : > { %262 = vmatpush.msra.mxu1 %v193_v44  ;;  %356 = vmatpush.msra.mxu3 %v335_v46  ;;  %v392_v7 = vld [vmem:[#allocation2 + $0x268] sm:$0xff]  ;;  %v540_v10 = vld [vmem:[#allocation2 + $0x3f0] sm:$0xff]  ;;  %v391_v11 = vld [vmem:[#allocation2 + $0x260] sm:$0xff] }
  0x2f   : > { %308 = vmatpush.msra.mxu2 %v285_v45  ;;  %237 = vmatpush.msra.mxu0 %v212_v47  ;;  %v441_v8 = vld [vmem:[#allocation2 + $0x2e8] sm:$0xff]  ;;  %v440_v12 = vld [vmem:[#allocation2 + $0x2e0] sm:$0xff]  ;;  %v390_v17 = vld [vmem:[#allocation2 + $0x258] sm:$0xff] }
  0x30   : > { %263 = vmatpush.msra.mxu1 %v192_v48  ;;  %357 = vmatpush.msra.mxu3 %v334_v50  ;;  %v490_v9 = vld [vmem:[#allocation2 + $0x368] sm:$0xff]  ;;  %v489_v13 = vld [vmem:[#allocation2 + $0x360] sm:$0xff]  ;;  %v439_v18 = vld [vmem:[#allocation2 + $0x2d8] sm:$0xff] }
  0x31   : > { %309 = vmatpush.msra.mxu2 %v284_v49  ;;  %238 = vmatpush.msra.mxu0 %v211_v51  ;;  %v539_v14 = vld [vmem:[#allocation2 + $0x3e8] sm:$0xff]  ;;  %v488_v19 = vld [vmem:[#allocation2 + $0x358] sm:$0xff]  ;;  %v538_v20 = vld [vmem:[#allocation2 + $0x3e0] sm:$0xff] }
  0x32   : > { %264 = vmatpush.msra.mxu1 %v191_v52  ;;  %358 = vmatpush.msra.mxu3 %v333_v54  ;;  %v205_v15 = vld [vmem:[%s1022_s8 + $0x1] sm:$0xff]  ;;  %v389_v23 = vld [vmem:[#allocation2 + $0x250] sm:$0xff]  ;;  %v537_v26 = vld [vmem:[#allocation2 + $0x3d8] sm:$0xff] }
  0x33   : > { %310 = vmatpush.msra.mxu2 %v283_v53  ;;  %239 = vmatpush.msra.mxu0 %v210_v55  ;;  %v277_v16 = vld [vmem:[%s1022_s8 + $0x2] sm:$0xff]  ;;  %v438_v24 = vld [vmem:[#allocation2 + $0x2d0] sm:$0xff]  ;;  %v386_v37 = vld [vmem:[#allocation2 + $0x238] sm:$0xff] }
  0x34   : > { %265 = vmatpush.msra.mxu1 %v190_v56  ;;  %359 = vmatpush.msra.mxu3 %v332_v58  ;;  %v186_v21 = vld [vmem:[%s1022_s8] sm:$0xff]  ;;  %v487_v25 = vld [vmem:[#allocation2 + $0x350] sm:$0xff]  ;;  %v388_v27 = vld [vmem:[#allocation2 + $0x248] sm:$0xff] }
  0x35   : > { %311 = vmatpush.msra.mxu2 %v282_v57  ;;  %240 = vmatpush.msra.mxu0 %v209_v59  ;;  %v326_v22 = vld [vmem:[%s1022_s8 + $0x6] sm:$0xff]  ;;  %v536_v30 = vld [vmem:[#allocation2 + $0x3d0] sm:$0xff]  ;;  %v435_v38 = vld [vmem:[#allocation2 + $0x2b8] sm:$0xff] }
  0x36   : > { %266 = vmatpush.msra.mxu1 %v189_v60  ;;  %360 = vmatpush.msra.mxu3 %v331_v62  ;;  %v437_v28 = vld [vmem:[#allocation2 + $0x2c8] sm:$0xff]  ;;  %v387_v31 = vld [vmem:[#allocation2 + $0x240] sm:$0xff]  ;;  %v484_v39 = vld [vmem:[#allocation2 + $0x338] sm:$0xff] }
  0x37   : > { %312 = vmatpush.msra.mxu2 %v281_v61  ;;  %395 = vmatpush.msrb.mxu0 %v394_v63  ;;  %v486_v29 = vld [vmem:[#allocation2 + $0x348] sm:$0xff]  ;;  %v436_v32 = vld [vmem:[#allocation2 + $0x2c0] sm:$0xff]  ;;  %v385_v43 = vld [vmem:[#allocation2 + $0x230] sm:$0xff] }
  0x38   : > { %444 = vmatpush.msrb.mxu1 %v443_v0  ;;  %361 = vmatpush.msra.mxu3 %v330_v2  ;;  %v485_v33 = vld [vmem:[#allocation2 + $0x340] sm:$0xff]  ;;  %v535_v34 = vld [vmem:[#allocation2 + $0x3c8] sm:$0xff]  ;;  %v434_v44 = vld [vmem:[#allocation2 + $0x2b0] sm:$0xff] }
  0x39   : > { %493 = vmatpush.msrb.mxu2 %v492_v1  ;;  %396 = vmatpush.msrb.mxu0 %v393_v3  ;;  %v206_v35 = vld [vmem:[%s1022_s8 + $0x9] sm:$0xff]  ;;  %v534_v40 = vld [vmem:[#allocation2 + $0x3c0] sm:$0xff]  ;;  %v533_v46 = vld [vmem:[#allocation2 + $0x3b8] sm:$0xff] }
  0x3a   : > { %445 = vmatpush.msrb.mxu1 %v442_v4  ;;  %542 = vmatpush.msrb.mxu3 %v541_v6  ;;  %v278_v36 = vld [vmem:[%s1022_s8 + $0xa] sm:$0xff]  ;;  %v383_v51 = vld [vmem:[#allocation2 + $0x220] sm:$0xff]  ;;  %v279_v56 = vld [vmem:[%s1022_s8 + $0x12] sm:$0xff] }
  0x3b   : > { %494 = vmatpush.msrb.mxu2 %v491_v5  ;;  %397 = vmatpush.msrb.mxu0 %v392_v7  ;;  %v1031_v41 = vld [vmem:[%s1022_s8 + $0x8] sm:$0xff]  ;;  %v483_v45 = vld [vmem:[#allocation2 + $0x330] sm:$0xff]  ;;  %v432_v52 = vld [vmem:[#allocation2 + $0x2a0] sm:$0xff] }
  0x3c   : > { %446 = vmatpush.msrb.mxu1 %v441_v8  ;;  %543 = vmatpush.msrb.mxu3 %v540_v10  ;;  %v1034_v42 = vld [vmem:[%s1022_s8 + $0xe] sm:$0xff]  ;;  %v481_v53 = vld [vmem:[#allocation2 + $0x320] sm:$0xff]  ;;  %v382_v57 = vld [vmem:[#allocation2 + $0x218] sm:$0xff] }
  0x3d   : > { %495 = vmatpush.msrb.mxu2 %v490_v9  ;;  %398 = vmatpush.msrb.mxu0 %v391_v11  ;;  %v384_v47 = vld [vmem:[#allocation2 + $0x228] sm:$0xff]  ;;  %v532_v50 = vld [vmem:[#allocation2 + $0x3b0] sm:$0xff]  ;;  %v431_v58 = vld [vmem:[#allocation2 + $0x298] sm:$0xff] }
  0x3e   : > { %447 = vmatpush.msrb.mxu1 %v440_v12  ;;  %544 = vmatpush.msrb.mxu3 %v539_v14  ;;  %v433_v48 = vld [vmem:[#allocation2 + $0x2a8] sm:$0xff]  ;;  %v207_v55 = vld [vmem:[%s1022_s8 + $0x11] sm:$0xff]  ;;  %v530_v60 = vld [vmem:[#allocation2 + $0x3a0] sm:$0xff] }
  0x3f   : > { %496 = vmatpush.msrb.mxu2 %v489_v13  ;;  %241 = vmatmul.f32.vlgmr.msra.gmra.mxu0 %v205_v15  ;;  %v482_v49 = vld [vmem:[#allocation2 + $0x328] sm:$0xff]  ;;  %v480_v59 = vld [vmem:[#allocation2 + $0x318] sm:$0xff]  ;;  %v1041_v61 = vld [vmem:[%s1022_s8 + $0x10] sm:$0xff] }
  0x40   : > { %313 = vmatmul.f32.vlgmr.msra.gmra.mxu2 %v277_v16  ;;  %399 = vmatpush.msrb.mxu0 %v390_v17  ;;  %v531_v54 = vld [vmem:[#allocation2 + $0x3a8] sm:$0xff]  ;;  %v1044_v62 = vld [vmem:[%s1022_s8 + $0x16] sm:$0xff]  ;;  %v379_v7 = vld [vmem:[#allocation2 + $0x200] sm:$0xff] }
  0x41   : > { %448 = vmatpush.msrb.mxu1 %v439_v18  ;;  %497 = vmatpush.msrb.mxu2 %v488_v19  ;;  %v381_v63 = vld [vmem:[#allocation2 + $0x210] sm:$0xff]  ;;  %v529_v2 = vld [vmem:[#allocation2 + $0x398] sm:$0xff]  ;;  %v380_v3 = vld [vmem:[#allocation2 + $0x208] sm:$0xff] }
  0x42   : > { %545 = vmatpush.msrb.mxu3 %v538_v20  ;;  %267 = vmatmul.f32.vlgmr.msra.gmra.mxu1 %v186_v21  ;;  %v430_v0 = vld [vmem:[#allocation2 + $0x290] sm:$0xff]  ;;  %v429_v4 = vld [vmem:[#allocation2 + $0x288] sm:$0xff]  ;;  %v428_v8 = vld [vmem:[#allocation2 + $0x280] sm:$0xff] }
  0x43   : > { %362 = vmatmul.f32.vlgmr.msra.gmra.mxu3 %v326_v22  ;;  %400 = vmatpush.msrb.mxu0 %v389_v23  ;;  %v479_v1 = vld [vmem:[#allocation2 + $0x310] sm:$0xff]  ;;  %v478_v5 = vld [vmem:[#allocation2 + $0x308] sm:$0xff]  ;;  %v477_v9 = vld [vmem:[#allocation2 + $0x300] sm:$0xff] }
  0x44   : > { %449 = vmatpush.msrb.mxu1 %v438_v24  ;;  %498 = vmatpush.msrb.mxu2 %v487_v25  ;;  %v528_v6 = vld [vmem:[#allocation2 + $0x390] sm:$0xff]  ;;  %v527_v10 = vld [vmem:[#allocation2 + $0x388] sm:$0xff]  ;;  %v590_v13 = vld [vmem:[#allocation2 + $0x478] sm:$0xff] }
  0x45   : > { %546 = vmatpush.msrb.mxu3 %v537_v26  ;;  %401 = vmatpush.msrb.mxu0 %v388_v27  ;;  %v375_v11 = vld [vmem:[%s1022_s8 + $0x7] sm:$0xff]  ;;  %v589_v16 = vld [vmem:[#allocation2 + $0x470] sm:$0xff]  ;;  %v586_v21 = vld [vmem:[#allocation2 + $0x458] sm:$0xff] }
  0x46   : > { %450 = vmatpush.msrb.mxu1 %v437_v28  ;;  %499 = vmatpush.msrb.mxu2 %v486_v29  ;;  %v473_v12 = vld [vmem:[%s1022_s8 + $0xc] sm:$0xff]  ;;  %v526_v14 = vld [vmem:[#allocation2 + $0x380] sm:$0xff]  ;;  %v474_v20 = vld [vmem:[%s1022_s8 + $0x14] sm:$0xff] }
  0x47   : > { %547 = vmatpush.msrb.mxu3 %v536_v30  ;;  %402 = vmatpush.msrb.mxu0 %v387_v31  ;;  %v522_v15 = vld [vmem:[%s1022_s8 + $0xd] sm:$0xff]  ;;  %v587_v18 = vld [vmem:[#allocation2 + $0x460] sm:$0xff]  ;;  %v523_v22 = vld [vmem:[%s1022_s8 + $0x15] sm:$0xff] }
  0x48   : > { %451 = vmatpush.msrb.mxu1 %v436_v32  ;;  %500 = vmatpush.msrb.mxu2 %v485_v33  ;;  %v588_v17 = vld [vmem:[#allocation2 + $0x468] sm:$0xff]  ;;  %v585_v23 = vld [vmem:[#allocation2 + $0x450] sm:$0xff]  ;;  %v583_v25 = vld [vmem:[#allocation2 + $0x440] sm:$0xff] }
  0x49   : > { %548 = vmatpush.msrb.mxu3 %v535_v34  ;;  %244 = vmatmul.f32.gmra.mxu0 %v206_v35  ;;  %v376_v19 = vld [vmem:[%s1022_s8 + $0xf] sm:$0xff]  ;;  %v377_v26 = vld [vmem:[%s1022_s8 + $0x17] sm:$0xff]  ;;  %v579_v33 = vld [vmem:[#allocation2 + $0x420] sm:$0xff] }
  0x4a   : > { %316 = vmatmul.f32.gmra.mxu2 %v278_v36  ;;  %403 = vmatpush.msrb.mxu0 %v386_v37  ;;  %v584_v24 = vld [vmem:[#allocation2 + $0x448] sm:$0xff]  ;;  %v475_v27 = vld [vmem:[%s1022_s8 + $0x1c] sm:$0xff]  ;;  %v581_v31 = vld [vmem:[#allocation2 + $0x430] sm:$0xff] }
  0x4b   : > { %452 = vmatpush.msrb.mxu1 %v435_v38  ;;  %501 = vmatpush.msrb.mxu2 %v484_v39  ;;  %v582_v28 = vld [vmem:[#allocation2 + $0x438] sm:$0xff]  ;;  %v580_v32 = vld [vmem:[#allocation2 + $0x428] sm:$0xff]  ;;  %v577_v35 = vld [vmem:[#allocation2 + $0x410] sm:$0xff] }
  0x4c   : > { %549 = vmatpush.msrb.mxu3 %v534_v40  ;;  %270 = vmatmul.f32.gmra.mxu1 %v1031_v41  ;;  %v426_v29 = vld [vmem:[%s1022_s8 + $0x18] sm:$0xff]  ;;  %v576_v36 = vld [vmem:[#allocation2 + $0x408] sm:$0xff]  ;;  %v575_v37 = vld [vmem:[#allocation2 + $0x400] sm:$0xff] }
  0x4d   : > { %365 = vmatmul.f32.gmra.mxu3 %v1034_v42  ;;  %404 = vmatpush.msrb.mxu0 %v385_v43  ;;  %v524_v30 = vld [vmem:[%s1022_s8 + $0x1d] sm:$0xff] }
  0x4e   : > { %453 = vmatpush.msrb.mxu1 %v434_v44  ;;  %502 = vmatpush.msrb.mxu2 %v483_v45  ;;  %v578_v34 = vld [vmem:[#allocation2 + $0x418] sm:$0xff] }
  0x4f   : > { %550 = vmatpush.msrb.mxu3 %v533_v46  ;;  %405 = vmatpush.msrb.mxu0 %v384_v47  ;;  %v573_v38 = vld [vmem:[%s1022_s8 + $0x1e] sm:$0xff] }
  0x50   : > { %454 = vmatpush.msrb.mxu1 %v433_v48  ;;  %503 = vmatpush.msrb.mxu2 %v482_v49 }
  0x51   : > { %551 = vmatpush.msrb.mxu3 %v532_v50  ;;  %406 = vmatpush.msrb.mxu0 %v383_v51 }
  0x52   : > { %455 = vmatpush.msrb.mxu1 %v432_v52  ;;  %504 = vmatpush.msrb.mxu2 %v481_v53 }
  0x53   : > { %552 = vmatpush.msrb.mxu3 %v531_v54  ;;  %247 = vmatmul.f32.gmra.mxu0 %v207_v55 }
  0x54   : > { %319 = vmatmul.f32.gmra.mxu2 %v279_v56  ;;  %407 = vmatpush.msrb.mxu0 %v382_v57 }
  0x55   : > { %456 = vmatpush.msrb.mxu1 %v431_v58  ;;  %505 = vmatpush.msrb.mxu2 %v480_v59 }
  0x56   : > { %553 = vmatpush.msrb.mxu3 %v530_v60  ;;  %273 = vmatmul.f32.gmra.mxu1 %v1041_v61 }
  0x57   : > { %368 = vmatmul.f32.gmra.mxu3 %v1044_v62  ;;  %408 = vmatpush.msrb.mxu0 %v381_v63 }
  0x58   : > { %457 = vmatpush.msrb.mxu1 %v430_v0  ;;  %506 = vmatpush.msrb.mxu2 %v479_v1 }
  0x59   : > { %554 = vmatpush.msrb.mxu3 %v529_v2  ;;  %409 = vmatpush.msrb.mxu0 %v380_v3 }
  0x5a   : > { %458 = vmatpush.msrb.mxu1 %v429_v4  ;;  %507 = vmatpush.msrb.mxu2 %v478_v5 }
  0x5b   : > { %555 = vmatpush.msrb.mxu3 %v528_v6  ;;  %410 = vmatpush.msrb.mxu0 %v379_v7 }
  0x5c   : > { %459 = vmatpush.msrb.mxu1 %v428_v8  ;;  %508 = vmatpush.msrb.mxu2 %v477_v9 }
  0x5d   : > { %556 = vmatpush.msrb.mxu3 %v527_v10  ;;  %411 = vmatmul.f32.vlgmr.msrb.gmra.mxu0 %v375_v11 }
  0x5e   : > { %509 = vmatmul.f32.vlgmr.msrb.gmra.mxu2 %v473_v12  ;;  %591 = vmatpush.msra.mxu0 %v590_v13 }
  0x5f   : > { %743 = vmatpush.msra.mxu1 %v590_v13  ;;  %744 = vmatpush.msra.mxu2 %v590_v13 }
  0x60   : > { %557 = vmatpush.msrb.mxu3 %v526_v14  ;;  %460 = vmatmul.f32.vlgmr.msrb.gmra.mxu1 %v1031_v41 }
  0x61   : > { %558 = vmatmul.f32.vlgmr.msrb.gmra.mxu3 %v522_v15  ;;  %592 = vmatpush.msra.mxu0 %v589_v16  ;;  %v830_v15 = vld [vmem:[%s1104_s2] ss:$0 sm:$0xff] }
  0x62   : > { %745 = vmatpush.msra.mxu1 %v589_v16  ;;  %746 = vmatpush.msra.mxu2 %v589_v16 }
  0x63   : > { %593 = vmatpush.msra.mxu0 %v588_v17 }
  0x64   : > { %747 = vmatpush.msra.mxu1 %v588_v17  ;;  %748 = vmatpush.msra.mxu2 %v588_v17 }
  0x65   : > { %594 = vmatpush.msra.mxu0 %v587_v18 }
  0x66   : > { %749 = vmatpush.msra.mxu1 %v587_v18  ;;  %750 = vmatpush.msra.mxu2 %v587_v18 }
  0x67   : > { %414 = vmatmul.f32.gmra.mxu0 %v376_v19  ;;  %512 = vmatmul.f32.gmra.mxu2 %v474_v20 }
  0x68   : > { %595 = vmatpush.msra.mxu0 %v586_v21  ;;  %751 = vmatpush.msra.mxu1 %v586_v21 }
  0x69   : > { %752 = vmatpush.msra.mxu2 %v586_v21  ;;  %463 = vmatmul.f32.gmra.mxu1 %v1041_v61 }
  0x6a   : > { %561 = vmatmul.f32.gmra.mxu3 %v523_v22  ;;  %596 = vmatpush.msra.mxu0 %v585_v23 }
  0x6b   : > { %753 = vmatpush.msra.mxu1 %v585_v23  ;;  %754 = vmatpush.msra.mxu2 %v585_v23 }
  0x6c   : > { %597 = vmatpush.msra.mxu0 %v584_v24 }
  0x6d   : > { %755 = vmatpush.msra.mxu1 %v584_v24  ;;  %756 = vmatpush.msra.mxu2 %v584_v24 }
  0x6e   : > { %598 = vmatpush.msra.mxu0 %v583_v25 }
  0x6f   : > { %757 = vmatpush.msra.mxu1 %v583_v25  ;;  %758 = vmatpush.msra.mxu2 %v583_v25 }
  0x70   : > { %417 = vmatmul.f32.gmra.mxu0 %v377_v26  ;;  %515 = vmatmul.f32.gmra.mxu2 %v475_v27 }
  0x71   : > { %599 = vmatpush.msra.mxu0 %v582_v28  ;;  %759 = vmatpush.msra.mxu1 %v582_v28 }
  0x72   : > { %760 = vmatpush.msra.mxu2 %v582_v28  ;;  %466 = vmatmul.f32.gmra.mxu1 %v426_v29 }
  0x73   : > { %564 = vmatmul.f32.gmra.mxu3 %v524_v30  ;;  %600 = vmatpush.msra.mxu0 %v581_v31 }
  0x74   : > { %761 = vmatpush.msra.mxu1 %v581_v31  ;;  %762 = vmatpush.msra.mxu2 %v581_v31 }
  0x75   : > { %601 = vmatpush.msra.mxu0 %v580_v32 }
  0x76   : > { %763 = vmatpush.msra.mxu1 %v580_v32  ;;  %764 = vmatpush.msra.mxu2 %v580_v32 }
  0x77   : > { %602 = vmatpush.msra.mxu0 %v579_v33 }
  0x78   : > { %765 = vmatpush.msra.mxu1 %v579_v33  ;;  %766 = vmatpush.msra.mxu2 %v579_v33 }
  0x79   : > { %603 = vmatpush.msra.mxu0 %v578_v34 }
  0x7a   : > { %767 = vmatpush.msra.mxu1 %v578_v34  ;;  %768 = vmatpush.msra.mxu2 %v578_v34 }
  0x7b   : > { %604 = vmatpush.msra.mxu0 %v577_v35 }
  0x7c   : > { %769 = vmatpush.msra.mxu1 %v577_v35  ;;  %770 = vmatpush.msra.mxu2 %v577_v35 }
  0x7d   : > { %605 = vmatpush.msra.mxu0 %v576_v36 }
  0x7e   : > { %771 = vmatpush.msra.mxu1 %v576_v36  ;;  %772 = vmatpush.msra.mxu2 %v576_v36 }
  0x7f   : > { %606 = vmatpush.msra.mxu0 %v575_v37 }
  0x80   : > { %773 = vmatpush.msra.mxu1 %v575_v37  ;;  %774 = vmatpush.msra.mxu2 %v575_v37 }
  0x81   : > { %607 = vmatmul.f32.vlgmr.msra.gmra.mxu0 %v1034_v42  ;;  %610 = vmatmul.f32.vlgmr.msra.gmra.mxu1 %v1044_v62 }
  0x82   : > { %613 = vmatmul.f32.vlgmr.msra.gmra.mxu2 %v573_v38 }
  0xbc   : > { %v242_v39 = vpop.f32.mrf.mxu0 }
  0xbf   : > { %v268_v40 = vpop.f32.mrf.mxu1 }
  0xc0   : > { %v269_v54 = vadd.f32 %v268_v40, %v242_v39 }
  0xc3   : > { %v314_v41 = vpop.f32.mrf.mxu2 }
  0xc4   : > { %v323_v57 = vadd.f32 %v314_v41, %v269_v54 }
  0xc6   : > { %v245_v43 = vpop.f32.mrf.mxu0  ;;  %v363_v44 = vpop.f32.mrf.mxu3 }
  0xc7   : > { %v372_v62 = vadd.f32 %v363_v44, %v323_v57 }
  0xc9   : > { %v271_v45 = vpop.f32.mrf.mxu1 }
  0xca   : > { %v272_v42 = vadd.f32 %v271_v45, %v245_v43 }
  0xcd   : > { %v317_v46 = vpop.f32.mrf.mxu2 }
  0xce   : > { %v324_v60 = vadd.f32 %v317_v46, %v272_v42 }
  0xd0   : > { %v248_v47 = vpop.f32.mrf.mxu0  ;;  %v366_v48 = vpop.f32.mrf.mxu3 }
  0xd1   : > { %v373_v63 = vadd.f32 %v366_v48, %v324_v60 }
  0xd3   : > { %v274_v49 = vpop.f32.mrf.mxu1 }
  0xd4   : > { %v275_v61 = vadd.f32 %v274_v49, %v248_v47 }
  0xd7   : > { %v320_v50 = vpop.f32.mrf.mxu2 }
  0xd8   : > { %v325_v2 = vadd.f32 %v320_v50, %v275_v61 }
  0xda   : > { %v412_v51 = vpop.f32.mrf.mxu0  ;;  %v369_v52 = vpop.f32.mrf.mxu3 }
  0xdb   : > { %v421_v0 = vadd.f32 %v412_v51, %v372_v62  ;;  %v374_v8 = vadd.f32 %v369_v52, %v325_v2 }
  0xdd   : > { %v461_v53 = vpop.f32.mrf.mxu1 }
  0xde   : > { %v470_v5 = vadd.f32 %v461_v53, %v421_v0 }
  0xe1   : > { %v510_v55 = vpop.f32.mrf.mxu2 }
  0xe2   : > { %v519_v10 = vadd.f32 %v510_v55, %v470_v5 }
  0xe4   : > { %v415_v56 = vpop.f32.mrf.mxu0  ;;  %v559_v58 = vpop.f32.mrf.mxu3 }
  0xe5   : > { %v422_v3 = vadd.f32 %v415_v56, %v373_v63  ;;  %v568_v13 = vadd.f32 %v559_v58, %v519_v10 }
  0xe6   : > { %v464_v59 = vpop.f32.mrf.mxu1 }
  0xe7   : > { %v471_v9 = vadd.f32 %v464_v59, %v422_v3 }
  0xea   : > { %v513_v1 = vpop.f32.mrf.mxu2 }
  0xeb   : > { %v520_v11 = vadd.f32 %v513_v1, %v471_v9 }
  0xed   : > { %v418_v4 = vpop.f32.mrf.mxu0  ;;  %v562_v6 = vpop.f32.mrf.mxu3 }
  0xee   : > { %v423_v12 = vadd.f32 %v418_v4, %v374_v8  ;;  %v569_v16 = vadd.f32 %v562_v6, %v520_v11 }
  0xef   : > { %v467_v7 = vpop.f32.mrf.mxu1 }
  0xf0   : > { %v472_v17 = vadd.f32 %v467_v7, %v423_v12 }
  0xf3   : > { %v516_v14 = vpop.f32.mrf.mxu2 }
  0xf4   : > { %v521_v21 = vadd.f32 %v516_v14, %v472_v17 }
  0xf6   : > { %v565_v23 = vpop.f32.mrf.mxu3 }
  0xf7   : > { %v570_v26 = vadd.f32 %v565_v23, %v521_v21 }
  0xfe   : > { %v608_v18 = vpop.f32.mrf.mxu0  ;;  %v611_v20 = vpop.f32.mrf.mxu1 }
  0xff   : > { %v617_v19 = vadd.f32 %v608_v18, %v568_v13  ;;  %v618_v22 = vadd.f32 %v611_v20, %v569_v16 }
 0x101   : > { %v624_v24 = vadd.f32 %v830_v15, %v617_v19  ;;  %v625_v25 = vadd.f32 %v830_v15, %v618_v22 }
 0x103   : > { %627 = vst [vmem:[%s180_s26] sm:$0xf] %v624_v24 }
 0x104   : > { %733 = vst [vmem:[%s180_s26 - $0x2] sm:$0xc0] %v624_v24 }
 0x105   : > { %734 = vst [vmem:[%s180_s26 + $0x6] sm:$0x3] %v625_v25  ;;  %v614_v27 = vpop.f32.mrf.mxu2 }
 0x106   : > { %735 = vst [vmem:[%s180_s26 + $0x4] sm:$0xf0] %v625_v25  ;;  %v619_v28 = vadd.f32 %v614_v27, %v570_v26 }
 0x108   : > { %v626_v29 = vadd.f32 %v830_v15, %v619_v28 }
 0x10a   : > { %736 = vst [vmem:[%s180_s26 + $0xa] sm:$0x3c] %v626_v29 }
 0x10b   : > { %888 = shalt.err (!%p885_p8)
}
 0x10c   : > { %s932_s9 = smov 64   ;;  %s933_s10 = smov 4  }
 0x10d   : > { %780 = dma.vmem_to_hbm [thread:$0]  (%p992_p5), %s649_s27, 256, %s651_s28, %s636_s16, %s932_s9, %s932_s9, %s933_s10  }
 0x10e PF: > { %p792_p9 = scmp.ge.s32.totalorder %s927_s15, 2  ;;  %s665_s11 = sand.u32 1, %s915_s12  }
 0x10f   : > { %s666_s17 = scalar_lea.sflag [#allocation4], %s665_s11 }
 0x110   : > { %p787_p10 = pnand %p792_p9, %p996_p6 }
 0x112   : > { %p788_p11 = pneg %p787_p10 }
 0x114   : > { %910 = dma.done.wait (%p788_p11), %s666_s17, 256  }
 0x115   : > { %912 = vsyncadd (%p788_p11), %s666_s17, 4294967040  ;;  %p14_p12 = scmp.ge.s32.totalorder %s979_s18, 4   ;;  %s1108_s12 = smov %s919_s13 }
 0x116   : > { %s1109_s13 = smov %s923_s14  ;;  %s1110_s14 = smov %s990_s21 }
 0x117   : > { %s1111_s15 = smov %s979_s18  ;;  %16 = sbr.rel (!%p14_p12) target bundleno = 4 (0x4), region = 83 }
 0x11c   :  { %672 = vsyncpa [#allocation3], 1 }
 0x11d   :  { %674 = vsyncpa [#allocation3 + $0x1], 1 }
 0x11e   :  { %675 = vsyncpa [#allocation4], 1 }
 0x11f   :  { %677 = vsyncpa [#allocation4 + $0x1], 1 }

// kernel: a_call__.12
= control target key start
LH: loop header
LB: loop body
LE: loop exit
PB: predicated region body
PF: predicated region fallthrough
CT: control target
= control target key end

     0   :  { %s551_s9 = smov 0   ;;  %s628_s0 = inlined_call_operand.vmem [shape: f32[2,8,8,128], index: 0, kind: input, shape index: {}]   ;;  %s629_s1 = inlined_call_operand.vmem [shape: f32[16,8], index: 1, kind: input, shape index: {}]   ;;  %s630_s2 = inlined_call_operand.vmem [shape: f32[2,16,16,128], index: 2, kind: output, shape index: {}]  }
   0x1 LB: > { %s454_s10 = sadd.s32 4294967295, %s534_s9   ;;  %p458_p0 = scmp.ge.s32.totalorder %s534_s9, 1  ;;  %s534_s9 = sphi %s551_s9, %s12_s9  }
   0x2   : > { %p112_p1 = scmp.lt.s32.totalorder %s534_s9, 3 }
   0x4   : > { %p113_p2 = pnand %p458_p0, %p112_p1 }
   0x5   : > { %p134_p3 = scmp.lt.s32.totalorder (!%p113_p2), %s454_s10, 1 }
   0x6   : > { %116 = sbr.rel (%p113_p2) target bundleno = 177 (0xb1), region = 28 }
   0xb   : > { %s632_s10 = smov (!%p134_p3, %s454_s10), 1  ;;  %v144_v0 = vld [vmem:[%s629_s1] sm:$0xff]  ;;  %vm147_vm0 = vcmask 64512   ;;  %v145_v9 = vld [vmem:[%s629_s1 + $0x8] sm:$0xff] }
   0xc   : > { %s518_s11 = sshll.u32 %s632_s10, 6  ;;  %s519_s19 = sshll.u32 %s632_s10, 8 }
   0xd   : > { %s138_s14 = scalar_lea.vmem %s628_s0, %s518_s11  ;;  %s591_s22 = scalar_lea.vmem %s630_s2, %s519_s19 }
   0xe   : > { %v474_v1 = vld [vmem:[%s138_s14 + $0x10] sm:$0xff]  ;;  %v481_v2 = vld [vmem:[%s138_s14 + $0x18] sm:$0xff]  ;;  %v146_v5 = vld [vmem:[%s138_s14] sm:$0xff] }
   0xf   : > { %v502_v3 = vld [vmem:[%s138_s14 + $0x30] sm:$0xff]  ;;  %230 = vmatpush.msra.mxu2 %v474_v1  ;;  %261 = vmatpush.msra.mxu3 %v481_v2  ;;  %v509_v4 = vld [vmem:[%s138_s14 + $0x38] sm:$0xff]  ;;  %v467_v6 = vld [vmem:[%s138_s14 + $0x8] sm:$0xff] }
  0x10   : > { %475 = vmatmul.msk.f32.vlgmr.msra.gmra.mxu2 %vm147_vm0, %v144_v0  ;;  %482 = vmatmul.msk.f32.vlgmr.msra.gmra.mxu3 %vm147_vm0, %v144_v0  ;;  %v488_v7 = vld [vmem:[%s138_s14 + $0x20] sm:$0xff]  ;;  %v495_v8 = vld [vmem:[%s138_s14 + $0x28] sm:$0xff] }
  0x11   : > { %354 = vmatpush.msrb.mxu2 %v502_v3  ;;  %385 = vmatpush.msrb.mxu3 %v509_v4 }
  0x12   : > { %169 = vmatpush.msra.mxu0 %v146_v5  ;;  %199 = vmatpush.msra.mxu1 %v467_v6 }
  0x13   : > { %463 = vmatmul.msk.f32.vlgmr.msra.gmra.mxu0 %vm147_vm0, %v144_v0  ;;  %468 = vmatmul.msk.f32.vlgmr.msra.gmra.mxu1 %vm147_vm0, %v144_v0 }
  0x14   : > { %292 = vmatpush.msrb.mxu0 %v488_v7  ;;  %323 = vmatpush.msrb.mxu1 %v495_v8 }
  0x18   : > { %476 = vmatmul.msk.f32.gmra.mxu2 %vm147_vm0, %v145_v9  ;;  %483 = vmatmul.msk.f32.gmra.mxu3 %vm147_vm0, %v145_v9 }
  0x1b   : > { %464 = vmatmul.msk.f32.gmra.mxu0 %vm147_vm0, %v145_v9  ;;  %469 = vmatmul.msk.f32.gmra.mxu1 %vm147_vm0, %v145_v9 }
  0x20   : > { %503 = vmatmul.msk.f32.vlgmr.msrb.gmra.mxu2 %vm147_vm0, %v144_v0  ;;  %510 = vmatmul.msk.f32.vlgmr.msrb.gmra.mxu3 %vm147_vm0, %v144_v0 }
  0x23   : > { %489 = vmatmul.msk.f32.vlgmr.msrb.gmra.mxu0 %vm147_vm0, %v144_v0  ;;  %496 = vmatmul.msk.f32.vlgmr.msrb.gmra.mxu1 %vm147_vm0, %v144_v0 }
  0x28   : > { %504 = vmatmul.msk.f32.gmra.mxu2 %vm147_vm0, %v145_v9  ;;  %511 = vmatmul.msk.f32.gmra.mxu3 %vm147_vm0, %v145_v9 }
  0x2b   : > { %490 = vmatmul.msk.f32.gmra.mxu0 %vm147_vm0, %v145_v9  ;;  %497 = vmatmul.msk.f32.gmra.mxu1 %vm147_vm0, %v145_v9 }
  0x90   : > { %v171_v10 = vpop.f32.mrf.mxu0  ;;  %v201_v11 = vpop.f32.mrf.mxu1 }
  0x91   : > { %177 = vst [vmem:[%s591_s22] sm:$0xff] %v171_v10 }
  0x92   : > { %465 = vst [vmem:[%s591_s22 + $0x10] sm:$0xff] %v171_v10 }
  0x93   : > { %470 = vst [vmem:[%s591_s22 + $0x20] sm:$0xff] %v201_v11  ;;  %v232_v12 = vpop.f32.mrf.mxu2  ;;  %v263_v13 = vpop.f32.mrf.mxu3 }
  0x94   : > { %472 = vst [vmem:[%s591_s22 + $0x30] sm:$0xff] %v201_v11 }
  0x95   : > { %477 = vst [vmem:[%s591_s22 + $0x40] sm:$0xff] %v232_v12 }
  0x96   : > { %479 = vst [vmem:[%s591_s22 + $0x50] sm:$0xff] %v232_v12 }
  0x97   : > { %484 = vst [vmem:[%s591_s22 + $0x60] sm:$0xff] %v263_v13 }
  0x98   : > { %486 = vst [vmem:[%s591_s22 + $0x70] sm:$0xff] %v263_v13  ;;  %v174_v14 = vpop.f32.mrf.mxu0  ;;  %v204_v15 = vpop.f32.mrf.mxu1 }
  0x99   : > { %178 = vst [vmem:[%s591_s22 + $0x8] sm:$0xff] %v174_v14 }
  0x9a   : > { %466 = vst [vmem:[%s591_s22 + $0x18] sm:$0xff] %v174_v14 }
  0x9b   : > { %471 = vst [vmem:[%s591_s22 + $0x28] sm:$0xff] %v204_v15  ;;  %v235_v16 = vpop.f32.mrf.mxu2  ;;  %v266_v17 = vpop.f32.mrf.mxu3 }
  0x9c   : > { %473 = vst [vmem:[%s591_s22 + $0x38] sm:$0xff] %v204_v15 }
  0x9d   : > { %478 = vst [vmem:[%s591_s22 + $0x48] sm:$0xff] %v235_v16 }
  0x9e   : > { %480 = vst [vmem:[%s591_s22 + $0x58] sm:$0xff] %v235_v16 }
  0x9f   : > { %485 = vst [vmem:[%s591_s22 + $0x68] sm:$0xff] %v266_v17 }
  0xa0   : > { %487 = vst [vmem:[%s591_s22 + $0x78] sm:$0xff] %v266_v17  ;;  %v294_v18 = vpop.f32.mrf.mxu0  ;;  %v325_v19 = vpop.f32.mrf.mxu1 }
  0xa1   : > { %491 = vst [vmem:[%s591_s22 + $0x80] sm:$0xff] %v294_v18 }
  0xa2   : > { %493 = vst [vmem:[%s591_s22 + $0x90] sm:$0xff] %v294_v18 }
  0xa3   : > { %498 = vst [vmem:[%s591_s22 + $0xa0] sm:$0xff] %v325_v19  ;;  %v356_v20 = vpop.f32.mrf.mxu2  ;;  %v387_v21 = vpop.f32.mrf.mxu3 }
  0xa4   : > { %500 = vst [vmem:[%s591_s22 + $0xb0] sm:$0xff] %v325_v19 }
  0xa5   : > { %505 = vst [vmem:[%s591_s22 + $0xc0] sm:$0xff] %v356_v20 }
  0xa6   : > { %507 = vst [vmem:[%s591_s22 + $0xd0] sm:$0xff] %v356_v20 }
  0xa7   : > { %512 = vst [vmem:[%s591_s22 + $0xe0] sm:$0xff] %v387_v21 }
  0xa8   : > { %514 = vst [vmem:[%s591_s22 + $0xf0] sm:$0xff] %v387_v21  ;;  %v297_v22 = vpop.f32.mrf.mxu0  ;;  %v328_v23 = vpop.f32.mrf.mxu1 }
  0xa9   : > { %492 = vst [vmem:[%s591_s22 + $0x88] sm:$0xff] %v297_v22 }
  0xaa   : > { %494 = vst [vmem:[%s591_s22 + $0x98] sm:$0xff] %v297_v22 }
  0xab   : > { %499 = vst [vmem:[%s591_s22 + $0xa8] sm:$0xff] %v328_v23  ;;  %v359_v24 = vpop.f32.mrf.mxu2  ;;  %v390_v25 = vpop.f32.mrf.mxu3 }
  0xac   : > { %501 = vst [vmem:[%s591_s22 + $0xb8] sm:$0xff] %v328_v23 }
  0xad   : > { %506 = vst [vmem:[%s591_s22 + $0xc8] sm:$0xff] %v359_v24 }
  0xae   : > { %508 = vst [vmem:[%s591_s22 + $0xd8] sm:$0xff] %v359_v24 }
  0xaf   : > { %513 = vst [vmem:[%s591_s22 + $0xe8] sm:$0xff] %v390_v25 }
  0xb0   : > { %515 = vst [vmem:[%s591_s22 + $0xf8] sm:$0xff] %v390_v25 }
  0xb1 PF: > { %s12_s9 = sadd.s32 1, %s534_s9  }
  0xb2   : > { %p9_p4 = scmp.ge.s32.totalorder %s12_s9, 4  }
  0xb4   :  { %11 = sbr.rel (!%p9_p4) target bundleno = 1 (0x1), region = 80 }

// kernel: a_call__.14
= control target key start
LH: loop header
LB: loop body
LE: loop exit
PB: predicated region body
PF: predicated region fallthrough
CT: control target
= control target key end

     0   :  { %9 = vsyncpa [#allocation3], 0  ;;  %s1141_s0 = inlined_call_operand.hbm [shape: f32[512,32], index: 0, kind: input, shape index: {}]   ;;  %s1142_s1 = inlined_call_operand.vmem [shape: f32[32,128], index: 1, kind: input, shape index: {}]   ;;  %s1143_s2 = inlined_call_operand.vmem [shape: f32[1,128], index: 2, kind: input, shape index: {}]   ;;  %s1144_s3 = inlined_call_operand.vmem [shape: f32[512,128], index: 3, kind: input, shape index: {}]   ;;  %s1145_s4 = inlined_call_operand.vmem [shape: f32[512,128], index: 4, kind: output, shape index: {}]  }
   0x1   :  { %11 = vsyncpa [#allocation3 + $0x1], 0  ;;  %s864_s15 = smov 0   ;;  %s866_s16 = smov 0  }
   0x2   :  { %s868_s17 = smov 0   ;;  %s870_s18 = smov 0  }
   0x3 LB: > { %s669_s19 = sadd.s32 4294967295, %s835_s18   ;;  %s884_s20 = sadd.s32 1, %s835_s18   ;;  %s835_s18 = sphi %s870_s18, %s1152_s18   ;;  %s831_s17 = sphi %s868_s17, %s1151_s17   ;;  %s827_s16 = sphi %s866_s16, %s1150_s16   ;;  %s823_s15 = sphi %s864_s15, %s1149_s15  }
   0x4   : > { %s21_s21 = ssub.s32 %s835_s18, %s884_s20  ;;  %s24_s22 = sadd.s32 1, %s831_s17 }
   0x5   : > { %p22_p0 = scmp.eq.s32.totalorder %s21_s21, 0  ;;  %p31_p1 = scmp.ne.s32.totalorder %s831_s17, %s827_s16 }
   0x6   : > { %p32_p2 = scmp.eq.s32.totalorder %s835_s18, 0  ;;  %p37_p3 = scmp.ne.s32.totalorder %s827_s16, %s823_s15 }
   0x7   : > { %s894_s23 = scalar_select %p22_p0, %s831_s17, %s24_s22  }
   0x8   : > { %p896_p4 = por %p32_p2, %p31_p1  ;;  %p38_p5 = scmp.eq.s32.totalorder %s669_s19, 0 }
   0x9   : > { %p735_p6 = scmp.lt.s32.totalorder %s835_s18, 2  ;;  %s161_s26 = sand.u32 1, %s831_s17  }
   0xa   : > { %p903_p7 = por %p38_p5, %p37_p3  ;;  %s673_s27 = sshll.u32 %s161_s26, 8 }
   0xb   : > { %s716_s28 = sshll.u32 %s835_s18, 8  ;;  %s165_s6 = scalar_lea.vmem [#allocation2], %s673_s27 }
   0xc   : > { %s170_s5 = scalar_lea.hbm %s1141_s0, %s716_s28  ;;  %s173_s7 = sshll.u32 %s165_s6, 4  ;;  %s174_s7 = int_to_ptr.vmem [resolvable:$true] %s173_s7 }
   0xd   : > { %s171_s8 = sshll.u32 %s170_s5, 4  ;;  %p914_p8 = pnand %p735_p6, %p896_p4  ;;  %s172_s8 = int_to_ptr.hbm [resolvable:$true] %s171_s8 }
   0xe   : > { %p676_p9 = scmp.ge.s32.totalorder %s835_s18, 1  ;;  %s162_s10 = scalar_lea.sflag [#allocation3], %s161_s26 }
   0xf   : > { %s771_s11 = sshra.s32 %s172_s8, 4  ;;  %p775_p11 = pneg %p914_p8  ;;  %s772_s11 = int_to_ptr.hbm [resolvable:$true] %s771_s11 }
  0x10   : > { %s773_s12 = scalar_lea.hbm %s772_s11, 256  ;;  %s778_s15 = scalar_lea.hbm %s1141_s0, 512 }
  0x11   : > { %p774_p10 = scmp.ne.s32.totalorder %s772_s11, %s773_s12  ;;  %p779_p0 = scmp.lt.s32.totalorder %s772_s11, %s1141_s0 }
  0x12   : > { %p780_p1 = scmp.lt.s32.totalorder %s778_s15, %s773_s12 }
  0x13   : > { %p776_p12 = pnand %p775_p11, %p774_p10 }
  0x14   : > { %p781_p2 = por %p780_p1, %p779_p0 }
  0x15   : > { %p777_p13 = pneg %p776_p12 }
  0x17   : > { %p782_p3 = pnand %p781_p2, %p777_p13 }
  0x19   : > { %785 = shalt.err (!%p782_p3)
}
  0x1a   : > { %s837_s24 = smov 128   ;;  %s838_s26 = smov 8  }
  0x1b   : > { %734 = dma.hbm_to_vmem [thread:$0]  (!%p914_p8), %s172_s8, 4096, %s174_s7, %s162_s10, %s837_s24, %s837_s24, %s838_s26  }
  0x1c   : > { %p190_p4 = scmp.lt.s32.totalorder %s835_s18, 3 }
  0x1e   : > { %p191_p5 = pnand %p676_p9, %p190_p4 }
  0x1f   : > { %s196_s27 = sand.u32 (!%p191_p5), 1, %s827_s16  }
  0x20   : > { %194 = sbr.rel (%p191_p5) target bundleno = 240 (0xf0), region = 36  ;;  %s677_s28 = sshll.u32 (!%p191_p5), %s196_s27, 8 }
  0x21   : > { %s197_s29 = scalar_lea.sflag (!%p191_p5), [#allocation3], %s196_s27  ;;  %s933_s30 = scalar_lea.vmem (!%p191_p5), [#allocation2], %s677_s28 }
  0x25   : > { %818 = dma.done.wait (%p903_p7), %s197_s29, 4096  }
  0x26   : > { %820 = vsyncadd (%p903_p7), %s197_s29, 4294963200  ;;  %v279_v0 = vld [vmem:[%s1142_s1 + $0x18] sm:$0xff]  ;;  %v278_v1 = vld [vmem:[%s1142_s1 + $0x10] sm:$0xff]  ;;  %vm284_vm0 = vcmask 261120   ;;  %s678_s12 = sshll.u32 %s669_s19, 5 }
  0x27   : > { %718 = vmatpush.msra.mxu2 %v279_v0  ;;  %719 = vmatpush.msra.mxu3 %v279_v0  ;;  %v277_v2 = vld [vmem:[%s1142_s1 + $0x8] sm:$0xff]  ;;  %v276_v3 = vld [vmem:[%s1142_s1] sm:$0xff]  ;;  %v262_v12 = vld [vmem:[%s933_s30 + $0x90] sm:$0xff]  ;;  %p233_p6 = scmp.lt.s32.totalorder %s678_s12, 63 }
  0x28   : > { %393 = vmatpush.msra.mxu0 %v279_v0  ;;  %717 = vmatpush.msra.mxu1 %v279_v0  ;;  %v260_v4 = vld [vmem:[%s933_s30 + $0x80] sm:$0xff]  ;;  %v261_v8 = vld [vmem:[%s933_s30 + $0x88] sm:$0xff]  ;;  %v270_v13 = vld [vmem:[%s933_s30 + $0xd0] sm:$0xff] }
  0x29   : > { %721 = vmatpush.msra.mxu2 %v278_v1  ;;  %722 = vmatpush.msra.mxu3 %v278_v1  ;;  %v268_v5 = vld [vmem:[%s933_s30 + $0xc0] sm:$0xff]  ;;  %v269_v9 = vld [vmem:[%s933_s30 + $0xc8] sm:$0xff]  ;;  %v246_v14 = vld [vmem:[%s933_s30 + $0x10] sm:$0xff]  ;;  %s1154_s12 = smov (!%p233_p6, %s678_s12), 63 }
  0x2a   : > { %394 = vmatpush.msra.mxu0 %v278_v1  ;;  %720 = vmatpush.msra.mxu1 %v278_v1  ;;  %v244_v6 = vld [vmem:[%s933_s30] sm:$0xff]  ;;  %v245_v10 = vld [vmem:[%s933_s30 + $0x8] sm:$0xff]  ;;  %v254_v15 = vld [vmem:[%s933_s30 + $0x50] sm:$0xff]  ;;  %s679_s13 = sshll.u32 %s1154_s12, 3 }
  0x2b   : > { %724 = vmatpush.msra.mxu2 %v277_v2  ;;  %725 = vmatpush.msra.mxu3 %v277_v2  ;;  %v252_v7 = vld [vmem:[%s933_s30 + $0x40] sm:$0xff]  ;;  %v253_v11 = vld [vmem:[%s933_s30 + $0x48] sm:$0xff]  ;;  %v263_v16 = vld [vmem:[%s933_s30 + $0x98] sm:$0xff]  ;;  %s1020_s21 = scalar_lea.vmem %s1144_s3, %s679_s13  ;;  %s1034_s26 = scalar_lea.vmem %s1145_s4, %s679_s13 }
  0x2c   : > { %395 = vmatpush.msra.mxu0 %v277_v2  ;;  %723 = vmatpush.msra.mxu1 %v277_v2  ;;  %v271_v17 = vld [vmem:[%s933_s30 + $0xd8] sm:$0xff]  ;;  %v264_v20 = vld [vmem:[%s933_s30 + $0xa0] sm:$0xff]  ;;  %v265_v24 = vld [vmem:[%s933_s30 + $0xa8] sm:$0xff] }
  0x2d   : > { %727 = vmatpush.msra.mxu2 %v276_v3  ;;  %728 = vmatpush.msra.mxu3 %v276_v3  ;;  %v247_v18 = vld [vmem:[%s933_s30 + $0x18] sm:$0xff]  ;;  %v272_v21 = vld [vmem:[%s933_s30 + $0xe0] sm:$0xff]  ;;  %v273_v25 = vld [vmem:[%s933_s30 + $0xe8] sm:$0xff] }
  0x2e   : > { %698 = vmatmul.msk.f32.vlgmr.msra.gmra.mxu2 %vm284_vm0, %v260_v4  ;;  %706 = vmatmul.msk.f32.vlgmr.msra.gmra.mxu3 %vm284_vm0, %v268_v5  ;;  %v255_v19 = vld [vmem:[%s933_s30 + $0x58] sm:$0xff]  ;;  %v248_v22 = vld [vmem:[%s933_s30 + $0x20] sm:$0xff]  ;;  %v249_v26 = vld [vmem:[%s933_s30 + $0x28] sm:$0xff] }
  0x2f   : > { %396 = vmatpush.msra.mxu0 %v276_v3  ;;  %726 = vmatpush.msra.mxu1 %v276_v3  ;;  %v256_v23 = vld [vmem:[%s933_s30 + $0x60] sm:$0xff]  ;;  %v257_v27 = vld [vmem:[%s933_s30 + $0x68] sm:$0xff]  ;;  %v266_v28 = vld [vmem:[%s933_s30 + $0xb0] sm:$0xff] }
  0x30   : > { %682 = vmatmul.msk.f32.vlgmr.msra.gmra.mxu0 %vm284_vm0, %v244_v6  ;;  %690 = vmatmul.msk.f32.vlgmr.msra.gmra.mxu1 %vm284_vm0, %v252_v7  ;;  %v274_v29 = vld [vmem:[%s933_s30 + $0xf0] sm:$0xff]  ;;  %v267_v32 = vld [vmem:[%s933_s30 + $0xb8] sm:$0xff]  ;;  %v1025_v36 = vld [vmem:[%s1143_s2] ss:$0 sm:$0xff] }
  0x31   : > { %v250_v30 = vld [vmem:[%s933_s30 + $0x30] sm:$0xff]  ;;  %v275_v33 = vld [vmem:[%s933_s30 + $0xf8] sm:$0xff]  ;;  %v494_v38 = vld [vmem:[%s1020_s21] sm:$0xff] }
  0x32   : > { %v258_v31 = vld [vmem:[%s933_s30 + $0x70] sm:$0xff]  ;;  %v251_v34 = vld [vmem:[%s933_s30 + $0x38] sm:$0xff]  ;;  %v502_v40 = vld [vmem:[%s1020_s21 + $0x40] sm:$0xff] }
  0x33   : > { %v259_v35 = vld [vmem:[%s933_s30 + $0x78] sm:$0xff]  ;;  %v510_v46 = vld [vmem:[%s1020_s21 + $0x80] sm:$0xff]  ;;  %v495_v54 = vld [vmem:[%s1020_s21 + $0x8] sm:$0xff] }
  0x34   : > { %v518_v48 = vld [vmem:[%s1020_s21 + $0xc0] sm:$0xff]  ;;  %v503_v56 = vld [vmem:[%s1020_s21 + $0x48] sm:$0xff]  ;;  %v496_v6 = vld [vmem:[%s1020_s21 + $0x10] sm:$0xff] }
  0x35   : > { %v511_v62 = vld [vmem:[%s1020_s21 + $0x88] sm:$0xff] }
  0x36   : > { %699 = vmatmul.msk.f32.gmra.mxu2 %vm284_vm0, %v261_v8  ;;  %707 = vmatmul.msk.f32.gmra.mxu3 %vm284_vm0, %v269_v9  ;;  %v519_v0 = vld [vmem:[%s1020_s21 + $0xc8] sm:$0xff]  ;;  %v504_v8 = vld [vmem:[%s1020_s21 + $0x50] sm:$0xff] }
  0x38   : > { %683 = vmatmul.msk.f32.gmra.mxu0 %vm284_vm0, %v245_v10  ;;  %691 = vmatmul.msk.f32.gmra.mxu1 %vm284_vm0, %v253_v11 }
  0x3e   : > { %700 = vmatmul.msk.f32.gmra.mxu2 %vm284_vm0, %v262_v12  ;;  %708 = vmatmul.msk.f32.gmra.mxu3 %vm284_vm0, %v270_v13 }
  0x40   : > { %684 = vmatmul.msk.f32.gmra.mxu0 %vm284_vm0, %v246_v14  ;;  %692 = vmatmul.msk.f32.gmra.mxu1 %vm284_vm0, %v254_v15  ;;  %v512_v14 = vld [vmem:[%s1020_s21 + $0x90] sm:$0xff] }
  0x46   : > { %701 = vmatmul.msk.f32.gmra.mxu2 %vm284_vm0, %v263_v16  ;;  %709 = vmatmul.msk.f32.gmra.mxu3 %vm284_vm0, %v271_v17  ;;  %v520_v16 = vld [vmem:[%s1020_s21 + $0xd0] sm:$0xff] }
  0x48   : > { %685 = vmatmul.msk.f32.gmra.mxu0 %vm284_vm0, %v247_v18  ;;  %693 = vmatmul.msk.f32.gmra.mxu1 %vm284_vm0, %v255_v19 }
  0x4e   : > { %702 = vmatmul.msk.f32.gmra.mxu2 %vm284_vm0, %v264_v20  ;;  %710 = vmatmul.msk.f32.gmra.mxu3 %vm284_vm0, %v272_v21 }
  0x50   : > { %686 = vmatmul.msk.f32.gmra.mxu0 %vm284_vm0, %v248_v22  ;;  %694 = vmatmul.msk.f32.gmra.mxu1 %vm284_vm0, %v256_v23  ;;  %v497_v22 = vld [vmem:[%s1020_s21 + $0x18] sm:$0xff] }
  0x56   : > { %703 = vmatmul.msk.f32.gmra.mxu2 %vm284_vm0, %v265_v24  ;;  %711 = vmatmul.msk.f32.gmra.mxu3 %vm284_vm0, %v273_v25  ;;  %v505_v24 = vld [vmem:[%s1020_s21 + $0x58] sm:$0xff] }
  0x58   : > { %687 = vmatmul.msk.f32.gmra.mxu0 %vm284_vm0, %v249_v26  ;;  %695 = vmatmul.msk.f32.gmra.mxu1 %vm284_vm0, %v257_v27 }
  0x5e   : > { %704 = vmatmul.msk.f32.gmra.mxu2 %vm284_vm0, %v266_v28  ;;  %712 = vmatmul.msk.f32.gmra.mxu3 %vm284_vm0, %v274_v29 }
  0x60   : > { %688 = vmatmul.msk.f32.gmra.mxu0 %vm284_vm0, %v250_v30  ;;  %696 = vmatmul.msk.f32.gmra.mxu1 %vm284_vm0, %v258_v31  ;;  %v513_v30 = vld [vmem:[%s1020_s21 + $0x98] sm:$0xff] }
  0x66   : > { %705 = vmatmul.msk.f32.gmra.mxu2 %vm284_vm0, %v267_v32  ;;  %713 = vmatmul.msk.f32.gmra.mxu3 %vm284_vm0, %v275_v33  ;;  %v521_v32 = vld [vmem:[%s1020_s21 + $0xd8] sm:$0xff] }
  0x68   : > { %689 = vmatmul.msk.f32.gmra.mxu0 %vm284_vm0, %v251_v34  ;;  %697 = vmatmul.msk.f32.gmra.mxu1 %vm284_vm0, %v259_v35 }
  0xad   : > { %v398_v37 = vpop.f32.mrf.mxu0  ;;  %v422_v39 = vpop.f32.mrf.mxu1 }
  0xae   : > { %v399_v41 = vadd.f32 %v1025_v36, %v398_v37  ;;  %v423_v42 = vadd.f32 %v1025_v36, %v422_v39  ;;  %v498_v39 = vld [vmem:[%s1020_s21 + $0x20] sm:$0xff] }
  0xb0   : > { %v526_v43 = vadd.f32 %v494_v38, %v399_v41  ;;  %v534_v44 = vadd.f32 %v502_v40, %v423_v42  ;;  %v506_v41 = vld [vmem:[%s1020_s21 + $0x60] sm:$0xff] }
  0xb1   : > { %v446_v45 = vpop.f32.mrf.mxu2  ;;  %v470_v47 = vpop.f32.mrf.mxu3 }
  0xb2   : > { %558 = vst [vmem:[%s1034_s26] sm:$0xff] %v526_v43  ;;  %v447_v49 = vadd.f32 %v1025_v36, %v446_v45  ;;  %v471_v50 = vadd.f32 %v1025_v36, %v470_v47  ;;  %v514_v47 = vld [vmem:[%s1020_s21 + $0xa0] sm:$0xff] }
  0xb3   : > { %566 = vst [vmem:[%s1034_s26 + $0x40] sm:$0xff] %v534_v44 }
  0xb4   : > { %v542_v51 = vadd.f32 %v510_v46, %v447_v49  ;;  %v550_v52 = vadd.f32 %v518_v48, %v471_v50  ;;  %v522_v49 = vld [vmem:[%s1020_s21 + $0xe0] sm:$0xff] }
  0xb5   : > { %v401_v53 = vpop.f32.mrf.mxu0  ;;  %v425_v55 = vpop.f32.mrf.mxu1 }
  0xb6   : > { %574 = vst [vmem:[%s1034_s26 + $0x80] sm:$0xff] %v542_v51  ;;  %v402_v57 = vadd.f32 %v1025_v36, %v401_v53  ;;  %v426_v58 = vadd.f32 %v1025_v36, %v425_v55  ;;  %v499_v55 = vld [vmem:[%s1020_s21 + $0x28] sm:$0xff] }
  0xb7   : > { %582 = vst [vmem:[%s1034_s26 + $0xc0] sm:$0xff] %v550_v52 }
  0xb8   : > { %v527_v59 = vadd.f32 %v495_v54, %v402_v57  ;;  %v535_v60 = vadd.f32 %v503_v56, %v426_v58  ;;  %v507_v57 = vld [vmem:[%s1020_s21 + $0x68] sm:$0xff] }
  0xb9   : > { %v449_v61 = vpop.f32.mrf.mxu2  ;;  %v473_v63 = vpop.f32.mrf.mxu3 }
  0xba   : > { %559 = vst [vmem:[%s1034_s26 + $0x8] sm:$0xff] %v527_v59  ;;  %v450_v1 = vadd.f32 %v1025_v36, %v449_v61  ;;  %v474_v2 = vadd.f32 %v1025_v36, %v473_v63  ;;  %v515_v63 = vld [vmem:[%s1020_s21 + $0xa8] sm:$0xff] }
  0xbb   : > { %567 = vst [vmem:[%s1034_s26 + $0x48] sm:$0xff] %v535_v60 }
  0xbc   : > { %v543_v3 = vadd.f32 %v511_v62, %v450_v1  ;;  %v551_v4 = vadd.f32 %v519_v0, %v474_v2  ;;  %v523_v1 = vld [vmem:[%s1020_s21 + $0xe8] sm:$0xff] }
  0xbd   : > { %v404_v5 = vpop.f32.mrf.mxu0  ;;  %v428_v7 = vpop.f32.mrf.mxu1 }
  0xbe   : > { %575 = vst [vmem:[%s1034_s26 + $0x88] sm:$0xff] %v543_v3  ;;  %v405_v9 = vadd.f32 %v1025_v36, %v404_v5  ;;  %v429_v10 = vadd.f32 %v1025_v36, %v428_v7  ;;  %v500_v7 = vld [vmem:[%s1020_s21 + $0x30] sm:$0xff] }
  0xbf   : > { %583 = vst [vmem:[%s1034_s26 + $0xc8] sm:$0xff] %v551_v4 }
  0xc0   : > { %v528_v11 = vadd.f32 %v496_v6, %v405_v9  ;;  %v536_v12 = vadd.f32 %v504_v8, %v429_v10  ;;  %v508_v9 = vld [vmem:[%s1020_s21 + $0x70] sm:$0xff] }
  0xc1   : > { %v452_v13 = vpop.f32.mrf.mxu2  ;;  %v476_v15 = vpop.f32.mrf.mxu3 }
  0xc2   : > { %560 = vst [vmem:[%s1034_s26 + $0x10] sm:$0xff] %v528_v11  ;;  %v453_v17 = vadd.f32 %v1025_v36, %v452_v13  ;;  %v477_v18 = vadd.f32 %v1025_v36, %v476_v15  ;;  %v516_v15 = vld [vmem:[%s1020_s21 + $0xb0] sm:$0xff] }
  0xc3   : > { %568 = vst [vmem:[%s1034_s26 + $0x50] sm:$0xff] %v536_v12 }
  0xc4   : > { %v544_v19 = vadd.f32 %v512_v14, %v453_v17  ;;  %v552_v20 = vadd.f32 %v520_v16, %v477_v18  ;;  %v524_v17 = vld [vmem:[%s1020_s21 + $0xf0] sm:$0xff] }
  0xc5   : > { %v407_v21 = vpop.f32.mrf.mxu0  ;;  %v431_v23 = vpop.f32.mrf.mxu1 }
  0xc6   : > { %576 = vst [vmem:[%s1034_s26 + $0x90] sm:$0xff] %v544_v19  ;;  %v408_v25 = vadd.f32 %v1025_v36, %v407_v21  ;;  %v432_v26 = vadd.f32 %v1025_v36, %v431_v23  ;;  %v501_v23 = vld [vmem:[%s1020_s21 + $0x38] sm:$0xff] }
  0xc7   : > { %584 = vst [vmem:[%s1034_s26 + $0xd0] sm:$0xff] %v552_v20 }
  0xc8   : > { %v529_v27 = vadd.f32 %v497_v22, %v408_v25  ;;  %v537_v28 = vadd.f32 %v505_v24, %v432_v26  ;;  %v509_v25 = vld [vmem:[%s1020_s21 + $0x78] sm:$0xff] }
  0xc9   : > { %v455_v29 = vpop.f32.mrf.mxu2  ;;  %v479_v31 = vpop.f32.mrf.mxu3 }
  0xca   : > { %561 = vst [vmem:[%s1034_s26 + $0x18] sm:$0xff] %v529_v27  ;;  %v456_v33 = vadd.f32 %v1025_v36, %v455_v29  ;;  %v480_v34 = vadd.f32 %v1025_v36, %v479_v31  ;;  %v517_v31 = vld [vmem:[%s1020_s21 + $0xb8] sm:$0xff] }
  0xcb   : > { %569 = vst [vmem:[%s1034_s26 + $0x58] sm:$0xff] %v537_v28 }
  0xcc   : > { %v545_v35 = vadd.f32 %v513_v30, %v456_v33  ;;  %v553_v37 = vadd.f32 %v521_v32, %v480_v34  ;;  %v525_v33 = vld [vmem:[%s1020_s21 + $0xf8] sm:$0xff] }
  0xcd   : > { %v410_v38 = vpop.f32.mrf.mxu0  ;;  %v434_v40 = vpop.f32.mrf.mxu1 }
  0xce   : > { %577 = vst [vmem:[%s1034_s26 + $0x98] sm:$0xff] %v545_v35  ;;  %v411_v42 = vadd.f32 %v1025_v36, %v410_v38  ;;  %v435_v43 = vadd.f32 %v1025_v36, %v434_v40 }
  0xcf   : > { %585 = vst [vmem:[%s1034_s26 + $0xd8] sm:$0xff] %v553_v37 }
  0xd0   : > { %v530_v44 = vadd.f32 %v498_v39, %v411_v42  ;;  %v538_v45 = vadd.f32 %v506_v41, %v435_v43 }
  0xd1   : > { %v458_v46 = vpop.f32.mrf.mxu2  ;;  %v482_v48 = vpop.f32.mrf.mxu3 }
  0xd2   : > { %562 = vst [vmem:[%s1034_s26 + $0x20] sm:$0xff] %v530_v44  ;;  %v459_v50 = vadd.f32 %v1025_v36, %v458_v46  ;;  %v483_v51 = vadd.f32 %v1025_v36, %v482_v48 }
  0xd3   : > { %570 = vst [vmem:[%s1034_s26 + $0x60] sm:$0xff] %v538_v45 }
  0xd4   : > { %v546_v52 = vadd.f32 %v514_v47, %v459_v50  ;;  %v554_v53 = vadd.f32 %v522_v49, %v483_v51 }
  0xd5   : > { %v413_v54 = vpop.f32.mrf.mxu0  ;;  %v437_v56 = vpop.f32.mrf.mxu1 }
  0xd6   : > { %578 = vst [vmem:[%s1034_s26 + $0xa0] sm:$0xff] %v546_v52  ;;  %v414_v58 = vadd.f32 %v1025_v36, %v413_v54  ;;  %v438_v59 = vadd.f32 %v1025_v36, %v437_v56 }
  0xd7   : > { %586 = vst [vmem:[%s1034_s26 + $0xe0] sm:$0xff] %v554_v53 }
  0xd8   : > { %v531_v60 = vadd.f32 %v499_v55, %v414_v58  ;;  %v539_v61 = vadd.f32 %v507_v57, %v438_v59 }
  0xd9   : > { %v461_v62 = vpop.f32.mrf.mxu2  ;;  %v485_v0 = vpop.f32.mrf.mxu3 }
  0xda   : > { %563 = vst [vmem:[%s1034_s26 + $0x28] sm:$0xff] %v531_v60  ;;  %v462_v2 = vadd.f32 %v1025_v36, %v461_v62  ;;  %v486_v3 = vadd.f32 %v1025_v36, %v485_v0 }
  0xdb   : > { %571 = vst [vmem:[%s1034_s26 + $0x68] sm:$0xff] %v539_v61 }
  0xdc   : > { %v547_v4 = vadd.f32 %v515_v63, %v462_v2  ;;  %v555_v5 = vadd.f32 %v523_v1, %v486_v3 }
  0xdd   : > { %v416_v6 = vpop.f32.mrf.mxu0  ;;  %v440_v8 = vpop.f32.mrf.mxu1 }
  0xde   : > { %579 = vst [vmem:[%s1034_s26 + $0xa8] sm:$0xff] %v547_v4  ;;  %v417_v10 = vadd.f32 %v1025_v36, %v416_v6  ;;  %v441_v11 = vadd.f32 %v1025_v36, %v440_v8 }
  0xdf   : > { %587 = vst [vmem:[%s1034_s26 + $0xe8] sm:$0xff] %v555_v5 }
  0xe0   : > { %v532_v12 = vadd.f32 %v500_v7, %v417_v10  ;;  %v540_v13 = vadd.f32 %v508_v9, %v441_v11 }
  0xe1   : > { %v464_v14 = vpop.f32.mrf.mxu2  ;;  %v488_v16 = vpop.f32.mrf.mxu3 }
  0xe2   : > { %564 = vst [vmem:[%s1034_s26 + $0x30] sm:$0xff] %v532_v12  ;;  %v465_v18 = vadd.f32 %v1025_v36, %v464_v14  ;;  %v489_v19 = vadd.f32 %v1025_v36, %v488_v16 }
  0xe3   : > { %572 = vst [vmem:[%s1034_s26 + $0x70] sm:$0xff] %v540_v13 }
  0xe4   : > { %v548_v20 = vadd.f32 %v516_v15, %v465_v18  ;;  %v556_v21 = vadd.f32 %v524_v17, %v489_v19 }
  0xe5   : > { %v419_v22 = vpop.f32.mrf.mxu0  ;;  %v443_v24 = vpop.f32.mrf.mxu1 }
  0xe6   : > { %580 = vst [vmem:[%s1034_s26 + $0xb0] sm:$0xff] %v548_v20  ;;  %v420_v26 = vadd.f32 %v1025_v36, %v419_v22  ;;  %v444_v27 = vadd.f32 %v1025_v36, %v443_v24 }
  0xe7   : > { %588 = vst [vmem:[%s1034_s26 + $0xf0] sm:$0xff] %v556_v21 }
  0xe8   : > { %v533_v28 = vadd.f32 %v501_v23, %v420_v26  ;;  %v541_v29 = vadd.f32 %v509_v25, %v444_v27 }
  0xe9   : > { %v467_v30 = vpop.f32.mrf.mxu2  ;;  %v491_v32 = vpop.f32.mrf.mxu3 }
  0xea   : > { %565 = vst [vmem:[%s1034_s26 + $0x38] sm:$0xff] %v533_v28  ;;  %v468_v34 = vadd.f32 %v1025_v36, %v467_v30  ;;  %v492_v35 = vadd.f32 %v1025_v36, %v491_v32 }
  0xeb   : > { %573 = vst [vmem:[%s1034_s26 + $0x78] sm:$0xff] %v541_v29 }
  0xec   : > { %v549_v37 = vadd.f32 %v517_v31, %v468_v34  ;;  %v557_v38 = vadd.f32 %v525_v33, %v492_v35 }
  0xee   : > { %581 = vst [vmem:[%s1034_s26 + $0xb8] sm:$0xff] %v549_v37 }
  0xef   : > { %589 = vst [vmem:[%s1034_s26 + $0xf8] sm:$0xff] %v557_v38 }
  0xf0 PF: > { %p14_p7 = scmp.ge.s32.totalorder %s884_s20, 4   ;;  %s1149_s15 = smov %s827_s16 }
  0xf1   : > { %s1150_s16 = smov %s831_s17  ;;  %s1151_s17 = smov %s894_s23 }
  0xf2   : > { %s1152_s18 = smov %s884_s20  ;;  %16 = sbr.rel (!%p14_p7) target bundleno = 3 (0x3), region = 79 }
  0xf7   :  { %612 = vsyncpa [#allocation3], 1 }
  0xf8   :  { %614 = vsyncpa [#allocation3 + $0x1], 1 }

// kernel: a_call__.13
= control target key start
LH: loop header
LB: loop body
LE: loop exit
PB: predicated region body
PF: predicated region fallthrough
CT: control target
= control target key end

     0   :  { %8 = vsyncpa [#allocation3], 0  ;;  %s2086_s0 = inlined_call_operand.vmem [shape: f32[2,110,128], index: 0, kind: input, shape index: {}]   ;;  %s2087_s1 = inlined_call_operand.vmem [shape: f32[9,128,128], index: 1, kind: input, shape index: {}]   ;;  %s2088_s2 = inlined_call_operand.vmem [shape: f32[1,128], index: 2, kind: input, shape index: {}]   ;;  %s2089_s3 = inlined_call_operand.hbm [shape: f32[2,8,8,128], index: 3, kind: output, shape index: {}]  }
   0x1   :  { %10 = vsyncpa [#allocation3 + $0x1], 0  ;;  %s1347_s12 = smov 0   ;;  %s1349_s13 = smov 0  }
   0x2   :  { %s1351_s14 = smov 0   ;;  %s1353_s15 = smov 0  }
   0x3 LB: > { %s1368_s16 = sadd.s32 4294967295, %s1323_s15   ;;  %s1017_s17 = sadd.s32 4294967294, %s1323_s15   ;;  %s1323_s15 = sphi %s1353_s15, %s2095_s15   ;;  %s1319_s14 = sphi %s1351_s14, %s2094_s14   ;;  %s1315_s13 = sphi %s1349_s13, %s2093_s13   ;;  %s1311_s12 = sphi %s1347_s12, %s2092_s12  }
   0x4   : > { %s1372_s18 = sadd.s32 1, %s1323_s15   ;;  %s91_s19 = sadd.s32 1, %s1319_s14 }
   0x5   : > { %s88_s20 = ssub.s32 %s1323_s15, %s1372_s18  ;;  %p101_p0 = scmp.ne.s32.totalorder %s1319_s14, %s1315_s13 }
   0x6   : > { %p89_p1 = scmp.eq.s32.totalorder %s88_s20, 0  ;;  %p102_p2 = scmp.eq.s32.totalorder %s1368_s16, 1 }
   0x7   : > { %p107_p3 = scmp.ne.s32.totalorder %s1315_s13, %s1311_s12  ;;  %p108_p4 = scmp.eq.s32.totalorder %s1017_s17, 1 }
   0x8   : > { %s1383_s21 = scalar_select %p89_p1, %s1319_s14, %s91_s19  }
   0x9   : > { %p1385_p5 = por %p102_p2, %p101_p0  ;;  %p1389_p6 = por %p108_p4, %p107_p3 }
   0xa   : > { %p1020_p7 = scmp.ge.s32.totalorder %s1323_s15, 1  ;;  %p140_p8 = scmp.lt.s32.totalorder %s1323_s15, 3 }
   0xc   : > { %p141_p9 = pnand %p1020_p7, %p140_p8 }
   0xd   : > { %p164_p10 = scmp.lt.s32.totalorder (!%p141_p9), %s1368_s16, 1  ;;  %s1169_s29 = sshll.u32 (!%p141_p9), %s1368_s16, 6 }
   0xe   : > { %144 = sbr.rel (%p141_p9) target bundleno = 379 (0x17b), region = 32  ;;  %s951_s5 = scalar_lea.hbm (!%p141_p9), %s2089_s3, %s1169_s29 }
   0xf   : > { %s954_s7 = sshll.u32 (!%p141_p9), %s951_s5, 4  ;;  %s1281_s17 = scalar_lea.hbm (!%p141_p9), %s2089_s3, 128  ;;  %s955_s7 = int_to_ptr.hbm [resolvable:$true] %s954_s7 }
  0x13   : > { %v1038_v0 = vld [vmem:[%s2087_s1 + $0xf8] sm:$0xff]  ;;  %v1037_v1 = vld [vmem:[%s2087_s1 + $0xf0] sm:$0xff]  ;;  %v1036_v2 = vld [vmem:[%s2087_s1 + $0xe8] sm:$0xff]  ;;  %s165_s26 = scalar_select %p164_p10, %s1368_s16, 1 }
  0x14   : > { %1170 = vmatpush.msra.mxu1 %v1038_v0  ;;  %1171 = vmatpush.msra.mxu2 %v1038_v0  ;;  %v1035_v3 = vld [vmem:[%s2087_s1 + $0xe0] sm:$0xff]  ;;  %v1070_v4 = vld [vmem:[%s2087_s1 + $0x1f8] sm:$0xff]  ;;  %v1069_v5 = vld [vmem:[%s2087_s1 + $0x1f0] sm:$0xff] }
  0x15   : > { %222 = vmatpush.msra.mxu0 %v1038_v0  ;;  %v1034_v6 = vld [vmem:[%s2087_s1 + $0xd8] sm:$0xff]  ;;  %427 = vmatpush.msra.mxu3 %v1070_v4  ;;  %v1068_v7 = vld [vmem:[%s2087_s1 + $0x1e8] sm:$0xff]  ;;  %v1033_v8 = vld [vmem:[%s2087_s1 + $0xd0] sm:$0xff]  ;;  %s1218_s8 = smul.u32 112, %s165_s26 }
  0x16   : > { %1172 = vmatpush.msra.mxu1 %v1037_v1  ;;  %1173 = vmatpush.msra.mxu2 %v1037_v1  ;;  %v1067_v9 = vld [vmem:[%s2087_s1 + $0x1e0] sm:$0xff]  ;;  %v1032_v10 = vld [vmem:[%s2087_s1 + $0xc8] sm:$0xff]  ;;  %v1066_v11 = vld [vmem:[%s2087_s1 + $0x1d8] sm:$0xff] }
  0x17   : > { %223 = vmatpush.msra.mxu0 %v1037_v1  ;;  %428 = vmatpush.msra.mxu3 %v1069_v5  ;;  %v1031_v12 = vld [vmem:[%s2087_s1 + $0xc0] sm:$0xff]  ;;  %v1065_v13 = vld [vmem:[%s2087_s1 + $0x1d0] sm:$0xff]  ;;  %v1030_v14 = vld [vmem:[%s2087_s1 + $0xb8] sm:$0xff]  ;;  %s1481_s28 = scalar_lea.vmem %s2086_s0, %s1218_s8  ;;  %s1275_s8 = sshra.s32 %s955_s7, 4  ;;  %s1276_s8 = int_to_ptr.hbm [resolvable:$true] %s1275_s8 }
  0x18   : > { %1174 = vmatpush.msra.mxu1 %v1036_v2  ;;  %1175 = vmatpush.msra.mxu2 %v1036_v2  ;;  %v1064_v15 = vld [vmem:[%s2087_s1 + $0x1c8] sm:$0xff]  ;;  %v1029_v16 = vld [vmem:[%s2087_s1 + $0xb0] sm:$0xff]  ;;  %v1063_v17 = vld [vmem:[%s2087_s1 + $0x1c0] sm:$0xff]  ;;  %s1277_s9 = scalar_lea.hbm %s1276_s8, 64  ;;  %p1282_p0 = scmp.lt.s32.totalorder %s1276_s8, %s2089_s3 }
  0x19   : > { %224 = vmatpush.msra.mxu0 %v1036_v2  ;;  %429 = vmatpush.msra.mxu3 %v1068_v7  ;;  %v1028_v18 = vld [vmem:[%s2087_s1 + $0xa8] sm:$0xff]  ;;  %v1062_v19 = vld [vmem:[%s2087_s1 + $0x1b8] sm:$0xff]  ;;  %v1027_v20 = vld [vmem:[%s2087_s1 + $0xa0] sm:$0xff]  ;;  %p1278_p11 = scmp.ne.s32.totalorder %s1276_s8, %s1277_s9  ;;  %p1283_p1 = scmp.lt.s32.totalorder %s1281_s17, %s1277_s9 }
  0x1a   : > { %1176 = vmatpush.msra.mxu1 %v1035_v3  ;;  %1177 = vmatpush.msra.mxu2 %v1035_v3  ;;  %v1061_v21 = vld [vmem:[%s2087_s1 + $0x1b0] sm:$0xff]  ;;  %v1026_v22 = vld [vmem:[%s2087_s1 + $0x98] sm:$0xff]  ;;  %v1060_v23 = vld [vmem:[%s2087_s1 + $0x1a8] sm:$0xff] }
  0x1b   : > { %225 = vmatpush.msra.mxu0 %v1035_v3  ;;  %430 = vmatpush.msra.mxu3 %v1067_v9  ;;  %v1025_v24 = vld [vmem:[%s2087_s1 + $0x90] sm:$0xff]  ;;  %v1059_v25 = vld [vmem:[%s2087_s1 + $0x1a0] sm:$0xff]  ;;  %v1024_v26 = vld [vmem:[%s2087_s1 + $0x88] sm:$0xff]  ;;  %p1279_p12 = pnand %p1278_p11, %p1385_p5  ;;  %p1284_p2 = por %p1283_p1, %p1282_p0 }
  0x1c   : > { %1178 = vmatpush.msra.mxu1 %v1034_v6  ;;  %1179 = vmatpush.msra.mxu2 %v1034_v6  ;;  %v1058_v27 = vld [vmem:[%s2087_s1 + $0x198] sm:$0xff]  ;;  %v1023_v28 = vld [vmem:[%s2087_s1 + $0x80] sm:$0xff]  ;;  %v1053_v32 = vld [vmem:[%s2087_s1 + $0x170] sm:$0xff] }
  0x1d   : > { %226 = vmatpush.msra.mxu0 %v1034_v6  ;;  %431 = vmatpush.msra.mxu3 %v1066_v11  ;;  %v199_v29 = vld [vmem:[%s1481_s28 + $0x21] sm:$0xff]  ;;  %v1054_v30 = vld [vmem:[%s2087_s1 + $0x178] sm:$0xff]  ;;  %v193_v34 = vld [vmem:[%s2087_s1 + $0x70] sm:$0xff]  ;;  %p1280_p13 = pneg %p1279_p12 }
  0x1e   : > { %1180 = vmatpush.msra.mxu1 %v1033_v8  ;;  %1181 = vmatpush.msra.mxu2 %v1033_v8  ;;  %v194_v31 = vld [vmem:[%s2087_s1 + $0x78] sm:$0xff]  ;;  %v195_v33 = vld [vmem:[%s1481_s28 + $0x1] sm:$0xff]  ;;  %v1057_v37 = vld [vmem:[%s2087_s1 + $0x190] sm:$0xff] }
  0x1f   : > { %227 = vmatpush.msra.mxu0 %v1033_v8  ;;  %432 = vmatpush.msra.mxu3 %v1065_v13  ;;  %v1086_v35 = vld [vmem:[%s2087_s1 + $0x278] sm:$0xff]  ;;  %v1052_v36 = vld [vmem:[%s2087_s1 + $0x168] sm:$0xff]  ;;  %v1085_v39 = vld [vmem:[%s2087_s1 + $0x270] sm:$0xff]  ;;  %p1285_p3 = pnand %p1284_p2, %p1280_p13 }
  0x20   : > { %1182 = vmatpush.msra.mxu1 %v1032_v10  ;;  %1183 = vmatpush.msra.mxu2 %v1032_v10  ;;  %v192_v38 = vld [vmem:[%s2087_s1 + $0x68] sm:$0xff]  ;;  %v1051_v40 = vld [vmem:[%s2087_s1 + $0x160] sm:$0xff]  ;;  %v1050_v45 = vld [vmem:[%s2087_s1 + $0x158] sm:$0xff] }
  0x21   : > { %228 = vmatpush.msra.mxu0 %v1032_v10  ;;  %433 = vmatpush.msra.mxu3 %v1064_v15  ;;  %v1056_v41 = vld [vmem:[%s2087_s1 + $0x188] sm:$0xff]  ;;  %v191_v42 = vld [vmem:[%s2087_s1 + $0x60] sm:$0xff]  ;;  %v190_v46 = vld [vmem:[%s2087_s1 + $0x58] sm:$0xff] }
  0x22   : > { %1184 = vmatpush.msra.mxu1 %v1031_v12  ;;  %1185 = vmatpush.msra.mxu2 %v1031_v12  ;;  %v1084_v43 = vld [vmem:[%s2087_s1 + $0x268] sm:$0xff]  ;;  %v1049_v48 = vld [vmem:[%s2087_s1 + $0x150] sm:$0xff]  ;;  %v1083_v49 = vld [vmem:[%s2087_s1 + $0x260] sm:$0xff] }
  0x23   : > { %229 = vmatpush.msra.mxu0 %v1031_v12  ;;  %434 = vmatpush.msra.mxu3 %v1063_v17  ;;  %v200_v44 = vld [vmem:[%s1481_s28 + $0x29] sm:$0xff]  ;;  %v203_v47 = vld [vmem:[%s1481_s28 + $0x41] sm:$0xff]  ;;  %v1082_v53 = vld [vmem:[%s2087_s1 + $0x258] sm:$0xff] }
  0x24   : > { %1186 = vmatpush.msra.mxu1 %v1030_v14  ;;  %1187 = vmatpush.msra.mxu2 %v1030_v14  ;;  %v189_v50 = vld [vmem:[%s2087_s1 + $0x50] sm:$0xff]  ;;  %v1048_v52 = vld [vmem:[%s2087_s1 + $0x148] sm:$0xff]  ;;  %v1055_v55 = vld [vmem:[%s2087_s1 + $0x180] sm:$0xff] }
  0x25   : > { %230 = vmatpush.msra.mxu0 %v1030_v14  ;;  %435 = vmatpush.msra.mxu3 %v1062_v19  ;;  %v196_v51 = vld [vmem:[%s1481_s28 + $0x9] sm:$0xff]  ;;  %v1047_v56 = vld [vmem:[%s2087_s1 + $0x140] sm:$0xff]  ;;  %v201_v60 = vld [vmem:[%s1481_s28 + $0x31] sm:$0xff] }
  0x26   : > { %1188 = vmatpush.msra.mxu1 %v1029_v16  ;;  %1189 = vmatpush.msra.mxu2 %v1029_v16  ;;  %v188_v54 = vld [vmem:[%s2087_s1 + $0x48] sm:$0xff]  ;;  %v1081_v57 = vld [vmem:[%s2087_s1 + $0x250] sm:$0xff]  ;;  %v187_v58 = vld [vmem:[%s2087_s1 + $0x40] sm:$0xff] }
  0x27   : > { %231 = vmatpush.msra.mxu0 %v1029_v16  ;;  %436 = vmatpush.msra.mxu3 %v1061_v21  ;;  %v1570_v59 = vld [vmem:[%s1481_s28 + $0xa] sm:$0xff]  ;;  %v1046_v61 = vld [vmem:[%s2087_s1 + $0x138] sm:$0xff]  ;;  %v1079_v5 = vld [vmem:[%s2087_s1 + $0x240] sm:$0xff] }
  0x28   : > { %1190 = vmatpush.msra.mxu1 %v1028_v18  ;;  %1191 = vmatpush.msra.mxu2 %v1028_v18  ;;  %v186_v62 = vld [vmem:[%s2087_s1 + $0x38] sm:$0xff]  ;;  %v1080_v63 = vld [vmem:[%s2087_s1 + $0x248] sm:$0xff]  ;;  %v1045_v0 = vld [vmem:[%s2087_s1 + $0x130] sm:$0xff] }
  0x29   : > { %232 = vmatpush.msra.mxu0 %v1028_v18  ;;  %437 = vmatpush.msra.mxu3 %v1060_v23  ;;  %v1134_v1 = vld [vmem:[%s2087_s1 + $0x3f8] sm:$0xff]  ;;  %v185_v2 = vld [vmem:[%s2087_s1 + $0x30] sm:$0xff]  ;;  %v1044_v4 = vld [vmem:[%s2087_s1 + $0x128] sm:$0xff] }
  0x2a   : > { %1192 = vmatpush.msra.mxu1 %v1027_v20  ;;  %1193 = vmatpush.msra.mxu2 %v1027_v20  ;;  %v204_v3 = vld [vmem:[%s1481_s28 + $0x49] sm:$0xff]  ;;  %v197_v7 = vld [vmem:[%s1481_s28 + $0x11] sm:$0xff]  ;;  %v1043_v8 = vld [vmem:[%s2087_s1 + $0x120] sm:$0xff] }
  0x2b   : > { %233 = vmatpush.msra.mxu0 %v1027_v20  ;;  %438 = vmatpush.msra.mxu3 %v1059_v25  ;;  %v184_v6 = vld [vmem:[%s2087_s1 + $0x28] sm:$0xff]  ;;  %v1078_v9 = vld [vmem:[%s2087_s1 + $0x238] sm:$0xff]  ;;  %v183_v10 = vld [vmem:[%s2087_s1 + $0x20] sm:$0xff] }
  0x2c   : > { %1194 = vmatpush.msra.mxu1 %v1026_v22  ;;  %1195 = vmatpush.msra.mxu2 %v1026_v22  ;;  %v1133_v11 = vld [vmem:[%s2087_s1 + $0x3f0] sm:$0xff]  ;;  %v202_v12 = vld [vmem:[%s1481_s28 + $0x39] sm:$0xff]  ;;  %v1076_v19 = vld [vmem:[%s2087_s1 + $0x228] sm:$0xff] }
  0x2d   : > { %234 = vmatpush.msra.mxu0 %v1026_v22  ;;  %439 = vmatpush.msra.mxu3 %v1058_v27  ;;  %v1042_v13 = vld [vmem:[%s2087_s1 + $0x118] sm:$0xff]  ;;  %v1077_v15 = vld [vmem:[%s2087_s1 + $0x230] sm:$0xff]  ;;  %v1040_v20 = vld [vmem:[%s2087_s1 + $0x108] sm:$0xff] }
  0x2e   : > { %1196 = vmatpush.msra.mxu1 %v1025_v24  ;;  %1197 = vmatpush.msra.mxu2 %v1025_v24  ;;  %v182_v14 = vld [vmem:[%s2087_s1 + $0x18] sm:$0xff]  ;;  %v1041_v16 = vld [vmem:[%s2087_s1 + $0x110] sm:$0xff]  ;;  %v1132_v21 = vld [vmem:[%s2087_s1 + $0x3e8] sm:$0xff] }
  0x2f   : > { %235 = vmatpush.msra.mxu0 %v1025_v24  ;;  %440 = vmatpush.msra.mxu3 %v1057_v37  ;;  %v1629_v17 = vld [vmem:[%s1481_s28 + $0x12] sm:$0xff]  ;;  %v180_v22 = vld [vmem:[%s2087_s1 + $0x8] sm:$0xff]  ;;  %v1075_v23 = vld [vmem:[%s2087_s1 + $0x220] sm:$0xff] }
  0x30   : > { %1198 = vmatpush.msra.mxu1 %v1024_v26  ;;  %1199 = vmatpush.msra.mxu2 %v1024_v26  ;;  %v181_v18 = vld [vmem:[%s2087_s1 + $0x10] sm:$0xff]  ;;  %v1039_v24 = vld [vmem:[%s2087_s1 + $0x100] sm:$0xff] }
  0x31   : > { %236 = vmatpush.msra.mxu0 %v1024_v26  ;;  %441 = vmatpush.msra.mxu3 %v1056_v41  ;;  %v198_v25 = vld [vmem:[%s1481_s28 + $0x19] sm:$0xff]  ;;  %v316_v27 = vld [vmem:[%s1481_s28 + $0x2] sm:$0xff] }
  0x32   : > { %1200 = vmatpush.msra.mxu1 %v1023_v28  ;;  %1201 = vmatpush.msra.mxu2 %v1023_v28  ;;  %v179_v26 = vld [vmem:[%s2087_s1] sm:$0xff]  ;;  %v1130_v41 = vld [vmem:[%s2087_s1 + $0x3d8] sm:$0xff] }
  0x33   : > { %250 = vmatmul.f32.vlgmr.msra.gmra.mxu1 %v199_v29  ;;  %237 = vmatpush.msra.mxu0 %v1023_v28  ;;  %v1118_v28 = vld [vmem:[%s2087_s1 + $0x378] sm:$0xff]  ;;  %v169_v29 = vld [vmem:[%s1481_s28] sm:$0xff] }
  0x34   : > { %343 = vmatpush.msrb.mxu2 %v1054_v30  ;;  %269 = vmatpush.msrb.mxu1 %v194_v31  ;;  %v1074_v30 = vld [vmem:[%s2087_s1 + $0x218] sm:$0xff] }
  0x35   : > { %238 = vmatmul.f32.vlgmr.msra.gmra.mxu0 %v195_v33  ;;  %262 = vmatmul.f32.vlgmr.msra.gmra.mxu2 %v203_v47  ;;  %v1102_v31 = vld [vmem:[%s2087_s1 + $0x2f8] sm:$0xff]  ;;  %v1131_v33 = vld [vmem:[%s2087_s1 + $0x3e0] sm:$0xff] }
  0x36   : > { %344 = vmatpush.msrb.mxu2 %v1053_v32  ;;  %270 = vmatpush.msrb.mxu1 %v193_v34  ;;  %v1117_v32 = vld [vmem:[%s2087_s1 + $0x370] sm:$0xff]  ;;  %v1684_v37 = vld [vmem:[%s1481_s28 + $0x1a] sm:$0xff] }
  0x37   : > { %511 = vmatpush.msrb.mxu0 %v1086_v35  ;;  %442 = vmatpush.msra.mxu3 %v1055_v55  ;;  %v1073_v34 = vld [vmem:[%s2087_s1 + $0x210] sm:$0xff]  ;;  %v1114_v47 = vld [vmem:[%s2087_s1 + $0x358] sm:$0xff] }
  0x38   : > { %345 = vmatpush.msrb.mxu2 %v1052_v36  ;;  %271 = vmatpush.msrb.mxu1 %v192_v38  ;;  %v1101_v35 = vld [vmem:[%s2087_s1 + $0x2f0] sm:$0xff]  ;;  %v1116_v36 = vld [vmem:[%s2087_s1 + $0x368] sm:$0xff] }
  0x39   : > { %512 = vmatpush.msrb.mxu0 %v1085_v39  ;;  %443 = vmatmul.f32.vlgmr.msra.gmra.mxu3 %v1570_v59  ;;  %v1072_v38 = vld [vmem:[%s2087_s1 + $0x208] sm:$0xff]  ;;  %v1097_v55 = vld [vmem:[%s2087_s1 + $0x2d0] sm:$0xff] }
  0x3a   : > { %346 = vmatpush.msrb.mxu2 %v1051_v40  ;;  %272 = vmatpush.msrb.mxu1 %v191_v42  ;;  %v1100_v39 = vld [vmem:[%s2087_s1 + $0x2e8] sm:$0xff]  ;;  %v1115_v40 = vld [vmem:[%s2087_s1 + $0x360] sm:$0xff] }
  0x3b   : > { %513 = vmatpush.msrb.mxu0 %v1084_v43  ;;  %253 = vmatmul.f32.gmra.mxu1 %v200_v44  ;;  %v1071_v42 = vld [vmem:[%s2087_s1 + $0x200] sm:$0xff]  ;;  %v170_v43 = vld [vmem:[%s1481_s28 + $0x8] sm:$0xff] }
  0x3c   : > { %347 = vmatpush.msrb.mxu2 %v1050_v45  ;;  %273 = vmatpush.msrb.mxu1 %v190_v46  ;;  %v484_v44 = vld [vmem:[%s1481_s28 + $0xb] sm:$0xff]  ;;  %v1707_v45 = vld [vmem:[%s2087_s1 + $0x478] sm:$0xff]  ;;  %v1099_v46 = vld [vmem:[%s2087_s1 + $0x2e0] sm:$0xff] }
  0x3d   : > { %514 = vmatpush.msrb.mxu0 %v1083_v49  ;;  %763 = vmatpush.msrb.mxu3 %v1134_v1  ;;  %v1722_v49 = vld [vmem:[%s2087_s1 + $0x470] sm:$0xff]  ;;  %v1095_v1 = vld [vmem:[%s2087_s1 + $0x2c0] sm:$0xff] }
  0x3e   : > { %348 = vmatpush.msrb.mxu2 %v1049_v48  ;;  %274 = vmatpush.msrb.mxu1 %v189_v50  ;;  %v1129_v48 = vld [vmem:[%s2087_s1 + $0x3d0] sm:$0xff]  ;;  %v1098_v50 = vld [vmem:[%s2087_s1 + $0x2d8] sm:$0xff] }
  0x3f   : > { %241 = vmatmul.f32.gmra.mxu0 %v196_v51  ;;  %265 = vmatmul.f32.gmra.mxu2 %v204_v3  ;;  %v1729_v51 = vld [vmem:[%s1481_s28 + $0x22] sm:$0xff]  ;;  %v1110_v3 = vld [vmem:[%s2087_s1 + $0x338] sm:$0xff] }
  0x40   : > { %349 = vmatpush.msrb.mxu2 %v1048_v52  ;;  %515 = vmatpush.msrb.mxu0 %v1082_v53  ;;  %v1113_v52 = vld [vmem:[%s2087_s1 + $0x350] sm:$0xff]  ;;  %v1128_v53 = vld [vmem:[%s2087_s1 + $0x3c8] sm:$0xff] }
  0x41   : > { %275 = vmatpush.msrb.mxu1 %v188_v54  ;;  %764 = vmatpush.msrb.mxu3 %v1133_v11  ;;  %v1740_v54 = vld [vmem:[%s2087_s1 + $0x468] sm:$0xff] }
  0x42   : > { %350 = vmatpush.msrb.mxu2 %v1047_v56  ;;  %516 = vmatpush.msrb.mxu0 %v1081_v57  ;;  %v1112_v56 = vld [vmem:[%s2087_s1 + $0x348] sm:$0xff]  ;;  %v1127_v57 = vld [vmem:[%s2087_s1 + $0x3c0] sm:$0xff] }
  0x43   : > { %276 = vmatpush.msrb.mxu1 %v187_v58  ;;  %446 = vmatmul.f32.gmra.mxu3 %v1629_v17  ;;  %v171_v58 = vld [vmem:[%s1481_s28 + $0x10] sm:$0xff]  ;;  %v1811_v11 = vld [vmem:[%s2087_s1 + $0x448] sm:$0xff] }
  0x44   : > { %256 = vmatmul.f32.gmra.mxu1 %v201_v60  ;;  %351 = vmatpush.msrb.mxu2 %v1046_v61  ;;  %v1759_v60 = vld [vmem:[%s2087_s1 + $0x460] sm:$0xff]  ;;  %v1096_v61 = vld [vmem:[%s2087_s1 + $0x2c8] sm:$0xff] }
  0x45   : > { %277 = vmatpush.msrb.mxu1 %v186_v62  ;;  %517 = vmatpush.msrb.mxu0 %v1080_v63  ;;  %v1111_v62 = vld [vmem:[%s2087_s1 + $0x340] sm:$0xff]  ;;  %v1126_v63 = vld [vmem:[%s2087_s1 + $0x3b8] sm:$0xff] }
  0x46   : > { %352 = vmatpush.msrb.mxu2 %v1045_v0  ;;  %765 = vmatpush.msrb.mxu3 %v1132_v21  ;;  %v1774_v0 = vld [vmem:[%s2087_s1 + $0x458] sm:$0xff]  ;;  %v1091_v21 = vld [vmem:[%s2087_s1 + $0x2a0] sm:$0xff] }
  0x47   : > { %278 = vmatpush.msrb.mxu1 %v185_v2  ;;  %518 = vmatpush.msrb.mxu0 %v1079_v5  ;;  %v1780_v2 = vld [vmem:[%s1481_s28 + $0x2a] sm:$0xff] }
  0x48   : > { %353 = vmatpush.msrb.mxu2 %v1044_v4  ;;  %244 = vmatmul.f32.gmra.mxu0 %v197_v7  ;;  %v1125_v4 = vld [vmem:[%s2087_s1 + $0x3b0] sm:$0xff] }
  0x49   : > { %279 = vmatpush.msrb.mxu1 %v184_v6  ;;  %519 = vmatpush.msrb.mxu0 %v1078_v9  ;;  %v1792_v5 = vld [vmem:[%s2087_s1 + $0x450] sm:$0xff]  ;;  %v1094_v6 = vld [vmem:[%s2087_s1 + $0x2b8] sm:$0xff] }
  0x4a   : > { %354 = vmatpush.msrb.mxu2 %v1043_v8  ;;  %766 = vmatpush.msrb.mxu3 %v1131_v33  ;;  %v1109_v7 = vld [vmem:[%s2087_s1 + $0x330] sm:$0xff]  ;;  %v1124_v8 = vld [vmem:[%s2087_s1 + $0x3a8] sm:$0xff]  ;;  %v172_v9 = vld [vmem:[%s1481_s28 + $0x18] sm:$0xff] }
  0x4b   : > { %280 = vmatpush.msrb.mxu1 %v183_v10  ;;  %520 = vmatpush.msrb.mxu0 %v1077_v15  ;;  %v486_v10 = vld [vmem:[%s1481_s28 + $0x1b] sm:$0xff]  ;;  %v1104_v33 = vld [vmem:[%s2087_s1 + $0x308] sm:$0xff] }
  0x4c   : > { %259 = vmatmul.f32.gmra.mxu1 %v202_v12  ;;  %355 = vmatpush.msrb.mxu2 %v1042_v13  ;;  %v1093_v12 = vld [vmem:[%s2087_s1 + $0x2b0] sm:$0xff]  ;;  %v1108_v13 = vld [vmem:[%s2087_s1 + $0x328] sm:$0xff]  ;;  %v1826_v15 = vld [vmem:[%s2087_s1 + $0x440] sm:$0xff] }
  0x4d   : > { %281 = vmatpush.msrb.mxu1 %v182_v14  ;;  %521 = vmatpush.msrb.mxu0 %v1076_v19  ;;  %v1123_v14 = vld [vmem:[%s2087_s1 + $0x3a0] sm:$0xff]  ;;  %v1122_v19 = vld [vmem:[%s2087_s1 + $0x398] sm:$0xff] }
  0x4e   : > { %356 = vmatpush.msrb.mxu2 %v1041_v16  ;;  %449 = vmatmul.f32.gmra.mxu3 %v1684_v37  ;;  %v1092_v16 = vld [vmem:[%s2087_s1 + $0x2a8] sm:$0xff] }
  0x4f   : > { %282 = vmatpush.msrb.mxu1 %v181_v18  ;;  %522 = vmatpush.msrb.mxu0 %v1075_v23  ;;  %v1107_v18 = vld [vmem:[%s2087_s1 + $0x320] sm:$0xff]  ;;  %v1121_v23 = vld [vmem:[%s2087_s1 + $0x390] sm:$0xff] }
  0x50   : > { %357 = vmatpush.msrb.mxu2 %v1040_v20  ;;  %247 = vmatmul.f32.gmra.mxu0 %v198_v25  ;;  %v1844_v20 = vld [vmem:[%s2087_s1 + $0x438] sm:$0xff]  ;;  %v487_v25 = vld [vmem:[%s1481_s28 + $0x23] sm:$0xff] }
  0x51   : > { %283 = vmatpush.msrb.mxu1 %v180_v22  ;;  %523 = vmatpush.msrb.mxu0 %v1074_v30  ;;  %v1106_v22 = vld [vmem:[%s2087_s1 + $0x318] sm:$0xff] }
  0x52   : > { %358 = vmatpush.msrb.mxu2 %v1039_v24  ;;  %767 = vmatpush.msrb.mxu3 %v1130_v41  ;;  %v173_v24 = vld [vmem:[%s1481_s28 + $0x20] sm:$0xff]  ;;  %v1138_v41 = vld [vmem:[%s2087_s1 + $0x418] sm:$0xff] }
  0x53   : > { %284 = vmatpush.msrb.mxu1 %v179_v26  ;;  %359 = vmatmul.f32.vlgmr.msrb.gmra.mxu2 %v316_v27  ;;  %v1863_v26 = vld [vmem:[%s2087_s1 + $0x430] sm:$0xff]  ;;  %v1090_v27 = vld [vmem:[%s2087_s1 + $0x298] sm:$0xff] }
  0x54   : > { %679 = vmatpush.msra.mxu2 %v1118_v28  ;;  %285 = vmatmul.f32.vlgmr.msrb.gmra.mxu1 %v169_v29  ;;  %v1105_v28 = vld [vmem:[%s2087_s1 + $0x310] sm:$0xff]  ;;  %v1120_v29 = vld [vmem:[%s2087_s1 + $0x388] sm:$0xff]  ;;  %v406_v30 = vld [vmem:[%s1481_s28 + $0x3a] sm:$0xff] }
  0x55   : > { %595 = vmatpush.msra.mxu1 %v1102_v31  ;;  %524 = vmatpush.msrb.mxu0 %v1073_v34  ;;  %v1140_v31 = vld [vmem:[%s2087_s1 + $0x428] sm:$0xff]  ;;  %v1119_v34 = vld [vmem:[%s2087_s1 + $0x380] sm:$0xff] }
  0x56   : > { %680 = vmatpush.msra.mxu2 %v1117_v32  ;;  %768 = vmatpush.msrb.mxu3 %v1129_v48  ;;  %v1089_v32 = vld [vmem:[%s2087_s1 + $0x290] sm:$0xff]  ;;  %v176_v48 = vld [vmem:[%s1481_s28 + $0x38] sm:$0xff] }
  0x57   : > { %596 = vmatpush.msra.mxu1 %v1101_v35  ;;  %525 = vmatpush.msrb.mxu0 %v1072_v38  ;;  %v174_v35 = vld [vmem:[%s1481_s28 + $0x28] sm:$0xff] }
  0x58   : > { %681 = vmatpush.msra.mxu2 %v1116_v36  ;;  %452 = vmatmul.f32.gmra.mxu3 %v1729_v51  ;;  %v488_v36 = vld [vmem:[%s1481_s28 + $0x2b] sm:$0xff] }
  0x59   : > { %597 = vmatpush.msra.mxu1 %v1100_v39  ;;  %526 = vmatpush.msrb.mxu0 %v1071_v42  ;;  %v1088_v38 = vld [vmem:[%s2087_s1 + $0x288] sm:$0xff]  ;;  %v1087_v42 = vld [vmem:[%s2087_s1 + $0x280] sm:$0xff] }
  0x5a   : > { %682 = vmatpush.msra.mxu2 %v1115_v40  ;;  %527 = vmatmul.f32.vlgmr.msrb.gmra.mxu0 %v484_v44  ;;  %v407_v39 = vld [vmem:[%s1481_s28 + $0x42] sm:$0xff]  ;;  %v489_v44 = vld [vmem:[%s1481_s28 + $0x33] sm:$0xff] }
  0x5b   : > { %362 = vmatmul.f32.gmra.mxu2 %v1570_v59  ;;  %847 = vmatpush.msra.mxu0 %v1707_v45  ;;  %v485_v59 = vld [vmem:[%s1481_s28 + $0x13] sm:$0xff]  ;;  %v1103_v40 = vld [vmem:[%s2087_s1 + $0x300] sm:$0xff] }
  0x5c   : > { %288 = vmatmul.f32.gmra.mxu1 %v170_v43  ;;  %683 = vmatpush.msra.mxu2 %v1114_v47  ;;  %v175_v43 = vld [vmem:[%s1481_s28 + $0x30] sm:$0xff]  ;;  %v1136_v47 = vld [vmem:[%s2087_s1 + $0x408] sm:$0xff] }
  0x5d   : > { %598 = vmatpush.msra.mxu1 %v1099_v46  ;;  %848 = vmatpush.msra.mxu0 %v1722_v49  ;;  %v408_v46 = vld [vmem:[%s1481_s28 + $0x4a] sm:$0xff] }
  0x5e   : > { %684 = vmatpush.msra.mxu2 %v1113_v52  ;;  %769 = vmatpush.msrb.mxu3 %v1128_v53  ;;  %v177_v52 = vld [vmem:[%s1481_s28 + $0x40] sm:$0xff] }
  0x5f   : > { %599 = vmatpush.msra.mxu1 %v1098_v50  ;;  %849 = vmatpush.msra.mxu0 %v1740_v54  ;;  %v1135_v50 = vld [vmem:[%s2087_s1 + $0x400] sm:$0xff] }
  0x60   : > { %685 = vmatpush.msra.mxu2 %v1112_v56  ;;  %770 = vmatpush.msrb.mxu3 %v1127_v57  ;;  %v491_v53 = vld [vmem:[%s1481_s28 + $0x43] sm:$0xff]  ;;  %v492_v56 = vld [vmem:[%s1481_s28 + $0x4b] sm:$0xff] }
  0x61   : > { %600 = vmatpush.msra.mxu1 %v1097_v55  ;;  %850 = vmatpush.msra.mxu0 %v1759_v60  ;;  %v178_v55 = vld [vmem:[%s1481_s28 + $0x48] sm:$0xff]  ;;  %v737_v57 = vld [vmem:[%s1481_s28 + $0x1d] sm:$0xff] }
  0x62   : > { %530 = vmatmul.f32.gmra.mxu0 %v485_v59  ;;  %686 = vmatpush.msra.mxu2 %v1111_v62  ;;  %v568_v59 = vld [vmem:[%s1481_s28 + $0xc] sm:$0xff]  ;;  %v653_v62 = vld [vmem:[%s1481_s28 + $0x1c] sm:$0xff] }
  0x63   : > { %365 = vmatmul.f32.gmra.mxu2 %v1629_v17  ;;  %601 = vmatpush.msra.mxu1 %v1096_v61  ;;  %v1832_v17 = vld [vmem:[%s1481_s28 + $0x32] sm:$0xff]  ;;  %v738_v61 = vld [vmem:[%s1481_s28 + $0x25] sm:$0xff] }
  0x64   : > { %291 = vmatmul.f32.gmra.mxu1 %v171_v58  ;;  %771 = vmatpush.msrb.mxu3 %v1126_v63  ;;  %v652_v58 = vld [vmem:[%s1481_s28 + $0x14] sm:$0xff] }
  0x65   : > { %851 = vmatpush.msra.mxu0 %v1774_v0  ;;  %602 = vmatpush.msra.mxu1 %v1095_v1  ;;  %v820_v63 = vld [vmem:[%s1481_s28 + $0x16] sm:$0xff]  ;;  %v654_v1 = vld [vmem:[%s1481_s28 + $0x24] sm:$0xff] }
  0x66   : > { %455 = vmatmul.f32.gmra.mxu3 %v1780_v2  ;;  %687 = vmatpush.msra.mxu2 %v1110_v3  ;;  %v821_v3 = vld [vmem:[%s1481_s28 + $0x1e] sm:$0xff] }
  0x67   : > { %772 = vmatpush.msrb.mxu3 %v1125_v4  ;;  %852 = vmatpush.msra.mxu0 %v1792_v5 }
  0x68   : > { %603 = vmatpush.msra.mxu1 %v1094_v6  ;;  %688 = vmatpush.msra.mxu2 %v1109_v7  ;;  %v655_v6 = vld [vmem:[%s1481_s28 + $0x2c] sm:$0xff] }
  0x69   : > { %773 = vmatpush.msrb.mxu3 %v1124_v8  ;;  %853 = vmatpush.msra.mxu0 %v1811_v11  ;;  %v822_v8 = vld [vmem:[%s1481_s28 + $0x26] sm:$0xff] }
  0x6a   : > { %533 = vmatmul.f32.gmra.mxu0 %v486_v10  ;;  %604 = vmatpush.msra.mxu1 %v1093_v12  ;;  %v741_v10 = vld [vmem:[%s1481_s28 + $0x3d] sm:$0xff] }
  0x6b   : > { %368 = vmatmul.f32.gmra.mxu2 %v1684_v37  ;;  %774 = vmatpush.msrb.mxu3 %v1123_v14  ;;  %v1139_v37 = vld [vmem:[%s2087_s1 + $0x420] sm:$0xff] }
  0x6c   : > { %294 = vmatmul.f32.gmra.mxu1 %v172_v9  ;;  %689 = vmatpush.msra.mxu2 %v1108_v13  ;;  %v823_v13 = vld [vmem:[%s1481_s28 + $0x2e] sm:$0xff] }
  0x6d   : > { %854 = vmatpush.msra.mxu0 %v1826_v15  ;;  %605 = vmatpush.msra.mxu1 %v1092_v16 }
  0x6e   : > { %458 = vmatmul.f32.gmra.mxu3 %v1832_v17  ;;  %690 = vmatpush.msra.mxu2 %v1107_v18  ;;  %v657_v18 = vld [vmem:[%s1481_s28 + $0x3c] sm:$0xff] }
  0x6f   : > { %775 = vmatpush.msrb.mxu3 %v1122_v19  ;;  %855 = vmatpush.msra.mxu0 %v1844_v20 }
  0x70   : > { %606 = vmatpush.msra.mxu1 %v1091_v21  ;;  %691 = vmatpush.msra.mxu2 %v1106_v22  ;;  %v743_v22 = vld [vmem:[%s1481_s28 + $0x4d] sm:$0xff] }
  0x71   : > { %776 = vmatpush.msrb.mxu3 %v1121_v23  ;;  %856 = vmatpush.msra.mxu0 %v1863_v26 }
  0x72   : > { %536 = vmatmul.f32.gmra.mxu0 %v487_v25  ;;  %607 = vmatpush.msra.mxu1 %v1090_v27 }
  0x73   : > { %371 = vmatmul.f32.gmra.mxu2 %v1729_v51  ;;  %777 = vmatpush.msrb.mxu3 %v1120_v29  ;;  %v409_v51 = vld [vmem:[%s1481_s28 + $0x52] sm:$0xff] }
  0x74   : > { %297 = vmatmul.f32.gmra.mxu1 %v173_v24  ;;  %692 = vmatpush.msra.mxu2 %v1105_v28  ;;  %v658_v24 = vld [vmem:[%s1481_s28 + $0x44] sm:$0xff]  ;;  %v744_v29 = vld [vmem:[%s1481_s28 + $0x55] sm:$0xff] }
  0x75   : > { %857 = vmatpush.msra.mxu0 %v1140_v31  ;;  %608 = vmatpush.msra.mxu1 %v1089_v32  ;;  %v659_v32 = vld [vmem:[%s1481_s28 + $0x4c] sm:$0xff] }
  0x76   : > { %461 = vmatmul.f32.gmra.mxu3 %v406_v30  ;;  %693 = vmatpush.msra.mxu2 %v1104_v33 }
  0x77   : > { %778 = vmatpush.msrb.mxu3 %v1119_v34  ;;  %858 = vmatpush.msra.mxu0 %v1139_v37 }
  0x78   : > { %609 = vmatpush.msra.mxu1 %v1088_v38  ;;  %694 = vmatpush.msra.mxu2 %v1103_v40  ;;  %v745_v40 = vld [vmem:[%s1481_s28 + $0x5d] sm:$0xff] }
  0x79   : > { %1202 = vmatpush.msra.mxu3 %v1707_v45  ;;  %859 = vmatpush.msra.mxu0 %v1138_v41  ;;  %v1137_v45 = vld [vmem:[%s2087_s1 + $0x410] sm:$0xff] }
  0x7a   : > { %539 = vmatmul.f32.gmra.mxu0 %v488_v36  ;;  %610 = vmatpush.msra.mxu1 %v1087_v42  ;;  %v826_v36 = vld [vmem:[%s1481_s28 + $0x46] sm:$0xff] }
  0x7b   : > { %374 = vmatmul.f32.gmra.mxu2 %v1780_v2  ;;  %1203 = vmatpush.msra.mxu3 %v1722_v49  ;;  %v490_v49 = vld [vmem:[%s1481_s28 + $0x3b] sm:$0xff] }
  0x7c   : > { %300 = vmatmul.f32.gmra.mxu1 %v174_v35  ;;  %860 = vmatpush.msra.mxu0 %v1137_v45 }
  0x7d   : > { %1204 = vmatpush.msra.mxu3 %v1740_v54  ;;  %v736_v54 = vld [vmem:[%s1481_s28 + $0x15] sm:$0xff] }
  0x7e   : > { %464 = vmatmul.f32.gmra.mxu3 %v407_v39  ;;  %861 = vmatpush.msra.mxu0 %v1136_v47 }
  0x7f   : > { %1205 = vmatpush.msra.mxu3 %v1759_v60  ;;  %v493_v60 = vld [vmem:[%s1481_s28 + $0x53] sm:$0xff] }
  0x80   : > { %862 = vmatpush.msra.mxu0 %v1135_v50 }
  0x81   : > { %1206 = vmatpush.msra.mxu3 %v1774_v0  ;;  %v739_v0 = vld [vmem:[%s1481_s28 + $0x2d] sm:$0xff] }
  0x82   : > { %542 = vmatmul.f32.gmra.mxu0 %v489_v44 }
  0x83   : > { %377 = vmatmul.f32.gmra.mxu2 %v1832_v17  ;;  %1207 = vmatpush.msra.mxu3 %v1792_v5  ;;  %v740_v5 = vld [vmem:[%s1481_s28 + $0x35] sm:$0xff] }
  0x84   : > { %303 = vmatmul.f32.gmra.mxu1 %v175_v43  ;;  %v660_v43 = vld [vmem:[%s1481_s28 + $0x54] sm:$0xff] }
  0x85   : > { %1208 = vmatpush.msra.mxu3 %v1811_v11  ;;  %v656_v11 = vld [vmem:[%s1481_s28 + $0x34] sm:$0xff] }
  0x86   : > { %467 = vmatmul.f32.gmra.mxu3 %v408_v46 }
  0x87   : > { %1209 = vmatpush.msra.mxu3 %v1826_v15  ;;  %v742_v15 = vld [vmem:[%s1481_s28 + $0x45] sm:$0xff] }
  0x89   : > { %1210 = vmatpush.msra.mxu3 %v1844_v20  ;;  %v824_v20 = vld [vmem:[%s1481_s28 + $0x36] sm:$0xff] }
  0x8a   : > { %545 = vmatmul.f32.gmra.mxu0 %v490_v49 }
  0x8b   : > { %380 = vmatmul.f32.gmra.mxu2 %v406_v30  ;;  %1211 = vmatpush.msra.mxu3 %v1863_v26  ;;  %v825_v26 = vld [vmem:[%s1481_s28 + $0x3e] sm:$0xff] }
  0x8c   : > { %306 = vmatmul.f32.gmra.mxu1 %v176_v48 }
  0x8d   : > { %1212 = vmatpush.msra.mxu3 %v1140_v31 }
  0x8e   : > { %470 = vmatmul.f32.gmra.mxu3 %v409_v51  ;;  %v829_v51 = vld [vmem:[%s1481_s28 + $0x5e] sm:$0xff] }
  0x8f   : > { %1213 = vmatpush.msra.mxu3 %v1139_v37 }
  0x91   : > { %1214 = vmatpush.msra.mxu3 %v1138_v41 }
  0x92   : > { %548 = vmatmul.f32.gmra.mxu0 %v491_v53 }
  0x93   : > { %383 = vmatmul.f32.gmra.mxu2 %v407_v39  ;;  %1215 = vmatpush.msra.mxu3 %v1137_v45 }
  0x94   : > { %309 = vmatmul.f32.gmra.mxu1 %v177_v52 }
  0x95   : > { %1216 = vmatpush.msra.mxu3 %v1136_v47  ;;  %v827_v47 = vld [vmem:[%s1481_s28 + $0x4e] sm:$0xff] }
  0x96   : > { %779 = vmatmul.f32.vlgmr.msrb.gmra.mxu3 %v736_v54  ;;  %v661_v54 = vld [vmem:[%s1481_s28 + $0x5c] sm:$0xff] }
  0x97   : > { %1217 = vmatpush.msra.mxu3 %v1135_v50 }
  0x9a   : > { %551 = vmatmul.f32.gmra.mxu0 %v492_v56 }
  0x9b   : > { %386 = vmatmul.f32.gmra.mxu2 %v408_v46 }
  0x9c   : > { %312 = vmatmul.f32.gmra.mxu1 %v178_v55 }
  0x9e   : > { %782 = vmatmul.f32.gmra.mxu3 %v737_v57 }
  0xa2   : > { %554 = vmatmul.f32.gmra.mxu0 %v493_v60 }
  0xa3   : > { %695 = vmatmul.f32.vlgmr.msra.gmra.mxu2 %v652_v58 }
  0xa4   : > { %611 = vmatmul.f32.vlgmr.msra.gmra.mxu1 %v568_v59 }
  0xa6   : > { %785 = vmatmul.f32.gmra.mxu3 %v738_v61 }
  0xaa   : > { %863 = vmatmul.f32.vlgmr.msra.gmra.mxu0 %v820_v63 }
  0xab   : > { %698 = vmatmul.f32.gmra.mxu2 %v653_v62 }
  0xac   : > { %614 = vmatmul.f32.gmra.mxu1 %v652_v58  ;;  %v828_v58 = vld [vmem:[%s1481_s28 + $0x56] sm:$0xff]  ;;  %s161_s28 = sand.u32 1, %s1315_s13  }
  0xad   : > { %s1021_s24 = sshll.u32 %s161_s28, 6  ;;  %s940_s16 = scalar_lea.sflag [#allocation3], %s161_s28 }
  0xae   : > { %788 = vmatmul.f32.gmra.mxu3 %v739_v0  ;;  %s2019_s27 = scalar_lea.vmem [#allocation2], %s1021_s24 }
  0xaf   : > { %s952_s6 = sshll.u32 %s2019_s27, 4  ;;  %s953_s6 = int_to_ptr.vmem [resolvable:$true] %s952_s6 }
  0xb0   : > { %v1948_v2 = vpop.f32.mrf.mxu1 }
  0xb2   : > { %v239_v4 = vpop.f32.mrf.mxu0  ;;  %866 = vmatmul.f32.gmra.mxu0 %v821_v3 }
  0xb3   : > { %701 = vmatmul.f32.gmra.mxu2 %v654_v1 }
  0xb4   : > { %617 = vmatmul.f32.gmra.mxu1 %v653_v62 }
  0xb6   : > { %791 = vmatmul.f32.gmra.mxu3 %v740_v5 }
  0xb8   : > { %v1953_v7 = vpop.f32.mrf.mxu1  ;;  %v1961_v14 = vpop.f32.mrf.mxu2 }
  0xba   : > { %869 = vmatmul.f32.gmra.mxu0 %v822_v8 }
  0xbb   : > { %704 = vmatmul.f32.gmra.mxu2 %v655_v6 }
  0xbc   : > { %620 = vmatmul.f32.gmra.mxu1 %v654_v1  ;;  %v242_v9 = vpop.f32.mrf.mxu0  ;;  %v444_v17 = vpop.f32.mrf.mxu3 }
  0xbe   : > { %794 = vmatmul.f32.gmra.mxu3 %v741_v10 }
  0xc1   : > { %v1958_v12 = vpop.f32.mrf.mxu1 }
  0xc2   : > { %872 = vmatmul.f32.gmra.mxu0 %v823_v13  ;;  %v1968_v21 = vpop.f32.mrf.mxu2 }
  0xc3   : > { %707 = vmatmul.f32.gmra.mxu2 %v656_v11 }
  0xc4   : > { %623 = vmatmul.f32.gmra.mxu1 %v655_v6 }
  0xc5   : > { %v245_v16 = vpop.f32.mrf.mxu0 }
  0xc6   : > { %797 = vmatmul.f32.gmra.mxu3 %v742_v15  ;;  %v447_v27 = vpop.f32.mrf.mxu3 }
  0xc9   : > { %v1965_v19 = vpop.f32.mrf.mxu1 }
  0xca   : > { %875 = vmatmul.f32.gmra.mxu0 %v824_v20 }
  0xcb   : > { %710 = vmatmul.f32.gmra.mxu2 %v657_v18 }
  0xcc   : > { %626 = vmatmul.f32.gmra.mxu1 %v656_v11 }
  0xcd   : > { %v248_v23 = vpop.f32.mrf.mxu0 }
  0xce   : > { %800 = vmatmul.f32.gmra.mxu3 %v743_v22 }
  0xd1   : > { %v286_v25 = vpop.f32.mrf.mxu1  ;;  %v450_v39 = vpop.f32.mrf.mxu3 }
  0xd2   : > { %v287_v28 = vadd.f32 %v286_v25, %v239_v4  ;;  %878 = vmatmul.f32.gmra.mxu0 %v825_v26 }
  0xd3   : > { %713 = vmatmul.f32.gmra.mxu2 %v658_v24 }
  0xd4   : > { %629 = vmatmul.f32.gmra.mxu1 %v657_v18 }
  0xd6   : > { %v360_v30 = vpop.f32.mrf.mxu2  ;;  %803 = vmatmul.f32.gmra.mxu3 %v744_v29 }
  0xd7   : > { %v390_v31 = vadd.f32 %v360_v30, %v287_v28  ;;  %v528_v35 = vpop.f32.mrf.mxu0 }
  0xd9   : > { %v289_v33 = vpop.f32.mrf.mxu1  ;;  %v474_v34 = vadd.f32 %v444_v17, %v390_v31 }
  0xda   : > { %v290_v37 = vadd.f32 %v289_v33, %v242_v9  ;;  %881 = vmatmul.f32.gmra.mxu0 %v826_v36 }
  0xdb   : > { %v1976_v38 = vadd.f32 %v528_v35, %v474_v34  ;;  %716 = vmatmul.f32.gmra.mxu2 %v659_v32  ;;  %v453_v50 = vpop.f32.mrf.mxu3 }
  0xdc   : > { %632 = vmatmul.f32.gmra.mxu1 %v658_v24 }
  0xde   : > { %v363_v41 = vpop.f32.mrf.mxu2  ;;  %806 = vmatmul.f32.gmra.mxu3 %v745_v40 }
  0xdf   : > { %v391_v42 = vadd.f32 %v363_v41, %v290_v37  ;;  %v531_v46 = vpop.f32.mrf.mxu0 }
  0xe1   : > { %v292_v44 = vpop.f32.mrf.mxu1  ;;  %v475_v45 = vadd.f32 %v447_v27, %v391_v42 }
  0xe2   : > { %v293_v48 = vadd.f32 %v292_v44, %v245_v16  ;;  %884 = vmatmul.f32.gmra.mxu0 %v827_v47 }
  0xe3   : > { %v1981_v49 = vadd.f32 %v531_v46, %v475_v45  ;;  %719 = vmatmul.f32.gmra.mxu2 %v660_v43 }
  0xe4   : > { %635 = vmatmul.f32.gmra.mxu1 %v659_v32 }
  0xe6   : > { %v366_v52 = vpop.f32.mrf.mxu2  ;;  %890 = vmatmul.f32.vlgmr.msra.gmra.mxu3 %v829_v51 }
  0xe7   : > { %v392_v53 = vadd.f32 %v366_v52, %v293_v48  ;;  %v534_v57 = vpop.f32.mrf.mxu0 }
  0xe9   : > { %v295_v55 = vpop.f32.mrf.mxu1  ;;  %v476_v56 = vadd.f32 %v450_v39, %v392_v53  ;;  %v456_v61 = vpop.f32.mrf.mxu3 }
  0xea   : > { %v296_v59 = vadd.f32 %v295_v55, %v248_v23  ;;  %887 = vmatmul.f32.gmra.mxu0 %v828_v58 }
  0xeb   : > { %v1986_v60 = vadd.f32 %v534_v57, %v476_v56  ;;  %722 = vmatmul.f32.gmra.mxu2 %v661_v54 }
  0xec   : > { %638 = vmatmul.f32.gmra.mxu1 %v660_v43 }
  0xee   : > { %v369_v62 = vpop.f32.mrf.mxu2 }
  0xef   : > { %v393_v63 = vadd.f32 %v369_v62, %v296_v59  ;;  %v537_v3 = vpop.f32.mrf.mxu0 }
  0xf1   : > { %v298_v0 = vpop.f32.mrf.mxu1  ;;  %v477_v1 = vadd.f32 %v453_v50, %v393_v63  ;;  %v459_v6 = vpop.f32.mrf.mxu3 }
  0xf2   : > { %v299_v4 = vadd.f32 %v298_v0, %v1948_v2 }
  0xf3   : > { %v1989_v5 = vadd.f32 %v537_v3, %v477_v1 }
  0xf6   : > { %v372_v8 = vpop.f32.mrf.mxu2 }
  0xf7   : > { %v394_v9 = vadd.f32 %v372_v8, %v299_v4  ;;  %v540_v13 = vpop.f32.mrf.mxu0 }
  0xf9   : > { %v301_v10 = vpop.f32.mrf.mxu1  ;;  %v478_v11 = vadd.f32 %v456_v61, %v394_v9  ;;  %v462_v17 = vpop.f32.mrf.mxu3 }
  0xfa   : > { %v302_v15 = vadd.f32 %v301_v10, %v1953_v7 }
  0xfb   : > { %v1992_v16 = vadd.f32 %v540_v13, %v478_v11 }
  0xfe   : > { %v375_v18 = vpop.f32.mrf.mxu2 }
  0xff   : > { %v395_v20 = vadd.f32 %v375_v18, %v302_v15  ;;  %v543_v24 = vpop.f32.mrf.mxu0 }
 0x101   : > { %v304_v22 = vpop.f32.mrf.mxu1  ;;  %v479_v23 = vadd.f32 %v459_v6, %v395_v20  ;;  %v465_v26 = vpop.f32.mrf.mxu3 }
 0x102   : > { %v305_v2 = vadd.f32 %v304_v22, %v1958_v12 }
 0x103   : > { %v1995_v25 = vadd.f32 %v543_v24, %v479_v23 }
 0x106   : > { %v378_v27 = vpop.f32.mrf.mxu2 }
 0x107   : > { %v396_v28 = vadd.f32 %v378_v27, %v305_v2  ;;  %v546_v31 = vpop.f32.mrf.mxu0 }
 0x109   : > { %v307_v29 = vpop.f32.mrf.mxu1  ;;  %v480_v30 = vadd.f32 %v462_v17, %v396_v28  ;;  %v468_v33 = vpop.f32.mrf.mxu3 }
 0x10a   : > { %v308_v7 = vadd.f32 %v307_v29, %v1965_v19 }
 0x10b   : > { %v1998_v32 = vadd.f32 %v546_v31, %v480_v30 }
 0x10e   : > { %v381_v34 = vpop.f32.mrf.mxu2 }
 0x10f   : > { %v397_v35 = vadd.f32 %v381_v34, %v308_v7  ;;  %v549_v39 = vpop.f32.mrf.mxu0 }
 0x111   : > { %v310_v36 = vpop.f32.mrf.mxu1  ;;  %v481_v37 = vadd.f32 %v465_v26, %v397_v35  ;;  %v471_v12 = vpop.f32.mrf.mxu3 }
 0x112   : > { %v311_v41 = vadd.f32 %v310_v36, %v1961_v14 }
 0x113   : > { %v2000_v40 = vadd.f32 %v549_v39, %v481_v37 }
 0x116   : > { %v384_v42 = vpop.f32.mrf.mxu2 }
 0x117   : > { %v398_v43 = vadd.f32 %v384_v42, %v311_v41  ;;  %v552_v46 = vpop.f32.mrf.mxu0 }
 0x119   : > { %v313_v44 = vpop.f32.mrf.mxu1  ;;  %v482_v45 = vadd.f32 %v468_v33, %v398_v43  ;;  %v780_v47 = vpop.f32.mrf.mxu3 }
 0x11a   : > { %v314_v48 = vadd.f32 %v313_v44, %v1968_v21  ;;  %v2015_v21 = vld [vmem:[%s2088_s2] ss:$0 sm:$0xff] }
 0x11b   : > { %v2003_v19 = vadd.f32 %v552_v46, %v482_v45 }
 0x11e   : > { %v387_v50 = vpop.f32.mrf.mxu2 }
 0x11f   : > { %v399_v51 = vadd.f32 %v387_v50, %v314_v48  ;;  %v555_v54 = vpop.f32.mrf.mxu0 }
 0x121   : > { %v612_v52 = vpop.f32.mrf.mxu1  ;;  %v483_v53 = vadd.f32 %v471_v12, %v399_v51  ;;  %v783_v14 = vpop.f32.mrf.mxu3 }
 0x122   : > { %v642_v56 = vadd.f32 %v612_v52, %v1976_v38 }
 0x123   : > { %v2006_v55 = vadd.f32 %v555_v54, %v483_v53 }
 0x126   : > { %v696_v57 = vpop.f32.mrf.mxu2 }
 0x127   : > { %v726_v58 = vadd.f32 %v696_v57, %v642_v56  ;;  %v864_v62 = vpop.f32.mrf.mxu0 }
 0x129   : > { %v615_v59 = vpop.f32.mrf.mxu1  ;;  %v810_v61 = vadd.f32 %v780_v47, %v726_v58  ;;  %v786_v0 = vpop.f32.mrf.mxu3 }
 0x12a   : > { %v643_v1 = vadd.f32 %v615_v59, %v1981_v49 }
 0x12b   : > { %v894_v63 = vadd.f32 %v864_v62, %v810_v61 }
 0x12d   : > { %v908_v3 = vadd.f32 %v2015_v21, %v894_v63 }
 0x12e   : > { %v699_v38 = vpop.f32.mrf.mxu2 }
 0x12f   : > { %918 = vst [vmem:[%s2019_s27] sm:$0xff] %v908_v3  ;;  %v727_v4 = vadd.f32 %v699_v38, %v643_v1  ;;  %v867_v9 = vpop.f32.mrf.mxu0 }
 0x131   : > { %v618_v6 = vpop.f32.mrf.mxu1  ;;  %v811_v8 = vadd.f32 %v783_v14, %v727_v4  ;;  %v789_v11 = vpop.f32.mrf.mxu3 }
 0x132   : > { %v644_v13 = vadd.f32 %v618_v6, %v1986_v60 }
 0x133   : > { %v895_v10 = vadd.f32 %v867_v9, %v811_v8 }
 0x135   : > { %v909_v49 = vadd.f32 %v2015_v21, %v895_v10 }
 0x136   : > { %v702_v15 = vpop.f32.mrf.mxu2 }
 0x137   : > { %1151 = vst [vmem:[%s2019_s27 + $0x6] sm:$0xfc] %v909_v49  ;;  %v728_v17 = vadd.f32 %v702_v15, %v644_v13  ;;  %v870_v22 = vpop.f32.mrf.mxu0 }
 0x139   : > { %v621_v18 = vpop.f32.mrf.mxu1  ;;  %v812_v20 = vadd.f32 %v786_v0, %v728_v17  ;;  %v792_v24 = vpop.f32.mrf.mxu3 }
 0x13a   : > { %v645_v2 = vadd.f32 %v621_v18, %v1989_v5 }
 0x13b   : > { %v896_v23 = vadd.f32 %v870_v22, %v812_v20 }
 0x13d   : > { %v910_v26 = vadd.f32 %v2015_v21, %v896_v23 }
 0x13e   : > { %v705_v27 = vpop.f32.mrf.mxu2 }
 0x13f   : > { %1152 = vst [vmem:[%s2019_s27 + $0xe] sm:$0x3] %v910_v26  ;;  %v729_v28 = vadd.f32 %v705_v27, %v645_v2  ;;  %v873_v30 = vpop.f32.mrf.mxu0 }
 0x140   : > { %1153 = vst [vmem:[%s2019_s27 + $0xc] sm:$0xf0] %v910_v26 }
 0x141   : > { %v624_v60 = vpop.f32.mrf.mxu1  ;;  %v813_v29 = vadd.f32 %v789_v11, %v729_v28  ;;  %v795_v7 = vpop.f32.mrf.mxu3 }
 0x142   : > { %v646_v33 = vadd.f32 %v624_v60, %v1992_v16 }
 0x143   : > { %v897_v31 = vadd.f32 %v873_v30, %v813_v29 }
 0x145   : > { %v911_v34 = vadd.f32 %v2015_v21, %v897_v31 }
 0x146   : > { %v708_v35 = vpop.f32.mrf.mxu2 }
 0x147   : > { %1154 = vst [vmem:[%s2019_s27 + $0x14] sm:$0xf] %v911_v34  ;;  %v730_v5 = vadd.f32 %v708_v35, %v646_v33  ;;  %v876_v39 = vpop.f32.mrf.mxu0 }
 0x148   : > { %1155 = vst [vmem:[%s2019_s27 + $0x12] sm:$0xc0] %v911_v34 }
 0x149   : > { %v627_v36 = vpop.f32.mrf.mxu1  ;;  %v814_v37 = vadd.f32 %v792_v24, %v730_v5  ;;  %v798_v41 = vpop.f32.mrf.mxu3 }
 0x14a   : > { %v647_v42 = vadd.f32 %v627_v36, %v1995_v25 }
 0x14b   : > { %v898_v12 = vadd.f32 %v876_v39, %v814_v37 }
 0x14d   : > { %v912_v43 = vadd.f32 %v2015_v21, %v898_v12 }
 0x14e   : > { %v711_v44 = vpop.f32.mrf.mxu2 }
 0x14f   : > { %1156 = vst [vmem:[%s2019_s27 + $0x1a] sm:$0x3f] %v912_v43  ;;  %v731_v45 = vadd.f32 %v711_v44, %v647_v42  ;;  %v879_v47 = vpop.f32.mrf.mxu0 }
 0x151   : > { %v630_v16 = vpop.f32.mrf.mxu1  ;;  %v815_v46 = vadd.f32 %v795_v7, %v731_v45  ;;  %v801_v50 = vpop.f32.mrf.mxu3 }
 0x152   : > { %v648_v51 = vadd.f32 %v630_v16, %v1998_v32 }
 0x153   : > { %v899_v48 = vadd.f32 %v879_v47, %v815_v46 }
 0x155   : > { %v913_v52 = vadd.f32 %v2015_v21, %v899_v48 }
 0x156   : > { %v714_v53 = vpop.f32.mrf.mxu2 }
 0x157   : > { %1157 = vst [vmem:[%s2019_s27 + $0x20] sm:$0xff] %v913_v52  ;;  %v732_v54 = vadd.f32 %v714_v53, %v648_v51  ;;  %v882_v56 = vpop.f32.mrf.mxu0 }
 0x159   : > { %v633_v14 = vpop.f32.mrf.mxu1  ;;  %v816_v25 = vadd.f32 %v798_v41, %v732_v54  ;;  %v804_v58 = vpop.f32.mrf.mxu3 }
 0x15a   : > { %v649_v59 = vadd.f32 %v633_v14, %v2000_v40 }
 0x15b   : > { %v900_v57 = vadd.f32 %v882_v56, %v816_v25 }
 0x15d   : > { %v914_v61 = vadd.f32 %v2015_v21, %v900_v57 }
 0x15e   : > { %v717_v62 = vpop.f32.mrf.mxu2 }
 0x15f   : > { %1158 = vst [vmem:[%s2019_s27 + $0x26] sm:$0xfc] %v914_v61  ;;  %v733_v63 = vadd.f32 %v717_v62, %v649_v59  ;;  %v885_v1 = vpop.f32.mrf.mxu0 }
 0x161   : > { %v636_v32 = vpop.f32.mrf.mxu1  ;;  %v817_v0 = vadd.f32 %v801_v50, %v733_v63  ;;  %v807_v8 = vpop.f32.mrf.mxu3 }
 0x162   : > { %v650_v38 = vadd.f32 %v636_v32, %v2003_v19 }
 0x163   : > { %v901_v3 = vadd.f32 %v885_v1, %v817_v0 }
 0x165   : > { %v915_v4 = vadd.f32 %v2015_v21, %v901_v3 }
 0x166   : > { %v720_v6 = vpop.f32.mrf.mxu2 }
 0x167   : > { %1159 = vst [vmem:[%s2019_s27 + $0x2e] sm:$0x3] %v915_v4  ;;  %v734_v40 = vadd.f32 %v720_v6, %v650_v38  ;;  %v888_v10 = vpop.f32.mrf.mxu0 }
 0x168   : > { %1160 = vst [vmem:[%s2019_s27 + $0x2c] sm:$0xf0] %v915_v4 }
 0x169   : > { %v818_v9 = vadd.f32 %v804_v58, %v734_v40  ;;  %v639_v11 = vpop.f32.mrf.mxu1  ;;  %v891_v18 = vpop.f32.mrf.mxu3 }
 0x16a   : > { %v651_v49 = vadd.f32 %v639_v11, %v2006_v55 }
 0x16b   : > { %v902_v13 = vadd.f32 %v888_v10, %v818_v9 }
 0x16d   : > { %v916_v19 = vadd.f32 %v2015_v21, %v902_v13 }
 0x16e   : > { %v723_v15 = vpop.f32.mrf.mxu2 }
 0x16f   : > { %1161 = vst [vmem:[%s2019_s27 + $0x34] sm:$0xf] %v916_v19  ;;  %v735_v17 = vadd.f32 %v723_v15, %v651_v49 }
 0x170   : > { %1162 = vst [vmem:[%s2019_s27 + $0x32] sm:$0xc0] %v916_v19 }
 0x171   : > { %v819_v20 = vadd.f32 %v807_v8, %v735_v17 }
 0x173   : > { %v903_v22 = vadd.f32 %v891_v18, %v819_v20 }
 0x175   : > { %v917_v55 = vadd.f32 %v2015_v21, %v903_v22 }
 0x177   : > { %1163 = vst [vmem:[%s2019_s27 + $0x3a] sm:$0x3f] %v917_v55 }
 0x178   : > { %1288 = shalt.err (!%p1285_p3)
}
 0x179   : > { %s1325_s28 = smov 128   ;;  %s1326_s24 = smov 8  }
 0x17a   : > { %1219 = dma.vmem_to_hbm [thread:$0]  (%p1385_p5), %s953_s6, 1024, %s955_s7, %s940_s16, %s1325_s28, %s1325_s28, %s1326_s24  }
 0x17b PF: > { %p1225_p4 = scmp.ge.s32.totalorder %s1323_s15, 2  ;;  %s969_s25 = sand.u32 1, %s1311_s12  }
 0x17c   : > { %s970_s26 = scalar_lea.sflag [#allocation3], %s969_s25 }
 0x17d   : > { %p1222_p7 = pnand %p1225_p4, %p1389_p6 }
 0x17f   : > { %p1223_p8 = pneg %p1222_p7 }
 0x181   : > { %1306 = dma.done.wait (%p1223_p8), %s970_s26, 1024  }
 0x182   : > { %1308 = vsyncadd (%p1223_p8), %s970_s26, 4294966272  ;;  %p13_p9 = scmp.ge.s32.totalorder %s1372_s18, 4   ;;  %s2092_s12 = smov %s1315_s13 }
 0x183   : > { %s2093_s13 = smov %s1319_s14  ;;  %s2094_s14 = smov %s1383_s21 }
 0x184   : > { %s2095_s15 = smov %s1372_s18  ;;  %15 = sbr.rel (!%p13_p9) target bundleno = 3 (0x3), region = 82 }
 0x189   :  { %976 = vsyncpa [#allocation3], 1 }
 0x18a   :  { %978 = vsyncpa [#allocation3 + $0x1], 1 }

// kernel: a_call__.15
= control target key start
LH: loop header
LB: loop body
LE: loop exit
PB: predicated region body
PF: predicated region fallthrough
CT: control target
= control target key end

     0   :  { %8 = vsyncpa [#allocation3], 0  ;;  %s3641_s0 = inlined_call_operand.vmem [shape: f32[2,342,128], index: 0, kind: input, shape index: {}]   ;;  %s3642_s1 = inlined_call_operand.vmem [shape: f32[9,128,128], index: 1, kind: input, shape index: {}]   ;;  %s3643_s2 = inlined_call_operand.vmem [shape: f32[1,128], index: 2, kind: input, shape index: {}]   ;;  %s3644_s3 = inlined_call_operand.hbm [shape: f32[2,16,16,128], index: 3, kind: output, shape index: {}]  }
   0x1   :  { %10 = vsyncpa [#allocation3 + $0x1], 0  ;;  %s2558_s12 = smov 0   ;;  %s2560_s13 = smov 0  }
   0x2   :  { %s2562_s14 = smov 0   ;;  %s2564_s15 = smov 0  }
   0x3 LB: > { %s2579_s16 = sadd.s32 4294967295, %s2534_s15   ;;  %s2199_s17 = sadd.s32 4294967294, %s2534_s15   ;;  %s2534_s15 = sphi %s2564_s15, %s3650_s15   ;;  %s2530_s14 = sphi %s2562_s14, %s3649_s14   ;;  %s2526_s13 = sphi %s2560_s13, %s3648_s13   ;;  %s2522_s12 = sphi %s2558_s12, %s3647_s12  }
   0x4   : > { %s2583_s18 = sadd.s32 1, %s2534_s15   ;;  %s91_s19 = sadd.s32 1, %s2530_s14 }
   0x5   : > { %s88_s20 = ssub.s32 %s2534_s15, %s2583_s18  ;;  %p101_p0 = scmp.ne.s32.totalorder %s2530_s14, %s2526_s13 }
   0x6   : > { %p89_p1 = scmp.eq.s32.totalorder %s88_s20, 0  ;;  %p102_p2 = scmp.eq.s32.totalorder %s2579_s16, 1 }
   0x7   : > { %p107_p3 = scmp.ne.s32.totalorder %s2526_s13, %s2522_s12  ;;  %p108_p4 = scmp.eq.s32.totalorder %s2199_s17, 1 }
   0x8   : > { %s2594_s21 = scalar_select %p89_p1, %s2530_s14, %s91_s19  }
   0x9   : > { %p2596_p5 = por %p102_p2, %p101_p0  ;;  %p2600_p6 = por %p108_p4, %p107_p3 }
   0xa   : > { %p2202_p7 = scmp.ge.s32.totalorder %s2534_s15, 1  ;;  %p140_p8 = scmp.lt.s32.totalorder %s2534_s15, 3 }
   0xc   : > { %p141_p9 = pnand %p2202_p7, %p140_p8 }
   0xd   : > { %p164_p10 = scmp.lt.s32.totalorder (!%p141_p9), %s2579_s16, 1  ;;  %s161_s26 = sand.u32 (!%p141_p9), 1, %s2526_s13  }
   0xe   : > { %144 = sbr.rel (%p141_p9) target bundleno = 835 (0x343), region = 32  ;;  %s2203_s27 = sshll.u32 (!%p141_p9), %s161_s26, 8 }
   0xf   : > { %s3438_s30 = scalar_lea.vmem (!%p141_p9), [#allocation2], %s2203_s27  ;;  %s2492_s20 = scalar_lea.hbm (!%p141_p9), %s3644_s3, 512 }
  0x10   : > { %s2134_s7 = sshll.u32 (!%p141_p9), %s3438_s30, 4  ;;  %s2135_s7 = int_to_ptr.vmem [resolvable:$true] %s2134_s7 }
  0x13   : > { %v2220_v0 = vld [vmem:[%s3642_s1 + $0xf8] sm:$0xff]  ;;  %v2219_v1 = vld [vmem:[%s3642_s1 + $0xf0] sm:$0xff]  ;;  %v2218_v2 = vld [vmem:[%s3642_s1 + $0xe8] sm:$0xff]  ;;  %s165_s28 = scalar_select %p164_p10, %s2579_s16, 1 }
  0x14   : > { %2381 = vmatpush.msra.mxu1 %v2220_v0  ;;  %2382 = vmatpush.msra.mxu2 %v2220_v0  ;;  %v2217_v3 = vld [vmem:[%s3642_s1 + $0xe0] sm:$0xff]  ;;  %v2216_v4 = vld [vmem:[%s3642_s1 + $0xd8] sm:$0xff]  ;;  %v2215_v5 = vld [vmem:[%s3642_s1 + $0xd0] sm:$0xff] }
  0x15   : > { %2383 = vmatpush.msra.mxu3 %v2220_v0  ;;  %274 = vmatpush.msra.mxu0 %v2220_v0  ;;  %v2214_v6 = vld [vmem:[%s3642_s1 + $0xc8] sm:$0xff]  ;;  %v2213_v7 = vld [vmem:[%s3642_s1 + $0xc0] sm:$0xff]  ;;  %v2212_v8 = vld [vmem:[%s3642_s1 + $0xb8] sm:$0xff]  ;;  %s2429_s6 = smul.u32 344, %s165_s28 }
  0x16   : > { %2384 = vmatpush.msra.mxu1 %v2219_v1  ;;  %2385 = vmatpush.msra.mxu2 %v2219_v1  ;;  %v2211_v9 = vld [vmem:[%s3642_s1 + $0xb0] sm:$0xff]  ;;  %v2210_v10 = vld [vmem:[%s3642_s1 + $0xa8] sm:$0xff]  ;;  %v2209_v11 = vld [vmem:[%s3642_s1 + $0xa0] sm:$0xff] }
  0x17   : > { %2386 = vmatpush.msra.mxu3 %v2219_v1  ;;  %275 = vmatpush.msra.mxu0 %v2219_v1  ;;  %v2208_v12 = vld [vmem:[%s3642_s1 + $0x98] sm:$0xff]  ;;  %v2207_v13 = vld [vmem:[%s3642_s1 + $0x90] sm:$0xff]  ;;  %v2206_v14 = vld [vmem:[%s3642_s1 + $0x88] sm:$0xff]  ;;  %s2656_s19 = scalar_lea.vmem %s3641_s0, %s2429_s6 }
  0x18   : > { %2387 = vmatpush.msra.mxu1 %v2218_v2  ;;  %2388 = vmatpush.msra.mxu2 %v2218_v2  ;;  %v2205_v15 = vld [vmem:[%s3642_s1 + $0x80] sm:$0xff]  ;;  %v230_v16 = vld [vmem:[%s2656_s19 + $0x49] sm:$0xff]  ;;  %v239_v17 = vld [vmem:[%s2656_s19 + $0x91] sm:$0xff] }
  0x19   : > { %2389 = vmatpush.msra.mxu3 %v2218_v2  ;;  %276 = vmatpush.msra.mxu0 %v2218_v2  ;;  %v2236_v18 = vld [vmem:[%s3642_s1 + $0x178] sm:$0xff]  ;;  %v2235_v22 = vld [vmem:[%s3642_s1 + $0x170] sm:$0xff]  ;;  %v2234_v25 = vld [vmem:[%s3642_s1 + $0x168] sm:$0xff] }
  0x1a   : > { %2390 = vmatpush.msra.mxu1 %v2217_v3  ;;  %2391 = vmatpush.msra.mxu2 %v2217_v3  ;;  %v248_v19 = vld [vmem:[%s2656_s19 + $0xd9] sm:$0xff]  ;;  %v219_v23 = vld [vmem:[%s3642_s1 + $0x70] sm:$0xff]  ;;  %v221_v26 = vld [vmem:[%s2656_s19 + $0x1] sm:$0xff] }
  0x1b   : > { %2392 = vmatpush.msra.mxu3 %v2217_v3  ;;  %277 = vmatpush.msra.mxu0 %v2217_v3  ;;  %v220_v20 = vld [vmem:[%s3642_s1 + $0x78] sm:$0xff]  ;;  %v2251_v24 = vld [vmem:[%s3642_s1 + $0x1f0] sm:$0xff]  ;;  %v218_v27 = vld [vmem:[%s3642_s1 + $0x68] sm:$0xff] }
  0x1c   : > { %2393 = vmatpush.msra.mxu1 %v2216_v4  ;;  %2394 = vmatpush.msra.mxu2 %v2216_v4  ;;  %v2252_v21 = vld [vmem:[%s3642_s1 + $0x1f8] sm:$0xff]  ;;  %v2250_v29 = vld [vmem:[%s3642_s1 + $0x1e8] sm:$0xff]  ;;  %v2233_v32 = vld [vmem:[%s3642_s1 + $0x160] sm:$0xff] }
  0x1d   : > { %2395 = vmatpush.msra.mxu3 %v2216_v4  ;;  %278 = vmatpush.msra.mxu0 %v2216_v4  ;;  %v2268_v28 = vld [vmem:[%s3642_s1 + $0x278] sm:$0xff]  ;;  %v2267_v33 = vld [vmem:[%s3642_s1 + $0x270] sm:$0xff]  ;;  %v249_v34 = vld [vmem:[%s2656_s19 + $0xe1] sm:$0xff] }
  0x1e   : > { %2396 = vmatpush.msra.mxu1 %v2215_v5  ;;  %2397 = vmatpush.msra.mxu2 %v2215_v5  ;;  %v231_v30 = vld [vmem:[%s2656_s19 + $0x51] sm:$0xff]  ;;  %v240_v31 = vld [vmem:[%s2656_s19 + $0x99] sm:$0xff]  ;;  %v2266_v38 = vld [vmem:[%s3642_s1 + $0x268] sm:$0xff] }
  0x1f   : > { %2398 = vmatpush.msra.mxu3 %v2215_v5  ;;  %279 = vmatpush.msra.mxu0 %v2215_v5  ;;  %v217_v35 = vld [vmem:[%s3642_s1 + $0x60] sm:$0xff]  ;;  %v2232_v37 = vld [vmem:[%s3642_s1 + $0x158] sm:$0xff]  ;;  %v2231_v41 = vld [vmem:[%s3642_s1 + $0x150] sm:$0xff] }
  0x20   : > { %2399 = vmatpush.msra.mxu1 %v2214_v6  ;;  %2400 = vmatpush.msra.mxu2 %v2214_v6  ;;  %v2249_v36 = vld [vmem:[%s3642_s1 + $0x1e0] sm:$0xff]  ;;  %v216_v39 = vld [vmem:[%s3642_s1 + $0x58] sm:$0xff]  ;;  %v222_v42 = vld [vmem:[%s2656_s19 + $0x9] sm:$0xff] }
  0x21   : > { %2401 = vmatpush.msra.mxu3 %v2214_v6  ;;  %280 = vmatpush.msra.mxu0 %v2214_v6  ;;  %v2248_v40 = vld [vmem:[%s3642_s1 + $0x1d8] sm:$0xff]  ;;  %v215_v43 = vld [vmem:[%s3642_s1 + $0x50] sm:$0xff]  ;;  %v2265_v44 = vld [vmem:[%s3642_s1 + $0x260] sm:$0xff] }
  0x22   : > { %2402 = vmatpush.msra.mxu1 %v2213_v7  ;;  %2403 = vmatpush.msra.mxu2 %v2213_v7  ;;  %v2247_v45 = vld [vmem:[%s3642_s1 + $0x1d0] sm:$0xff]  ;;  %v232_v46 = vld [vmem:[%s2656_s19 + $0x59] sm:$0xff]  ;;  %v241_v47 = vld [vmem:[%s2656_s19 + $0xa1] sm:$0xff] }
  0x23   : > { %2404 = vmatpush.msra.mxu3 %v2213_v7  ;;  %281 = vmatpush.msra.mxu0 %v2213_v7  ;;  %v2230_v48 = vld [vmem:[%s3642_s1 + $0x148] sm:$0xff]  ;;  %v2264_v49 = vld [vmem:[%s3642_s1 + $0x258] sm:$0xff]  ;;  %v2229_v53 = vld [vmem:[%s3642_s1 + $0x140] sm:$0xff] }
  0x24   : > { %2405 = vmatpush.msra.mxu1 %v2212_v8  ;;  %2406 = vmatpush.msra.mxu2 %v2212_v8  ;;  %v250_v50 = vld [vmem:[%s2656_s19 + $0xe9] sm:$0xff]  ;;  %v213_v55 = vld [vmem:[%s3642_s1 + $0x40] sm:$0xff]  ;;  %v2228_v57 = vld [vmem:[%s3642_s1 + $0x138] sm:$0xff] }
  0x25   : > { %2407 = vmatpush.msra.mxu3 %v2212_v8  ;;  %282 = vmatpush.msra.mxu0 %v2212_v8  ;;  %v214_v51 = vld [vmem:[%s3642_s1 + $0x48] sm:$0xff]  ;;  %v2263_v54 = vld [vmem:[%s3642_s1 + $0x250] sm:$0xff]  ;;  %v2245_v56 = vld [vmem:[%s3642_s1 + $0x1c0] sm:$0xff] }
  0x26   : > { %2408 = vmatpush.msra.mxu1 %v2211_v9  ;;  %2409 = vmatpush.msra.mxu2 %v2211_v9  ;;  %v2246_v52 = vld [vmem:[%s3642_s1 + $0x1c8] sm:$0xff]  ;;  %v223_v58 = vld [vmem:[%s2656_s19 + $0x11] sm:$0xff]  ;;  %v2261_v1 = vld [vmem:[%s3642_s1 + $0x240] sm:$0xff] }
  0x27   : > { %2410 = vmatpush.msra.mxu3 %v2211_v9  ;;  %283 = vmatpush.msra.mxu0 %v2211_v9  ;;  %v212_v59 = vld [vmem:[%s3642_s1 + $0x38] sm:$0xff]  ;;  %v2262_v60 = vld [vmem:[%s3642_s1 + $0x248] sm:$0xff]  ;;  %v2227_v0 = vld [vmem:[%s3642_s1 + $0x130] sm:$0xff] }
  0x28   : > { %2411 = vmatpush.msra.mxu1 %v2210_v10  ;;  %2412 = vmatpush.msra.mxu2 %v2210_v10  ;;  %v2244_v61 = vld [vmem:[%s3642_s1 + $0x1b8] sm:$0xff]  ;;  %v233_v62 = vld [vmem:[%s2656_s19 + $0x61] sm:$0xff]  ;;  %v242_v63 = vld [vmem:[%s2656_s19 + $0xa9] sm:$0xff] }
  0x29   : > { %2413 = vmatpush.msra.mxu3 %v2210_v10  ;;  %284 = vmatpush.msra.mxu0 %v2210_v10  ;;  %v251_v2 = vld [vmem:[%s2656_s19 + $0xf1] sm:$0xff]  ;;  %v2226_v5 = vld [vmem:[%s3642_s1 + $0x128] sm:$0xff]  ;;  %v2225_v9 = vld [vmem:[%s3642_s1 + $0x120] sm:$0xff] }
  0x2a   : > { %2414 = vmatpush.msra.mxu1 %v2209_v11  ;;  %2415 = vmatpush.msra.mxu2 %v2209_v11  ;;  %v211_v3 = vld [vmem:[%s3642_s1 + $0x30] sm:$0xff]  ;;  %v2260_v6 = vld [vmem:[%s3642_s1 + $0x238] sm:$0xff]  ;;  %v210_v7 = vld [vmem:[%s3642_s1 + $0x28] sm:$0xff] }
  0x2b   : > { %2416 = vmatpush.msra.mxu3 %v2209_v11  ;;  %285 = vmatpush.msra.mxu0 %v2209_v11  ;;  %v2243_v4 = vld [vmem:[%s3642_s1 + $0x1b0] sm:$0xff]  ;;  %v2242_v8 = vld [vmem:[%s3642_s1 + $0x1a8] sm:$0xff]  ;;  %v224_v10 = vld [vmem:[%s2656_s19 + $0x19] sm:$0xff] }
  0x2c   : > { %2417 = vmatpush.msra.mxu1 %v2208_v12  ;;  %2418 = vmatpush.msra.mxu2 %v2208_v12  ;;  %v209_v11 = vld [vmem:[%s3642_s1 + $0x20] sm:$0xff] }
  0x2d   : > { %2419 = vmatpush.msra.mxu3 %v2208_v12  ;;  %286 = vmatpush.msra.mxu0 %v2208_v12  ;;  %v2259_v12 = vld [vmem:[%s3642_s1 + $0x230] sm:$0xff] }
  0x2e   : > { %2420 = vmatpush.msra.mxu1 %v2207_v13  ;;  %2421 = vmatpush.msra.mxu2 %v2207_v13 }
  0x2f   : > { %2422 = vmatpush.msra.mxu3 %v2207_v13  ;;  %287 = vmatpush.msra.mxu0 %v2207_v13  ;;  %v2241_v13 = vld [vmem:[%s3642_s1 + $0x1a0] sm:$0xff] }
  0x30   : > { %2423 = vmatpush.msra.mxu1 %v2206_v14  ;;  %2424 = vmatpush.msra.mxu2 %v2206_v14 }
  0x31   : > { %2425 = vmatpush.msra.mxu3 %v2206_v14  ;;  %288 = vmatpush.msra.mxu0 %v2206_v14  ;;  %v234_v14 = vld [vmem:[%s2656_s19 + $0x69] sm:$0xff] }
  0x32   : > { %2426 = vmatpush.msra.mxu1 %v2205_v15  ;;  %2427 = vmatpush.msra.mxu2 %v2205_v15 }
  0x33   : > { %317 = vmatmul.f32.vlgmr.msra.gmra.mxu1 %v230_v16  ;;  %344 = vmatmul.f32.vlgmr.msra.gmra.mxu2 %v239_v17  ;;  %v2224_v16 = vld [vmem:[%s3642_s1 + $0x118] sm:$0xff]  ;;  %v2258_v17 = vld [vmem:[%s3642_s1 + $0x228] sm:$0xff] }
  0x34   : > { %577 = vmatpush.msrb.mxu2 %v2236_v18  ;;  %2428 = vmatpush.msra.mxu3 %v2205_v15  ;;  %v252_v18 = vld [vmem:[%s2656_s19 + $0xf9] sm:$0xff] }
  0x35   : > { %371 = vmatmul.f32.vlgmr.msra.gmra.mxu3 %v248_v19  ;;  %399 = vmatpush.msrb.mxu1 %v220_v20  ;;  %v208_v19 = vld [vmem:[%s3642_s1 + $0x18] sm:$0xff] }
  0x36   : > { %791 = vmatpush.msrb.mxu3 %v2252_v21  ;;  %578 = vmatpush.msrb.mxu2 %v2235_v22  ;;  %v2240_v20 = vld [vmem:[%s3642_s1 + $0x198] sm:$0xff]  ;;  %v2223_v21 = vld [vmem:[%s3642_s1 + $0x110] sm:$0xff]  ;;  %v2257_v22 = vld [vmem:[%s3642_s1 + $0x220] sm:$0xff] }
  0x37   : > { %289 = vmatpush.msra.mxu0 %v2205_v15  ;;  %400 = vmatpush.msrb.mxu1 %v219_v23  ;;  %v243_v15 = vld [vmem:[%s2656_s19 + $0xb1] sm:$0xff] }
  0x38   : > { %792 = vmatpush.msrb.mxu3 %v2251_v24  ;;  %579 = vmatpush.msrb.mxu2 %v2234_v25  ;;  %v207_v23 = vld [vmem:[%s3642_s1 + $0x10] sm:$0xff]  ;;  %v2222_v25 = vld [vmem:[%s3642_s1 + $0x108] sm:$0xff] }
  0x39   : > { %290 = vmatmul.f32.vlgmr.msra.gmra.mxu0 %v221_v26  ;;  %401 = vmatpush.msrb.mxu1 %v218_v27  ;;  %v2239_v24 = vld [vmem:[%s3642_s1 + $0x190] sm:$0xff]  ;;  %v225_v26 = vld [vmem:[%s2656_s19 + $0x21] sm:$0xff] }
  0x3a   : > { %1005 = vmatpush.msrb.mxu0 %v2268_v28  ;;  %793 = vmatpush.msrb.mxu3 %v2250_v29  ;;  %v206_v27 = vld [vmem:[%s3642_s1 + $0x8] sm:$0xff]  ;;  %v2256_v28 = vld [vmem:[%s3642_s1 + $0x218] sm:$0xff] }
  0x3b   : > { %320 = vmatmul.f32.gmra.mxu1 %v231_v30  ;;  %347 = vmatmul.f32.gmra.mxu2 %v240_v31  ;;  %v2238_v29 = vld [vmem:[%s3642_s1 + $0x188] sm:$0xff]  ;;  %v235_v30 = vld [vmem:[%s2656_s19 + $0x71] sm:$0xff]  ;;  %v244_v31 = vld [vmem:[%s2656_s19 + $0xb9] sm:$0xff] }
  0x3c   : > { %580 = vmatpush.msrb.mxu2 %v2233_v32  ;;  %1006 = vmatpush.msrb.mxu0 %v2267_v33  ;;  %v2221_v32 = vld [vmem:[%s3642_s1 + $0x100] sm:$0xff]  ;;  %v2255_v33 = vld [vmem:[%s3642_s1 + $0x210] sm:$0xff] }
  0x3d   : > { %374 = vmatmul.f32.gmra.mxu3 %v249_v34  ;;  %402 = vmatpush.msrb.mxu1 %v217_v35  ;;  %v253_v34 = vld [vmem:[%s2656_s19 + $0x101] sm:$0xff] }
  0x3e   : > { %794 = vmatpush.msrb.mxu3 %v2249_v36  ;;  %581 = vmatpush.msrb.mxu2 %v2232_v37  ;;  %v205_v35 = vld [vmem:[%s3642_s1] sm:$0xff]  ;;  %v2300_v37 = vld [vmem:[%s3642_s1 + $0x378] sm:$0xff] }
  0x3f   : > { %1007 = vmatpush.msrb.mxu0 %v2266_v38  ;;  %403 = vmatpush.msrb.mxu1 %v216_v39  ;;  %v2237_v36 = vld [vmem:[%s3642_s1 + $0x180] sm:$0xff]  ;;  %v2254_v38 = vld [vmem:[%s3642_s1 + $0x208] sm:$0xff]  ;;  %v2316_v39 = vld [vmem:[%s3642_s1 + $0x3f8] sm:$0xff] }
  0x40   : > { %795 = vmatpush.msrb.mxu3 %v2248_v40  ;;  %582 = vmatpush.msrb.mxu2 %v2231_v41  ;;  %v2284_v40 = vld [vmem:[%s3642_s1 + $0x2f8] sm:$0xff]  ;;  %v226_v41 = vld [vmem:[%s2656_s19 + $0x29] sm:$0xff] }
  0x41   : > { %293 = vmatmul.f32.gmra.mxu0 %v222_v42  ;;  %404 = vmatpush.msrb.mxu1 %v215_v43  ;;  %v2253_v42 = vld [vmem:[%s3642_s1 + $0x200] sm:$0xff] }
  0x42   : > { %1008 = vmatpush.msrb.mxu0 %v2265_v44  ;;  %796 = vmatpush.msrb.mxu3 %v2247_v45  ;;  %v236_v43 = vld [vmem:[%s2656_s19 + $0x79] sm:$0xff]  ;;  %v245_v44 = vld [vmem:[%s2656_s19 + $0xc1] sm:$0xff]  ;;  %v254_v45 = vld [vmem:[%s2656_s19 + $0x109] sm:$0xff] }
  0x43   : > { %323 = vmatmul.f32.gmra.mxu1 %v232_v46  ;;  %350 = vmatmul.f32.gmra.mxu2 %v241_v47  ;;  %v2332_v46 = vld [vmem:[%s3642_s1 + $0x478] sm:$0xff] }
  0x44   : > { %583 = vmatpush.msrb.mxu2 %v2230_v48  ;;  %1009 = vmatpush.msrb.mxu0 %v2264_v49  ;;  %v227_v47 = vld [vmem:[%s2656_s19 + $0x31] sm:$0xff]  ;;  %v237_v48 = vld [vmem:[%s2656_s19 + $0x81] sm:$0xff]  ;;  %v246_v49 = vld [vmem:[%s2656_s19 + $0xc9] sm:$0xff] }
  0x45   : > { %377 = vmatmul.f32.gmra.mxu3 %v250_v50  ;;  %405 = vmatpush.msrb.mxu1 %v214_v51  ;;  %v255_v50 = vld [vmem:[%s2656_s19 + $0x111] sm:$0xff] }
  0x46   : > { %797 = vmatpush.msrb.mxu3 %v2246_v52  ;;  %584 = vmatpush.msrb.mxu2 %v2229_v53  ;;  %v2299_v51 = vld [vmem:[%s3642_s1 + $0x370] sm:$0xff] }
  0x47   : > { %1010 = vmatpush.msrb.mxu0 %v2263_v54  ;;  %406 = vmatpush.msrb.mxu1 %v213_v55  ;;  %v2315_v52 = vld [vmem:[%s3642_s1 + $0x3f0] sm:$0xff]  ;;  %v228_v54 = vld [vmem:[%s2656_s19 + $0x39] sm:$0xff] }
  0x48   : > { %798 = vmatpush.msrb.mxu3 %v2245_v56  ;;  %585 = vmatpush.msrb.mxu2 %v2228_v57  ;;  %v2283_v53 = vld [vmem:[%s3642_s1 + $0x2f0] sm:$0xff]  ;;  %v256_v57 = vld [vmem:[%s2656_s19 + $0x119] sm:$0xff] }
  0x49   : > { %296 = vmatmul.f32.gmra.mxu0 %v223_v58  ;;  %407 = vmatpush.msrb.mxu1 %v212_v59  ;;  %v238_v55 = vld [vmem:[%s2656_s19 + $0x89] sm:$0xff]  ;;  %v247_v56 = vld [vmem:[%s2656_s19 + $0xd1] sm:$0xff]  ;;  %v229_v59 = vld [vmem:[%s2656_s19 + $0x41] sm:$0xff] }
  0x4a   : > { %1011 = vmatpush.msrb.mxu0 %v2262_v60  ;;  %799 = vmatpush.msrb.mxu3 %v2244_v61  ;;  %v2331_v58 = vld [vmem:[%s3642_s1 + $0x470] sm:$0xff]  ;;  %v169_v60 = vld [vmem:[%s2656_s19] sm:$0xff] }
  0x4b   : > { %326 = vmatmul.f32.gmra.mxu1 %v233_v62  ;;  %353 = vmatmul.f32.gmra.mxu2 %v242_v63  ;;  %v524_v61 = vld [vmem:[%s2656_s19 + $0x2] sm:$0xff]  ;;  %v738_v62 = vld [vmem:[%s2656_s19 + $0x12] sm:$0xff] }
  0x4c   : > { %586 = vmatpush.msrb.mxu2 %v2227_v0  ;;  %1012 = vmatpush.msrb.mxu0 %v2261_v1  ;;  %v2298_v63 = vld [vmem:[%s3642_s1 + $0x368] sm:$0xff]  ;;  %v952_v1 = vld [vmem:[%s2656_s19 + $0x13] sm:$0xff] }
  0x4d   : > { %380 = vmatmul.f32.gmra.mxu3 %v251_v2  ;;  %408 = vmatpush.msrb.mxu1 %v211_v3  ;;  %v2314_v0 = vld [vmem:[%s3642_s1 + $0x3e8] sm:$0xff] }
  0x4e   : > { %800 = vmatpush.msrb.mxu3 %v2243_v4  ;;  %587 = vmatpush.msrb.mxu2 %v2226_v5  ;;  %v170_v2 = vld [vmem:[%s2656_s19 + $0x8] sm:$0xff]  ;;  %v739_v4 = vld [vmem:[%s2656_s19 + $0x1a] sm:$0xff] }
  0x4f   : > { %1013 = vmatpush.msrb.mxu0 %v2260_v6  ;;  %409 = vmatpush.msrb.mxu1 %v210_v7  ;;  %v525_v3 = vld [vmem:[%s2656_s19 + $0xa] sm:$0xff]  ;;  %v953_v7 = vld [vmem:[%s2656_s19 + $0x1b] sm:$0xff] }
  0x50   : > { %801 = vmatpush.msrb.mxu3 %v2242_v8  ;;  %588 = vmatpush.msrb.mxu2 %v2225_v9  ;;  %v2282_v5 = vld [vmem:[%s3642_s1 + $0x2e8] sm:$0xff]  ;;  %v171_v8 = vld [vmem:[%s2656_s19 + $0x10] sm:$0xff] }
  0x51   : > { %299 = vmatmul.f32.gmra.mxu0 %v224_v10  ;;  %410 = vmatpush.msrb.mxu1 %v209_v11  ;;  %v2330_v6 = vld [vmem:[%s3642_s1 + $0x468] sm:$0xff]  ;;  %v172_v11 = vld [vmem:[%s2656_s19 + $0x18] sm:$0xff] }
  0x52   : > { %1014 = vmatpush.msrb.mxu0 %v2259_v12  ;;  %802 = vmatpush.msrb.mxu3 %v2241_v13  ;;  %v740_v9 = vld [vmem:[%s2656_s19 + $0x22] sm:$0xff]  ;;  %v741_v13 = vld [vmem:[%s2656_s19 + $0x2a] sm:$0xff] }
  0x53   : > { %329 = vmatmul.f32.gmra.mxu1 %v234_v14  ;;  %356 = vmatmul.f32.gmra.mxu2 %v243_v15  ;;  %v954_v10 = vld [vmem:[%s2656_s19 + $0x23] sm:$0xff] }
  0x54   : > { %589 = vmatpush.msrb.mxu2 %v2224_v16  ;;  %1015 = vmatpush.msrb.mxu0 %v2258_v17  ;;  %v2297_v12 = vld [vmem:[%s3642_s1 + $0x360] sm:$0xff]  ;;  %v955_v16 = vld [vmem:[%s2656_s19 + $0x2b] sm:$0xff] }
  0x55   : > { %383 = vmatmul.f32.gmra.mxu3 %v252_v18  ;;  %411 = vmatpush.msrb.mxu1 %v208_v19  ;;  %v2313_v14 = vld [vmem:[%s3642_s1 + $0x3e0] sm:$0xff]  ;;  %v742_v18 = vld [vmem:[%s2656_s19 + $0x32] sm:$0xff] }
  0x56   : > { %803 = vmatpush.msrb.mxu3 %v2240_v20  ;;  %590 = vmatpush.msrb.mxu2 %v2223_v21  ;;  %v2281_v15 = vld [vmem:[%s3642_s1 + $0x2e0] sm:$0xff]  ;;  %v956_v20 = vld [vmem:[%s2656_s19 + $0x33] sm:$0xff]  ;;  %v174_v21 = vld [vmem:[%s2656_s19 + $0x28] sm:$0xff] }
  0x57   : > { %1016 = vmatpush.msrb.mxu0 %v2257_v22  ;;  %412 = vmatpush.msrb.mxu1 %v207_v23  ;;  %v173_v17 = vld [vmem:[%s2656_s19 + $0x20] sm:$0xff]  ;;  %v2296_v23 = vld [vmem:[%s3642_s1 + $0x358] sm:$0xff] }
  0x58   : > { %804 = vmatpush.msrb.mxu3 %v2239_v24  ;;  %591 = vmatpush.msrb.mxu2 %v2222_v25  ;;  %v2329_v19 = vld [vmem:[%s3642_s1 + $0x460] sm:$0xff]  ;;  %v2312_v24 = vld [vmem:[%s3642_s1 + $0x3d8] sm:$0xff] }
  0x59   : > { %302 = vmatmul.f32.gmra.mxu0 %v225_v26  ;;  %413 = vmatpush.msrb.mxu1 %v206_v27  ;;  %v743_v22 = vld [vmem:[%s2656_s19 + $0x3a] sm:$0xff]  ;;  %v175_v27 = vld [vmem:[%s2656_s19 + $0x30] sm:$0xff] }
  0x5a   : > { %1017 = vmatpush.msrb.mxu0 %v2256_v28  ;;  %805 = vmatpush.msrb.mxu3 %v2238_v29  ;;  %v957_v25 = vld [vmem:[%s2656_s19 + $0x3b] sm:$0xff] }
  0x5b   : > { %332 = vmatmul.f32.gmra.mxu1 %v235_v30  ;;  %359 = vmatmul.f32.gmra.mxu2 %v244_v31  ;;  %v2280_v26 = vld [vmem:[%s3642_s1 + $0x2d8] sm:$0xff]  ;;  %v744_v28 = vld [vmem:[%s2656_s19 + $0x42] sm:$0xff] }
  0x5c   : > { %592 = vmatpush.msrb.mxu2 %v2221_v32  ;;  %1018 = vmatpush.msrb.mxu0 %v2255_v33  ;;  %v2328_v29 = vld [vmem:[%s3642_s1 + $0x458] sm:$0xff]  ;;  %v958_v30 = vld [vmem:[%s2656_s19 + $0x43] sm:$0xff] }
  0x5d   : > { %386 = vmatmul.f32.gmra.mxu3 %v253_v34  ;;  %414 = vmatpush.msrb.mxu1 %v205_v35  ;;  %v176_v32 = vld [vmem:[%s2656_s19 + $0x38] sm:$0xff]  ;;  %v745_v33 = vld [vmem:[%s2656_s19 + $0x4a] sm:$0xff] }
  0x5e   : > { %806 = vmatpush.msrb.mxu3 %v2237_v36  ;;  %1433 = vmatpush.msra.mxu2 %v2300_v37  ;;  %v2295_v34 = vld [vmem:[%s3642_s1 + $0x350] sm:$0xff] }
  0x5f   : > { %1019 = vmatpush.msrb.mxu0 %v2254_v38  ;;  %1219 = vmatpush.msra.mxu1 %v2284_v40  ;;  %v959_v37 = vld [vmem:[%s2656_s19 + $0x4b] sm:$0xff] }
  0x60   : > { %1647 = vmatpush.msra.mxu3 %v2316_v39  ;;  %1434 = vmatpush.msra.mxu2 %v2299_v51  ;;  %v2311_v38 = vld [vmem:[%s3642_s1 + $0x3d0] sm:$0xff]  ;;  %v747_v51 = vld [vmem:[%s2656_s19 + $0x5a] sm:$0xff] }
  0x61   : > { %305 = vmatmul.f32.gmra.mxu0 %v226_v41  ;;  %1220 = vmatpush.msra.mxu1 %v2283_v53  ;;  %v177_v41 = vld [vmem:[%s2656_s19 + $0x40] sm:$0xff] }
  0x62   : > { %1020 = vmatpush.msrb.mxu0 %v2253_v42  ;;  %1648 = vmatpush.msra.mxu3 %v2315_v52  ;;  %v2279_v42 = vld [vmem:[%s3642_s1 + $0x2d0] sm:$0xff] }
  0x63   : > { %335 = vmatmul.f32.gmra.mxu1 %v236_v43  ;;  %362 = vmatmul.f32.gmra.mxu2 %v245_v44  ;;  %v746_v43 = vld [vmem:[%s2656_s19 + $0x52] sm:$0xff] }
  0x64   : > { %1861 = vmatpush.msra.mxu0 %v2332_v46  ;;  %1435 = vmatpush.msra.mxu2 %v2298_v63  ;;  %v960_v46 = vld [vmem:[%s2656_s19 + $0x53] sm:$0xff] }
  0x65   : > { %389 = vmatmul.f32.gmra.mxu3 %v254_v45  ;;  %1221 = vmatpush.msra.mxu1 %v2282_v5  ;;  %v749_v5 = vld [vmem:[%s2656_s19 + $0x6a] sm:$0xff] }
  0x66   : > { %1862 = vmatpush.msra.mxu0 %v2331_v58  ;;  %1649 = vmatpush.msra.mxu3 %v2314_v0  ;;  %v179_v58 = vld [vmem:[%s2656_s19 + $0x50] sm:$0xff]  ;;  %v962_v0 = vld [vmem:[%s2656_s19 + $0x63] sm:$0xff] }
  0x67   : > { %1436 = vmatpush.msra.mxu2 %v2297_v12  ;;  %1222 = vmatpush.msra.mxu1 %v2281_v15  ;;  %v2293_v12 = vld [vmem:[%s3642_s1 + $0x340] sm:$0xff] }
  0x68   : > { %1863 = vmatpush.msra.mxu0 %v2330_v6  ;;  %1650 = vmatpush.msra.mxu3 %v2313_v14  ;;  %v2309_v14 = vld [vmem:[%s3642_s1 + $0x3c0] sm:$0xff] }
  0x69   : > { %308 = vmatmul.f32.gmra.mxu0 %v227_v47  ;;  %1437 = vmatpush.msra.mxu2 %v2296_v23  ;;  %v2327_v47 = vld [vmem:[%s3642_s1 + $0x450] sm:$0xff]  ;;  %v2277_v15 = vld [vmem:[%s3642_s1 + $0x2c0] sm:$0xff] }
  0x6a   : > { %1864 = vmatpush.msra.mxu0 %v2329_v19  ;;  %1651 = vmatpush.msra.mxu3 %v2312_v24  ;;  %v2325_v23 = vld [vmem:[%s3642_s1 + $0x440] sm:$0xff] }
  0x6b   : > { %338 = vmatmul.f32.gmra.mxu1 %v237_v48  ;;  %365 = vmatmul.f32.gmra.mxu2 %v246_v49 }
  0x6c   : > { %1223 = vmatpush.msra.mxu1 %v2280_v26  ;;  %1865 = vmatpush.msra.mxu0 %v2328_v29  ;;  %v965_v26 = vld [vmem:[%s2656_s19 + $0x7b] sm:$0xff]  ;;  %v183_v29 = vld [vmem:[%s2656_s19 + $0x70] sm:$0xff] }
  0x6d   : > { %392 = vmatmul.f32.gmra.mxu3 %v255_v50  ;;  %1438 = vmatpush.msra.mxu2 %v2295_v34  ;;  %v178_v50 = vld [vmem:[%s2656_s19 + $0x48] sm:$0xff] }
  0x6e   : > { %1652 = vmatpush.msra.mxu3 %v2311_v38  ;;  %1224 = vmatpush.msra.mxu1 %v2279_v42  ;;  %v966_v38 = vld [vmem:[%s2656_s19 + $0x83] sm:$0xff] }
  0x6f   : > { %1866 = vmatpush.msra.mxu0 %v2327_v47  ;;  %v753_v47 = vld [vmem:[%s2656_s19 + $0x8a] sm:$0xff] }
  0x71   : > { %311 = vmatmul.f32.gmra.mxu0 %v228_v54  ;;  %v961_v54 = vld [vmem:[%s2656_s19 + $0x5b] sm:$0xff] }
  0x73   : > { %341 = vmatmul.f32.gmra.mxu1 %v238_v55  ;;  %368 = vmatmul.f32.gmra.mxu2 %v247_v56  ;;  %v2294_v55 = vld [vmem:[%s3642_s1 + $0x348] sm:$0xff] }
  0x74   : > { %1439 = vmatpush.msra.mxu2 %v2294_v55  ;;  %v967_v55 = vld [vmem:[%s2656_s19 + $0x8b] sm:$0xff] }
  0x75   : > { %395 = vmatmul.f32.gmra.mxu3 %v256_v57 }
  0x76   : > { %1440 = vmatpush.msra.mxu2 %v2293_v12  ;;  %v2307_v12 = vld [vmem:[%s3642_s1 + $0x3b0] sm:$0xff] }
  0x79   : > { %314 = vmatmul.f32.gmra.mxu0 %v229_v59  ;;  %v2310_v59 = vld [vmem:[%s3642_s1 + $0x3c8] sm:$0xff] }
  0x7a   : > { %1653 = vmatpush.msra.mxu3 %v2310_v59 }
  0x7b   : > { %415 = vmatmul.f32.vlgmr.msrb.gmra.mxu1 %v169_v60  ;;  %593 = vmatmul.f32.vlgmr.msrb.gmra.mxu2 %v524_v61  ;;  %v748_v60 = vld [vmem:[%s2656_s19 + $0x62] sm:$0xff] }
  0x7c   : > { %v2278_v61 = vld [vmem:[%s3642_s1 + $0x2c8] sm:$0xff]  ;;  %1654 = vmatpush.msra.mxu3 %v2309_v14 }
  0x7d   : > { %807 = vmatmul.f32.vlgmr.msrb.gmra.mxu3 %v738_v62  ;;  %1225 = vmatpush.msra.mxu1 %v2278_v61  ;;  %v754_v61 = vld [vmem:[%s2656_s19 + $0x92] sm:$0xff] }
  0x7f   : > { %1226 = vmatpush.msra.mxu1 %v2277_v15  ;;  %v186_v15 = vld [vmem:[%s2656_s19 + $0x88] sm:$0xff] }
  0x81   : > { %1021 = vmatmul.f32.vlgmr.msrb.gmra.mxu0 %v952_v1 }
  0x83   : > { %418 = vmatmul.f32.gmra.mxu1 %v170_v2  ;;  %596 = vmatmul.f32.gmra.mxu2 %v525_v3  ;;  %v180_v3 = vld [vmem:[%s2656_s19 + $0x58] sm:$0xff] }
  0x85   : > { %810 = vmatmul.f32.gmra.mxu3 %v739_v4 }
  0x89   : > { %1024 = vmatmul.f32.gmra.mxu0 %v953_v7 }
  0x8b   : > { %421 = vmatmul.f32.gmra.mxu1 %v171_v8  ;;  %599 = vmatmul.f32.gmra.mxu2 %v738_v62  ;;  %v963_v8 = vld [vmem:[%s2656_s19 + $0x6b] sm:$0xff] }
  0x8d   : > { %813 = vmatmul.f32.gmra.mxu3 %v740_v9 }
  0x91   : > { %1027 = vmatmul.f32.gmra.mxu0 %v954_v10 }
  0x93   : > { %424 = vmatmul.f32.gmra.mxu1 %v172_v11  ;;  %602 = vmatmul.f32.gmra.mxu2 %v739_v4  ;;  %v2326_v4 = vld [vmem:[%s3642_s1 + $0x448] sm:$0xff]  ;;  %v181_v11 = vld [vmem:[%s2656_s19 + $0x60] sm:$0xff] }
  0x94   : > { %1867 = vmatpush.msra.mxu0 %v2326_v4 }
  0x95   : > { %816 = vmatmul.f32.gmra.mxu3 %v741_v13 }
  0x96   : > { %1868 = vmatpush.msra.mxu0 %v2325_v23 }
  0x99   : > { %1030 = vmatmul.f32.gmra.mxu0 %v955_v16 }
  0x9b   : > { %427 = vmatmul.f32.gmra.mxu1 %v173_v17  ;;  %605 = vmatmul.f32.gmra.mxu2 %v740_v9 }
  0x9d   : > { %819 = vmatmul.f32.gmra.mxu3 %v742_v18 }
  0xa1   : > { %1033 = vmatmul.f32.gmra.mxu0 %v956_v20 }
  0xa3   : > { %430 = vmatmul.f32.gmra.mxu1 %v174_v21  ;;  %608 = vmatmul.f32.gmra.mxu2 %v741_v13  ;;  %v750_v13 = vld [vmem:[%s2656_s19 + $0x72] sm:$0xff]  ;;  %v182_v21 = vld [vmem:[%s2656_s19 + $0x68] sm:$0xff] }
  0xa5   : > { %822 = vmatmul.f32.gmra.mxu3 %v743_v22 }
  0xa9   : > { %1036 = vmatmul.f32.gmra.mxu0 %v957_v25 }
  0xab   : > { %433 = vmatmul.f32.gmra.mxu1 %v175_v27  ;;  %611 = vmatmul.f32.gmra.mxu2 %v742_v18  ;;  %v964_v18 = vld [vmem:[%s2656_s19 + $0x73] sm:$0xff] }
  0xad   : > { %825 = vmatmul.f32.gmra.mxu3 %v744_v28 }
  0xb0   : > { %v2972_v31 = vpop.f32.mrf.mxu1 }
  0xb1   : > { %1039 = vmatmul.f32.gmra.mxu0 %v958_v30  ;;  %v752_v30 = vld [vmem:[%s2656_s19 + $0x82] sm:$0xff] }
  0xb3   : > { %436 = vmatmul.f32.gmra.mxu1 %v176_v32  ;;  %614 = vmatmul.f32.gmra.mxu2 %v743_v22  ;;  %v751_v22 = vld [vmem:[%s2656_s19 + $0x7a] sm:$0xff] }
  0xb4   : > { %v2292_v32 = vld [vmem:[%s3642_s1 + $0x338] sm:$0xff] }
  0xb5   : > { %828 = vmatmul.f32.gmra.mxu3 %v745_v33  ;;  %1441 = vmatpush.msra.mxu2 %v2292_v32 }
  0xb6   : > { %v2979_v35 = vpop.f32.mrf.mxu2  ;;  %v2981_v36 = vpop.f32.mrf.mxu0 }
  0xb8   : > { %v2987_v39 = vpop.f32.mrf.mxu1  ;;  %v2989_v40 = vpop.f32.mrf.mxu3 }
  0xb9   : > { %1042 = vmatmul.f32.gmra.mxu0 %v959_v37 }
  0xbb   : > { %439 = vmatmul.f32.gmra.mxu1 %v177_v41  ;;  %617 = vmatmul.f32.gmra.mxu2 %v744_v28  ;;  %v2276_v41 = vld [vmem:[%s3642_s1 + $0x2b8] sm:$0xff] }
  0xbc   : > { %1227 = vmatpush.msra.mxu1 %v2276_v41 }
  0xbd   : > { %831 = vmatmul.f32.gmra.mxu3 %v746_v43 }
  0xbe   : > { %v2996_v44 = vpop.f32.mrf.mxu2  ;;  %v2998_v45 = vpop.f32.mrf.mxu0 }
  0xc0   : > { %v3004_v48 = vpop.f32.mrf.mxu1  ;;  %v3006_v49 = vpop.f32.mrf.mxu3 }
  0xc1   : > { %1045 = vmatmul.f32.gmra.mxu0 %v960_v46  ;;  %v184_v46 = vld [vmem:[%s2656_s19 + $0x78] sm:$0xff] }
  0xc3   : > { %442 = vmatmul.f32.gmra.mxu1 %v178_v50  ;;  %620 = vmatmul.f32.gmra.mxu2 %v745_v33  ;;  %v2308_v33 = vld [vmem:[%s3642_s1 + $0x3b8] sm:$0xff] }
  0xc4   : > { %1655 = vmatpush.msra.mxu3 %v2308_v33  ;;  %v2324_v50 = vld [vmem:[%s3642_s1 + $0x438] sm:$0xff]  ;;  %v2323_v33 = vld [vmem:[%s3642_s1 + $0x430] sm:$0xff] }
  0xc5   : > { %834 = vmatmul.f32.gmra.mxu3 %v747_v51  ;;  %1869 = vmatpush.msra.mxu0 %v2324_v50 }
  0xc6   : > { %v3010_v52 = vpop.f32.mrf.mxu2  ;;  %v3012_v53 = vpop.f32.mrf.mxu0  ;;  %1656 = vmatpush.msra.mxu3 %v2307_v12 }
  0xc7   : > { %1870 = vmatpush.msra.mxu0 %v2323_v33 }
  0xc8   : > { %v3018_v56 = vpop.f32.mrf.mxu1  ;;  %v3020_v57 = vpop.f32.mrf.mxu3 }
  0xc9   : > { %1048 = vmatmul.f32.gmra.mxu0 %v961_v54 }
  0xcb   : > { %445 = vmatmul.f32.gmra.mxu1 %v179_v58  ;;  %623 = vmatmul.f32.gmra.mxu2 %v746_v43 }
  0xcd   : > { %837 = vmatmul.f32.gmra.mxu3 %v748_v60 }
  0xce   : > { %v3030_v62 = vpop.f32.mrf.mxu2  ;;  %v3032_v63 = vpop.f32.mrf.mxu0 }
  0xd0   : > { %v3035_v1 = vpop.f32.mrf.mxu1  ;;  %v3037_v2 = vpop.f32.mrf.mxu3 }
  0xd1   : > { %1051 = vmatmul.f32.gmra.mxu0 %v962_v0 }
  0xd3   : > { %448 = vmatmul.f32.gmra.mxu1 %v180_v3  ;;  %626 = vmatmul.f32.gmra.mxu2 %v747_v51  ;;  %v2291_v3 = vld [vmem:[%s3642_s1 + $0x330] sm:$0xff] }
  0xd4   : > { %1442 = vmatpush.msra.mxu2 %v2291_v3 }
  0xd5   : > { %840 = vmatmul.f32.gmra.mxu3 %v749_v5 }
  0xd6   : > { %v3044_v6 = vpop.f32.mrf.mxu2  ;;  %v3046_v7 = vpop.f32.mrf.mxu0 }
  0xd8   : > { %v3049_v9 = vpop.f32.mrf.mxu1  ;;  %v3051_v10 = vpop.f32.mrf.mxu3 }
  0xd9   : > { %1054 = vmatmul.f32.gmra.mxu0 %v963_v8  ;;  %v968_v8 = vld [vmem:[%s2656_s19 + $0x93] sm:$0xff] }
  0xdb   : > { %451 = vmatmul.f32.gmra.mxu1 %v181_v11  ;;  %629 = vmatmul.f32.gmra.mxu2 %v748_v60  ;;  %v185_v60 = vld [vmem:[%s2656_s19 + $0x80] sm:$0xff] }
  0xdd   : > { %843 = vmatmul.f32.gmra.mxu3 %v750_v13 }
  0xde   : > { %v3064_v16 = vpop.f32.mrf.mxu2  ;;  %v3066_v17 = vpop.f32.mrf.mxu0 }
  0xe0   : > { %v3069_v19 = vpop.f32.mrf.mxu1  ;;  %v3071_v20 = vpop.f32.mrf.mxu3 }
  0xe1   : > { %1057 = vmatmul.f32.gmra.mxu0 %v964_v18  ;;  %v2275_v18 = vld [vmem:[%s3642_s1 + $0x2b0] sm:$0xff] }
  0xe2   : > { %1228 = vmatpush.msra.mxu1 %v2275_v18 }
  0xe3   : > { %454 = vmatmul.f32.gmra.mxu1 %v182_v21  ;;  %632 = vmatmul.f32.gmra.mxu2 %v749_v5  ;;  %v755_v21 = vld [vmem:[%s2656_s19 + $0x9a] sm:$0xff] }
  0xe5   : > { %846 = vmatmul.f32.gmra.mxu3 %v751_v22 }
  0xe6   : > { %v3078_v24 = vpop.f32.mrf.mxu2  ;;  %v3080_v25 = vpop.f32.mrf.mxu0 }
  0xe8   : > { %v3083_v27 = vpop.f32.mrf.mxu1  ;;  %v3085_v28 = vpop.f32.mrf.mxu3 }
  0xe9   : > { %1060 = vmatmul.f32.gmra.mxu0 %v965_v26 }
  0xeb   : > { %457 = vmatmul.f32.gmra.mxu1 %v183_v29  ;;  %635 = vmatmul.f32.gmra.mxu2 %v750_v13 }
  0xed   : > { %849 = vmatmul.f32.gmra.mxu3 %v752_v30 }
  0xee   : > { %v3095_v34 = vpop.f32.mrf.mxu2  ;;  %v3097_v37 = vpop.f32.mrf.mxu0 }
  0xf0   : > { %v3103_v42 = vpop.f32.mrf.mxu1  ;;  %v3105_v43 = vpop.f32.mrf.mxu3 }
  0xf1   : > { %1063 = vmatmul.f32.gmra.mxu0 %v966_v38 }
  0xf3   : > { %460 = vmatmul.f32.gmra.mxu1 %v184_v46  ;;  %638 = vmatmul.f32.gmra.mxu2 %v751_v22  ;;  %v187_v46 = vld [vmem:[%s2656_s19 + $0x90] sm:$0xff] }
  0xf5   : > { %852 = vmatmul.f32.gmra.mxu3 %v753_v47 }
  0xf6   : > { %v3112_v51 = vpop.f32.mrf.mxu2  ;;  %v3114_v54 = vpop.f32.mrf.mxu0 }
  0xf8   : > { %v3117_v58 = vpop.f32.mrf.mxu3  ;;  %v416_v59 = vpop.f32.mrf.mxu1 }
  0xf9   : > { %1066 = vmatmul.f32.gmra.mxu0 %v967_v55  ;;  %v417_v0 = vadd.f32 %v416_v59, %v2981_v36 }
  0xfb   : > { %463 = vmatmul.f32.gmra.mxu1 %v185_v60  ;;  %641 = vmatmul.f32.gmra.mxu2 %v752_v30  ;;  %v969_v30 = vld [vmem:[%s2656_s19 + $0x9b] sm:$0xff] }
  0xfd   : > { %855 = vmatmul.f32.gmra.mxu3 %v754_v61 }
  0xfe   : > { %v594_v4 = vpop.f32.mrf.mxu2  ;;  %v1022_v5 = vpop.f32.mrf.mxu0 }
  0xff   : > { %v702_v11 = vadd.f32 %v594_v4, %v417_v0  ;;  %v970_v0 = vld [vmem:[%s2656_s19 + $0xa3] sm:$0xff] }
 0x100   : > { %v419_v13 = vpop.f32.mrf.mxu1  ;;  %v808_v14 = vpop.f32.mrf.mxu3  ;;  %v2290_v4 = vld [vmem:[%s3642_s1 + $0x328] sm:$0xff] }
 0x101   : > { %v916_v36 = vadd.f32 %v808_v14, %v702_v11  ;;  %1069 = vmatmul.f32.gmra.mxu0 %v968_v8  ;;  %v420_v23 = vadd.f32 %v419_v13, %v2998_v45  ;;  %v188_v11 = vld [vmem:[%s2656_s19 + $0x98] sm:$0xff]  ;;  %1443 = vmatpush.msra.mxu2 %v2290_v4  ;;  %v2274_v14 = vld [vmem:[%s3642_s1 + $0x2a8] sm:$0xff] }
 0x102   : > { %1229 = vmatpush.msra.mxu1 %v2274_v14 }
 0x103   : > { %v3134_v22 = vadd.f32 %v1022_v5, %v916_v36  ;;  %466 = vmatmul.f32.gmra.mxu1 %v186_v15  ;;  %644 = vmatmul.f32.gmra.mxu2 %v753_v47  ;;  %v756_v47 = vld [vmem:[%s2656_s19 + $0xa2] sm:$0xff] }
 0x105   : > { %858 = vmatmul.f32.gmra.mxu3 %v755_v21 }
 0x106   : > { %v597_v26 = vpop.f32.mrf.mxu2  ;;  %v1025_v29 = vpop.f32.mrf.mxu0 }
 0x107   : > { %v703_v32 = vadd.f32 %v597_v26, %v420_v23  ;;  %v971_v23 = vld [vmem:[%s2656_s19 + $0xab] sm:$0xff] }
 0x108   : > { %v422_v38 = vpop.f32.mrf.mxu1  ;;  %v811_v41 = vpop.f32.mrf.mxu3 }
 0x109   : > { %v917_v50 = vadd.f32 %v811_v41, %v703_v32  ;;  %1072 = vmatmul.f32.gmra.mxu0 %v969_v30  ;;  %v423_v45 = vadd.f32 %v422_v38, %v3012_v53  ;;  %v2306_v53 = vld [vmem:[%s3642_s1 + $0x3a8] sm:$0xff]  ;;  %v189_v32 = vld [vmem:[%s2656_s19 + $0xa0] sm:$0xff]  ;;  %v758_v38 = vld [vmem:[%s2656_s19 + $0xb2] sm:$0xff] }
 0x10a   : > { %1657 = vmatpush.msra.mxu3 %v2306_v53 }
 0x10b   : > { %v3143_v55 = vadd.f32 %v1025_v29, %v917_v50  ;;  %469 = vmatmul.f32.gmra.mxu1 %v187_v46  ;;  %647 = vmatmul.f32.gmra.mxu2 %v754_v61  ;;  %v757_v61 = vld [vmem:[%s2656_s19 + $0xaa] sm:$0xff] }
 0x10d   : > { %861 = vmatmul.f32.gmra.mxu3 %v756_v47 }
 0x10e   : > { %v600_v59 = vpop.f32.mrf.mxu2  ;;  %v1028_v60 = vpop.f32.mrf.mxu0 }
 0x10f   : > { %v704_v3 = vadd.f32 %v600_v59, %v423_v45  ;;  %v972_v45 = vld [vmem:[%s2656_s19 + $0xb3] sm:$0xff] }
 0x110   : > { %v425_v5 = vpop.f32.mrf.mxu1  ;;  %v814_v8 = vpop.f32.mrf.mxu3 }
 0x111   : > { %v918_v12 = vadd.f32 %v814_v8, %v704_v3  ;;  %1075 = vmatmul.f32.gmra.mxu0 %v970_v0  ;;  %v426_v15 = vadd.f32 %v425_v5, %v3032_v63  ;;  %v190_v3 = vld [vmem:[%s2656_s19 + $0xa8] sm:$0xff]  ;;  %v2289_v5 = vld [vmem:[%s3642_s1 + $0x320] sm:$0xff] }
 0x112   : > { %v759_v8 = vld [vmem:[%s2656_s19 + $0xba] sm:$0xff]  ;;  %1444 = vmatpush.msra.mxu2 %v2289_v5 }
 0x113   : > { %v3155_v13 = vadd.f32 %v1028_v60, %v918_v12  ;;  %472 = vmatmul.f32.gmra.mxu1 %v188_v11  ;;  %650 = vmatmul.f32.gmra.mxu2 %v755_v21  ;;  %v2322_v21 = vld [vmem:[%s3642_s1 + $0x428] sm:$0xff]  ;;  %v2273_v12 = vld [vmem:[%s3642_s1 + $0x2a0] sm:$0xff] }
 0x114   : > { %1871 = vmatpush.msra.mxu0 %v2322_v21  ;;  %1230 = vmatpush.msra.mxu1 %v2273_v12 }
 0x115   : > { %864 = vmatmul.f32.gmra.mxu3 %v757_v61 }
 0x116   : > { %v603_v36 = vpop.f32.mrf.mxu2  ;;  %v1031_v18 = vpop.f32.mrf.mxu0 }
 0x117   : > { %v705_v26 = vadd.f32 %v603_v36, %v426_v15  ;;  %v973_v15 = vld [vmem:[%s2656_s19 + $0xbb] sm:$0xff] }
 0x118   : > { %v428_v29 = vpop.f32.mrf.mxu1  ;;  %v817_v30 = vpop.f32.mrf.mxu3 }
 0x119   : > { %v919_v33 = vadd.f32 %v817_v30, %v705_v26  ;;  %1078 = vmatmul.f32.gmra.mxu0 %v971_v23  ;;  %v429_v41 = vadd.f32 %v428_v29, %v3046_v7  ;;  %v2305_v7 = vld [vmem:[%s3642_s1 + $0x3a0] sm:$0xff]  ;;  %v191_v23 = vld [vmem:[%s2656_s19 + $0xb0] sm:$0xff] }
 0x11a   : > { %1658 = vmatpush.msra.mxu3 %v2305_v7  ;;  %v760_v29 = vld [vmem:[%s2656_s19 + $0xc2] sm:$0xff] }
 0x11b   : > { %v3167_v63 = vadd.f32 %v1031_v18, %v919_v33  ;;  %475 = vmatmul.f32.gmra.mxu1 %v189_v32  ;;  %653 = vmatmul.f32.gmra.mxu2 %v756_v47 }
 0x11d   : > { %867 = vmatmul.f32.gmra.mxu3 %v758_v38 }
 0x11e   : > { %v606_v46 = vpop.f32.mrf.mxu2  ;;  %v1034_v50 = vpop.f32.mrf.mxu0 }
 0x11f   : > { %v706_v59 = vadd.f32 %v606_v46, %v429_v41  ;;  %v974_v41 = vld [vmem:[%s2656_s19 + $0xc3] sm:$0xff] }
 0x120   : > { %v431_v60 = vpop.f32.mrf.mxu1  ;;  %v820_v0 = vpop.f32.mrf.mxu3 }
 0x121   : > { %v920_v4 = vadd.f32 %v820_v0, %v706_v59  ;;  %1081 = vmatmul.f32.gmra.mxu0 %v972_v45  ;;  %v432_v11 = vadd.f32 %v431_v60, %v3066_v17  ;;  %v2321_v17 = vld [vmem:[%s3642_s1 + $0x420] sm:$0xff]  ;;  %v192_v59 = vld [vmem:[%s2656_s19 + $0xb8] sm:$0xff]  ;;  %v761_v0 = vld [vmem:[%s2656_s19 + $0xca] sm:$0xff] }
 0x122   : > { %1872 = vmatpush.msra.mxu0 %v2321_v17 }
 0x123   : > { %v3176_v47 = vadd.f32 %v1034_v50, %v920_v4  ;;  %478 = vmatmul.f32.gmra.mxu1 %v190_v3  ;;  %656 = vmatmul.f32.gmra.mxu2 %v757_v61  ;;  %v2304_v4 = vld [vmem:[%s3642_s1 + $0x398] sm:$0xff] }
 0x124   : > { %1659 = vmatpush.msra.mxu3 %v2304_v4 }
 0x125   : > { %870 = vmatmul.f32.gmra.mxu3 %v759_v8 }
 0x126   : > { %v609_v53 = vpop.f32.mrf.mxu2  ;;  %v1037_v14 = vpop.f32.mrf.mxu0 }
 0x127   : > { %v707_v36 = vadd.f32 %v609_v53, %v432_v11  ;;  %v975_v11 = vld [vmem:[%s2656_s19 + $0xcb] sm:$0xff] }
 0x128   : > { %v434_v61 = vpop.f32.mrf.mxu1  ;;  %v823_v18 = vpop.f32.mrf.mxu3 }
 0x129   : > { %v921_v26 = vadd.f32 %v823_v18, %v707_v36  ;;  %1084 = vmatmul.f32.gmra.mxu0 %v973_v15  ;;  %v435_v32 = vadd.f32 %v434_v61, %v3080_v25  ;;  %v2288_v25 = vld [vmem:[%s3642_s1 + $0x318] sm:$0xff]  ;;  %v193_v15 = vld [vmem:[%s2656_s19 + $0xc0] sm:$0xff] }
 0x12a   : > { %1445 = vmatpush.msra.mxu2 %v2288_v25  ;;  %v762_v36 = vld [vmem:[%s2656_s19 + $0xd2] sm:$0xff] }
 0x12b   : > { %v3188_v30 = vadd.f32 %v1037_v14, %v921_v26  ;;  %481 = vmatmul.f32.gmra.mxu1 %v191_v23  ;;  %659 = vmatmul.f32.gmra.mxu2 %v758_v38  ;;  %v2320_v23 = vld [vmem:[%s3642_s1 + $0x418] sm:$0xff] }
 0x12c   : > { %1873 = vmatpush.msra.mxu0 %v2320_v23 }
 0x12d   : > { %873 = vmatmul.f32.gmra.mxu3 %v760_v29 }
 0x12e   : > { %v612_v33 = vpop.f32.mrf.mxu2  ;;  %v1040_v21 = vpop.f32.mrf.mxu0 }
 0x12f   : > { %v708_v46 = vadd.f32 %v612_v33, %v435_v32  ;;  %v976_v32 = vld [vmem:[%s2656_s19 + $0xd3] sm:$0xff] }
 0x130   : > { %v437_v50 = vpop.f32.mrf.mxu1  ;;  %v826_v45 = vpop.f32.mrf.mxu3 }
 0x131   : > { %v922_v60 = vadd.f32 %v826_v45, %v708_v46  ;;  %1087 = vmatmul.f32.gmra.mxu0 %v974_v41  ;;  %v438_v3 = vadd.f32 %v437_v50, %v3097_v37  ;;  %v194_v46 = vld [vmem:[%s2656_s19 + $0xc8] sm:$0xff] }
 0x133   : > { %v3197_v38 = vadd.f32 %v1040_v21, %v922_v60  ;;  %484 = vmatmul.f32.gmra.mxu1 %v192_v59  ;;  %662 = vmatmul.f32.gmra.mxu2 %v759_v8  ;;  %v2272_v8 = vld [vmem:[%s3642_s1 + $0x298] sm:$0xff]  ;;  %v2287_v59 = vld [vmem:[%s3642_s1 + $0x310] sm:$0xff] }
 0x134   : > { %1231 = vmatpush.msra.mxu1 %v2272_v8  ;;  %1446 = vmatpush.msra.mxu2 %v2287_v59  ;;  %v764_v8 = vld [vmem:[%s2656_s19 + $0xe2] sm:$0xff] }
 0x135   : > { %876 = vmatmul.f32.gmra.mxu3 %v761_v0 }
 0x136   : > { %v615_v5 = vpop.f32.mrf.mxu2  ;;  %v1043_v7 = vpop.f32.mrf.mxu0 }
 0x137   : > { %v709_v12 = vadd.f32 %v615_v5, %v438_v3  ;;  %v977_v3 = vld [vmem:[%s2656_s19 + $0xdb] sm:$0xff]  ;;  %v2303_v5 = vld [vmem:[%s3642_s1 + $0x390] sm:$0xff] }
 0x138   : > { %v440_v53 = vpop.f32.mrf.mxu1  ;;  %v829_v14 = vpop.f32.mrf.mxu3  ;;  %1660 = vmatpush.msra.mxu3 %v2303_v5 }
 0x139   : > { %v923_v37 = vadd.f32 %v829_v14, %v709_v12  ;;  %1090 = vmatmul.f32.gmra.mxu0 %v975_v11  ;;  %v441_v18 = vadd.f32 %v440_v53, %v3114_v54  ;;  %v195_v11 = vld [vmem:[%s2656_s19 + $0xd0] sm:$0xff] }
 0x13a   : > { %v2271_v12 = vld [vmem:[%s3642_s1 + $0x290] sm:$0xff] }
 0x13b   : > { %v3212_v61 = vadd.f32 %v1043_v7, %v923_v37  ;;  %487 = vmatmul.f32.gmra.mxu1 %v193_v15  ;;  %665 = vmatmul.f32.gmra.mxu2 %v760_v29  ;;  %v763_v29 = vld [vmem:[%s2656_s19 + $0xda] sm:$0xff] }
 0x13c   : > { %1232 = vmatpush.msra.mxu1 %v2271_v12 }
 0x13d   : > { %879 = vmatmul.f32.gmra.mxu3 %v762_v36 }
 0x13e   : > { %v618_v26 = vpop.f32.mrf.mxu2  ;;  %v1046_v17 = vpop.f32.mrf.mxu0 }
 0x13f   : > { %v710_v33 = vadd.f32 %v618_v26, %v441_v18  ;;  %v978_v18 = vld [vmem:[%s2656_s19 + $0xe3] sm:$0xff]  ;;  %v2319_v26 = vld [vmem:[%s3642_s1 + $0x410] sm:$0xff] }
 0x140   : > { %v443_v21 = vpop.f32.mrf.mxu1  ;;  %v832_v41 = vpop.f32.mrf.mxu3  ;;  %1874 = vmatpush.msra.mxu0 %v2319_v26 }
 0x141   : > { %v924_v50 = vadd.f32 %v832_v41, %v710_v33  ;;  %1093 = vmatmul.f32.gmra.mxu0 %v976_v32  ;;  %v444_v54 = vadd.f32 %v443_v21, %v2972_v31  ;;  %v196_v33 = vld [vmem:[%s2656_s19 + $0xd8] sm:$0xff] }
 0x143   : > { %v3221_v45 = vadd.f32 %v1046_v17, %v924_v50  ;;  %490 = vmatmul.f32.gmra.mxu1 %v194_v46  ;;  %668 = vmatmul.f32.gmra.mxu2 %v761_v0 }
 0x145   : > { %882 = vmatmul.f32.gmra.mxu3 %v763_v29 }
 0x146   : > { %v621_v60 = vpop.f32.mrf.mxu2  ;;  %v1049_v25 = vpop.f32.mrf.mxu0 }
 0x147   : > { %v711_v4 = vadd.f32 %v621_v60, %v444_v54  ;;  %v979_v54 = vld [vmem:[%s2656_s19 + $0xeb] sm:$0xff] }
 0x148   : > { %v446_v7 = vpop.f32.mrf.mxu1  ;;  %v835_v0 = vpop.f32.mrf.mxu3  ;;  %v2286_v60 = vld [vmem:[%s3642_s1 + $0x308] sm:$0xff] }
 0x149   : > { %v925_v31 = vadd.f32 %v835_v0, %v711_v4  ;;  %1096 = vmatmul.f32.gmra.mxu0 %v977_v3  ;;  %v447_v14 = vadd.f32 %v446_v7, %v2987_v39  ;;  %v197_v4 = vld [vmem:[%s2656_s19 + $0xe0] sm:$0xff]  ;;  %1447 = vmatpush.msra.mxu2 %v2286_v60  ;;  %v2270_v0 = vld [vmem:[%s3642_s1 + $0x288] sm:$0xff] }
 0x14a   : > { %1233 = vmatpush.msra.mxu1 %v2270_v0 }
 0x14b   : > { %v3236_v53 = vadd.f32 %v1049_v25, %v925_v31  ;;  %493 = vmatmul.f32.gmra.mxu1 %v195_v11  ;;  %671 = vmatmul.f32.gmra.mxu2 %v762_v36  ;;  %v765_v36 = vld [vmem:[%s2656_s19 + $0xea] sm:$0xff] }
 0x14d   : > { %885 = vmatmul.f32.gmra.mxu3 %v764_v8 }
 0x14e   : > { %v624_v15 = vpop.f32.mrf.mxu2  ;;  %v1052_v37 = vpop.f32.mrf.mxu0 }
 0x14f   : > { %v712_v23 = vadd.f32 %v624_v15, %v447_v14  ;;  %v980_v14 = vld [vmem:[%s2656_s19 + $0xf3] sm:$0xff] }
 0x150   : > { %v449_v17 = vpop.f32.mrf.mxu1  ;;  %v838_v32 = vpop.f32.mrf.mxu3 }
 0x151   : > { %v926_v21 = vadd.f32 %v838_v32, %v712_v23  ;;  %1099 = vmatmul.f32.gmra.mxu0 %v978_v18  ;;  %v450_v39 = vadd.f32 %v449_v17, %v3004_v48  ;;  %v2302_v48 = vld [vmem:[%s3642_s1 + $0x388] sm:$0xff]  ;;  %v767_v17 = vld [vmem:[%s2656_s19 + $0xfa] sm:$0xff] }
 0x152   : > { %1661 = vmatpush.msra.mxu3 %v2302_v48  ;;  %v198_v23 = vld [vmem:[%s2656_s19 + $0xe8] sm:$0xff] }
 0x153   : > { %v3245_v41 = vadd.f32 %v1052_v37, %v926_v21  ;;  %496 = vmatmul.f32.gmra.mxu1 %v196_v33  ;;  %674 = vmatmul.f32.gmra.mxu2 %v763_v29  ;;  %v766_v29 = vld [vmem:[%s2656_s19 + $0xf2] sm:$0xff] }
 0x155   : > { %888 = vmatmul.f32.gmra.mxu3 %v765_v36 }
 0x156   : > { %v627_v46 = vpop.f32.mrf.mxu2  ;;  %v1055_v50 = vpop.f32.mrf.mxu0 }
 0x157   : > { %v713_v59 = vadd.f32 %v627_v46, %v450_v39  ;;  %v981_v39 = vld [vmem:[%s2656_s19 + $0xfb] sm:$0xff] }
 0x158   : > { %v452_v25 = vpop.f32.mrf.mxu1  ;;  %v841_v3 = vpop.f32.mrf.mxu3 }
 0x159   : > { %v927_v5 = vadd.f32 %v841_v3, %v713_v59  ;;  %1102 = vmatmul.f32.gmra.mxu0 %v979_v54  ;;  %v453_v11 = vadd.f32 %v452_v25, %v3018_v56  ;;  %v199_v59 = vld [vmem:[%s2656_s19 + $0xf0] sm:$0xff]  ;;  %v2285_v25 = vld [vmem:[%s3642_s1 + $0x300] sm:$0xff] }
 0x15a   : > { %v768_v3 = vld [vmem:[%s2656_s19 + $0x102] sm:$0xff]  ;;  %1448 = vmatpush.msra.mxu2 %v2285_v25  ;;  %v984_v25 = vld [vmem:[%s2656_s19 + $0x113] sm:$0xff] }
 0x15b   : > { %v3257_v7 = vadd.f32 %v1055_v50, %v927_v5  ;;  %499 = vmatmul.f32.gmra.mxu1 %v197_v4  ;;  %677 = vmatmul.f32.gmra.mxu2 %v764_v8  ;;  %v2318_v8 = vld [vmem:[%s3642_s1 + $0x408] sm:$0xff]  ;;  %v2269_v5 = vld [vmem:[%s3642_s1 + $0x280] sm:$0xff] }
 0x15c   : > { %1875 = vmatpush.msra.mxu0 %v2318_v8  ;;  %1234 = vmatpush.msra.mxu1 %v2269_v5 }
 0x15d   : > { %891 = vmatmul.f32.gmra.mxu3 %v766_v29 }
 0x15e   : > { %v630_v31 = vpop.f32.mrf.mxu2  ;;  %v1058_v12 = vpop.f32.mrf.mxu0 }
 0x15f   : > { %v714_v15 = vadd.f32 %v630_v31, %v453_v11  ;;  %v982_v11 = vld [vmem:[%s2656_s19 + $0x103] sm:$0xff] }
 0x160   : > { %v455_v37 = vpop.f32.mrf.mxu1  ;;  %v844_v18 = vpop.f32.mrf.mxu3 }
 0x161   : > { %v928_v26 = vadd.f32 %v844_v18, %v714_v15  ;;  %1105 = vmatmul.f32.gmra.mxu0 %v980_v14  ;;  %v456_v32 = vadd.f32 %v455_v37, %v3035_v1  ;;  %v2301_v1 = vld [vmem:[%s3642_s1 + $0x380] sm:$0xff]  ;;  %v200_v14 = vld [vmem:[%s2656_s19 + $0xf8] sm:$0xff]  ;;  %v769_v37 = vld [vmem:[%s2656_s19 + $0x10a] sm:$0xff] }
 0x162   : > { %1662 = vmatpush.msra.mxu3 %v2301_v1 }
 0x163   : > { %v3269_v56 = vadd.f32 %v1058_v12, %v928_v26  ;;  %502 = vmatmul.f32.gmra.mxu1 %v198_v23  ;;  %680 = vmatmul.f32.gmra.mxu2 %v765_v36 }
 0x165   : > { %894 = vmatmul.f32.gmra.mxu3 %v767_v17 }
 0x166   : > { %v633_v33 = vpop.f32.mrf.mxu2  ;;  %v1061_v21 = vpop.f32.mrf.mxu0 }
 0x167   : > { %v715_v46 = vadd.f32 %v633_v33, %v456_v32  ;;  %v983_v32 = vld [vmem:[%s2656_s19 + $0x10b] sm:$0xff] }
 0x168   : > { %v458_v50 = vpop.f32.mrf.mxu1  ;;  %v847_v54 = vpop.f32.mrf.mxu3 }
 0x169   : > { %v929_v60 = vadd.f32 %v847_v54, %v715_v46  ;;  %1108 = vmatmul.f32.gmra.mxu0 %v981_v39  ;;  %v459_v4 = vadd.f32 %v458_v50, %v3049_v9  ;;  %v2317_v9 = vld [vmem:[%s3642_s1 + $0x400] sm:$0xff] }
 0x16a   : > { %1876 = vmatpush.msra.mxu0 %v2317_v9  ;;  %v201_v46 = vld [vmem:[%s2656_s19 + $0x100] sm:$0xff] }
 0x16b   : > { %v3278_v36 = vadd.f32 %v1061_v21, %v929_v60  ;;  %505 = vmatmul.f32.gmra.mxu1 %v199_v59  ;;  %683 = vmatmul.f32.gmra.mxu2 %v766_v29 }
 0x16d   : > { %897 = vmatmul.f32.gmra.mxu3 %v768_v3 }
 0x16e   : > { %v636_v48 = vpop.f32.mrf.mxu2  ;;  %v1064_v0 = vpop.f32.mrf.mxu0 }
 0x16f   : > { %v716_v31 = vadd.f32 %v636_v48, %v459_v4  ;;  %v202_v48 = vld [vmem:[%s2656_s19 + $0x108] sm:$0xff] }
 0x170   : > { %v461_v29 = vpop.f32.mrf.mxu1  ;;  %v850_v12 = vpop.f32.mrf.mxu3 }
 0x171   : > { %v930_v15 = vadd.f32 %v850_v12, %v716_v31  ;;  %1111 = vmatmul.f32.gmra.mxu0 %v982_v11  ;;  %v462_v23 = vadd.f32 %v461_v29, %v3069_v19  ;;  %v771_v11 = vld [vmem:[%s2656_s19 + $0x11a] sm:$0xff] }
 0x172   : > { %v985_v12 = vld [vmem:[%s2656_s19 + $0x11b] sm:$0xff] }
 0x173   : > { %v3290_v18 = vadd.f32 %v1064_v0, %v930_v15  ;;  %508 = vmatmul.f32.gmra.mxu1 %v200_v14  ;;  %686 = vmatmul.f32.gmra.mxu2 %v767_v17  ;;  %v770_v17 = vld [vmem:[%s2656_s19 + $0x112] sm:$0xff] }
 0x175   : > { %900 = vmatmul.f32.gmra.mxu3 %v769_v37 }
 0x176   : > { %v639_v26 = vpop.f32.mrf.mxu2  ;;  %v1067_v8 = vpop.f32.mrf.mxu0 }
 0x177   : > { %v717_v33 = vadd.f32 %v639_v26, %v462_v23  ;;  %v203_v23 = vld [vmem:[%s2656_s19 + $0x110] sm:$0xff] }
 0x178   : > { %v464_v21 = vpop.f32.mrf.mxu1  ;;  %v853_v39 = vpop.f32.mrf.mxu3 }
 0x179   : > { %v931_v50 = vadd.f32 %v853_v39, %v717_v33  ;;  %1114 = vmatmul.f32.gmra.mxu0 %v983_v32  ;;  %v465_v19 = vadd.f32 %v464_v21, %v3083_v27  ;;  %v986_v21 = vld [vmem:[%s2656_s19 + $0x123] sm:$0xff] }
 0x17b   : > { %v3299_v54 = vadd.f32 %v1067_v8, %v931_v50  ;;  %511 = vmatmul.f32.gmra.mxu1 %v201_v46  ;;  %689 = vmatmul.f32.gmra.mxu2 %v768_v3  ;;  %v772_v8 = vld [vmem:[%s2656_s19 + $0x122] sm:$0xff] }
 0x17d   : > { %903 = vmatmul.f32.gmra.mxu3 %v770_v17 }
 0x17e   : > { %v642_v59 = vpop.f32.mrf.mxu2  ;;  %v1070_v60 = vpop.f32.mrf.mxu0 }
 0x17f   : > { %v718_v1 = vadd.f32 %v642_v59, %v465_v19  ;;  %v204_v19 = vld [vmem:[%s2656_s19 + $0x118] sm:$0xff] }
 0x180   : > { %v467_v4 = vpop.f32.mrf.mxu1  ;;  %v856_v5 = vpop.f32.mrf.mxu3 }
 0x181   : > { %v932_v0 = vadd.f32 %v856_v5, %v718_v1  ;;  %1117 = vmatmul.f32.gmra.mxu0 %v984_v25  ;;  %v468_v27 = vadd.f32 %v467_v4, %v3103_v42  ;;  %v987_v4 = vld [vmem:[%s2656_s19 + $0x12b] sm:$0xff] }
 0x183   : > { %v3305_v31 = vadd.f32 %v1070_v60, %v932_v0  ;;  %514 = vmatmul.f32.gmra.mxu1 %v202_v48  ;;  %692 = vmatmul.f32.gmra.mxu2 %v769_v37  ;;  %v773_v60 = vld [vmem:[%s2656_s19 + $0x12a] sm:$0xff] }
 0x185   : > { %906 = vmatmul.f32.gmra.mxu3 %v771_v11 }
 0x186   : > { %v645_v3 = vpop.f32.mrf.mxu2  ;;  %v1073_v29 = vpop.f32.mrf.mxu0 }
 0x187   : > { %v719_v14 = vadd.f32 %v645_v3, %v468_v27  ;;  %v1166_v27 = vld [vmem:[%s2656_s19 + $0x14] sm:$0xff]  ;;  %v1380_v3 = vld [vmem:[%s2656_s19 + $0x24] sm:$0xff] }
 0x188   : > { %v470_v15 = vpop.f32.mrf.mxu1  ;;  %v859_v9 = vpop.f32.mrf.mxu3 }
 0x189   : > { %v933_v26 = vadd.f32 %v859_v9, %v719_v14  ;;  %1120 = vmatmul.f32.gmra.mxu0 %v985_v12  ;;  %v471_v42 = vadd.f32 %v470_v15, %v2979_v35  ;;  %v1594_v12 = vld [vmem:[%s2656_s19 + $0x25] sm:$0xff] }
 0x18a   : > { %v1808_v9 = vld [vmem:[%s2656_s19 + $0x26] sm:$0xff] }
 0x18b   : > { %v3311_v32 = vadd.f32 %v1073_v29, %v933_v26  ;;  %517 = vmatmul.f32.gmra.mxu1 %v203_v23  ;;  %695 = vmatmul.f32.gmra.mxu2 %v770_v17 }
 0x18d   : > { %909 = vmatmul.f32.gmra.mxu3 %v772_v8 }
 0x18e   : > { %v648_v37 = vpop.f32.mrf.mxu2  ;;  %v1076_v33 = vpop.f32.mrf.mxu0 }
 0x18f   : > { %v720_v39 = vadd.f32 %v648_v37, %v471_v42  ;;  %v1167_v42 = vld [vmem:[%s2656_s19 + $0x1c] sm:$0xff]  ;;  %v1381_v37 = vld [vmem:[%s2656_s19 + $0x2c] sm:$0xff] }
 0x190   : > { %v473_v46 = vpop.f32.mrf.mxu1  ;;  %v862_v50 = vpop.f32.mrf.mxu3 }
 0x191   : > { %v934_v59 = vadd.f32 %v862_v50, %v720_v39  ;;  %1123 = vmatmul.f32.gmra.mxu0 %v986_v21  ;;  %v474_v35 = vadd.f32 %v473_v46, %v2996_v44  ;;  %v1595_v21 = vld [vmem:[%s2656_s19 + $0x2d] sm:$0xff] }
 0x193   : > { %v3317_v25 = vadd.f32 %v1076_v33, %v934_v59  ;;  %520 = vmatmul.f32.gmra.mxu1 %v204_v19  ;;  %698 = vmatmul.f32.gmra.mxu2 %v771_v11  ;;  %v1809_v19 = vld [vmem:[%s2656_s19 + $0x2e] sm:$0xff] }
 0x195   : > { %912 = vmatmul.f32.gmra.mxu3 %v773_v60 }
 0x196   : > { %v651_v17 = vpop.f32.mrf.mxu2  ;;  %v1079_v1 = vpop.f32.mrf.mxu0 }
 0x197   : > { %v721_v5 = vadd.f32 %v651_v17, %v474_v35  ;;  %v1382_v17 = vld [vmem:[%s2656_s19 + $0x34] sm:$0xff] }
 0x198   : > { %v476_v48 = vpop.f32.mrf.mxu1  ;;  %v865_v0 = vpop.f32.mrf.mxu3 }
 0x199   : > { %v935_v29 = vadd.f32 %v865_v0, %v721_v5  ;;  %1126 = vmatmul.f32.gmra.mxu0 %v987_v4  ;;  %v477_v44 = vadd.f32 %v476_v48, %v3010_v52  ;;  %v1596_v4 = vld [vmem:[%s2656_s19 + $0x35] sm:$0xff] }
 0x19b   : > { %v3324_v14 = vadd.f32 %v1079_v1, %v935_v29  ;;  %1235 = vmatmul.f32.vlgmr.msra.gmra.mxu1 %v1166_v27  ;;  %1449 = vmatmul.f32.vlgmr.msra.gmra.mxu2 %v1380_v3  ;;  %v1810_v27 = vld [vmem:[%s2656_s19 + $0x36] sm:$0xff] }
 0x19d   : > { %1663 = vmatmul.f32.vlgmr.msra.gmra.mxu3 %v1594_v12 }
 0x19e   : > { %v654_v11 = vpop.f32.mrf.mxu2  ;;  %v1082_v15 = vpop.f32.mrf.mxu0 }
 0x19f   : > { %v722_v23 = vadd.f32 %v654_v11, %v477_v44  ;;  %v1383_v11 = vld [vmem:[%s2656_s19 + $0x3c] sm:$0xff] }
 0x1a0   : > { %v479_v26 = vpop.f32.mrf.mxu1  ;;  %v868_v8 = vpop.f32.mrf.mxu3 }
 0x1a1   : > { %v936_v33 = vadd.f32 %v868_v8, %v722_v23  ;;  %1877 = vmatmul.f32.vlgmr.msra.gmra.mxu0 %v1808_v9  ;;  %v480_v52 = vadd.f32 %v479_v26, %v3030_v62  ;;  %v1597_v9 = vld [vmem:[%s2656_s19 + $0x3d] sm:$0xff] }
 0x1a2   : > { %v1811_v8 = vld [vmem:[%s2656_s19 + $0x3e] sm:$0xff] }
 0x1a3   : > { %v3331_v39 = vadd.f32 %v1082_v15, %v936_v33  ;;  %1238 = vmatmul.f32.gmra.mxu1 %v1167_v42  ;;  %1452 = vmatmul.f32.gmra.mxu2 %v1381_v37 }
 0x1a5   : > { %1666 = vmatmul.f32.gmra.mxu3 %v1595_v21 }
 0x1a6   : > { %v657_v46 = vpop.f32.mrf.mxu2  ;;  %v1085_v50 = vpop.f32.mrf.mxu0 }
 0x1a7   : > { %v723_v59 = vadd.f32 %v657_v46, %v480_v52  ;;  %v1384_v52 = vld [vmem:[%s2656_s19 + $0x44] sm:$0xff] }
 0x1a8   : > { %v482_v60 = vpop.f32.mrf.mxu1  ;;  %v871_v35 = vpop.f32.mrf.mxu3 }
 0x1a9   : > { %v937_v1 = vadd.f32 %v871_v35, %v723_v59  ;;  %1880 = vmatmul.f32.gmra.mxu0 %v1809_v19  ;;  %v483_v62 = vadd.f32 %v482_v60, %v3044_v6  ;;  %v1812_v60 = vld [vmem:[%s2656_s19 + $0x46] sm:$0xff] }
 0x1ab   : > { %v3337_v5 = vadd.f32 %v1085_v50, %v937_v1  ;;  %1241 = vmatmul.f32.gmra.mxu1 %v1380_v3  ;;  %1455 = vmatmul.f32.gmra.mxu2 %v1382_v17  ;;  %v1598_v50 = vld [vmem:[%s2656_s19 + $0x45] sm:$0xff] }
 0x1ad   : > { %1669 = vmatmul.f32.gmra.mxu3 %v1596_v4 }
 0x1ae   : > { %v660_v48 = vpop.f32.mrf.mxu2  ;;  %v1088_v0 = vpop.f32.mrf.mxu0 }
 0x1af   : > { %v724_v29 = vadd.f32 %v660_v48, %v483_v62  ;;  %v1385_v62 = vld [vmem:[%s2656_s19 + $0x4c] sm:$0xff] }
 0x1b0   : > { %v485_v12 = vpop.f32.mrf.mxu1  ;;  %v874_v44 = vpop.f32.mrf.mxu3 }
 0x1b1   : > { %v938_v15 = vadd.f32 %v874_v44, %v724_v29  ;;  %1883 = vmatmul.f32.gmra.mxu0 %v1810_v27  ;;  %v486_v6 = vadd.f32 %v485_v12, %v3064_v16  ;;  %v1813_v12 = vld [vmem:[%s2656_s19 + $0x4e] sm:$0xff] }
 0x1b3   : > { %v3343_v23 = vadd.f32 %v1088_v0, %v938_v15  ;;  %1244 = vmatmul.f32.gmra.mxu1 %v1381_v37  ;;  %1458 = vmatmul.f32.gmra.mxu2 %v1383_v11  ;;  %v1599_v0 = vld [vmem:[%s2656_s19 + $0x4d] sm:$0xff] }
 0x1b5   : > { %1672 = vmatmul.f32.gmra.mxu3 %v1597_v9 }
 0x1b6   : > { %v663_v3 = vpop.f32.mrf.mxu2  ;;  %v1091_v26 = vpop.f32.mrf.mxu0 }
 0x1b7   : > { %v725_v42 = vadd.f32 %v663_v3, %v486_v6  ;;  %v1386_v6 = vld [vmem:[%s2656_s19 + $0x54] sm:$0xff] }
 0x1b8   : > { %v488_v33 = vpop.f32.mrf.mxu1  ;;  %v877_v21 = vpop.f32.mrf.mxu3 }
 0x1b9   : > { %v939_v46 = vadd.f32 %v877_v21, %v725_v42  ;;  %1886 = vmatmul.f32.gmra.mxu0 %v1811_v8  ;;  %v489_v16 = vadd.f32 %v488_v33, %v3078_v24  ;;  %v1814_v33 = vld [vmem:[%s2656_s19 + $0x56] sm:$0xff] }
 0x1bb   : > { %v3349_v19 = vadd.f32 %v1091_v26, %v939_v46  ;;  %1247 = vmatmul.f32.gmra.mxu1 %v1382_v17  ;;  %1461 = vmatmul.f32.gmra.mxu2 %v1384_v52  ;;  %v1600_v26 = vld [vmem:[%s2656_s19 + $0x55] sm:$0xff] }
 0x1bd   : > { %1675 = vmatmul.f32.gmra.mxu3 %v1598_v50 }
 0x1be   : > { %v666_v37 = vpop.f32.mrf.mxu2  ;;  %v1094_v59 = vpop.f32.mrf.mxu0 }
 0x1bf   : > { %v726_v35 = vadd.f32 %v666_v37, %v489_v16  ;;  %v1387_v16 = vld [vmem:[%s2656_s19 + $0x5c] sm:$0xff] }
 0x1c0   : > { %v491_v1 = vpop.f32.mrf.mxu1  ;;  %v880_v4 = vpop.f32.mrf.mxu3 }
 0x1c1   : > { %v940_v48 = vadd.f32 %v880_v4, %v726_v35  ;;  %1889 = vmatmul.f32.gmra.mxu0 %v1812_v60  ;;  %v492_v24 = vadd.f32 %v491_v1, %v3095_v34  ;;  %v1815_v1 = vld [vmem:[%s2656_s19 + $0x5e] sm:$0xff] }
 0x1c3   : > { %v3355_v27 = vadd.f32 %v1094_v59, %v940_v48  ;;  %1250 = vmatmul.f32.gmra.mxu1 %v1383_v11  ;;  %1464 = vmatmul.f32.gmra.mxu2 %v1385_v62  ;;  %v1601_v59 = vld [vmem:[%s2656_s19 + $0x5d] sm:$0xff] }
 0x1c5   : > { %1678 = vmatmul.f32.gmra.mxu3 %v1599_v0 }
 0x1c6   : > { %v669_v17 = vpop.f32.mrf.mxu2  ;;  %v1097_v29 = vpop.f32.mrf.mxu0 }
 0x1c7   : > { %v727_v44 = vadd.f32 %v669_v17, %v492_v24  ;;  %v1388_v24 = vld [vmem:[%s2656_s19 + $0x64] sm:$0xff] }
 0x1c8   : > { %v494_v15 = vpop.f32.mrf.mxu1  ;;  %v883_v9 = vpop.f32.mrf.mxu3 }
 0x1c9   : > { %v941_v3 = vadd.f32 %v883_v9, %v727_v44  ;;  %1892 = vmatmul.f32.gmra.mxu0 %v1813_v12  ;;  %v495_v34 = vadd.f32 %v494_v15, %v3112_v51  ;;  %v1816_v15 = vld [vmem:[%s2656_s19 + $0x66] sm:$0xff] }
 0x1cb   : > { %v3361_v8 = vadd.f32 %v1097_v29, %v941_v3  ;;  %1253 = vmatmul.f32.gmra.mxu1 %v1384_v52  ;;  %1467 = vmatmul.f32.gmra.mxu2 %v1386_v6  ;;  %v1602_v29 = vld [vmem:[%s2656_s19 + $0x65] sm:$0xff] }
 0x1cd   : > { %1681 = vmatmul.f32.gmra.mxu3 %v1600_v26 }
 0x1ce   : > { %v672_v11 = vpop.f32.mrf.mxu2  ;;  %v1100_v42 = vpop.f32.mrf.mxu0 }
 0x1cf   : > { %v728_v21 = vadd.f32 %v672_v11, %v495_v34  ;;  %v1389_v34 = vld [vmem:[%s2656_s19 + $0x6c] sm:$0xff] }
 0x1d0   : > { %v497_v46 = vpop.f32.mrf.mxu1  ;;  %v886_v50 = vpop.f32.mrf.mxu3 }
 0x1d1   : > { %v942_v37 = vadd.f32 %v886_v50, %v728_v21  ;;  %1895 = vmatmul.f32.gmra.mxu0 %v1814_v33  ;;  %v498_v51 = vadd.f32 %v497_v46, %v2989_v40  ;;  %v1817_v46 = vld [vmem:[%s2656_s19 + $0x6e] sm:$0xff] }
 0x1d3   : > { %v3367_v60 = vadd.f32 %v1100_v42, %v942_v37  ;;  %1256 = vmatmul.f32.gmra.mxu1 %v1385_v62  ;;  %1470 = vmatmul.f32.gmra.mxu2 %v1387_v16  ;;  %v1603_v42 = vld [vmem:[%s2656_s19 + $0x6d] sm:$0xff] }
 0x1d5   : > { %1684 = vmatmul.f32.gmra.mxu3 %v1601_v59 }
 0x1d6   : > { %v675_v52 = vpop.f32.mrf.mxu2  ;;  %v1103_v35 = vpop.f32.mrf.mxu0 }
 0x1d7   : > { %v729_v4 = vadd.f32 %v675_v52, %v498_v51  ;;  %v1390_v51 = vld [vmem:[%s2656_s19 + $0x74] sm:$0xff] }
 0x1d8   : > { %v500_v48 = vpop.f32.mrf.mxu1  ;;  %v889_v0 = vpop.f32.mrf.mxu3 }
 0x1d9   : > { %v943_v17 = vadd.f32 %v889_v0, %v729_v4  ;;  %1898 = vmatmul.f32.gmra.mxu0 %v1815_v1  ;;  %v501_v40 = vadd.f32 %v500_v48, %v3006_v49  ;;  %v1818_v48 = vld [vmem:[%s2656_s19 + $0x76] sm:$0xff] }
 0x1db   : > { %v3373_v12 = vadd.f32 %v1103_v35, %v943_v17  ;;  %1259 = vmatmul.f32.gmra.mxu1 %v1386_v6  ;;  %1473 = vmatmul.f32.gmra.mxu2 %v1388_v24  ;;  %v1604_v35 = vld [vmem:[%s2656_s19 + $0x75] sm:$0xff] }
 0x1dd   : > { %1687 = vmatmul.f32.gmra.mxu3 %v1602_v29 }
 0x1de   : > { %v678_v62 = vpop.f32.mrf.mxu2  ;;  %v1106_v44 = vpop.f32.mrf.mxu0 }
 0x1df   : > { %v730_v9 = vadd.f32 %v678_v62, %v501_v40  ;;  %v1391_v40 = vld [vmem:[%s2656_s19 + $0x7c] sm:$0xff] }
 0x1e0   : > { %v503_v3 = vpop.f32.mrf.mxu1  ;;  %v892_v26 = vpop.f32.mrf.mxu3 }
 0x1e1   : > { %v944_v11 = vadd.f32 %v892_v26, %v730_v9  ;;  %1901 = vmatmul.f32.gmra.mxu0 %v1816_v15  ;;  %v504_v49 = vadd.f32 %v503_v3, %v3020_v57  ;;  %v1819_v3 = vld [vmem:[%s2656_s19 + $0x7e] sm:$0xff] }
 0x1e3   : > { %v3379_v33 = vadd.f32 %v1106_v44, %v944_v11  ;;  %1262 = vmatmul.f32.gmra.mxu1 %v1387_v16  ;;  %1476 = vmatmul.f32.gmra.mxu2 %v1389_v34  ;;  %v1605_v44 = vld [vmem:[%s2656_s19 + $0x7d] sm:$0xff] }
 0x1e5   : > { %1690 = vmatmul.f32.gmra.mxu3 %v1603_v42 }
 0x1e6   : > { %v681_v6 = vpop.f32.mrf.mxu2  ;;  %v1109_v21 = vpop.f32.mrf.mxu0 }
 0x1e7   : > { %v731_v50 = vadd.f32 %v681_v6, %v504_v49  ;;  %v1392_v49 = vld [vmem:[%s2656_s19 + $0x84] sm:$0xff] }
 0x1e8   : > { %v506_v37 = vpop.f32.mrf.mxu1  ;;  %v895_v59 = vpop.f32.mrf.mxu3 }
 0x1e9   : > { %v945_v52 = vadd.f32 %v895_v59, %v731_v50  ;;  %1904 = vmatmul.f32.gmra.mxu0 %v1817_v46  ;;  %v507_v57 = vadd.f32 %v506_v37, %v3037_v2  ;;  %v1820_v37 = vld [vmem:[%s2656_s19 + $0x86] sm:$0xff] }
 0x1eb   : > { %v3385_v1 = vadd.f32 %v1109_v21, %v945_v52  ;;  %1265 = vmatmul.f32.gmra.mxu1 %v1388_v24  ;;  %1479 = vmatmul.f32.gmra.mxu2 %v1390_v51  ;;  %v1606_v21 = vld [vmem:[%s2656_s19 + $0x85] sm:$0xff] }
 0x1ed   : > { %1693 = vmatmul.f32.gmra.mxu3 %v1604_v35 }
 0x1ee   : > { %v684_v16 = vpop.f32.mrf.mxu2  ;;  %v1112_v4 = vpop.f32.mrf.mxu0 }
 0x1ef   : > { %v732_v0 = vadd.f32 %v684_v16, %v507_v57  ;;  %v1393_v57 = vld [vmem:[%s2656_s19 + $0x8c] sm:$0xff] }
 0x1f0   : > { %v509_v17 = vpop.f32.mrf.mxu1  ;;  %v898_v29 = vpop.f32.mrf.mxu3 }
 0x1f1   : > { %v946_v62 = vadd.f32 %v898_v29, %v732_v0  ;;  %1907 = vmatmul.f32.gmra.mxu0 %v1818_v48  ;;  %v510_v2 = vadd.f32 %v509_v17, %v3051_v10  ;;  %v1821_v17 = vld [vmem:[%s2656_s19 + $0x8e] sm:$0xff] }
 0x1f3   : > { %v3391_v15 = vadd.f32 %v1112_v4, %v946_v62  ;;  %1268 = vmatmul.f32.gmra.mxu1 %v1389_v34  ;;  %1482 = vmatmul.f32.gmra.mxu2 %v1391_v40  ;;  %v1607_v4 = vld [vmem:[%s2656_s19 + $0x8d] sm:$0xff] }
 0x1f5   : > { %1696 = vmatmul.f32.gmra.mxu3 %v1605_v44 }
 0x1f6   : > { %v687_v24 = vpop.f32.mrf.mxu2  ;;  %v1115_v9 = vpop.f32.mrf.mxu0 }
 0x1f7   : > { %v733_v26 = vadd.f32 %v687_v24, %v510_v2  ;;  %v1394_v2 = vld [vmem:[%s2656_s19 + $0x94] sm:$0xff] }
 0x1f8   : > { %v512_v11 = vpop.f32.mrf.mxu1  ;;  %v901_v42 = vpop.f32.mrf.mxu3 }
 0x1f9   : > { %v947_v6 = vadd.f32 %v901_v42, %v733_v26  ;;  %1910 = vmatmul.f32.gmra.mxu0 %v1819_v3  ;;  %v513_v10 = vadd.f32 %v512_v11, %v3071_v20  ;;  %v1822_v11 = vld [vmem:[%s2656_s19 + $0x96] sm:$0xff] }
 0x1fb   : > { %v3397_v46 = vadd.f32 %v1115_v9, %v947_v6  ;;  %1271 = vmatmul.f32.gmra.mxu1 %v1390_v51  ;;  %1485 = vmatmul.f32.gmra.mxu2 %v1392_v49  ;;  %v1608_v9 = vld [vmem:[%s2656_s19 + $0x95] sm:$0xff] }
 0x1fd   : > { %1699 = vmatmul.f32.gmra.mxu3 %v1606_v21 }
 0x1fe   : > { %v690_v34 = vpop.f32.mrf.mxu2  ;;  %v1118_v50 = vpop.f32.mrf.mxu0 }
 0x1ff   : > { %v734_v59 = vadd.f32 %v690_v34, %v513_v10  ;;  %v1395_v10 = vld [vmem:[%s2656_s19 + $0x9c] sm:$0xff] }
 0x200   : > { %v515_v52 = vpop.f32.mrf.mxu1  ;;  %v904_v35 = vpop.f32.mrf.mxu3 }
 0x201   : > { %v948_v16 = vadd.f32 %v904_v35, %v734_v59  ;;  %1913 = vmatmul.f32.gmra.mxu0 %v1820_v37  ;;  %v516_v20 = vadd.f32 %v515_v52, %v3085_v28  ;;  %v1823_v52 = vld [vmem:[%s2656_s19 + $0x9e] sm:$0xff] }
 0x203   : > { %v3403_v48 = vadd.f32 %v1118_v50, %v948_v16  ;;  %1274 = vmatmul.f32.gmra.mxu1 %v1391_v40  ;;  %1488 = vmatmul.f32.gmra.mxu2 %v1393_v57  ;;  %v1609_v50 = vld [vmem:[%s2656_s19 + $0x9d] sm:$0xff] }
 0x205   : > { %1702 = vmatmul.f32.gmra.mxu3 %v1607_v4 }
 0x206   : > { %v693_v51 = vpop.f32.mrf.mxu2  ;;  %v1121_v0 = vpop.f32.mrf.mxu0 }
 0x207   : > { %v735_v29 = vadd.f32 %v693_v51, %v516_v20  ;;  %v1396_v20 = vld [vmem:[%s2656_s19 + $0xa4] sm:$0xff] }
 0x208   : > { %v518_v62 = vpop.f32.mrf.mxu1  ;;  %v907_v44 = vpop.f32.mrf.mxu3 }
 0x209   : > { %v949_v24 = vadd.f32 %v907_v44, %v735_v29  ;;  %1916 = vmatmul.f32.gmra.mxu0 %v1821_v17  ;;  %v519_v28 = vadd.f32 %v518_v62, %v3105_v43  ;;  %v1824_v62 = vld [vmem:[%s2656_s19 + $0xa6] sm:$0xff] }
 0x20b   : > { %v3409_v3 = vadd.f32 %v1121_v0, %v949_v24  ;;  %1277 = vmatmul.f32.gmra.mxu1 %v1392_v49  ;;  %1491 = vmatmul.f32.gmra.mxu2 %v1394_v2  ;;  %v1610_v0 = vld [vmem:[%s2656_s19 + $0xa5] sm:$0xff] }
 0x20d   : > { %1705 = vmatmul.f32.gmra.mxu3 %v1608_v9 }
 0x20e   : > { %v696_v40 = vpop.f32.mrf.mxu2  ;;  %v1124_v26 = vpop.f32.mrf.mxu0 }
 0x20f   : > { %v736_v42 = vadd.f32 %v696_v40, %v519_v28  ;;  %v1397_v28 = vld [vmem:[%s2656_s19 + $0xac] sm:$0xff] }
 0x210   : > { %v521_v6 = vpop.f32.mrf.mxu1  ;;  %v910_v21 = vpop.f32.mrf.mxu3 }
 0x211   : > { %v950_v34 = vadd.f32 %v910_v21, %v736_v42  ;;  %1919 = vmatmul.f32.gmra.mxu0 %v1822_v11  ;;  %v522_v43 = vadd.f32 %v521_v6, %v3117_v58 }
 0x213   : > { %v3415_v37 = vadd.f32 %v1124_v26, %v950_v34  ;;  %1280 = vmatmul.f32.gmra.mxu1 %v1393_v57  ;;  %1494 = vmatmul.f32.gmra.mxu2 %v1395_v10  ;;  %v1825_v34 = vld [vmem:[%s2656_s19 + $0xae] sm:$0xff] }
 0x215   : > { %1708 = vmatmul.f32.gmra.mxu3 %v1609_v50 }
 0x216   : > { %v699_v49 = vpop.f32.mrf.mxu2  ;;  %v1127_v59 = vpop.f32.mrf.mxu0 }
 0x217   : > { %v737_v35 = vadd.f32 %v699_v49, %v522_v43 }
 0x218   : > { %v913_v16 = vpop.f32.mrf.mxu3  ;;  %v1236_v4 = vpop.f32.mrf.mxu1 }
 0x219   : > { %v951_v51 = vadd.f32 %v913_v16, %v737_v35  ;;  %1922 = vmatmul.f32.gmra.mxu0 %v1823_v52  ;;  %v1344_v58 = vadd.f32 %v1236_v4, %v3134_v22  ;;  %v1611_v22 = vld [vmem:[%s2656_s19 + $0xad] sm:$0xff] }
 0x21b   : > { %v3421_v17 = vadd.f32 %v1127_v59, %v951_v51  ;;  %1283 = vmatmul.f32.gmra.mxu1 %v1394_v2  ;;  %1497 = vmatmul.f32.gmra.mxu2 %v1396_v20  ;;  %v3432_v2 = vld [vmem:[%s3643_s2] ss:$0 sm:$0xff] }
 0x21d   : > { %1711 = vmatmul.f32.gmra.mxu3 %v1610_v0  ;;  %v1826_v0 = vld [vmem:[%s2656_s19 + $0xb6] sm:$0xff] }
 0x21e   : > { %v1450_v57 = vpop.f32.mrf.mxu2  ;;  %v1878_v29 = vpop.f32.mrf.mxu0 }
 0x21f   : > { %v1558_v44 = vadd.f32 %v1450_v57, %v1344_v58 }
 0x220   : > { %v1239_v24 = vpop.f32.mrf.mxu1  ;;  %v1664_v9 = vpop.f32.mrf.mxu3 }
 0x221   : > { %v1772_v40 = vadd.f32 %v1664_v9, %v1558_v44  ;;  %1925 = vmatmul.f32.gmra.mxu0 %v1824_v62  ;;  %v1345_v11 = vadd.f32 %v1239_v24, %v3143_v55  ;;  %v1612_v55 = vld [vmem:[%s2656_s19 + $0xb5] sm:$0xff] }
 0x222   : > { %v1399_v62 = vld [vmem:[%s2656_s19 + $0xbc] sm:$0xff] }
 0x223   : > { %v1986_v26 = vadd.f32 %v1878_v29, %v1772_v40  ;;  %1286 = vmatmul.f32.gmra.mxu1 %v1395_v10  ;;  %1500 = vmatmul.f32.gmra.mxu2 %v1397_v28  ;;  %v1398_v10 = vld [vmem:[%s2656_s19 + $0xb4] sm:$0xff] }
 0x225   : > { %v2026_v42 = vadd.f32 %v3432_v2, %v1986_v26  ;;  %1714 = vmatmul.f32.gmra.mxu3 %v1611_v22  ;;  %v1827_v26 = vld [vmem:[%s2656_s19 + $0xbe] sm:$0xff] }
 0x226   : > { %v1453_v6 = vpop.f32.mrf.mxu2  ;;  %v1881_v21 = vpop.f32.mrf.mxu0 }
 0x227   : > { %2062 = vst [vmem:[%s3438_s30] sm:$0xff] %v2026_v42  ;;  %v1559_v50 = vadd.f32 %v1453_v6, %v1345_v11 }
 0x228   : > { %v1242_v43 = vpop.f32.mrf.mxu1  ;;  %v1667_v49 = vpop.f32.mrf.mxu3 }
 0x229   : > { %v1773_v59 = vadd.f32 %v1667_v49, %v1559_v50  ;;  %1928 = vmatmul.f32.gmra.mxu0 %v1825_v34  ;;  %v1346_v35 = vadd.f32 %v1242_v43, %v3155_v13 }
 0x22b   : > { %v1987_v52 = vadd.f32 %v1881_v21, %v1773_v59  ;;  %1289 = vmatmul.f32.gmra.mxu1 %v1396_v20  ;;  %1503 = vmatmul.f32.gmra.mxu2 %v1398_v10  ;;  %v1613_v20 = vld [vmem:[%s2656_s19 + $0xbd] sm:$0xff] }
 0x22c   : > { %v1400_v21 = vld [vmem:[%s2656_s19 + $0xc4] sm:$0xff] }
 0x22d   : > { %v2027_v16 = vadd.f32 %v3432_v2, %v1987_v52  ;;  %1717 = vmatmul.f32.gmra.mxu3 %v1612_v55  ;;  %v1828_v55 = vld [vmem:[%s2656_s19 + $0xc6] sm:$0xff] }
 0x22e   : > { %v1456_v4 = vpop.f32.mrf.mxu2  ;;  %v1884_v51 = vpop.f32.mrf.mxu0 }
 0x22f   : > { %2063 = vst [vmem:[%s3438_s30 + $0x8] sm:$0xff] %v2027_v16  ;;  %v1560_v58 = vadd.f32 %v1456_v4, %v1346_v35  ;;  %v1401_v4 = vld [vmem:[%s2656_s19 + $0xcc] sm:$0xff] }
 0x230   : > { %v1245_v57 = vpop.f32.mrf.mxu1  ;;  %v1670_v29 = vpop.f32.mrf.mxu3 }
 0x231   : > { %v1774_v44 = vadd.f32 %v1670_v29, %v1560_v58  ;;  %1931 = vmatmul.f32.gmra.mxu0 %v1826_v0  ;;  %v1347_v13 = vadd.f32 %v1245_v57, %v3167_v63 }
 0x233   : > { %v1988_v24 = vadd.f32 %v1884_v51, %v1774_v44  ;;  %1292 = vmatmul.f32.gmra.mxu1 %v1397_v28  ;;  %1506 = vmatmul.f32.gmra.mxu2 %v1399_v62  ;;  %v1614_v28 = vld [vmem:[%s2656_s19 + $0xc5] sm:$0xff]  ;;  %v1829_v44 = vld [vmem:[%s2656_s19 + $0xce] sm:$0xff] }
 0x235   : > { %v2028_v9 = vadd.f32 %v3432_v2, %v1988_v24  ;;  %1720 = vmatmul.f32.gmra.mxu3 %v1613_v20 }
 0x236   : > { %v1459_v40 = vpop.f32.mrf.mxu2  ;;  %v1887_v22 = vpop.f32.mrf.mxu0 }
 0x237   : > { %2333 = vst [vmem:[%s3438_s30 + $0xe] sm:$0xfc] %v2028_v9  ;;  %v1561_v11 = vadd.f32 %v1459_v40, %v1347_v13  ;;  %v1402_v9 = vld [vmem:[%s2656_s19 + $0xd4] sm:$0xff] }
 0x238   : > { %v1248_v42 = vpop.f32.mrf.mxu1  ;;  %v1673_v6 = vpop.f32.mrf.mxu3 }
 0x239   : > { %v1775_v34 = vadd.f32 %v1673_v6, %v1561_v11  ;;  %1934 = vmatmul.f32.gmra.mxu0 %v1827_v26  ;;  %v1348_v63 = vadd.f32 %v1248_v42, %v3176_v47  ;;  %v1830_v6 = vld [vmem:[%s2656_s19 + $0xd6] sm:$0xff] }
 0x23b   : > { %v1989_v50 = vadd.f32 %v1887_v22, %v1775_v34  ;;  %1295 = vmatmul.f32.gmra.mxu1 %v1398_v10  ;;  %1509 = vmatmul.f32.gmra.mxu2 %v1400_v21  ;;  %v1615_v10 = vld [vmem:[%s2656_s19 + $0xcd] sm:$0xff] }
 0x23d   : > { %v2029_v43 = vadd.f32 %v3432_v2, %v1989_v50  ;;  %1723 = vmatmul.f32.gmra.mxu3 %v1614_v28 }
 0x23e   : > { %v1462_v49 = vpop.f32.mrf.mxu2  ;;  %v1890_v59 = vpop.f32.mrf.mxu0 }
 0x23f   : > { %2334 = vst [vmem:[%s3438_s30 + $0x16] sm:$0xff] %v2029_v43  ;;  %v1562_v52 = vadd.f32 %v1462_v49, %v1348_v63  ;;  %v1403_v63 = vld [vmem:[%s2656_s19 + $0xdc] sm:$0xff] }
 0x240   : > { %v1251_v35 = vpop.f32.mrf.mxu1  ;;  %v1676_v16 = vpop.f32.mrf.mxu3 }
 0x241   : > { %v1776_v51 = vadd.f32 %v1676_v16, %v1562_v52  ;;  %1937 = vmatmul.f32.gmra.mxu0 %v1828_v55  ;;  %v1349_v47 = vadd.f32 %v1251_v35, %v3188_v30  ;;  %v1831_v35 = vld [vmem:[%s2656_s19 + $0xde] sm:$0xff] }
 0x243   : > { %v1990_v0 = vadd.f32 %v1890_v59, %v1776_v51  ;;  %1298 = vmatmul.f32.gmra.mxu1 %v1399_v62  ;;  %1512 = vmatmul.f32.gmra.mxu2 %v1401_v4  ;;  %v1616_v62 = vld [vmem:[%s2656_s19 + $0xd5] sm:$0xff] }
 0x245   : > { %v2030_v58 = vadd.f32 %v3432_v2, %v1990_v0  ;;  %1726 = vmatmul.f32.gmra.mxu3 %v1615_v10  ;;  %v1404_v0 = vld [vmem:[%s2656_s19 + $0xe4] sm:$0xff] }
 0x246   : > { %v1465_v57 = vpop.f32.mrf.mxu2  ;;  %v1893_v29 = vpop.f32.mrf.mxu0 }
 0x247   : > { %2335 = vst [vmem:[%s3438_s30 + $0x1e] sm:$0x3] %v2030_v58  ;;  %v1563_v20 = vadd.f32 %v1465_v57, %v1349_v47 }
 0x248   : > { %2336 = vst [vmem:[%s3438_s30 + $0x1c] sm:$0xf0] %v2030_v58  ;;  %v1254_v24 = vpop.f32.mrf.mxu1  ;;  %v1679_v13 = vpop.f32.mrf.mxu3 }
 0x249   : > { %v1777_v40 = vadd.f32 %v1679_v13, %v1563_v20  ;;  %1940 = vmatmul.f32.gmra.mxu0 %v1829_v44  ;;  %v1350_v30 = vadd.f32 %v1254_v24, %v3197_v38  ;;  %v1832_v20 = vld [vmem:[%s2656_s19 + $0xe6] sm:$0xff] }
 0x24b   : > { %v1991_v22 = vadd.f32 %v1893_v29, %v1777_v40  ;;  %1301 = vmatmul.f32.gmra.mxu1 %v1400_v21  ;;  %1515 = vmatmul.f32.gmra.mxu2 %v1402_v9  ;;  %v1617_v21 = vld [vmem:[%s2656_s19 + $0xdd] sm:$0xff] }
 0x24d   : > { %v2031_v26 = vadd.f32 %v3432_v2, %v1991_v22  ;;  %1729 = vmatmul.f32.gmra.mxu3 %v1616_v62  ;;  %v1405_v62 = vld [vmem:[%s2656_s19 + $0xec] sm:$0xff] }
 0x24e   : > { %v1468_v11 = vpop.f32.mrf.mxu2  ;;  %v1896_v42 = vpop.f32.mrf.mxu0 }
 0x24f   : > { %2337 = vst [vmem:[%s3438_s30 + $0x24] sm:$0xff] %v2031_v26  ;;  %v1564_v34 = vadd.f32 %v1468_v11, %v1350_v30 }
 0x250   : > { %v1257_v28 = vpop.f32.mrf.mxu1  ;;  %v1682_v50 = vpop.f32.mrf.mxu3 }
 0x251   : > { %v1778_v43 = vadd.f32 %v1682_v50, %v1564_v34  ;;  %1943 = vmatmul.f32.gmra.mxu0 %v1830_v6  ;;  %v1351_v38 = vadd.f32 %v1257_v28, %v3212_v61  ;;  %v1833_v6 = vld [vmem:[%s2656_s19 + $0xee] sm:$0xff] }
 0x253   : > { %v1992_v49 = vadd.f32 %v1896_v42, %v1778_v43  ;;  %1304 = vmatmul.f32.gmra.mxu1 %v1401_v4  ;;  %1518 = vmatmul.f32.gmra.mxu2 %v1403_v63  ;;  %v1618_v4 = vld [vmem:[%s2656_s19 + $0xe5] sm:$0xff]  ;;  %v1406_v43 = vld [vmem:[%s2656_s19 + $0xf4] sm:$0xff] }
 0x255   : > { %v2032_v59 = vadd.f32 %v3432_v2, %v1992_v49  ;;  %1732 = vmatmul.f32.gmra.mxu3 %v1617_v21 }
 0x256   : > { %v1471_v55 = vpop.f32.mrf.mxu2  ;;  %v1899_v52 = vpop.f32.mrf.mxu0 }
 0x257   : > { %2338 = vst [vmem:[%s3438_s30 + $0x2c] sm:$0xf] %v2032_v59  ;;  %v1565_v16 = vadd.f32 %v1471_v55, %v1351_v38 }
 0x258   : > { %2339 = vst [vmem:[%s3438_s30 + $0x2a] sm:$0xc0] %v2032_v59  ;;  %v1260_v51 = vpop.f32.mrf.mxu1  ;;  %v1685_v10 = vpop.f32.mrf.mxu3 }
 0x259   : > { %v1779_v47 = vadd.f32 %v1685_v10, %v1565_v16  ;;  %1946 = vmatmul.f32.gmra.mxu0 %v1831_v35  ;;  %v1352_v61 = vadd.f32 %v1260_v51, %v3221_v45  ;;  %v1407_v10 = vld [vmem:[%s2656_s19 + $0xfc] sm:$0xff] }
 0x25b   : > { %v1993_v58 = vadd.f32 %v1899_v52, %v1779_v47  ;;  %1307 = vmatmul.f32.gmra.mxu1 %v1402_v9  ;;  %1521 = vmatmul.f32.gmra.mxu2 %v1404_v0  ;;  %v1619_v9 = vld [vmem:[%s2656_s19 + $0xed] sm:$0xff]  ;;  %v1834_v52 = vld [vmem:[%s2656_s19 + $0xf6] sm:$0xff] }
 0x25d   : > { %v2033_v57 = vadd.f32 %v3432_v2, %v1993_v58  ;;  %1735 = vmatmul.f32.gmra.mxu3 %v1618_v4 }
 0x25e   : > { %v1474_v29 = vpop.f32.mrf.mxu2  ;;  %v1902_v44 = vpop.f32.mrf.mxu0 }
 0x25f   : > { %2340 = vst [vmem:[%s3438_s30 + $0x32] sm:$0xff] %v2033_v57  ;;  %v1566_v24 = vadd.f32 %v1474_v29, %v1352_v61  ;;  %v1835_v29 = vld [vmem:[%s2656_s19 + $0xfe] sm:$0xff] }
 0x260   : > { %v1263_v13 = vpop.f32.mrf.mxu1  ;;  %v1688_v40 = vpop.f32.mrf.mxu3 }
 0x261   : > { %v1780_v22 = vadd.f32 %v1688_v40, %v1566_v24  ;;  %1949 = vmatmul.f32.gmra.mxu0 %v1832_v20  ;;  %v1353_v45 = vadd.f32 %v1263_v13, %v3236_v53  ;;  %v1408_v13 = vld [vmem:[%s2656_s19 + $0x104] sm:$0xff] }
 0x263   : > { %v1994_v30 = vadd.f32 %v1902_v44, %v1780_v22  ;;  %1310 = vmatmul.f32.gmra.mxu1 %v1403_v63  ;;  %1524 = vmatmul.f32.gmra.mxu2 %v1405_v62  ;;  %v1620_v63 = vld [vmem:[%s2656_s19 + $0xf5] sm:$0xff] }
 0x265   : > { %v2034_v26 = vadd.f32 %v3432_v2, %v1994_v30  ;;  %1738 = vmatmul.f32.gmra.mxu3 %v1619_v9 }
 0x266   : > { %v1477_v11 = vpop.f32.mrf.mxu2  ;;  %v1905_v42 = vpop.f32.mrf.mxu0 }
 0x267   : > { %2341 = vst [vmem:[%s3438_s30 + $0x3a] sm:$0x3f] %v2034_v26  ;;  %v1567_v34 = vadd.f32 %v1477_v11, %v1353_v45  ;;  %v1836_v26 = vld [vmem:[%s2656_s19 + $0x106] sm:$0xff] }
 0x268   : > { %v1266_v28 = vpop.f32.mrf.mxu1  ;;  %v1691_v50 = vpop.f32.mrf.mxu3 }
 0x269   : > { %v1781_v21 = vadd.f32 %v1691_v50, %v1567_v34  ;;  %1952 = vmatmul.f32.gmra.mxu0 %v1833_v6  ;;  %v1354_v53 = vadd.f32 %v1266_v28, %v3245_v41  ;;  %v1409_v34 = vld [vmem:[%s2656_s19 + $0x10c] sm:$0xff] }
 0x26a   : > { %v1623_v50 = vld [vmem:[%s2656_s19 + $0x10d] sm:$0xff] }
 0x26b   : > { %v1995_v49 = vadd.f32 %v1905_v42, %v1781_v21  ;;  %1313 = vmatmul.f32.gmra.mxu1 %v1404_v0  ;;  %1527 = vmatmul.f32.gmra.mxu2 %v1406_v43  ;;  %v1621_v0 = vld [vmem:[%s2656_s19 + $0xfd] sm:$0xff] }
 0x26d   : > { %v2035_v38 = vadd.f32 %v3432_v2, %v1995_v49  ;;  %1741 = vmatmul.f32.gmra.mxu3 %v1620_v63 }
 0x26e   : > { %v1480_v59 = vpop.f32.mrf.mxu2  ;;  %v1908_v55 = vpop.f32.mrf.mxu0 }
 0x26f   : > { %2342 = vst [vmem:[%s3438_s30 + $0x40] sm:$0xff] %v2035_v38  ;;  %v1568_v35 = vadd.f32 %v1480_v59, %v1354_v53  ;;  %v1837_v53 = vld [vmem:[%s2656_s19 + $0x10e] sm:$0xff] }
 0x270   : > { %v1269_v16 = vpop.f32.mrf.mxu1  ;;  %v1694_v51 = vpop.f32.mrf.mxu3 }
 0x271   : > { %v1782_v47 = vadd.f32 %v1694_v51, %v1568_v35  ;;  %1955 = vmatmul.f32.gmra.mxu0 %v1834_v52  ;;  %v1355_v41 = vadd.f32 %v1269_v16, %v3257_v7  ;;  %v1410_v52 = vld [vmem:[%s2656_s19 + $0x114] sm:$0xff] }
 0x272   : > { %v1624_v16 = vld [vmem:[%s2656_s19 + $0x115] sm:$0xff] }
 0x273   : > { %v1996_v4 = vadd.f32 %v1908_v55, %v1782_v47  ;;  %1316 = vmatmul.f32.gmra.mxu1 %v1405_v62  ;;  %1530 = vmatmul.f32.gmra.mxu2 %v1407_v10  ;;  %v1622_v62 = vld [vmem:[%s2656_s19 + $0x105] sm:$0xff] }
 0x275   : > { %v2036_v58 = vadd.f32 %v3432_v2, %v1996_v4  ;;  %1744 = vmatmul.f32.gmra.mxu3 %v1621_v0  ;;  %v1838_v4 = vld [vmem:[%s2656_s19 + $0x116] sm:$0xff] }
 0x276   : > { %v1483_v61 = vpop.f32.mrf.mxu2  ;;  %v1911_v57 = vpop.f32.mrf.mxu0 }
 0x277   : > { %2343 = vst [vmem:[%s3438_s30 + $0x48] sm:$0xff] %v2036_v58  ;;  %v1569_v44 = vadd.f32 %v1483_v61, %v1355_v41 }
 0x278   : > { %v1272_v20 = vpop.f32.mrf.mxu1  ;;  %v1697_v24 = vpop.f32.mrf.mxu3 }
 0x279   : > { %v1783_v40 = vadd.f32 %v1697_v24, %v1569_v44  ;;  %1958 = vmatmul.f32.gmra.mxu0 %v1835_v29  ;;  %v1356_v7 = vadd.f32 %v1272_v20, %v3269_v56  ;;  %v1625_v44 = vld [vmem:[%s2656_s19 + $0x11d] sm:$0xff] }
 0x27b   : > { %v1997_v22 = vadd.f32 %v1911_v57, %v1783_v40  ;;  %1319 = vmatmul.f32.gmra.mxu1 %v1406_v43  ;;  %1533 = vmatmul.f32.gmra.mxu2 %v1408_v13  ;;  %v1411_v57 = vld [vmem:[%s2656_s19 + $0x11c] sm:$0xff] }
 0x27d   : > { %v2037_v9 = vadd.f32 %v3432_v2, %v1997_v22  ;;  %1747 = vmatmul.f32.gmra.mxu3 %v1622_v62  ;;  %v1839_v62 = vld [vmem:[%s2656_s19 + $0x11e] sm:$0xff] }
 0x27e   : > { %v1486_v30 = vpop.f32.mrf.mxu2  ;;  %v1914_v45 = vpop.f32.mrf.mxu0 }
 0x27f   : > { %2344 = vst [vmem:[%s3438_s30 + $0x4e] sm:$0xfc] %v2037_v9  ;;  %v1570_v11 = vadd.f32 %v1486_v30, %v1356_v7  ;;  %v1412_v30 = vld [vmem:[%s2656_s19 + $0x124] sm:$0xff] }
 0x280   : > { %v1275_v42 = vpop.f32.mrf.mxu1  ;;  %v1700_v6 = vpop.f32.mrf.mxu3 }
 0x281   : > { %v1784_v28 = vadd.f32 %v1700_v6, %v1570_v11  ;;  %1961 = vmatmul.f32.gmra.mxu0 %v1836_v26  ;;  %v1357_v56 = vadd.f32 %v1275_v42, %v3278_v36  ;;  %v1626_v26 = vld [vmem:[%s2656_s19 + $0x125] sm:$0xff] }
 0x283   : > { %v1998_v43 = vadd.f32 %v1914_v45, %v1784_v28  ;;  %1322 = vmatmul.f32.gmra.mxu1 %v1407_v10  ;;  %1536 = vmatmul.f32.gmra.mxu2 %v1409_v34  ;;  %v1840_v28 = vld [vmem:[%s2656_s19 + $0x126] sm:$0xff] }
 0x285   : > { %v2038_v21 = vadd.f32 %v3432_v2, %v1998_v43  ;;  %1750 = vmatmul.f32.gmra.mxu3 %v1623_v50 }
 0x286   : > { %v1489_v63 = vpop.f32.mrf.mxu2  ;;  %v1917_v49 = vpop.f32.mrf.mxu0 }
 0x287   : > { %2345 = vst [vmem:[%s3438_s30 + $0x56] sm:$0xff] %v2038_v21  ;;  %v1571_v38 = vadd.f32 %v1489_v63, %v1357_v56  ;;  %v1413_v21 = vld [vmem:[%s2656_s19 + $0x12c] sm:$0xff] }
 0x288   : > { %v1278_v59 = vpop.f32.mrf.mxu1  ;;  %v1703_v55 = vpop.f32.mrf.mxu3 }
 0x289   : > { %v1785_v35 = vadd.f32 %v1703_v55, %v1571_v38  ;;  %1964 = vmatmul.f32.gmra.mxu0 %v1837_v53  ;;  %v1358_v36 = vadd.f32 %v1278_v59, %v3290_v18 }
 0x28b   : > { %v1999_v51 = vadd.f32 %v1917_v49, %v1785_v35  ;;  %1325 = vmatmul.f32.gmra.mxu1 %v1408_v13  ;;  %1539 = vmatmul.f32.gmra.mxu2 %v1410_v52  ;;  %v1627_v49 = vld [vmem:[%s2656_s19 + $0x12d] sm:$0xff] }
 0x28d   : > { %v2039_v10 = vadd.f32 %v3432_v2, %v1999_v51  ;;  %1753 = vmatmul.f32.gmra.mxu3 %v1624_v16 }
 0x28e   : > { %v1492_v47 = vpop.f32.mrf.mxu2  ;;  %v1920_v0 = vpop.f32.mrf.mxu0 }
 0x28f   : > { %2346 = vst [vmem:[%s3438_s30 + $0x5e] sm:$0x3] %v2039_v10  ;;  %v1572_v41 = vadd.f32 %v1492_v47, %v1358_v36  ;;  %v1414_v36 = vld [vmem:[%s2656_s19 + $0x134] sm:$0xff] }
 0x290   : > { %2347 = vst [vmem:[%s3438_s30 + $0x5c] sm:$0xf0] %v2039_v10  ;;  %v1281_v58 = vpop.f32.mrf.mxu1  ;;  %v1706_v61 = vpop.f32.mrf.mxu3  ;;  %v1628_v47 = vld [vmem:[%s2656_s19 + $0x135] sm:$0xff] }
 0x291   : > { %v1786_v29 = vadd.f32 %v1706_v61, %v1572_v41  ;;  %1967 = vmatmul.f32.gmra.mxu0 %v1838_v4  ;;  %v1359_v18 = vadd.f32 %v1281_v58, %v3299_v54  ;;  %v1842_v61 = vld [vmem:[%s2656_s19 + $0x136] sm:$0xff] }
 0x293   : > { %v2000_v20 = vadd.f32 %v1920_v0, %v1786_v29  ;;  %1328 = vmatmul.f32.gmra.mxu1 %v1409_v34  ;;  %1542 = vmatmul.f32.gmra.mxu2 %v1411_v57 }
 0x295   : > { %v2040_v24 = vadd.f32 %v3432_v2, %v2000_v20  ;;  %1756 = vmatmul.f32.gmra.mxu3 %v1625_v44  ;;  %v1415_v20 = vld [vmem:[%s2656_s19 + $0x13c] sm:$0xff] }
 0x296   : > { %v1495_v13 = vpop.f32.mrf.mxu2  ;;  %v1923_v40 = vpop.f32.mrf.mxu0 }
 0x297   : > { %2348 = vst [vmem:[%s3438_s30 + $0x64] sm:$0xff] %v2040_v24  ;;  %v1573_v22 = vadd.f32 %v1495_v13, %v1359_v18  ;;  %v1629_v24 = vld [vmem:[%s2656_s19 + $0x13d] sm:$0xff] }
 0x298   : > { %v1284_v7 = vpop.f32.mrf.mxu1  ;;  %v1709_v9 = vpop.f32.mrf.mxu3 }
 0x299   : > { %v1787_v45 = vadd.f32 %v1709_v9, %v1573_v22  ;;  %1970 = vmatmul.f32.gmra.mxu0 %v1839_v62  ;;  %v1360_v54 = vadd.f32 %v1284_v7, %v3305_v31  ;;  %v1843_v7 = vld [vmem:[%s2656_s19 + $0x13e] sm:$0xff] }
 0x29b   : > { %v2001_v11 = vadd.f32 %v1923_v40, %v1787_v45  ;;  %1331 = vmatmul.f32.gmra.mxu1 %v1410_v52  ;;  %1545 = vmatmul.f32.gmra.mxu2 %v1412_v30  ;;  %v1841_v52 = vld [vmem:[%s2656_s19 + $0x12e] sm:$0xff]  ;;  %s2380_s19 = sshll.u32 %s2579_s16, 8  ;;  %s2122_s16 = scalar_lea.sflag [#allocation3], %s161_s26 }
 0x29c   : > { %s2133_s6 = scalar_lea.hbm %s3644_s3, %s2380_s19 }
 0x29d   : > { %v2041_v42 = vadd.f32 %v3432_v2, %v2001_v11  ;;  %1759 = vmatmul.f32.gmra.mxu3 %v1626_v26  ;;  %s2136_s8 = sshll.u32 %s2133_s6, 4  ;;  %s2137_s8 = int_to_ptr.hbm [resolvable:$true] %s2136_s8 }
 0x29e   : > { %v1498_v6 = vpop.f32.mrf.mxu2  ;;  %v1926_v34 = vpop.f32.mrf.mxu0  ;;  %s2486_s9 = sshra.s32 %s2137_s8, 4  ;;  %s2487_s9 = int_to_ptr.hbm [resolvable:$true] %s2486_s9 }
 0x29f   : > { %2349 = vst [vmem:[%s3438_s30 + $0x6c] sm:$0xf] %v2041_v42  ;;  %v1574_v50 = vadd.f32 %v1498_v6, %v1360_v54  ;;  %s2488_s10 = scalar_lea.hbm %s2487_s9, 256  ;;  %p2493_p0 = scmp.lt.s32.totalorder %s2487_s9, %s3644_s3 }
 0x2a0   : > { %2350 = vst [vmem:[%s3438_s30 + $0x6a] sm:$0xc0] %v2041_v42  ;;  %v1287_v43 = vpop.f32.mrf.mxu1  ;;  %v1712_v56 = vpop.f32.mrf.mxu3  ;;  %p2489_p11 = scmp.ne.s32.totalorder %s2487_s9, %s2488_s10  ;;  %p2494_p1 = scmp.lt.s32.totalorder %s2492_s20, %s2488_s10 }
 0x2a1   : > { %v1788_v63 = vadd.f32 %v1712_v56, %v1574_v50  ;;  %1973 = vmatmul.f32.gmra.mxu0 %v1840_v28  ;;  %v1361_v31 = vadd.f32 %v1287_v43, %v3311_v32 }
 0x2a2   : > { %p2490_p12 = pnand %p2489_p11, %p2596_p5  ;;  %p2495_p2 = por %p2494_p1, %p2493_p0 }
 0x2a3   : > { %v2002_v53 = vadd.f32 %v1926_v34, %v1788_v63  ;;  %1334 = vmatmul.f32.gmra.mxu1 %v1411_v57  ;;  %1548 = vmatmul.f32.gmra.mxu2 %v1413_v21 }
 0x2a4   : > { %p2491_p13 = pneg %p2490_p12 }
 0x2a5   : > { %v2042_v38 = vadd.f32 %v3432_v2, %v2002_v53  ;;  %1762 = vmatmul.f32.gmra.mxu3 %v1627_v49 }
 0x2a6   : > { %v1501_v59 = vpop.f32.mrf.mxu2  ;;  %v1929_v55 = vpop.f32.mrf.mxu0  ;;  %p2496_p3 = pnand %p2495_p2, %p2491_p13 }
 0x2a7   : > { %2351 = vst [vmem:[%s3438_s30 + $0x72] sm:$0xff] %v2042_v38  ;;  %v1575_v35 = vadd.f32 %v1501_v59, %v1361_v31 }
 0x2a8   : > { %v1290_v16 = vpop.f32.mrf.mxu1  ;;  %v1715_v51 = vpop.f32.mrf.mxu3 }
 0x2a9   : > { %v1789_v10 = vadd.f32 %v1715_v51, %v1575_v35  ;;  %1976 = vmatmul.f32.gmra.mxu0 %v1841_v52  ;;  %v1362_v32 = vadd.f32 %v1290_v16, %v3317_v25 }
 0x2ab   : > { %v2003_v0 = vadd.f32 %v1929_v55, %v1789_v10  ;;  %1337 = vmatmul.f32.gmra.mxu1 %v1412_v30  ;;  %1551 = vmatmul.f32.gmra.mxu2 %v1414_v36 }
 0x2ad   : > { %v2043_v4 = vadd.f32 %v3432_v2, %v2003_v0  ;;  %1765 = vmatmul.f32.gmra.mxu3 %v1628_v47 }
 0x2ae   : > { %v1504_v41 = vpop.f32.mrf.mxu2  ;;  %v1932_v58 = vpop.f32.mrf.mxu0 }
 0x2af   : > { %2352 = vst [vmem:[%s3438_s30 + $0x7a] sm:$0x3f] %v2043_v4  ;;  %v1576_v57 = vadd.f32 %v1504_v41, %v1362_v32 }
 0x2b0   : > { %v1293_v29 = vpop.f32.mrf.mxu1  ;;  %v1718_v44 = vpop.f32.mrf.mxu3 }
 0x2b1   : > { %v1790_v18 = vadd.f32 %v1718_v44, %v1576_v57  ;;  %1979 = vmatmul.f32.gmra.mxu0 %v1842_v61  ;;  %v1363_v25 = vadd.f32 %v1293_v29, %v3324_v14 }
 0x2b3   : > { %v2004_v13 = vadd.f32 %v1932_v58, %v1790_v18  ;;  %1340 = vmatmul.f32.gmra.mxu1 %v1413_v21  ;;  %1554 = vmatmul.f32.gmra.mxu2 %v1415_v20 }
 0x2b5   : > { %v2044_v40 = vadd.f32 %v3432_v2, %v2004_v13  ;;  %1768 = vmatmul.f32.gmra.mxu3 %v1629_v24 }
 0x2b6   : > { %v1507_v62 = vpop.f32.mrf.mxu2  ;;  %v1935_v22 = vpop.f32.mrf.mxu0 }
 0x2b7   : > { %2353 = vst [vmem:[%s3438_s30 + $0x80] sm:$0xff] %v2044_v40  ;;  %v1577_v9 = vadd.f32 %v1507_v62, %v1363_v25 }
 0x2b8   : > { %v1296_v30 = vpop.f32.mrf.mxu1  ;;  %v1721_v45 = vpop.f32.mrf.mxu3 }
 0x2b9   : > { %v1791_v26 = vadd.f32 %v1721_v45, %v1577_v9  ;;  %1982 = vmatmul.f32.gmra.mxu0 %v1843_v7  ;;  %v1364_v54 = vadd.f32 %v1296_v30, %v3331_v39 }
 0x2bb   : > { %v2005_v11 = vadd.f32 %v1935_v22, %v1791_v26 }
 0x2bd   : > { %v2045_v42 = vadd.f32 %v3432_v2, %v2005_v11 }
 0x2be   : > { %v1510_v14 = vpop.f32.mrf.mxu2  ;;  %v1938_v6 = vpop.f32.mrf.mxu0 }
 0x2bf   : > { %2354 = vst [vmem:[%s3438_s30 + $0x88] sm:$0xff] %v2045_v42  ;;  %v1578_v34 = vadd.f32 %v1510_v14, %v1364_v54 }
 0x2c0   : > { %v1299_v28 = vpop.f32.mrf.mxu1  ;;  %v1724_v50 = vpop.f32.mrf.mxu3 }
 0x2c1   : > { %v1792_v43 = vadd.f32 %v1724_v50, %v1578_v34  ;;  %v1365_v21 = vadd.f32 %v1299_v28, %v3337_v5 }
 0x2c3   : > { %v2006_v56 = vadd.f32 %v1938_v6, %v1792_v43 }
 0x2c5   : > { %v2046_v63 = vadd.f32 %v3432_v2, %v2006_v56 }
 0x2c6   : > { %v1513_v49 = vpop.f32.mrf.mxu2  ;;  %v1941_v53 = vpop.f32.mrf.mxu0 }
 0x2c7   : > { %2355 = vst [vmem:[%s3438_s30 + $0x8e] sm:$0xfc] %v2046_v63  ;;  %v1579_v31 = vadd.f32 %v1513_v49, %v1365_v21 }
 0x2c8   : > { %v1302_v39 = vpop.f32.mrf.mxu1  ;;  %v1727_v38 = vpop.f32.mrf.mxu3 }
 0x2c9   : > { %v1793_v59 = vadd.f32 %v1727_v38, %v1579_v31  ;;  %v1366_v52 = vadd.f32 %v1302_v39, %v3343_v23 }
 0x2cb   : > { %v2007_v55 = vadd.f32 %v1941_v53, %v1793_v59 }
 0x2cd   : > { %v2047_v35 = vadd.f32 %v3432_v2, %v2007_v55 }
 0x2ce   : > { %v1516_v16 = vpop.f32.mrf.mxu2  ;;  %v1944_v51 = vpop.f32.mrf.mxu0 }
 0x2cf   : > { %2356 = vst [vmem:[%s3438_s30 + $0x96] sm:$0xff] %v2047_v35  ;;  %v1580_v5 = vadd.f32 %v1516_v16, %v1366_v52 }
 0x2d0   : > { %v1305_v36 = vpop.f32.mrf.mxu1  ;;  %v1730_v10 = vpop.f32.mrf.mxu3 }
 0x2d1   : > { %v1794_v47 = vadd.f32 %v1730_v10, %v1580_v5  ;;  %v1367_v32 = vadd.f32 %v1305_v36, %v3349_v19 }
 0x2d3   : > { %v2008_v0 = vadd.f32 %v1944_v51, %v1794_v47 }
 0x2d5   : > { %v2048_v4 = vadd.f32 %v3432_v2, %v2008_v0 }
 0x2d6   : > { %v1519_v41 = vpop.f32.mrf.mxu2  ;;  %v1947_v58 = vpop.f32.mrf.mxu0 }
 0x2d7   : > { %2357 = vst [vmem:[%s3438_s30 + $0x9e] sm:$0x3] %v2048_v4  ;;  %v1581_v23 = vadd.f32 %v1519_v41, %v1367_v32 }
 0x2d8   : > { %2358 = vst [vmem:[%s3438_s30 + $0x9c] sm:$0xf0] %v2048_v4  ;;  %v1308_v61 = vpop.f32.mrf.mxu1  ;;  %v1733_v57 = vpop.f32.mrf.mxu3 }
 0x2d9   : > { %v1795_v29 = vadd.f32 %v1733_v57, %v1581_v23  ;;  %v1368_v20 = vadd.f32 %v1308_v61, %v3355_v27 }
 0x2db   : > { %v2009_v44 = vadd.f32 %v1947_v58, %v1795_v29 }
 0x2dd   : > { %v2049_v18 = vadd.f32 %v3432_v2, %v2009_v44 }
 0x2de   : > { %v1522_v24 = vpop.f32.mrf.mxu2  ;;  %v1950_v13 = vpop.f32.mrf.mxu0 }
 0x2df   : > { %2359 = vst [vmem:[%s3438_s30 + $0xa4] sm:$0xff] %v2049_v18  ;;  %v1582_v19 = vadd.f32 %v1522_v24, %v1368_v20 }
 0x2e0   : > { %v1311_v25 = vpop.f32.mrf.mxu1  ;;  %v1736_v40 = vpop.f32.mrf.mxu3 }
 0x2e1   : > { %v1796_v62 = vadd.f32 %v1736_v40, %v1582_v19  ;;  %v1369_v7 = vadd.f32 %v1311_v25, %v3361_v8 }
 0x2e3   : > { %v2010_v22 = vadd.f32 %v1950_v13, %v1796_v62 }
 0x2e5   : > { %v2050_v9 = vadd.f32 %v3432_v2, %v2010_v22 }
 0x2e6   : > { %v1525_v30 = vpop.f32.mrf.mxu2  ;;  %v1953_v45 = vpop.f32.mrf.mxu0 }
 0x2e7   : > { %2360 = vst [vmem:[%s3438_s30 + $0xac] sm:$0xf] %v2050_v9  ;;  %v1583_v27 = vadd.f32 %v1525_v30, %v1369_v7 }
 0x2e8   : > { %2361 = vst [vmem:[%s3438_s30 + $0xaa] sm:$0xc0] %v2050_v9  ;;  %v1314_v26 = vpop.f32.mrf.mxu1  ;;  %v1739_v11 = vpop.f32.mrf.mxu3 }
 0x2e9   : > { %v1797_v54 = vadd.f32 %v1739_v11, %v1583_v27  ;;  %v1370_v14 = vadd.f32 %v1314_v26, %v3367_v60 }
 0x2eb   : > { %v2011_v42 = vadd.f32 %v1953_v45, %v1797_v54 }
 0x2ed   : > { %v2051_v6 = vadd.f32 %v3432_v2, %v2011_v42 }
 0x2ee   : > { %v1528_v34 = vpop.f32.mrf.mxu2  ;;  %v1956_v28 = vpop.f32.mrf.mxu0 }
 0x2ef   : > { %2362 = vst [vmem:[%s3438_s30 + $0xb2] sm:$0xff] %v2051_v6  ;;  %v1584_v8 = vadd.f32 %v1528_v34, %v1370_v14 }
 0x2f0   : > { %v1317_v50 = vpop.f32.mrf.mxu1  ;;  %v1742_v43 = vpop.f32.mrf.mxu3 }
 0x2f1   : > { %v1798_v56 = vadd.f32 %v1742_v43, %v1584_v8  ;;  %v1371_v63 = vadd.f32 %v1317_v50, %v3373_v12 }
 0x2f3   : > { %v2012_v21 = vadd.f32 %v1956_v28, %v1798_v56 }
 0x2f5   : > { %v2052_v49 = vadd.f32 %v3432_v2, %v2012_v21 }
 0x2f6   : > { %v1531_v53 = vpop.f32.mrf.mxu2  ;;  %v1959_v31 = vpop.f32.mrf.mxu0 }
 0x2f7   : > { %2363 = vst [vmem:[%s3438_s30 + $0xba] sm:$0x3f] %v2052_v49  ;;  %v1585_v39 = vadd.f32 %v1531_v53, %v1371_v63 }
 0x2f8   : > { %v1320_v60 = vpop.f32.mrf.mxu1  ;;  %v1745_v38 = vpop.f32.mrf.mxu3 }
 0x2f9   : > { %v1799_v59 = vadd.f32 %v1745_v38, %v1585_v39  ;;  %v1372_v52 = vadd.f32 %v1320_v60, %v3379_v33 }
 0x2fb   : > { %v2013_v55 = vadd.f32 %v1959_v31, %v1799_v59 }
 0x2fd   : > { %v2053_v35 = vadd.f32 %v3432_v2, %v2013_v55 }
 0x2fe   : > { %v1534_v16 = vpop.f32.mrf.mxu2  ;;  %v1962_v51 = vpop.f32.mrf.mxu0 }
 0x2ff   : > { %2364 = vst [vmem:[%s3438_s30 + $0xc0] sm:$0xff] %v2053_v35  ;;  %v1586_v5 = vadd.f32 %v1534_v16, %v1372_v52 }
 0x300   : > { %v1323_v12 = vpop.f32.mrf.mxu1  ;;  %v1748_v36 = vpop.f32.mrf.mxu3 }
 0x301   : > { %v1800_v10 = vadd.f32 %v1748_v36, %v1586_v5  ;;  %v1373_v0 = vadd.f32 %v1323_v12, %v3385_v1 }
 0x303   : > { %v2014_v47 = vadd.f32 %v1962_v51, %v1800_v10 }
 0x305   : > { %v2054_v32 = vadd.f32 %v3432_v2, %v2014_v47 }
 0x306   : > { %v1537_v4 = vpop.f32.mrf.mxu2  ;;  %v1965_v41 = vpop.f32.mrf.mxu0 }
 0x307   : > { %2365 = vst [vmem:[%s3438_s30 + $0xc8] sm:$0xff] %v2054_v32  ;;  %v1587_v58 = vadd.f32 %v1537_v4, %v1373_v0 }
 0x308   : > { %v1326_v33 = vpop.f32.mrf.mxu1  ;;  %v1751_v23 = vpop.f32.mrf.mxu3 }
 0x309   : > { %v1801_v61 = vadd.f32 %v1751_v23, %v1587_v58  ;;  %v1374_v29 = vadd.f32 %v1326_v33, %v3391_v15 }
 0x30b   : > { %v2015_v57 = vadd.f32 %v1965_v41, %v1801_v61 }
 0x30d   : > { %v2055_v44 = vadd.f32 %v3432_v2, %v2015_v57 }
 0x30e   : > { %v1540_v20 = vpop.f32.mrf.mxu2  ;;  %v1968_v18 = vpop.f32.mrf.mxu0 }
 0x30f   : > { %2366 = vst [vmem:[%s3438_s30 + $0xce] sm:$0xfc] %v2055_v44  ;;  %v1588_v24 = vadd.f32 %v1540_v20, %v1374_v29 }
 0x310   : > { %v1329_v1 = vpop.f32.mrf.mxu1  ;;  %v1754_v13 = vpop.f32.mrf.mxu3 }
 0x311   : > { %v1802_v19 = vadd.f32 %v1754_v13, %v1588_v24  ;;  %v1375_v40 = vadd.f32 %v1329_v1, %v3397_v46 }
 0x313   : > { %v2016_v25 = vadd.f32 %v1968_v18, %v1802_v19 }
 0x315   : > { %v2056_v62 = vadd.f32 %v3432_v2, %v2016_v25 }
 0x316   : > { %v1543_v22 = vpop.f32.mrf.mxu2  ;;  %v1971_v7 = vpop.f32.mrf.mxu0 }
 0x317   : > { %2367 = vst [vmem:[%s3438_s30 + $0xd6] sm:$0xff] %v2056_v62  ;;  %v1589_v15 = vadd.f32 %v1543_v22, %v1375_v40 }
 0x318   : > { %v1332_v9 = vpop.f32.mrf.mxu1  ;;  %v1757_v30 = vpop.f32.mrf.mxu3 }
 0x319   : > { %v1803_v45 = vadd.f32 %v1757_v30, %v1589_v15  ;;  %v1376_v26 = vadd.f32 %v1332_v9, %v3403_v48 }
 0x31b   : > { %v2017_v27 = vadd.f32 %v1971_v7, %v1803_v45 }
 0x31d   : > { %v2057_v11 = vadd.f32 %v3432_v2, %v2017_v27 }
 0x31e   : > { %v1546_v54 = vpop.f32.mrf.mxu2  ;;  %v1974_v42 = vpop.f32.mrf.mxu0 }
 0x31f   : > { %2368 = vst [vmem:[%s3438_s30 + $0xde] sm:$0x3] %v2057_v11  ;;  %v1590_v46 = vadd.f32 %v1546_v54, %v1376_v26 }
 0x320   : > { %2369 = vst [vmem:[%s3438_s30 + $0xdc] sm:$0xf0] %v2057_v11  ;;  %v1335_v14 = vpop.f32.mrf.mxu1  ;;  %v1760_v6 = vpop.f32.mrf.mxu3 }
 0x321   : > { %v1804_v34 = vadd.f32 %v1760_v6, %v1590_v46  ;;  %v1377_v8 = vadd.f32 %v1335_v14, %v3409_v3 }
 0x323   : > { %v2018_v28 = vadd.f32 %v1974_v42, %v1804_v34 }
 0x325   : > { %v2058_v50 = vadd.f32 %v3432_v2, %v2018_v28 }
 0x326   : > { %v1549_v43 = vpop.f32.mrf.mxu2  ;;  %v1977_v56 = vpop.f32.mrf.mxu0 }
 0x327   : > { %2370 = vst [vmem:[%s3438_s30 + $0xe4] sm:$0xff] %v2058_v50  ;;  %v1591_v48 = vadd.f32 %v1549_v43, %v1377_v8 }
 0x328   : > { %v1338_v21 = vpop.f32.mrf.mxu1  ;;  %v1763_v63 = vpop.f32.mrf.mxu3 }
 0x329   : > { %v1805_v49 = vadd.f32 %v1763_v63, %v1591_v48  ;;  %v1378_v31 = vadd.f32 %v1338_v21, %v3415_v37 }
 0x32b   : > { %v2019_v53 = vadd.f32 %v1977_v56, %v1805_v49 }
 0x32d   : > { %v2059_v39 = vadd.f32 %v3432_v2, %v2019_v53 }
 0x32e   : > { %v1552_v60 = vpop.f32.mrf.mxu2  ;;  %v1980_v38 = vpop.f32.mrf.mxu0 }
 0x32f   : > { %2371 = vst [vmem:[%s3438_s30 + $0xec] sm:$0xf] %v2059_v39  ;;  %v1592_v3 = vadd.f32 %v1552_v60, %v1378_v31 }
 0x330   : > { %2372 = vst [vmem:[%s3438_s30 + $0xea] sm:$0xc0] %v2059_v39  ;;  %v1766_v59 = vpop.f32.mrf.mxu3  ;;  %v1341_v52 = vpop.f32.mrf.mxu1 }
 0x331   : > { %v1806_v55 = vadd.f32 %v1766_v59, %v1592_v3  ;;  %v1379_v16 = vadd.f32 %v1341_v52, %v3421_v17 }
 0x333   : > { %v2020_v35 = vadd.f32 %v1980_v38, %v1806_v55 }
 0x335   : > { %v2060_v37 = vadd.f32 %v3432_v2, %v2020_v35 }
 0x336   : > { %v1555_v51 = vpop.f32.mrf.mxu2  ;;  %v1983_v36 = vpop.f32.mrf.mxu0 }
 0x337   : > { %2373 = vst [vmem:[%s3438_s30 + $0xf2] sm:$0xff] %v2060_v37  ;;  %v1593_v5 = vadd.f32 %v1555_v51, %v1379_v16 }
 0x338   : > { %v1769_v12 = vpop.f32.mrf.mxu3 }
 0x339   : > { %v1807_v10 = vadd.f32 %v1769_v12, %v1593_v5 }
 0x33b   : > { %v2021_v47 = vadd.f32 %v1983_v36, %v1807_v10 }
 0x33d   : > { %v2061_v17 = vadd.f32 %v3432_v2, %v2021_v47 }
 0x33f   : > { %2374 = vst [vmem:[%s3438_s30 + $0xfa] sm:$0x3f] %v2061_v17 }
 0x340   : > { %2499 = shalt.err (!%p2496_p3)
}
 0x341   : > { %s2536_s26 = smov 128   ;;  %s2537_s27 = smov 8  }
 0x342   : > { %2430 = dma.vmem_to_hbm [thread:$0]  (%p2596_p5), %s2135_s7, 4096, %s2137_s8, %s2122_s16, %s2536_s26, %s2536_s26, %s2537_s27  }
 0x343 PF: > { %p2436_p4 = scmp.ge.s32.totalorder %s2534_s15, 2  ;;  %s2151_s28 = sand.u32 1, %s2522_s12  }
 0x344   : > { %s2152_s29 = scalar_lea.sflag [#allocation3], %s2151_s28 }
 0x345   : > { %p2433_p7 = pnand %p2436_p4, %p2600_p6 }
 0x347   : > { %p2434_p8 = pneg %p2433_p7 }
 0x349   : > { %2517 = dma.done.wait (%p2434_p8), %s2152_s29, 4096  }
 0x34a   : > { %2519 = vsyncadd (%p2434_p8), %s2152_s29, 4294963200  ;;  %p13_p9 = scmp.ge.s32.totalorder %s2583_s18, 4   ;;  %s3647_s12 = smov %s2526_s13 }
 0x34b   : > { %s3648_s13 = smov %s2530_s14  ;;  %s3649_s14 = smov %s2594_s21 }
 0x34c   : > { %s3650_s15 = smov %s2583_s18  ;;  %15 = sbr.rel (!%p13_p9) target bundleno = 3 (0x3), region = 90 }
 0x351   :  { %2158 = vsyncpa [#allocation3], 1 }
 0x352   :  { %2160 = vsyncpa [#allocation3 + $0x1], 1 }

</bundles_post_ra>
